<compile_context>
chip_gen: v5e
topology: v5e:2x2
jax: 0.10.0
libtpu: 0.0.40
codegen_flags: <defaults>
</compile_context>

<pallas_src>
import math

import jax
import jax.numpy as jnp
from jax.experimental import pallas as pl
from jax.experimental.pallas import tpu as pltpu

# ----- config (mirrors config.transformer / config.expand_ratio / KV_size) ---
NUM_HEADS = 4
NUM_LAYERS = 4          # config.transformer['num_layers']
EXPAND_RATIO = 2        # config.expand_ratio
LN_EPS = 1e-6           # nn.LayerNorm eps used throughout the module
IN_EPS = 1e-5           # nn.InstanceNorm2d default eps

# vec-slab row layout (per layer)
_ROW_G_ATTN, _ROW_B_ATTN = 0, 1     # attn_norm1/2/3 gamma/beta (concat)
_ROW_G_ALL, _ROW_B_ALL = 2, 3       # attn_norm (KV_size) gamma/beta
_ROW_G_FFN, _ROW_B_FFN = 4, 5       # ffn_norm1/2/3 gamma/beta (concat)
_ROW_B_FC1, _ROW_B_FC2 = 6, 7       # fc1 / fc2 biases (concat)
_ROW_G_ENC, _ROW_B_ENC = 8, 9       # encoder_norm1/2/3 gamma/beta
_NUM_VEC_ROWS = 10


# ----------------------------- shared helpers --------------------------------
def _erf(x):
    # Abramowitz & Stegun 7.1.26 polynomial (|err| < 1.5e-7 ~ f32 precision).
    # TODO(synk): lax.erf is not guaranteed to lower in Mosaic; polynomial used.
    a1, a2, a3, a4, a5 = (0.254829592, -0.284496736, 1.421413741,
                          -1.453152027, 1.061405429)
    p = 0.3275911
    s = jnp.where(x >= 0.0, 1.0, -1.0)
    ax = jnp.abs(x)
    t = 1.0 / (1.0 + p * ax)
    poly = ((((a5 * t + a4) * t + a3) * t + a2) * t + a1) * t
    return s * (1.0 - poly * jnp.exp(-ax * ax))


def _gelu_exact(x):
    # matches torch.nn.GELU() (approximate='none') up to ~f32 precision
    return 0.5 * x * (1.0 + _erf(x * (1.0 / math.sqrt(2.0))))


# ------------------------ fused whole-encoder kernel --------------------------
def _make_encoder_kernel(B, S, channel_num, num_heads, expand_ratio, num_layers):
    C1, C2, C3 = channel_num
    KV = C1 + C2 + C3
    HKV = num_heads * KV
    MLP = expand_ratio * KV
    BS = B * S
    cb = (0, C1, C1 + C2, KV)                 # branch channel boundaries
    scale = 1.0 / math.sqrt(KV)
    inv_h = 1.0 / num_heads
    probe_layer = min(1, num_layers - 1)      # M_return: probs of layer index 1

    def kernel(emb_ref, vec_ref, wq_ref, wkv_ref, wo_ref, w1_ref, w2_ref,
               out_ref, probs_ref, act_ref):
        layer = pl.program_id(0)
        is_probe = layer == probe_layer
        is_last = layer == num_layers - 1

        # Load the input activation once; afterwards it stays VMEM resident.
        @pl.when(layer == 0)
        def _load_input():
            act_ref[...] = emb_ref[...]

        emb = act_ref[...]                    # (BS, KV) f32, residual source
        vec = vec_ref[...]                    # (NUM_VEC_ROWS, max(MLP,KV))

        g_attn = vec[_ROW_G_ATTN:_ROW_G_ATTN + 1, :KV]
        b_attn = vec[_ROW_B_ATTN:_ROW_B_ATTN + 1, :KV]
        g_all = vec[_ROW_G_ALL:_ROW_G_ALL + 1, :KV]
        b_all = vec[_ROW_B_ALL:_ROW_B_ALL + 1, :KV]
        g_ffn = vec[_ROW_G_FFN:_ROW_G_FFN + 1, :KV]
        b_ffn = vec[_ROW_B_FFN:_ROW_B_FFN + 1, :KV]
        b_fc1 = vec[_ROW_B_FC1:_ROW_B_FC1 + 1, :MLP]
        b_fc2 = vec[_ROW_B_FC2:_ROW_B_FC2 + 1, :KV]

        # Compile-time branch masks (avoid lane slices/concats at offsets 8/24).
        col = jax.lax.broadcasted_iota(jnp.int32, (1, KV), 1)
        row = jax.lax.broadcasted_iota(jnp.int32, (KV, 1), 0)
        lane_m = [((col >= cb[i]) & (col < cb[i + 1])).astype(jnp.float32)
                  for i in range(3)]
        row_m = [((row >= cb[i]) & (row < cb[i + 1])).astype(jnp.float32)
                 for i in range(3)]
        inv_cnt = [1.0 / (cb[i + 1] - cb[i]) for i in range(3)]
        inv_area = [1.0 / ((cb[i + 1] - cb[i]) * KV) for i in range(3)]

        def branch_ln(x):
            # per-branch LayerNorm (no affine) via mask-weighted reductions.
            mean_map = jnp.zeros_like(x)
            for i in range(3):
                s = jnp.sum(x * lane_m[i], axis=-1, keepdims=True)
                mean_map = mean_map + (s * inv_cnt[i]) * lane_m[i]
            xc = x - mean_map
            var_map = jnp.zeros_like(x)
            for i in range(3):
                v = jnp.sum(xc * xc * lane_m[i], axis=-1, keepdims=True)
                var_map = var_map + (v * inv_cnt[i]) * lane_m[i]
            return xc * jax.lax.rsqrt(var_map + LN_EPS)

        # ---- attn_norm1/2/3 (per branch) and attn_norm (full KV) ----
        cx = branch_ln(emb) * g_attn + b_attn
        mu = jnp.mean(emb, axis=-1, keepdims=True)
        var = jnp.mean((emb - mu) ** 2, axis=-1, keepdims=True)
        eall = (emb - mu) * jax.lax.rsqrt(var + LN_EPS) * g_all + b_all

        # ---- fused projections (2 wide matmuls) ----
        # qT_all[h*KV + c, n] = Q[b(n), h, s(n), c]  (Wq stored row-major, NT dot)
        qT_all = jax.lax.dot_general(
            wq_ref[...], cx, (((1,), (1,)), ((), ())),
            preferred_element_type=jnp.float32)            # (HKV, BS)
        kv_all = jnp.dot(eall, wkv_ref[...],
                         preferred_element_type=jnp.float32)  # (BS, 2*HKV)

        # ---- per (batch, head) channel attention ----
        ctx_rows = []
        for b in range(B):                                 # static unroll
            r0 = b * S
            v_b = kv_all[r0:r0 + S, HKV:2 * HKV]           # (S, HKV)
            head_probs = []
            for h in range(num_heads):                     # static unroll
                c0 = h * KV
                qT = qT_all[c0:c0 + KV, r0:r0 + S]         # (KV_c, S)
                k = kv_all[r0:r0 + S, c0:c0 + KV]          # (S, KV)
                scores = jnp.dot(qT, k,
                                 preferred_element_type=jnp.float32) * scale
                # psi = InstanceNorm2d: per (b,h,branch) over the (C_i, KV) plane
                mean_map = jnp.zeros_like(row_m[0])
                for i in range(3):
                    t = jnp.sum(jnp.sum(scores * row_m[i], axis=0, keepdims=True),
                                axis=1, keepdims=True)
                    mean_map = mean_map + (t * inv_area[i]) * row_m[i]
                sc = scores - mean_map
                var_map = jnp.zeros_like(row_m[0])
                for i in range(3):
                    t = jnp.sum(jnp.sum(sc * sc * row_m[i], axis=0, keepdims=True),
                                axis=1, keepdims=True)
                    var_map = var_map + (t * inv_area[i]) * row_m[i]
                sn = sc * jax.lax.rsqrt(var_map + IN_EPS)
                # softmax over the KV (lane) axis
                sn = sn - jnp.max(sn, axis=-1, keepdims=True)
                e = jnp.exp(sn)
                denom = jnp.sum(e, axis=-1, keepdims=True)
                probs = e * pl.reciprocal(denom)           # exact reciprocal
                head_probs.append(probs)

                row0 = (b * num_heads + h) * KV

                @pl.when(is_probe)                         # only at layer index 1
                def _store_probs(probs=probs, row0=row0):
                    probs_ref[row0:row0 + KV, :] = probs

            # context for ALL heads of this batch in one depth-(H*KV) matmul:
            # ctx[s, c] = sum_{h,kv} V[s, h*KV+kv] * probs_h[c, kv]
            p_cat = jnp.concatenate(head_probs, axis=1)    # (KV, HKV)
            ctx_b = jax.lax.dot_general(
                v_b, p_cat, (((1,), (1,)), ((), ())),
                preferred_element_type=jnp.float32) * inv_h
            ctx_rows.append(ctx_b)
        ctx = jnp.concatenate(ctx_rows, axis=0)            # (BS, KV)

        # ---- out1/out2/out3 (block-diag) + residual 1 ----
        attn_out = jnp.dot(ctx, wo_ref[...], preferred_element_type=jnp.float32)
        x = emb + attn_out

        # ---- ffn_norm1/2/3 + Mlp (fc1 -> GELU -> fc2) + residual 2 ----
        hn = branch_ln(x) * g_ffn + b_ffn
        h1 = jnp.dot(hn, w1_ref[...], preferred_element_type=jnp.float32) + b_fc1
        h1 = _gelu_exact(h1)
        h2 = jnp.dot(h1, w2_ref[...], preferred_element_type=jnp.float32) + b_fc2
        y = x + h2

        act_ref[...] = y                                   # carry to next layer

        @pl.when(is_last)                                  # encoder_norm1/2/3
        def _finalize():
            g_enc = vec[_ROW_G_ENC:_ROW_G_ENC + 1, :KV]
            b_enc = vec[_ROW_B_ENC:_ROW_B_ENC + 1, :KV]
            out_ref[...] = (branch_ln(y) * g_enc + b_enc).astype(out_ref.dtype)

    return kernel


# --------------------------------- wrapper -----------------------------------
def encoder_pallas(emb1, emb2, emb3, params, *, num_heads=NUM_HEADS,
                   expand_ratio=EXPAND_RATIO):
    C1, C2, C3 = emb1.shape[-1], emb2.shape[-1], emb3.shape[-1]
    channel_num = (C1, C2, C3)
    KV = C1 + C2 + C3
    B, S, _ = emb1.shape
    BS = B * S
    HKV = num_heads * KV
    MLP = expand_ratio * KV
    VW = max(MLP, KV)
    L = params["wq"].shape[0]

    # concat ONCE into a lane-dense activation and present a 2-D row slab.
    emb2d = jnp.concatenate([emb1, emb2, emb3], axis=-1).reshape(BS, KV)

    kernel = _make_encoder_kernel(B, S, channel_num, num_heads, expand_ratio, L)

    grid_spec = pltpu.PrefetchScalarGridSpec(
        num_scalar_prefetch=0,
        grid=(L,),                                   # sequential layer axis
        in_specs=[
            pl.BlockSpec((BS, KV), lambda l: (0, 0)),                      # activation
            pl.BlockSpec((None, _NUM_VEC_ROWS, VW), lambda l: (l, 0, 0)),  # packed vecs
            pl.BlockSpec((None, HKV, KV), lambda l: (l, 0, 0)),            # Wq rows/head
            pl.BlockSpec((None, KV, 2 * HKV), lambda l: (l, 0, 0)),        # Wk|Wv
            pl.BlockSpec((None, KV, KV), lambda l: (l, 0, 0)),             # Wo
            pl.BlockSpec((None, KV, MLP), lambda l: (l, 0, 0)),            # fc1
            pl.BlockSpec((None, MLP, KV), lambda l: (l, 0, 0)),            # fc2
        ],
        out_specs=(
            pl.BlockSpec((BS, KV), lambda l: (0, 0)),
            pl.BlockSpec((B * num_heads * KV, KV), lambda l: (0, 0)),
        ),
        scratch_shapes=[pltpu.VMEM((BS, KV), jnp.float32)],   # resident activation
    )

    out2d, probs_flat = pl.pallas_call(
        kernel,
        grid_spec=grid_spec,
        out_shape=(jax.ShapeDtypeStruct((BS, KV), jnp.float32),
                   jax.ShapeDtypeStruct((B * num_heads * KV, KV), jnp.float32)),
        compiler_params=pltpu.CompilerParams(
            dimension_semantics=("arbitrary",)),
    )(emb2d, params["vec"], params["wq"], params["wkv"], params["wo"],
      params["w1"], params["w2"])

    out = out2d.reshape(B, S, KV)
    x1 = out[..., :C1]
    x2 = out[..., C1:C1 + C2]
    x3 = out[..., C1 + C2:]

    pa = probs_flat.reshape(B, num_heads, KV, KV)
    probs1 = pa[:, :, :C1, :]
    probs2 = pa[:, :, C1:C1 + C2, :]
    probs3 = pa[:, :, C1 + C2:, :]

    attn_weights = []                                       # vis=False
    return x1, x2, x3, attn_weights, probs1, probs2, probs3


# ---------------------------- pure-JAX reference ------------------------------
def encoder_reference(emb1, emb2, emb3, params, *, num_heads=NUM_HEADS,
                      expand_ratio=EXPAND_RATIO):
    HP = jax.lax.Precision.HIGHEST
    C1, C2, C3 = emb1.shape[-1], emb2.shape[-1], emb3.shape[-1]
    cb = (0, C1, C1 + C2, C1 + C2 + C3)
    KV = cb[3]
    B, S, _ = emb1.shape
    H = num_heads
    HKV = H * KV
    MLP = expand_ratio * KV
    L = params["wq"].shape[0]

    def branch_ln(x):
        outs = []
        for i in range(3):
            xi = x[..., cb[i]:cb[i + 1]]
            m = jnp.mean(xi, -1, keepdims=True)
            v = jnp.mean((xi - m) ** 2, -1, keepdims=True)
            outs.append((xi - m) * jax.lax.rsqrt(v + LN_EPS))
        return jnp.concatenate(outs, -1)

    emb = jnp.concatenate([emb1, emb2, emb3], axis=-1)
    probs_saved = None
    for l in range(L):
        vec = params["vec"][l]
        g_attn, b_attn = vec[_ROW_G_ATTN, :KV], vec[_ROW_B_ATTN, :KV]
        g_all, b_all = vec[_ROW_G_ALL, :KV], vec[_ROW_B_ALL, :KV]
        g_ffn, b_ffn = vec[_ROW_G_FFN, :KV], vec[_ROW_B_FFN, :KV]
        b1, b2 = vec[_ROW_B_FC1, :MLP], vec[_ROW_B_FC2, :KV]
        wq = params["wq"][l].reshape(H, KV, KV)
        wkv = params["wkv"][l]
        wo, w1, w2 = params["wo"][l], params["w1"][l], params["w2"][l]

        cx = branch_ln(emb) * g_attn + b_attn
        mu = jnp.mean(emb, -1, keepdims=True)
        var = jnp.mean((emb - mu) ** 2, -1, keepdims=True)
        eall = (emb - mu) * jax.lax.rsqrt(var + LN_EPS) * g_all + b_all

        q = jnp.einsum("bsk,hck->bhsc", cx, wq, precision=HP)
        kvp = jnp.einsum("bsk,kn->bsn", eall, wkv, precision=HP)
        k = kvp[..., :HKV].reshape(B, S, H, KV).transpose(0, 2, 1, 3)
        v = kvp[..., HKV:].reshape(B, S, H, KV).transpose(0, 2, 1, 3)

        scores = jnp.einsum("bhsc,bhsk->bhck", q, k, precision=HP) / math.sqrt(KV)
        prob_parts = []
        for i in range(3):
            si = scores[:, :, cb[i]:cb[i + 1], :]
            m = jnp.mean(si, axis=(2, 3), keepdims=True)
            va = jnp.mean((si - m) ** 2, axis=(2, 3), keepdims=True)
            prob_parts.append(
                jax.nn.softmax((si - m) * jax.lax.rsqrt(va + IN_EPS), axis=-1))
        probs = jnp.concatenate(prob_parts, axis=2)
        if l == min(1, L - 1):
            probs_saved = probs
        ctx = jnp.einsum("bhck,bhsk->bsc", probs, v, precision=HP) / H
        x = emb + jnp.einsum("bsc,cd->bsd", ctx, wo, precision=HP)
        hn = branch_ln(x) * g_ffn + b_ffn
        h1 = _gelu_exact(jnp.einsum("bsk,km->bsm", hn, w1, precision=HP) + b1)
        h2 = jnp.einsum("bsm,mk->bsk", h1, w2, precision=HP) + b2
        emb = x + h2

    g_enc = params["vec"][L - 1][_ROW_G_ENC, :KV]
    b_enc = params["vec"][L - 1][_ROW_B_ENC, :KV]
    out = branch_ln(emb) * g_enc + b_enc
    x1, x2, x3 = out[..., :C1], out[..., C1:cb[2]], out[..., cb[2]:]
    p1 = probs_saved[:, :, :C1, :]
    p2 = probs_saved[:, :, C1:cb[2], :]
    p3 = probs_saved[:, :, cb[2]:, :]
    return x1, x2, x3, p1, p2, p3


# ------------------------------ parameter init -------------------------------
def init_params(key, channel_num, *, num_layers=NUM_LAYERS, num_heads=NUM_HEADS,
                expand_ratio=EXPAND_RATIO):
    """PyTorch-equivalent init, packed/stacked into the fused kernel layouts."""
    C1, C2, C3 = channel_num
    chans = (C1, C2, C3)
    KV = C1 + C2 + C3
    MLP = expand_ratio * KV
    VW = max(MLP, KV)

    def kaiming_uniform(k, shape, fan_in):          # default nn.Linear weight init
        bound = 1.0 / math.sqrt(fan_in)
        return jax.random.uniform(k, shape, jnp.float32, -bound, bound)

    def xavier_uniform(k, shape, fan_in, fan_out):  # Mlp._init_weights
        bound = math.sqrt(6.0 / (fan_in + fan_out))
        return jax.random.uniform(k, shape, jnp.float32, -bound, bound)

    def block_diag(blocks):
        rows = sum(b.shape[0] for b in blocks)
        cols = sum(b.shape[1] for b in blocks)
        out = jnp.zeros((rows, cols), jnp.float32)
        r = c = 0
        for blk in blocks:
            out = out.at[r:r + blk.shape[0], c:c + blk.shape[1]].set(blk)
            r += blk.shape[0]
            c += blk.shape[1]
        return out

    vec_l, wq_l, wkv_l, wo_l, w1_l, w2_l = [], [], [], [], [], []
    lkeys = jax.random.split(key, num_layers)
    for li in range(num_layers):
        lk = iter(jax.random.split(lkeys[li], 64))

        wq_rows, wk_cols, wv_cols = [], [], []
        for _ in range(num_heads):
            # query1/2/3 per head (bias=False): block-diag, row-major (out, in)
            q_blocks = [kaiming_uniform(next(lk), (c, c), c) for c in chans]
            wq_rows.append(block_diag(q_blocks))                       # (KV, KV)
            # key / value per head (dense KV x KV, bias=False), pre-transposed
            wk_cols.append(kaiming_uniform(next(lk), (KV, KV), KV).T)
            wv_cols.append(kaiming_uniform(next(lk), (KV, KV), KV).T)
        wq = jnp.concatenate(wq_rows, axis=0)                          # (H*KV, KV)
        wkv = jnp.concatenate(wk_cols + wv_cols, axis=1)               # (KV, 2*H*KV)

        # out1/out2/out3 (bias=False): block-diag, pre-transposed
        wo = block_diag([kaiming_uniform(next(lk), (c, c), c) for c in chans]).T

        # Mlp fc1/fc2 (xavier weights, normal(std=1e-6) biases), block-diag
        fc1 = [xavier_uniform(next(lk), (expand_ratio * c, c), c, expand_ratio * c)
               for c in chans]
        fc2 = [xavier_uniform(next(lk), (c, expand_ratio * c), expand_ratio * c, c)
               for c in chans]
        w1 = block_diag(fc1).T                                          # (KV, MLP)
        w2 = block_diag(fc2).T                                          # (MLP, KV)
        b_fc1 = jnp.concatenate(
            [1e-6 * jax.random.normal(next(lk), (expand_ratio * c,), jnp.float32)
             for c in chans])
        b_fc2 = jnp.concatenate(
            [1e-6 * jax.random.normal(next(lk), (c,), jnp.float32) for c in chans])

        # packed slab of all tiny 1-D params (LayerNorm init: weight=1, bias=0)
        ones_kv = jnp.ones((KV,), jnp.float32)
        vec = jnp.zeros((_NUM_VEC_ROWS, VW), jnp.float32)
        vec = vec.at[_ROW_G_ATTN, :KV].set(ones_kv)
        vec = vec.at[_ROW_G_ALL, :KV].set(ones_kv)
        vec = vec.at[_ROW_G_FFN, :KV].set(ones_kv)
        vec = vec.at[_ROW_B_FC1, :MLP].set(b_fc1)
        vec = vec.at[_ROW_B_FC2, :KV].set(b_fc2)
        vec = vec.at[_ROW_G_ENC, :KV].set(ones_kv)   # encoder norms (same weights)
        # all beta rows stay zero (LayerNorm bias init)

        vec_l.append(vec); wq_l.append(wq); wkv_l.append(wkv)
        wo_l.append(wo); w1_l.append(w1); w2_l.append(w2)

    return {"vec": jnp.stack(vec_l), "wq": jnp.stack(wq_l),
            "wkv": jnp.stack(wkv_l), "wo": jnp.stack(wo_l),
            "w1": jnp.stack(w1_l), "w2": jnp.stack(w2_l)}


# ----------------------------------- main ------------------------------------
if __name__ == "__main__":
    channel_num = (8, 16, 24)      # -> KV_size = 48
    B, S = 2, 16                   # batch, n_patches
    KV = sum(channel_num)

    key = jax.random.PRNGKey(0)
    k1, k2, k3, kp = jax.random.split(key, 4)
    emb1 = jax.random.normal(k1, (B, S, channel_num[0]), jnp.float32)
    emb2 = jax.random.normal(k2, (B, S, channel_num[1]), jnp.float32)
    emb3 = jax.random.normal(k3, (B, S, channel_num[2]), jnp.float32)
    params = init_params(kp, channel_num)

    encoder = jax.jit(encoder_pallas)
    x1, x2, x3, attn_weights, probs1, probs2, probs3 = encoder(
        emb1, emb2, emb3, params)
    jax.block_until_ready((x1, x2, x3, probs1, probs2, probs3))

    # shape / structure checks (module contract: vis=False, M_return=True)
    assert x1.shape == (B, S, channel_num[0])
    assert x2.shape == (B, S, channel_num[1])
    assert x3.shape == (B, S, channel_num[2])
    assert attn_weights == []
    assert probs1.shape == (B, NUM_HEADS, channel_num[0], KV)
    assert probs2.shape == (B, NUM_HEADS, channel_num[1], KV)
    assert probs3.shape == (B, NUM_HEADS, channel_num[2], KV)

    # numerical check against an independent pure-JAX reference
    r1, r2, r3, rp1, rp2, rp3 = jax.jit(encoder_reference)(emb1, emb2, emb3, params)
    for name, got, ref in (("x1", x1, r1), ("x2", x2, r2), ("x3", x3, r3),
                           ("probs1", probs1, rp1), ("probs2", probs2, rp2),
                           ("probs3", probs3, rp3)):
        err = float(jnp.max(jnp.abs(got - ref)))
        assert err < 1e-2, f"{name}: max abs err {err:.3e} vs pure-JAX reference"

    print("KERNEL_OK")
</pallas_src>

<mosaic_0001>
module attributes {stable_mosaic.version = 11 : i64} {
  func.func @kernel(%arg0: i32, %arg1: memref<32x48xf32, #tpu.memory_space<vmem>>, %arg2: memref<1x10x96xf32, #tpu.memory_space<vmem>>, %arg3: memref<1x192x48xf32, #tpu.memory_space<vmem>>, %arg4: memref<1x48x384xf32, #tpu.memory_space<vmem>>, %arg5: memref<1x48x48xf32, #tpu.memory_space<vmem>>, %arg6: memref<1x48x96xf32, #tpu.memory_space<vmem>>, %arg7: memref<1x96x48xf32, #tpu.memory_space<vmem>>, %arg8: memref<32x48xf32, #tpu.memory_space<vmem>>, %arg9: memref<384x48xf32, #tpu.memory_space<vmem>>, %arg10: memref<32x48xf32, #tpu.memory_space<vmem>>) attributes {dimension_semantics = [#tpu.dimension_semantics<arbitrary>], iteration_bounds = array<i64: 4>, scalar_prefetch = 0 : i64, scratch_operands = 1 : i64, tpu.core_type = #tpu.core_type<tc>, window_params = [{pipeline_mode = #tpu.pipeline_mode<synchronous>, transform_indices = @transform_0, window_bounds = array<i64: 32, 48>}, {transform_indices = @transform_1, window_bounds = array<i64: 1, 10, 96>}, {transform_indices = @transform_2, window_bounds = array<i64: 1, 192, 48>}, {transform_indices = @transform_3, window_bounds = array<i64: 1, 48, 384>}, {transform_indices = @transform_4, window_bounds = array<i64: 1, 48, 48>}, {transform_indices = @transform_5, window_bounds = array<i64: 1, 48, 96>}, {transform_indices = @transform_6, window_bounds = array<i64: 1, 96, 48>}, {pipeline_mode = #tpu.pipeline_mode<synchronous>, transform_indices = @transform_7, window_bounds = array<i64: 32, 48>}, {pipeline_mode = #tpu.pipeline_mode<synchronous>, transform_indices = @transform_8, window_bounds = array<i64: 384, 48>}]} {
    %c1_i32 = arith.constant 1 : i32
    %0 = arith.cmpi eq, %arg0, %c1_i32 : i32
    %c3_i32 = arith.constant 3 : i32
    %1 = arith.cmpi eq, %arg0, %c3_i32 : i32
    %c0_i32 = arith.constant 0 : i32
    %2 = arith.cmpi eq, %arg0, %c0_i32 : i32
    %3 = arith.extui %2 : i1 to i32
    %c0_i32_0 = arith.constant 0 : i32
    %4 = arith.cmpi ne, %3, %c0_i32_0 : i32
    scf.if %4 {
      %c0_299 = arith.constant 0 : index
      %c0_300 = arith.constant 0 : index
      %1066 = vector.load %arg1[%c0_299, %c0_300] : memref<32x48xf32, #tpu.memory_space<vmem>>, vector<32x48xf32>
      %c0_301 = arith.constant 0 : index
      %c0_302 = arith.constant 0 : index
      %1067 = vector.load %arg10[%c0_301, %c0_302] : memref<32x48xf32, #tpu.memory_space<vmem>>, vector<32x48xf32>
      tpu.vector_store %arg10[%c0_301, %c0_302], %1066 {strides = array<i32>} : memref<32x48xf32, #tpu.memory_space<vmem>>, vector<32x48xf32>,
    } else {
    }
    %c0 = arith.constant 0 : index
    %c0_1 = arith.constant 0 : index
    %5 = vector.load %arg10[%c0, %c0_1] : memref<32x48xf32, #tpu.memory_space<vmem>>, vector<32x48xf32>
    %c0_2 = arith.constant 0 : index
    %c0_3 = arith.constant 0 : index
    %c0_4 = arith.constant 0 : index
    %6 = vector.load %arg2[%c0_2, %c0_3, %c0_4] : memref<1x10x96xf32, #tpu.memory_space<vmem>>, vector<1x10x96xf32>
    %7 = vector.shape_cast %6 : vector<1x10x96xf32> to vector<10x96xf32>
    %8 = vector.extract_strided_slice %7 {offsets = [0, 0], sizes = [1, 48], strides = [1, 1]} : vector<10x96xf32> to vector<1x48xf32>
    %9 = vector.extract_strided_slice %7 {offsets = [1, 0], sizes = [1, 48], strides = [1, 1]} : vector<10x96xf32> to vector<1x48xf32>
    %10 = vector.extract_strided_slice %7 {offsets = [2, 0], sizes = [1, 48], strides = [1, 1]} : vector<10x96xf32> to vector<1x48xf32>
    %11 = vector.extract_strided_slice %7 {offsets = [3, 0], sizes = [1, 48], strides = [1, 1]} : vector<10x96xf32> to vector<1x48xf32>
    %12 = vector.extract_strided_slice %7 {offsets = [4, 0], sizes = [1, 48], strides = [1, 1]} : vector<10x96xf32> to vector<1x48xf32>
    %13 = vector.extract_strided_slice %7 {offsets = [5, 0], sizes = [1, 48], strides = [1, 1]} : vector<10x96xf32> to vector<1x48xf32>
    %14 = vector.extract_strided_slice %7 {offsets = [6, 0], sizes = [1, 96], strides = [1, 1]} : vector<10x96xf32> to vector<1x96xf32>
    %15 = vector.extract_strided_slice %7 {offsets = [7, 0], sizes = [1, 48], strides = [1, 1]} : vector<10x96xf32> to vector<1x48xf32>
    %16 = tpu.iota {dimensions = array<i32: 1>} : vector<1x48xi32>
    %17 = tpu.iota {dimensions = array<i32: 0>} : vector<48x1xi32>
    %c0_i32_5 = arith.constant 0 : i32
    %18 = vector.broadcast %c0_i32_5 : i32 to vector<1x48xi32>
    %19 = arith.cmpi sge, %16, %18 : vector<1x48xi32>
    %c8_i32 = arith.constant 8 : i32
    %20 = vector.broadcast %c8_i32 : i32 to vector<1x48xi32>
    %21 = arith.cmpi slt, %16, %20 : vector<1x48xi32>
    %22 = arith.andi %19, %21 : vector<1x48xi1>
    %23 = arith.extui %22 : vector<1x48xi1> to vector<1x48xi32>
    %24 = arith.sitofp %23 : vector<1x48xi32> to vector<1x48xf32>
    %c8_i32_6 = arith.constant 8 : i32
    %25 = vector.broadcast %c8_i32_6 : i32 to vector<1x48xi32>
    %26 = arith.cmpi sge, %16, %25 : vector<1x48xi32>
    %c24_i32 = arith.constant 24 : i32
    %27 = vector.broadcast %c24_i32 : i32 to vector<1x48xi32>
    %28 = arith.cmpi slt, %16, %27 : vector<1x48xi32>
    %29 = arith.andi %26, %28 : vector<1x48xi1>
    %30 = arith.extui %29 : vector<1x48xi1> to vector<1x48xi32>
    %31 = arith.sitofp %30 : vector<1x48xi32> to vector<1x48xf32>
    %c24_i32_7 = arith.constant 24 : i32
    %32 = vector.broadcast %c24_i32_7 : i32 to vector<1x48xi32>
    %33 = arith.cmpi sge, %16, %32 : vector<1x48xi32>
    %c48_i32 = arith.constant 48 : i32
    %34 = vector.broadcast %c48_i32 : i32 to vector<1x48xi32>
    %35 = arith.cmpi slt, %16, %34 : vector<1x48xi32>
    %36 = arith.andi %33, %35 : vector<1x48xi1>
    %37 = arith.extui %36 : vector<1x48xi1> to vector<1x48xi32>
    %38 = arith.sitofp %37 : vector<1x48xi32> to vector<1x48xf32>
    %c0_i32_8 = arith.constant 0 : i32
    %39 = vector.broadcast %c0_i32_8 : i32 to vector<48x1xi32>
    %40 = arith.cmpi sge, %17, %39 : vector<48x1xi32>
    %c8_i32_9 = arith.constant 8 : i32
    %41 = vector.broadcast %c8_i32_9 : i32 to vector<48x1xi32>
    %42 = arith.cmpi slt, %17, %41 : vector<48x1xi32>
    %43 = arith.andi %40, %42 : vector<48x1xi1>
    %44 = arith.extui %43 : vector<48x1xi1> to vector<48x1xi32>
    %45 = arith.sitofp %44 : vector<48x1xi32> to vector<48x1xf32>
    %c8_i32_10 = arith.constant 8 : i32
    %46 = vector.broadcast %c8_i32_10 : i32 to vector<48x1xi32>
    %47 = arith.cmpi sge, %17, %46 : vector<48x1xi32>
    %c24_i32_11 = arith.constant 24 : i32
    %48 = vector.broadcast %c24_i32_11 : i32 to vector<48x1xi32>
    %49 = arith.cmpi slt, %17, %48 : vector<48x1xi32>
    %50 = arith.andi %47, %49 : vector<48x1xi1>
    %51 = arith.extui %50 : vector<48x1xi1> to vector<48x1xi32>
    %52 = arith.sitofp %51 : vector<48x1xi32> to vector<48x1xf32>
    %c24_i32_12 = arith.constant 24 : i32
    %53 = vector.broadcast %c24_i32_12 : i32 to vector<48x1xi32>
    %54 = arith.cmpi sge, %17, %53 : vector<48x1xi32>
    %c48_i32_13 = arith.constant 48 : i32
    %55 = vector.broadcast %c48_i32_13 : i32 to vector<48x1xi32>
    %56 = arith.cmpi slt, %17, %55 : vector<48x1xi32>
    %57 = arith.andi %54, %56 : vector<48x1xi1>
    %58 = arith.extui %57 : vector<48x1xi1> to vector<48x1xi32>
    %59 = arith.sitofp %58 : vector<48x1xi32> to vector<48x1xf32>
    %cst = arith.constant 0.000000e+00 : f32
    %60 = vector.broadcast %cst : f32 to vector<32x48xf32>
    %61 = vector.broadcast %24 : vector<1x48xf32> to vector<32x48xf32>
    %62 = arith.mulf %5, %61 : vector<32x48xf32>
    %cst_14 = arith.constant dense<0.000000e+00> : vector<32xf32>
    %63 = vector.multi_reduction <add>, %62, %cst_14 [1] : vector<32x48xf32> to vector<32xf32>
    %64 = vector.shape_cast %63 : vector<32xf32> to vector<32x1xf32>
    %cst_15 = arith.constant 1.250000e-01 : f32
    %65 = vector.broadcast %cst_15 : f32 to vector<32x1xf32>
    %66 = arith.mulf %64, %65 : vector<32x1xf32>
    %67 = vector.broadcast %66 : vector<32x1xf32> to vector<32x48xf32>
    %68 = vector.broadcast %24 : vector<1x48xf32> to vector<32x48xf32>
    %69 = arith.mulf %67, %68 : vector<32x48xf32>
    %70 = arith.addf %60, %69 : vector<32x48xf32>
    %71 = vector.broadcast %31 : vector<1x48xf32> to vector<32x48xf32>
    %72 = arith.mulf %5, %71 : vector<32x48xf32>
    %cst_16 = arith.constant dense<0.000000e+00> : vector<32xf32>
    %73 = vector.multi_reduction <add>, %72, %cst_16 [1] : vector<32x48xf32> to vector<32xf32>
    %74 = vector.shape_cast %73 : vector<32xf32> to vector<32x1xf32>
    %cst_17 = arith.constant 6.250000e-02 : f32
    %75 = vector.broadcast %cst_17 : f32 to vector<32x1xf32>
    %76 = arith.mulf %74, %75 : vector<32x1xf32>
    %77 = vector.broadcast %76 : vector<32x1xf32> to vector<32x48xf32>
    %78 = vector.broadcast %31 : vector<1x48xf32> to vector<32x48xf32>
    %79 = arith.mulf %77, %78 : vector<32x48xf32>
    %80 = arith.addf %70, %79 : vector<32x48xf32>
    %81 = vector.broadcast %38 : vector<1x48xf32> to vector<32x48xf32>
    %82 = arith.mulf %5, %81 : vector<32x48xf32>
    %cst_18 = arith.constant dense<0.000000e+00> : vector<32xf32>
    %83 = vector.multi_reduction <add>, %82, %cst_18 [1] : vector<32x48xf32> to vector<32xf32>
    %84 = vector.shape_cast %83 : vector<32xf32> to vector<32x1xf32>
    %cst_19 = arith.constant 0.0416666679 : f32
    %85 = vector.broadcast %cst_19 : f32 to vector<32x1xf32>
    %86 = arith.mulf %84, %85 : vector<32x1xf32>
    %87 = vector.broadcast %86 : vector<32x1xf32> to vector<32x48xf32>
    %88 = vector.broadcast %38 : vector<1x48xf32> to vector<32x48xf32>
    %89 = arith.mulf %87, %88 : vector<32x48xf32>
    %90 = arith.addf %80, %89 : vector<32x48xf32>
    %91 = arith.subf %5, %90 : vector<32x48xf32>
    %cst_20 = arith.constant 0.000000e+00 : f32
    %92 = vector.broadcast %cst_20 : f32 to vector<32x48xf32>
    %93 = arith.mulf %91, %91 : vector<32x48xf32>
    %94 = vector.broadcast %24 : vector<1x48xf32> to vector<32x48xf32>
    %95 = arith.mulf %93, %94 : vector<32x48xf32>
    %cst_21 = arith.constant dense<0.000000e+00> : vector<32xf32>
    %96 = vector.multi_reduction <add>, %95, %cst_21 [1] : vector<32x48xf32> to vector<32xf32>
    %97 = vector.shape_cast %96 : vector<32xf32> to vector<32x1xf32>
    %cst_22 = arith.constant 1.250000e-01 : f32
    %98 = vector.broadcast %cst_22 : f32 to vector<32x1xf32>
    %99 = arith.mulf %97, %98 : vector<32x1xf32>
    %100 = vector.broadcast %99 : vector<32x1xf32> to vector<32x48xf32>
    %101 = vector.broadcast %24 : vector<1x48xf32> to vector<32x48xf32>
    %102 = arith.mulf %100, %101 : vector<32x48xf32>
    %103 = arith.addf %92, %102 : vector<32x48xf32>
    %104 = arith.mulf %91, %91 : vector<32x48xf32>
    %105 = vector.broadcast %31 : vector<1x48xf32> to vector<32x48xf32>
    %106 = arith.mulf %104, %105 : vector<32x48xf32>
    %cst_23 = arith.constant dense<0.000000e+00> : vector<32xf32>
    %107 = vector.multi_reduction <add>, %106, %cst_23 [1] : vector<32x48xf32> to vector<32xf32>
    %108 = vector.shape_cast %107 : vector<32xf32> to vector<32x1xf32>
    %cst_24 = arith.constant 6.250000e-02 : f32
    %109 = vector.broadcast %cst_24 : f32 to vector<32x1xf32>
    %110 = arith.mulf %108, %109 : vector<32x1xf32>
    %111 = vector.broadcast %110 : vector<32x1xf32> to vector<32x48xf32>
    %112 = vector.broadcast %31 : vector<1x48xf32> to vector<32x48xf32>
    %113 = arith.mulf %111, %112 : vector<32x48xf32>
    %114 = arith.addf %103, %113 : vector<32x48xf32>
    %115 = arith.mulf %91, %91 : vector<32x48xf32>
    %116 = vector.broadcast %38 : vector<1x48xf32> to vector<32x48xf32>
    %117 = arith.mulf %115, %116 : vector<32x48xf32>
    %cst_25 = arith.constant dense<0.000000e+00> : vector<32xf32>
    %118 = vector.multi_reduction <add>, %117, %cst_25 [1] : vector<32x48xf32> to vector<32xf32>
    %119 = vector.shape_cast %118 : vector<32xf32> to vector<32x1xf32>
    %cst_26 = arith.constant 0.0416666679 : f32
    %120 = vector.broadcast %cst_26 : f32 to vector<32x1xf32>
    %121 = arith.mulf %119, %120 : vector<32x1xf32>
    %122 = vector.broadcast %121 : vector<32x1xf32> to vector<32x48xf32>
    %123 = vector.broadcast %38 : vector<1x48xf32> to vector<32x48xf32>
    %124 = arith.mulf %122, %123 : vector<32x48xf32>
    %125 = arith.addf %114, %124 : vector<32x48xf32>
    %cst_27 = arith.constant 9.99999997E-7 : f32
    %126 = vector.broadcast %cst_27 : f32 to vector<32x48xf32>
    %127 = arith.addf %125, %126 : vector<32x48xf32>
    %128 = math.rsqrt %127 : vector<32x48xf32>
    %129 = arith.mulf %91, %128 : vector<32x48xf32>
    %130 = vector.broadcast %8 : vector<1x48xf32> to vector<32x48xf32>
    %131 = arith.mulf %129, %130 : vector<32x48xf32>
    %132 = vector.broadcast %9 : vector<1x48xf32> to vector<32x48xf32>
    %133 = arith.addf %131, %132 : vector<32x48xf32>
    %cst_28 = arith.constant dense<0.000000e+00> : vector<32xf32>
    %134 = vector.multi_reduction <add>, %5, %cst_28 [1] : vector<32x48xf32> to vector<32xf32>
    %135 = vector.shape_cast %134 : vector<32xf32> to vector<32x1xf32>
    %cst_29 = arith.constant 4.800000e+01 : f32
    %136 = vector.broadcast %cst_29 : f32 to vector<32x1xf32>
    %137 = arith.divf %135, %136 : vector<32x1xf32>
    %138 = vector.broadcast %137 : vector<32x1xf32> to vector<32x48xf32>
    %139 = arith.subf %5, %138 : vector<32x48xf32>
    %140 = arith.mulf %139, %139 : vector<32x48xf32>
    %cst_30 = arith.constant dense<0.000000e+00> : vector<32xf32>
    %141 = vector.multi_reduction <add>, %140, %cst_30 [1] : vector<32x48xf32> to vector<32xf32>
    %142 = vector.shape_cast %141 : vector<32xf32> to vector<32x1xf32>
    %cst_31 = arith.constant 4.800000e+01 : f32
    %143 = vector.broadcast %cst_31 : f32 to vector<32x1xf32>
    %144 = arith.divf %142, %143 : vector<32x1xf32>
    %145 = vector.broadcast %137 : vector<32x1xf32> to vector<32x48xf32>
    %146 = arith.subf %5, %145 : vector<32x48xf32>
    %cst_32 = arith.constant 9.99999997E-7 : f32
    %147 = vector.broadcast %cst_32 : f32 to vector<32x1xf32>
    %148 = arith.addf %144, %147 : vector<32x1xf32>
    %149 = math.rsqrt %148 : vector<32x1xf32>
    %150 = vector.broadcast %149 : vector<32x1xf32> to vector<32x48xf32>
    %151 = arith.mulf %146, %150 : vector<32x48xf32>
    %152 = vector.broadcast %10 : vector<1x48xf32> to vector<32x48xf32>
    %153 = arith.mulf %151, %152 : vector<32x48xf32>
    %154 = vector.broadcast %11 : vector<1x48xf32> to vector<32x48xf32>
    %155 = arith.addf %153, %154 : vector<32x48xf32>
    %c0_33 = arith.constant 0 : index
    %c0_34 = arith.constant 0 : index
    %c0_35 = arith.constant 0 : index
    %156 = vector.load %arg3[%c0_33, %c0_34, %c0_35] : memref<1x192x48xf32, #tpu.memory_space<vmem>>, vector<1x192x48xf32>
    %157 = vector.shape_cast %156 : vector<1x192x48xf32> to vector<192x48xf32>
    %cst_36 = arith.constant dense<0.000000e+00> : vector<192x32xf32>
    %158 = tpu.matmul %157, %133, %cst_36 {dimension_numbers = #tpu.dot_dimension_numbers<[1], [1], [0], [0], [0, 0, 1, 0], [], []>} : vector<192x48xf32>, vector<32x48xf32>, vector<192x32xf32> -> vector<192x32xf32>
    %c0_37 = arith.constant 0 : index
    %c0_38 = arith.constant 0 : index
    %c0_39 = arith.constant 0 : index
    %159 = vector.load %arg4[%c0_37, %c0_38, %c0_39] : memref<1x48x384xf32, #tpu.memory_space<vmem>>, vector<1x48x384xf32>
    %160 = vector.shape_cast %159 : vector<1x48x384xf32> to vector<48x384xf32>
    %cst_40 = arith.constant dense<0.000000e+00> : vector<32x384xf32>
    %161 = tpu.matmul %155, %160, %cst_40 {dimension_numbers = #tpu.dot_dimension_numbers<[1], [0], [0], [1], [0, 0, 1, 1], [], []>} : vector<32x48xf32>, vector<48x384xf32>, vector<32x384xf32> -> vector<32x384xf32>
    %162 = vector.extract_strided_slice %161 {offsets = [0, 192], sizes = [16, 192], strides = [1, 1]} : vector<32x384xf32> to vector<16x192xf32>
    %163 = vector.extract_strided_slice %158 {offsets = [0, 0], sizes = [48, 16], strides = [1, 1]} : vector<192x32xf32> to vector<48x16xf32>
    %164 = vector.extract_strided_slice %161 {offsets = [0, 0], sizes = [16, 48], strides = [1, 1]} : vector<32x384xf32> to vector<16x48xf32>
    %cst_41 = arith.constant dense<0.000000e+00> : vector<48x48xf32>
    %165 = tpu.matmul %163, %164, %cst_41 {dimension_numbers = #tpu.dot_dimension_numbers<[1], [0], [0], [1], [0, 0, 1, 1], [], []>} : vector<48x16xf32>, vector<16x48xf32>, vector<48x48xf32> -> vector<48x48xf32>
    %cst_42 = arith.constant 0.144337565 : f32
    %166 = vector.broadcast %cst_42 : f32 to vector<48x48xf32>
    %167 = arith.mulf %165, %166 : vector<48x48xf32>
    %cst_43 = arith.constant 0.000000e+00 : f32
    %168 = vector.broadcast %cst_43 : f32 to vector<48x1xf32>
    %169 = vector.broadcast %45 : vector<48x1xf32> to vector<48x48xf32>
    %170 = arith.mulf %167, %169 : vector<48x48xf32>
    %cst_44 = arith.constant dense<0.000000e+00> : vector<48xf32>
    %171 = vector.multi_reduction <add>, %170, %cst_44 [0] : vector<48x48xf32> to vector<48xf32>
    %172 = vector.shape_cast %171 : vector<48xf32> to vector<1x48xf32>
    %cst_45 = arith.constant dense<0.000000e+00> : vector<1xf32>
    %173 = vector.multi_reduction <add>, %172, %cst_45 [1] : vector<1x48xf32> to vector<1xf32>
    %174 = vector.shape_cast %173 : vector<1xf32> to vector<1x1xf32>
    %cst_46 = arith.constant 0.00260416674 : f32
    %175 = vector.broadcast %cst_46 : f32 to vector<1x1xf32>
    %176 = arith.mulf %174, %175 : vector<1x1xf32>
    %177 = vector.broadcast %176 : vector<1x1xf32> to vector<48x1xf32>
    %178 = arith.mulf %177, %45 : vector<48x1xf32>
    %179 = arith.addf %168, %178 : vector<48x1xf32>
    %180 = vector.broadcast %52 : vector<48x1xf32> to vector<48x48xf32>
    %181 = arith.mulf %167, %180 : vector<48x48xf32>
    %cst_47 = arith.constant dense<0.000000e+00> : vector<48xf32>
    %182 = vector.multi_reduction <add>, %181, %cst_47 [0] : vector<48x48xf32> to vector<48xf32>
    %183 = vector.shape_cast %182 : vector<48xf32> to vector<1x48xf32>
    %cst_48 = arith.constant dense<0.000000e+00> : vector<1xf32>
    %184 = vector.multi_reduction <add>, %183, %cst_48 [1] : vector<1x48xf32> to vector<1xf32>
    %185 = vector.shape_cast %184 : vector<1xf32> to vector<1x1xf32>
    %cst_49 = arith.constant 0.00130208337 : f32
    %186 = vector.broadcast %cst_49 : f32 to vector<1x1xf32>
    %187 = arith.mulf %185, %186 : vector<1x1xf32>
    %188 = vector.broadcast %187 : vector<1x1xf32> to vector<48x1xf32>
    %189 = arith.mulf %188, %52 : vector<48x1xf32>
    %190 = arith.addf %179, %189 : vector<48x1xf32>
    %191 = vector.broadcast %59 : vector<48x1xf32> to vector<48x48xf32>
    %192 = arith.mulf %167, %191 : vector<48x48xf32>
    %cst_50 = arith.constant dense<0.000000e+00> : vector<48xf32>
    %193 = vector.multi_reduction <add>, %192, %cst_50 [0] : vector<48x48xf32> to vector<48xf32>
    %194 = vector.shape_cast %193 : vector<48xf32> to vector<1x48xf32>
    %cst_51 = arith.constant dense<0.000000e+00> : vector<1xf32>
    %195 = vector.multi_reduction <add>, %194, %cst_51 [1] : vector<1x48xf32> to vector<1xf32>
    %196 = vector.shape_cast %195 : vector<1xf32> to vector<1x1xf32>
    %cst_52 = arith.constant 8.68055562E-4 : f32
    %197 = vector.broadcast %cst_52 : f32 to vector<1x1xf32>
    %198 = arith.mulf %196, %197 : vector<1x1xf32>
    %199 = vector.broadcast %198 : vector<1x1xf32> to vector<48x1xf32>
    %200 = arith.mulf %199, %59 : vector<48x1xf32>
    %201 = arith.addf %190, %200 : vector<48x1xf32>
    %202 = vector.broadcast %201 : vector<48x1xf32> to vector<48x48xf32>
    %203 = arith.subf %167, %202 : vector<48x48xf32>
    %cst_53 = arith.constant 0.000000e+00 : f32
    %204 = vector.broadcast %cst_53 : f32 to vector<48x1xf32>
    %205 = arith.mulf %203, %203 : vector<48x48xf32>
    %206 = vector.broadcast %45 : vector<48x1xf32> to vector<48x48xf32>
    %207 = arith.mulf %205, %206 : vector<48x48xf32>
    %cst_54 = arith.constant dense<0.000000e+00> : vector<48xf32>
    %208 = vector.multi_reduction <add>, %207, %cst_54 [0] : vector<48x48xf32> to vector<48xf32>
    %209 = vector.shape_cast %208 : vector<48xf32> to vector<1x48xf32>
    %cst_55 = arith.constant dense<0.000000e+00> : vector<1xf32>
    %210 = vector.multi_reduction <add>, %209, %cst_55 [1] : vector<1x48xf32> to vector<1xf32>
    %211 = vector.shape_cast %210 : vector<1xf32> to vector<1x1xf32>
    %cst_56 = arith.constant 0.00260416674 : f32
    %212 = vector.broadcast %cst_56 : f32 to vector<1x1xf32>
    %213 = arith.mulf %211, %212 : vector<1x1xf32>
    %214 = vector.broadcast %213 : vector<1x1xf32> to vector<48x1xf32>
    %215 = arith.mulf %214, %45 : vector<48x1xf32>
    %216 = arith.addf %204, %215 : vector<48x1xf32>
    %217 = arith.mulf %203, %203 : vector<48x48xf32>
    %218 = vector.broadcast %52 : vector<48x1xf32> to vector<48x48xf32>
    %219 = arith.mulf %217, %218 : vector<48x48xf32>
    %cst_57 = arith.constant dense<0.000000e+00> : vector<48xf32>
    %220 = vector.multi_reduction <add>, %219, %cst_57 [0] : vector<48x48xf32> to vector<48xf32>
    %221 = vector.shape_cast %220 : vector<48xf32> to vector<1x48xf32>
    %cst_58 = arith.constant dense<0.000000e+00> : vector<1xf32>
    %222 = vector.multi_reduction <add>, %221, %cst_58 [1] : vector<1x48xf32> to vector<1xf32>
    %223 = vector.shape_cast %222 : vector<1xf32> to vector<1x1xf32>
    %cst_59 = arith.constant 0.00130208337 : f32
    %224 = vector.broadcast %cst_59 : f32 to vector<1x1xf32>
    %225 = arith.mulf %223, %224 : vector<1x1xf32>
    %226 = vector.broadcast %225 : vector<1x1xf32> to vector<48x1xf32>
    %227 = arith.mulf %226, %52 : vector<48x1xf32>
    %228 = arith.addf %216, %227 : vector<48x1xf32>
    %229 = arith.mulf %203, %203 : vector<48x48xf32>
    %230 = vector.broadcast %59 : vector<48x1xf32> to vector<48x48xf32>
    %231 = arith.mulf %229, %230 : vector<48x48xf32>
    %cst_60 = arith.constant dense<0.000000e+00> : vector<48xf32>
    %232 = vector.multi_reduction <add>, %231, %cst_60 [0] : vector<48x48xf32> to vector<48xf32>
    %233 = vector.shape_cast %232 : vector<48xf32> to vector<1x48xf32>
    %cst_61 = arith.constant dense<0.000000e+00> : vector<1xf32>
    %234 = vector.multi_reduction <add>, %233, %cst_61 [1] : vector<1x48xf32> to vector<1xf32>
    %235 = vector.shape_cast %234 : vector<1xf32> to vector<1x1xf32>
    %cst_62 = arith.constant 8.68055562E-4 : f32
    %236 = vector.broadcast %cst_62 : f32 to vector<1x1xf32>
    %237 = arith.mulf %235, %236 : vector<1x1xf32>
    %238 = vector.broadcast %237 : vector<1x1xf32> to vector<48x1xf32>
    %239 = arith.mulf %238, %59 : vector<48x1xf32>
    %240 = arith.addf %228, %239 : vector<48x1xf32>
    %cst_63 = arith.constant 9.99999974E-6 : f32
    %241 = vector.broadcast %cst_63 : f32 to vector<48x1xf32>
    %242 = arith.addf %240, %241 : vector<48x1xf32>
    %243 = math.rsqrt %242 : vector<48x1xf32>
    %244 = vector.broadcast %243 : vector<48x1xf32> to vector<48x48xf32>
    %245 = arith.mulf %203, %244 : vector<48x48xf32>
    %cst_64 = arith.constant dense<0xFF800000> : vector<48xf32>
    %246 = vector.multi_reduction <maximumf>, %245, %cst_64 [1] : vector<48x48xf32> to vector<48xf32>
    %247 = vector.shape_cast %246 : vector<48xf32> to vector<48x1xf32>
    %248 = vector.broadcast %247 : vector<48x1xf32> to vector<48x48xf32>
    %249 = arith.subf %245, %248 : vector<48x48xf32>
    %250 = math.exp %249 : vector<48x48xf32>
    %cst_65 = arith.constant dense<0.000000e+00> : vector<48xf32>
    %251 = vector.multi_reduction <add>, %250, %cst_65 [1] : vector<48x48xf32> to vector<48xf32>
    %252 = vector.shape_cast %251 : vector<48xf32> to vector<48x1xf32>
    %253 = tpu.reciprocal %252 : vector<48x1xf32> -> vector<48x1xf32>
    %254 = vector.broadcast %253 : vector<48x1xf32> to vector<48x48xf32>
    %255 = arith.mulf %250, %254 : vector<48x48xf32>
    %256 = arith.extui %0 : i1 to i32
    %c0_i32_66 = arith.constant 0 : i32
    %257 = arith.cmpi ne, %256, %c0_i32_66 : i32
    scf.if %257 {
      %c0_299 = arith.constant 0 : index
      %c0_300 = arith.constant 0 : index
      %1066 = vector.load %arg9[%c0_299, %c0_300] : memref<384x48xf32, #tpu.memory_space<vmem>>, vector<48x48xf32>
      tpu.vector_store %arg9[%c0_299, %c0_300], %255 {strides = array<i32>} : memref<384x48xf32, #tpu.memory_space<vmem>>, vector<48x48xf32>,
    } else {
    }
    %258 = vector.extract_strided_slice %158 {offsets = [48, 0], sizes = [48, 16], strides = [1, 1]} : vector<192x32xf32> to vector<48x16xf32>
    %259 = vector.extract_strided_slice %161 {offsets = [0, 48], sizes = [16, 48], strides = [1, 1]} : vector<32x384xf32> to vector<16x48xf32>
    %cst_67 = arith.constant dense<0.000000e+00> : vector<48x48xf32>
    %260 = tpu.matmul %258, %259, %cst_67 {dimension_numbers = #tpu.dot_dimension_numbers<[1], [0], [0], [1], [0, 0, 1, 1], [], []>} : vector<48x16xf32>, vector<16x48xf32>, vector<48x48xf32> -> vector<48x48xf32>
    %cst_68 = arith.constant 0.144337565 : f32
    %261 = vector.broadcast %cst_68 : f32 to vector<48x48xf32>
    %262 = arith.mulf %260, %261 : vector<48x48xf32>
    %cst_69 = arith.constant 0.000000e+00 : f32
    %263 = vector.broadcast %cst_69 : f32 to vector<48x1xf32>
    %264 = vector.broadcast %45 : vector<48x1xf32> to vector<48x48xf32>
    %265 = arith.mulf %262, %264 : vector<48x48xf32>
    %cst_70 = arith.constant dense<0.000000e+00> : vector<48xf32>
    %266 = vector.multi_reduction <add>, %265, %cst_70 [0] : vector<48x48xf32> to vector<48xf32>
    %267 = vector.shape_cast %266 : vector<48xf32> to vector<1x48xf32>
    %cst_71 = arith.constant dense<0.000000e+00> : vector<1xf32>
    %268 = vector.multi_reduction <add>, %267, %cst_71 [1] : vector<1x48xf32> to vector<1xf32>
    %269 = vector.shape_cast %268 : vector<1xf32> to vector<1x1xf32>
    %cst_72 = arith.constant 0.00260416674 : f32
    %270 = vector.broadcast %cst_72 : f32 to vector<1x1xf32>
    %271 = arith.mulf %269, %270 : vector<1x1xf32>
    %272 = vector.broadcast %271 : vector<1x1xf32> to vector<48x1xf32>
    %273 = arith.mulf %272, %45 : vector<48x1xf32>
    %274 = arith.addf %263, %273 : vector<48x1xf32>
    %275 = vector.broadcast %52 : vector<48x1xf32> to vector<48x48xf32>
    %276 = arith.mulf %262, %275 : vector<48x48xf32>
    %cst_73 = arith.constant dense<0.000000e+00> : vector<48xf32>
    %277 = vector.multi_reduction <add>, %276, %cst_73 [0] : vector<48x48xf32> to vector<48xf32>
    %278 = vector.shape_cast %277 : vector<48xf32> to vector<1x48xf32>
    %cst_74 = arith.constant dense<0.000000e+00> : vector<1xf32>
    %279 = vector.multi_reduction <add>, %278, %cst_74 [1] : vector<1x48xf32> to vector<1xf32>
    %280 = vector.shape_cast %279 : vector<1xf32> to vector<1x1xf32>
    %cst_75 = arith.constant 0.00130208337 : f32
    %281 = vector.broadcast %cst_75 : f32 to vector<1x1xf32>
    %282 = arith.mulf %280, %281 : vector<1x1xf32>
    %283 = vector.broadcast %282 : vector<1x1xf32> to vector<48x1xf32>
    %284 = arith.mulf %283, %52 : vector<48x1xf32>
    %285 = arith.addf %274, %284 : vector<48x1xf32>
    %286 = vector.broadcast %59 : vector<48x1xf32> to vector<48x48xf32>
    %287 = arith.mulf %262, %286 : vector<48x48xf32>
    %cst_76 = arith.constant dense<0.000000e+00> : vector<48xf32>
    %288 = vector.multi_reduction <add>, %287, %cst_76 [0] : vector<48x48xf32> to vector<48xf32>
    %289 = vector.shape_cast %288 : vector<48xf32> to vector<1x48xf32>
    %cst_77 = arith.constant dense<0.000000e+00> : vector<1xf32>
    %290 = vector.multi_reduction <add>, %289, %cst_77 [1] : vector<1x48xf32> to vector<1xf32>
    %291 = vector.shape_cast %290 : vector<1xf32> to vector<1x1xf32>
    %cst_78 = arith.constant 8.68055562E-4 : f32
    %292 = vector.broadcast %cst_78 : f32 to vector<1x1xf32>
    %293 = arith.mulf %291, %292 : vector<1x1xf32>
    %294 = vector.broadcast %293 : vector<1x1xf32> to vector<48x1xf32>
    %295 = arith.mulf %294, %59 : vector<48x1xf32>
    %296 = arith.addf %285, %295 : vector<48x1xf32>
    %297 = vector.broadcast %296 : vector<48x1xf32> to vector<48x48xf32>
    %298 = arith.subf %262, %297 : vector<48x48xf32>
    %cst_79 = arith.constant 0.000000e+00 : f32
    %299 = vector.broadcast %cst_79 : f32 to vector<48x1xf32>
    %300 = arith.mulf %298, %298 : vector<48x48xf32>
    %301 = vector.broadcast %45 : vector<48x1xf32> to vector<48x48xf32>
    %302 = arith.mulf %300, %301 : vector<48x48xf32>
    %cst_80 = arith.constant dense<0.000000e+00> : vector<48xf32>
    %303 = vector.multi_reduction <add>, %302, %cst_80 [0] : vector<48x48xf32> to vector<48xf32>
    %304 = vector.shape_cast %303 : vector<48xf32> to vector<1x48xf32>
    %cst_81 = arith.constant dense<0.000000e+00> : vector<1xf32>
    %305 = vector.multi_reduction <add>, %304, %cst_81 [1] : vector<1x48xf32> to vector<1xf32>
    %306 = vector.shape_cast %305 : vector<1xf32> to vector<1x1xf32>
    %cst_82 = arith.constant 0.00260416674 : f32
    %307 = vector.broadcast %cst_82 : f32 to vector<1x1xf32>
    %308 = arith.mulf %306, %307 : vector<1x1xf32>
    %309 = vector.broadcast %308 : vector<1x1xf32> to vector<48x1xf32>
    %310 = arith.mulf %309, %45 : vector<48x1xf32>
    %311 = arith.addf %299, %310 : vector<48x1xf32>
    %312 = arith.mulf %298, %298 : vector<48x48xf32>
    %313 = vector.broadcast %52 : vector<48x1xf32> to vector<48x48xf32>
    %314 = arith.mulf %312, %313 : vector<48x48xf32>
    %cst_83 = arith.constant dense<0.000000e+00> : vector<48xf32>
    %315 = vector.multi_reduction <add>, %314, %cst_83 [0] : vector<48x48xf32> to vector<48xf32>
    %316 = vector.shape_cast %315 : vector<48xf32> to vector<1x48xf32>
    %cst_84 = arith.constant dense<0.000000e+00> : vector<1xf32>
    %317 = vector.multi_reduction <add>, %316, %cst_84 [1] : vector<1x48xf32> to vector<1xf32>
    %318 = vector.shape_cast %317 : vector<1xf32> to vector<1x1xf32>
    %cst_85 = arith.constant 0.00130208337 : f32
    %319 = vector.broadcast %cst_85 : f32 to vector<1x1xf32>
    %320 = arith.mulf %318, %319 : vector<1x1xf32>
    %321 = vector.broadcast %320 : vector<1x1xf32> to vector<48x1xf32>
    %322 = arith.mulf %321, %52 : vector<48x1xf32>
    %323 = arith.addf %311, %322 : vector<48x1xf32>
    %324 = arith.mulf %298, %298 : vector<48x48xf32>
    %325 = vector.broadcast %59 : vector<48x1xf32> to vector<48x48xf32>
    %326 = arith.mulf %324, %325 : vector<48x48xf32>
    %cst_86 = arith.constant dense<0.000000e+00> : vector<48xf32>
    %327 = vector.multi_reduction <add>, %326, %cst_86 [0] : vector<48x48xf32> to vector<48xf32>
    %328 = vector.shape_cast %327 : vector<48xf32> to vector<1x48xf32>
    %cst_87 = arith.constant dense<0.000000e+00> : vector<1xf32>
    %329 = vector.multi_reduction <add>, %328, %cst_87 [1] : vector<1x48xf32> to vector<1xf32>
    %330 = vector.shape_cast %329 : vector<1xf32> to vector<1x1xf32>
    %cst_88 = arith.constant 8.68055562E-4 : f32
    %331 = vector.broadcast %cst_88 : f32 to vector<1x1xf32>
    %332 = arith.mulf %330, %331 : vector<1x1xf32>
    %333 = vector.broadcast %332 : vector<1x1xf32> to vector<48x1xf32>
    %334 = arith.mulf %333, %59 : vector<48x1xf32>
    %335 = arith.addf %323, %334 : vector<48x1xf32>
    %cst_89 = arith.constant 9.99999974E-6 : f32
    %336 = vector.broadcast %cst_89 : f32 to vector<48x1xf32>
    %337 = arith.addf %335, %336 : vector<48x1xf32>
    %338 = math.rsqrt %337 : vector<48x1xf32>
    %339 = vector.broadcast %338 : vector<48x1xf32> to vector<48x48xf32>
    %340 = arith.mulf %298, %339 : vector<48x48xf32>
    %cst_90 = arith.constant dense<0xFF800000> : vector<48xf32>
    %341 = vector.multi_reduction <maximumf>, %340, %cst_90 [1] : vector<48x48xf32> to vector<48xf32>
    %342 = vector.shape_cast %341 : vector<48xf32> to vector<48x1xf32>
    %343 = vector.broadcast %342 : vector<48x1xf32> to vector<48x48xf32>
    %344 = arith.subf %340, %343 : vector<48x48xf32>
    %345 = math.exp %344 : vector<48x48xf32>
    %cst_91 = arith.constant dense<0.000000e+00> : vector<48xf32>
    %346 = vector.multi_reduction <add>, %345, %cst_91 [1] : vector<48x48xf32> to vector<48xf32>
    %347 = vector.shape_cast %346 : vector<48xf32> to vector<48x1xf32>
    %348 = tpu.reciprocal %347 : vector<48x1xf32> -> vector<48x1xf32>
    %349 = vector.broadcast %348 : vector<48x1xf32> to vector<48x48xf32>
    %350 = arith.mulf %345, %349 : vector<48x48xf32>
    %351 = arith.extui %0 : i1 to i32
    %c0_i32_92 = arith.constant 0 : i32
    %352 = arith.cmpi ne, %351, %c0_i32_92 : i32
    scf.if %352 {
      %c48 = arith.constant 48 : index
      %c0_299 = arith.constant 0 : index
      %1066 = vector.load %arg9[%c48, %c0_299] : memref<384x48xf32, #tpu.memory_space<vmem>>, vector<48x48xf32>
      tpu.vector_store %arg9[%c48, %c0_299], %350 {strides = array<i32>} : memref<384x48xf32, #tpu.memory_space<vmem>>, vector<48x48xf32>,
    } else {
    }
    %353 = vector.extract_strided_slice %158 {offsets = [96, 0], sizes = [48, 16], strides = [1, 1]} : vector<192x32xf32> to vector<48x16xf32>
    %354 = vector.extract_strided_slice %161 {offsets = [0, 96], sizes = [16, 48], strides = [1, 1]} : vector<32x384xf32> to vector<16x48xf32>
    %cst_93 = arith.constant dense<0.000000e+00> : vector<48x48xf32>
    %355 = tpu.matmul %353, %354, %cst_93 {dimension_numbers = #tpu.dot_dimension_numbers<[1], [0], [0], [1], [0, 0, 1, 1], [], []>} : vector<48x16xf32>, vector<16x48xf32>, vector<48x48xf32> -> vector<48x48xf32>
    %cst_94 = arith.constant 0.144337565 : f32
    %356 = vector.broadcast %cst_94 : f32 to vector<48x48xf32>
    %357 = arith.mulf %355, %356 : vector<48x48xf32>
    %cst_95 = arith.constant 0.000000e+00 : f32
    %358 = vector.broadcast %cst_95 : f32 to vector<48x1xf32>
    %359 = vector.broadcast %45 : vector<48x1xf32> to vector<48x48xf32>
    %360 = arith.mulf %357, %359 : vector<48x48xf32>
    %cst_96 = arith.constant dense<0.000000e+00> : vector<48xf32>
    %361 = vector.multi_reduction <add>, %360, %cst_96 [0] : vector<48x48xf32> to vector<48xf32>
    %362 = vector.shape_cast %361 : vector<48xf32> to vector<1x48xf32>
    %cst_97 = arith.constant dense<0.000000e+00> : vector<1xf32>
    %363 = vector.multi_reduction <add>, %362, %cst_97 [1] : vector<1x48xf32> to vector<1xf32>
    %364 = vector.shape_cast %363 : vector<1xf32> to vector<1x1xf32>
    %cst_98 = arith.constant 0.00260416674 : f32
    %365 = vector.broadcast %cst_98 : f32 to vector<1x1xf32>
    %366 = arith.mulf %364, %365 : vector<1x1xf32>
    %367 = vector.broadcast %366 : vector<1x1xf32> to vector<48x1xf32>
    %368 = arith.mulf %367, %45 : vector<48x1xf32>
    %369 = arith.addf %358, %368 : vector<48x1xf32>
    %370 = vector.broadcast %52 : vector<48x1xf32> to vector<48x48xf32>
    %371 = arith.mulf %357, %370 : vector<48x48xf32>
    %cst_99 = arith.constant dense<0.000000e+00> : vector<48xf32>
    %372 = vector.multi_reduction <add>, %371, %cst_99 [0] : vector<48x48xf32> to vector<48xf32>
    %373 = vector.shape_cast %372 : vector<48xf32> to vector<1x48xf32>
    %cst_100 = arith.constant dense<0.000000e+00> : vector<1xf32>
    %374 = vector.multi_reduction <add>, %373, %cst_100 [1] : vector<1x48xf32> to vector<1xf32>
    %375 = vector.shape_cast %374 : vector<1xf32> to vector<1x1xf32>
    %cst_101 = arith.constant 0.00130208337 : f32
    %376 = vector.broadcast %cst_101 : f32 to vector<1x1xf32>
    %377 = arith.mulf %375, %376 : vector<1x1xf32>
    %378 = vector.broadcast %377 : vector<1x1xf32> to vector<48x1xf32>
    %379 = arith.mulf %378, %52 : vector<48x1xf32>
    %380 = arith.addf %369, %379 : vector<48x1xf32>
    %381 = vector.broadcast %59 : vector<48x1xf32> to vector<48x48xf32>
    %382 = arith.mulf %357, %381 : vector<48x48xf32>
    %cst_102 = arith.constant dense<0.000000e+00> : vector<48xf32>
    %383 = vector.multi_reduction <add>, %382, %cst_102 [0] : vector<48x48xf32> to vector<48xf32>
    %384 = vector.shape_cast %383 : vector<48xf32> to vector<1x48xf32>
    %cst_103 = arith.constant dense<0.000000e+00> : vector<1xf32>
    %385 = vector.multi_reduction <add>, %384, %cst_103 [1] : vector<1x48xf32> to vector<1xf32>
    %386 = vector.shape_cast %385 : vector<1xf32> to vector<1x1xf32>
    %cst_104 = arith.constant 8.68055562E-4 : f32
    %387 = vector.broadcast %cst_104 : f32 to vector<1x1xf32>
    %388 = arith.mulf %386, %387 : vector<1x1xf32>
    %389 = vector.broadcast %388 : vector<1x1xf32> to vector<48x1xf32>
    %390 = arith.mulf %389, %59 : vector<48x1xf32>
    %391 = arith.addf %380, %390 : vector<48x1xf32>
    %392 = vector.broadcast %391 : vector<48x1xf32> to vector<48x48xf32>
    %393 = arith.subf %357, %392 : vector<48x48xf32>
    %cst_105 = arith.constant 0.000000e+00 : f32
    %394 = vector.broadcast %cst_105 : f32 to vector<48x1xf32>
    %395 = arith.mulf %393, %393 : vector<48x48xf32>
    %396 = vector.broadcast %45 : vector<48x1xf32> to vector<48x48xf32>
    %397 = arith.mulf %395, %396 : vector<48x48xf32>
    %cst_106 = arith.constant dense<0.000000e+00> : vector<48xf32>
    %398 = vector.multi_reduction <add>, %397, %cst_106 [0] : vector<48x48xf32> to vector<48xf32>
    %399 = vector.shape_cast %398 : vector<48xf32> to vector<1x48xf32>
    %cst_107 = arith.constant dense<0.000000e+00> : vector<1xf32>
    %400 = vector.multi_reduction <add>, %399, %cst_107 [1] : vector<1x48xf32> to vector<1xf32>
    %401 = vector.shape_cast %400 : vector<1xf32> to vector<1x1xf32>
    %cst_108 = arith.constant 0.00260416674 : f32
    %402 = vector.broadcast %cst_108 : f32 to vector<1x1xf32>
    %403 = arith.mulf %401, %402 : vector<1x1xf32>
    %404 = vector.broadcast %403 : vector<1x1xf32> to vector<48x1xf32>
    %405 = arith.mulf %404, %45 : vector<48x1xf32>
    %406 = arith.addf %394, %405 : vector<48x1xf32>
    %407 = arith.mulf %393, %393 : vector<48x48xf32>
    %408 = vector.broadcast %52 : vector<48x1xf32> to vector<48x48xf32>
    %409 = arith.mulf %407, %408 : vector<48x48xf32>
    %cst_109 = arith.constant dense<0.000000e+00> : vector<48xf32>
    %410 = vector.multi_reduction <add>, %409, %cst_109 [0] : vector<48x48xf32> to vector<48xf32>
    %411 = vector.shape_cast %410 : vector<48xf32> to vector<1x48xf32>
    %cst_110 = arith.constant dense<0.000000e+00> : vector<1xf32>
    %412 = vector.multi_reduction <add>, %411, %cst_110 [1] : vector<1x48xf32> to vector<1xf32>
    %413 = vector.shape_cast %412 : vector<1xf32> to vector<1x1xf32>
    %cst_111 = arith.constant 0.00130208337 : f32
    %414 = vector.broadcast %cst_111 : f32 to vector<1x1xf32>
    %415 = arith.mulf %413, %414 : vector<1x1xf32>
    %416 = vector.broadcast %415 : vector<1x1xf32> to vector<48x1xf32>
    %417 = arith.mulf %416, %52 : vector<48x1xf32>
    %418 = arith.addf %406, %417 : vector<48x1xf32>
    %419 = arith.mulf %393, %393 : vector<48x48xf32>
    %420 = vector.broadcast %59 : vector<48x1xf32> to vector<48x48xf32>
    %421 = arith.mulf %419, %420 : vector<48x48xf32>
    %cst_112 = arith.constant dense<0.000000e+00> : vector<48xf32>
    %422 = vector.multi_reduction <add>, %421, %cst_112 [0] : vector<48x48xf32> to vector<48xf32>
    %423 = vector.shape_cast %422 : vector<48xf32> to vector<1x48xf32>
    %cst_113 = arith.constant dense<0.000000e+00> : vector<1xf32>
    %424 = vector.multi_reduction <add>, %423, %cst_113 [1] : vector<1x48xf32> to vector<1xf32>
    %425 = vector.shape_cast %424 : vector<1xf32> to vector<1x1xf32>
    %cst_114 = arith.constant 8.68055562E-4 : f32
    %426 = vector.broadcast %cst_114 : f32 to vector<1x1xf32>
    %427 = arith.mulf %425, %426 : vector<1x1xf32>
    %428 = vector.broadcast %427 : vector<1x1xf32> to vector<48x1xf32>
    %429 = arith.mulf %428, %59 : vector<48x1xf32>
    %430 = arith.addf %418, %429 : vector<48x1xf32>
    %cst_115 = arith.constant 9.99999974E-6 : f32
    %431 = vector.broadcast %cst_115 : f32 to vector<48x1xf32>
    %432 = arith.addf %430, %431 : vector<48x1xf32>
    %433 = math.rsqrt %432 : vector<48x1xf32>
    %434 = vector.broadcast %433 : vector<48x1xf32> to vector<48x48xf32>
    %435 = arith.mulf %393, %434 : vector<48x48xf32>
    %cst_116 = arith.constant dense<0xFF800000> : vector<48xf32>
    %436 = vector.multi_reduction <maximumf>, %435, %cst_116 [1] : vector<48x48xf32> to vector<48xf32>
    %437 = vector.shape_cast %436 : vector<48xf32> to vector<48x1xf32>
    %438 = vector.broadcast %437 : vector<48x1xf32> to vector<48x48xf32>
    %439 = arith.subf %435, %438 : vector<48x48xf32>
    %440 = math.exp %439 : vector<48x48xf32>
    %cst_117 = arith.constant dense<0.000000e+00> : vector<48xf32>
    %441 = vector.multi_reduction <add>, %440, %cst_117 [1] : vector<48x48xf32> to vector<48xf32>
    %442 = vector.shape_cast %441 : vector<48xf32> to vector<48x1xf32>
    %443 = tpu.reciprocal %442 : vector<48x1xf32> -> vector<48x1xf32>
    %444 = vector.broadcast %443 : vector<48x1xf32> to vector<48x48xf32>
    %445 = arith.mulf %440, %444 : vector<48x48xf32>
    %446 = arith.extui %0 : i1 to i32
    %c0_i32_118 = arith.constant 0 : i32
    %447 = arith.cmpi ne, %446, %c0_i32_118 : i32
    scf.if %447 {
      %c96 = arith.constant 96 : index
      %c0_299 = arith.constant 0 : index
      %1066 = vector.load %arg9[%c96, %c0_299] : memref<384x48xf32, #tpu.memory_space<vmem>>, vector<48x48xf32>
      tpu.vector_store %arg9[%c96, %c0_299], %445 {strides = array<i32>} : memref<384x48xf32, #tpu.memory_space<vmem>>, vector<48x48xf32>,
    } else {
    }
    %448 = vector.extract_strided_slice %158 {offsets = [144, 0], sizes = [48, 16], strides = [1, 1]} : vector<192x32xf32> to vector<48x16xf32>
    %449 = vector.extract_strided_slice %161 {offsets = [0, 144], sizes = [16, 48], strides = [1, 1]} : vector<32x384xf32> to vector<16x48xf32>
    %cst_119 = arith.constant dense<0.000000e+00> : vector<48x48xf32>
    %450 = tpu.matmul %448, %449, %cst_119 {dimension_numbers = #tpu.dot_dimension_numbers<[1], [0], [0], [1], [0, 0, 1, 1], [], []>} : vector<48x16xf32>, vector<16x48xf32>, vector<48x48xf32> -> vector<48x48xf32>
    %cst_120 = arith.constant 0.144337565 : f32
    %451 = vector.broadcast %cst_120 : f32 to vector<48x48xf32>
    %452 = arith.mulf %450, %451 : vector<48x48xf32>
    %cst_121 = arith.constant 0.000000e+00 : f32
    %453 = vector.broadcast %cst_121 : f32 to vector<48x1xf32>
    %454 = vector.broadcast %45 : vector<48x1xf32> to vector<48x48xf32>
    %455 = arith.mulf %452, %454 : vector<48x48xf32>
    %cst_122 = arith.constant dense<0.000000e+00> : vector<48xf32>
    %456 = vector.multi_reduction <add>, %455, %cst_122 [0] : vector<48x48xf32> to vector<48xf32>
    %457 = vector.shape_cast %456 : vector<48xf32> to vector<1x48xf32>
    %cst_123 = arith.constant dense<0.000000e+00> : vector<1xf32>
    %458 = vector.multi_reduction <add>, %457, %cst_123 [1] : vector<1x48xf32> to vector<1xf32>
    %459 = vector.shape_cast %458 : vector<1xf32> to vector<1x1xf32>
    %cst_124 = arith.constant 0.00260416674 : f32
    %460 = vector.broadcast %cst_124 : f32 to vector<1x1xf32>
    %461 = arith.mulf %459, %460 : vector<1x1xf32>
    %462 = vector.broadcast %461 : vector<1x1xf32> to vector<48x1xf32>
    %463 = arith.mulf %462, %45 : vector<48x1xf32>
    %464 = arith.addf %453, %463 : vector<48x1xf32>
    %465 = vector.broadcast %52 : vector<48x1xf32> to vector<48x48xf32>
    %466 = arith.mulf %452, %465 : vector<48x48xf32>
    %cst_125 = arith.constant dense<0.000000e+00> : vector<48xf32>
    %467 = vector.multi_reduction <add>, %466, %cst_125 [0] : vector<48x48xf32> to vector<48xf32>
    %468 = vector.shape_cast %467 : vector<48xf32> to vector<1x48xf32>
    %cst_126 = arith.constant dense<0.000000e+00> : vector<1xf32>
    %469 = vector.multi_reduction <add>, %468, %cst_126 [1] : vector<1x48xf32> to vector<1xf32>
    %470 = vector.shape_cast %469 : vector<1xf32> to vector<1x1xf32>
    %cst_127 = arith.constant 0.00130208337 : f32
    %471 = vector.broadcast %cst_127 : f32 to vector<1x1xf32>
    %472 = arith.mulf %470, %471 : vector<1x1xf32>
    %473 = vector.broadcast %472 : vector<1x1xf32> to vector<48x1xf32>
    %474 = arith.mulf %473, %52 : vector<48x1xf32>
    %475 = arith.addf %464, %474 : vector<48x1xf32>
    %476 = vector.broadcast %59 : vector<48x1xf32> to vector<48x48xf32>
    %477 = arith.mulf %452, %476 : vector<48x48xf32>
    %cst_128 = arith.constant dense<0.000000e+00> : vector<48xf32>
    %478 = vector.multi_reduction <add>, %477, %cst_128 [0] : vector<48x48xf32> to vector<48xf32>
    %479 = vector.shape_cast %478 : vector<48xf32> to vector<1x48xf32>
    %cst_129 = arith.constant dense<0.000000e+00> : vector<1xf32>
    %480 = vector.multi_reduction <add>, %479, %cst_129 [1] : vector<1x48xf32> to vector<1xf32>
    %481 = vector.shape_cast %480 : vector<1xf32> to vector<1x1xf32>
    %cst_130 = arith.constant 8.68055562E-4 : f32
    %482 = vector.broadcast %cst_130 : f32 to vector<1x1xf32>
    %483 = arith.mulf %481, %482 : vector<1x1xf32>
    %484 = vector.broadcast %483 : vector<1x1xf32> to vector<48x1xf32>
    %485 = arith.mulf %484, %59 : vector<48x1xf32>
    %486 = arith.addf %475, %485 : vector<48x1xf32>
    %487 = vector.broadcast %486 : vector<48x1xf32> to vector<48x48xf32>
    %488 = arith.subf %452, %487 : vector<48x48xf32>
    %cst_131 = arith.constant 0.000000e+00 : f32
    %489 = vector.broadcast %cst_131 : f32 to vector<48x1xf32>
    %490 = arith.mulf %488, %488 : vector<48x48xf32>
    %491 = vector.broadcast %45 : vector<48x1xf32> to vector<48x48xf32>
    %492 = arith.mulf %490, %491 : vector<48x48xf32>
    %cst_132 = arith.constant dense<0.000000e+00> : vector<48xf32>
    %493 = vector.multi_reduction <add>, %492, %cst_132 [0] : vector<48x48xf32> to vector<48xf32>
    %494 = vector.shape_cast %493 : vector<48xf32> to vector<1x48xf32>
    %cst_133 = arith.constant dense<0.000000e+00> : vector<1xf32>
    %495 = vector.multi_reduction <add>, %494, %cst_133 [1] : vector<1x48xf32> to vector<1xf32>
    %496 = vector.shape_cast %495 : vector<1xf32> to vector<1x1xf32>
    %cst_134 = arith.constant 0.00260416674 : f32
    %497 = vector.broadcast %cst_134 : f32 to vector<1x1xf32>
    %498 = arith.mulf %496, %497 : vector<1x1xf32>
    %499 = vector.broadcast %498 : vector<1x1xf32> to vector<48x1xf32>
    %500 = arith.mulf %499, %45 : vector<48x1xf32>
    %501 = arith.addf %489, %500 : vector<48x1xf32>
    %502 = arith.mulf %488, %488 : vector<48x48xf32>
    %503 = vector.broadcast %52 : vector<48x1xf32> to vector<48x48xf32>
    %504 = arith.mulf %502, %503 : vector<48x48xf32>
    %cst_135 = arith.constant dense<0.000000e+00> : vector<48xf32>
    %505 = vector.multi_reduction <add>, %504, %cst_135 [0] : vector<48x48xf32> to vector<48xf32>
    %506 = vector.shape_cast %505 : vector<48xf32> to vector<1x48xf32>
    %cst_136 = arith.constant dense<0.000000e+00> : vector<1xf32>
    %507 = vector.multi_reduction <add>, %506, %cst_136 [1] : vector<1x48xf32> to vector<1xf32>
    %508 = vector.shape_cast %507 : vector<1xf32> to vector<1x1xf32>
    %cst_137 = arith.constant 0.00130208337 : f32
    %509 = vector.broadcast %cst_137 : f32 to vector<1x1xf32>
    %510 = arith.mulf %508, %509 : vector<1x1xf32>
    %511 = vector.broadcast %510 : vector<1x1xf32> to vector<48x1xf32>
    %512 = arith.mulf %511, %52 : vector<48x1xf32>
    %513 = arith.addf %501, %512 : vector<48x1xf32>
    %514 = arith.mulf %488, %488 : vector<48x48xf32>
    %515 = vector.broadcast %59 : vector<48x1xf32> to vector<48x48xf32>
    %516 = arith.mulf %514, %515 : vector<48x48xf32>
    %cst_138 = arith.constant dense<0.000000e+00> : vector<48xf32>
    %517 = vector.multi_reduction <add>, %516, %cst_138 [0] : vector<48x48xf32> to vector<48xf32>
    %518 = vector.shape_cast %517 : vector<48xf32> to vector<1x48xf32>
    %cst_139 = arith.constant dense<0.000000e+00> : vector<1xf32>
    %519 = vector.multi_reduction <add>, %518, %cst_139 [1] : vector<1x48xf32> to vector<1xf32>
    %520 = vector.shape_cast %519 : vector<1xf32> to vector<1x1xf32>
    %cst_140 = arith.constant 8.68055562E-4 : f32
    %521 = vector.broadcast %cst_140 : f32 to vector<1x1xf32>
    %522 = arith.mulf %520, %521 : vector<1x1xf32>
    %523 = vector.broadcast %522 : vector<1x1xf32> to vector<48x1xf32>
    %524 = arith.mulf %523, %59 : vector<48x1xf32>
    %525 = arith.addf %513, %524 : vector<48x1xf32>
    %cst_141 = arith.constant 9.99999974E-6 : f32
    %526 = vector.broadcast %cst_141 : f32 to vector<48x1xf32>
    %527 = arith.addf %525, %526 : vector<48x1xf32>
    %528 = math.rsqrt %527 : vector<48x1xf32>
    %529 = vector.broadcast %528 : vector<48x1xf32> to vector<48x48xf32>
    %530 = arith.mulf %488, %529 : vector<48x48xf32>
    %cst_142 = arith.constant dense<0xFF800000> : vector<48xf32>
    %531 = vector.multi_reduction <maximumf>, %530, %cst_142 [1] : vector<48x48xf32> to vector<48xf32>
    %532 = vector.shape_cast %531 : vector<48xf32> to vector<48x1xf32>
    %533 = vector.broadcast %532 : vector<48x1xf32> to vector<48x48xf32>
    %534 = arith.subf %530, %533 : vector<48x48xf32>
    %535 = math.exp %534 : vector<48x48xf32>
    %cst_143 = arith.constant dense<0.000000e+00> : vector<48xf32>
    %536 = vector.multi_reduction <add>, %535, %cst_143 [1] : vector<48x48xf32> to vector<48xf32>
    %537 = vector.shape_cast %536 : vector<48xf32> to vector<48x1xf32>
    %538 = tpu.reciprocal %537 : vector<48x1xf32> -> vector<48x1xf32>
    %539 = vector.broadcast %538 : vector<48x1xf32> to vector<48x48xf32>
    %540 = arith.mulf %535, %539 : vector<48x48xf32>
    %541 = arith.extui %0 : i1 to i32
    %c0_i32_144 = arith.constant 0 : i32
    %542 = arith.cmpi ne, %541, %c0_i32_144 : i32
    scf.if %542 {
      %c144 = arith.constant 144 : index
      %c0_299 = arith.constant 0 : index
      %1066 = vector.load %arg9[%c144, %c0_299] : memref<384x48xf32, #tpu.memory_space<vmem>>, vector<48x48xf32>
      tpu.vector_store %arg9[%c144, %c0_299], %540 {strides = array<i32>} : memref<384x48xf32, #tpu.memory_space<vmem>>, vector<48x48xf32>,
    } else {
    }
    %543 = tpu.concatenate %255, %350, %445, %540 in 1 : vector<48x48xf32>, vector<48x48xf32>, vector<48x48xf32>, vector<48x48xf32> -> vector<48x192xf32>
    %cst_145 = arith.constant dense<0.000000e+00> : vector<16x48xf32>
    %544 = tpu.matmul %162, %543, %cst_145 {dimension_numbers = #tpu.dot_dimension_numbers<[1], [1], [0], [0], [0, 0, 1, 0], [], []>} : vector<16x192xf32>, vector<48x192xf32>, vector<16x48xf32> -> vector<16x48xf32>
    %cst_146 = arith.constant 2.500000e-01 : f32
    %545 = vector.broadcast %cst_146 : f32 to vector<16x48xf32>
    %546 = arith.mulf %544, %545 : vector<16x48xf32>
    %547 = vector.extract_strided_slice %161 {offsets = [16, 192], sizes = [16, 192], strides = [1, 1]} : vector<32x384xf32> to vector<16x192xf32>
    %548 = vector.extract_strided_slice %158 {offsets = [0, 16], sizes = [48, 16], strides = [1, 1]} : vector<192x32xf32> to vector<48x16xf32>
    %549 = vector.extract_strided_slice %161 {offsets = [16, 0], sizes = [16, 48], strides = [1, 1]} : vector<32x384xf32> to vector<16x48xf32>
    %cst_147 = arith.constant dense<0.000000e+00> : vector<48x48xf32>
    %550 = tpu.matmul %548, %549, %cst_147 {dimension_numbers = #tpu.dot_dimension_numbers<[1], [0], [0], [1], [0, 0, 1, 1], [], []>} : vector<48x16xf32>, vector<16x48xf32>, vector<48x48xf32> -> vector<48x48xf32>
    %cst_148 = arith.constant 0.144337565 : f32
    %551 = vector.broadcast %cst_148 : f32 to vector<48x48xf32>
    %552 = arith.mulf %550, %551 : vector<48x48xf32>
    %cst_149 = arith.constant 0.000000e+00 : f32
    %553 = vector.broadcast %cst_149 : f32 to vector<48x1xf32>
    %554 = vector.broadcast %45 : vector<48x1xf32> to vector<48x48xf32>
    %555 = arith.mulf %552, %554 : vector<48x48xf32>
    %cst_150 = arith.constant dense<0.000000e+00> : vector<48xf32>
    %556 = vector.multi_reduction <add>, %555, %cst_150 [0] : vector<48x48xf32> to vector<48xf32>
    %557 = vector.shape_cast %556 : vector<48xf32> to vector<1x48xf32>
    %cst_151 = arith.constant dense<0.000000e+00> : vector<1xf32>
    %558 = vector.multi_reduction <add>, %557, %cst_151 [1] : vector<1x48xf32> to vector<1xf32>
    %559 = vector.shape_cast %558 : vector<1xf32> to vector<1x1xf32>
    %cst_152 = arith.constant 0.00260416674 : f32
    %560 = vector.broadcast %cst_152 : f32 to vector<1x1xf32>
    %561 = arith.mulf %559, %560 : vector<1x1xf32>
    %562 = vector.broadcast %561 : vector<1x1xf32> to vector<48x1xf32>
    %563 = arith.mulf %562, %45 : vector<48x1xf32>
    %564 = arith.addf %553, %563 : vector<48x1xf32>
    %565 = vector.broadcast %52 : vector<48x1xf32> to vector<48x48xf32>
    %566 = arith.mulf %552, %565 : vector<48x48xf32>
    %cst_153 = arith.constant dense<0.000000e+00> : vector<48xf32>
    %567 = vector.multi_reduction <add>, %566, %cst_153 [0] : vector<48x48xf32> to vector<48xf32>
    %568 = vector.shape_cast %567 : vector<48xf32> to vector<1x48xf32>
    %cst_154 = arith.constant dense<0.000000e+00> : vector<1xf32>
    %569 = vector.multi_reduction <add>, %568, %cst_154 [1] : vector<1x48xf32> to vector<1xf32>
    %570 = vector.shape_cast %569 : vector<1xf32> to vector<1x1xf32>
    %cst_155 = arith.constant 0.00130208337 : f32
    %571 = vector.broadcast %cst_155 : f32 to vector<1x1xf32>
    %572 = arith.mulf %570, %571 : vector<1x1xf32>
    %573 = vector.broadcast %572 : vector<1x1xf32> to vector<48x1xf32>
    %574 = arith.mulf %573, %52 : vector<48x1xf32>
    %575 = arith.addf %564, %574 : vector<48x1xf32>
    %576 = vector.broadcast %59 : vector<48x1xf32> to vector<48x48xf32>
    %577 = arith.mulf %552, %576 : vector<48x48xf32>
    %cst_156 = arith.constant dense<0.000000e+00> : vector<48xf32>
    %578 = vector.multi_reduction <add>, %577, %cst_156 [0] : vector<48x48xf32> to vector<48xf32>
    %579 = vector.shape_cast %578 : vector<48xf32> to vector<1x48xf32>
    %cst_157 = arith.constant dense<0.000000e+00> : vector<1xf32>
    %580 = vector.multi_reduction <add>, %579, %cst_157 [1] : vector<1x48xf32> to vector<1xf32>
    %581 = vector.shape_cast %580 : vector<1xf32> to vector<1x1xf32>
    %cst_158 = arith.constant 8.68055562E-4 : f32
    %582 = vector.broadcast %cst_158 : f32 to vector<1x1xf32>
    %583 = arith.mulf %581, %582 : vector<1x1xf32>
    %584 = vector.broadcast %583 : vector<1x1xf32> to vector<48x1xf32>
    %585 = arith.mulf %584, %59 : vector<48x1xf32>
    %586 = arith.addf %575, %585 : vector<48x1xf32>
    %587 = vector.broadcast %586 : vector<48x1xf32> to vector<48x48xf32>
    %588 = arith.subf %552, %587 : vector<48x48xf32>
    %cst_159 = arith.constant 0.000000e+00 : f32
    %589 = vector.broadcast %cst_159 : f32 to vector<48x1xf32>
    %590 = arith.mulf %588, %588 : vector<48x48xf32>
    %591 = vector.broadcast %45 : vector<48x1xf32> to vector<48x48xf32>
    %592 = arith.mulf %590, %591 : vector<48x48xf32>
    %cst_160 = arith.constant dense<0.000000e+00> : vector<48xf32>
    %593 = vector.multi_reduction <add>, %592, %cst_160 [0] : vector<48x48xf32> to vector<48xf32>
    %594 = vector.shape_cast %593 : vector<48xf32> to vector<1x48xf32>
    %cst_161 = arith.constant dense<0.000000e+00> : vector<1xf32>
    %595 = vector.multi_reduction <add>, %594, %cst_161 [1] : vector<1x48xf32> to vector<1xf32>
    %596 = vector.shape_cast %595 : vector<1xf32> to vector<1x1xf32>
    %cst_162 = arith.constant 0.00260416674 : f32
    %597 = vector.broadcast %cst_162 : f32 to vector<1x1xf32>
    %598 = arith.mulf %596, %597 : vector<1x1xf32>
    %599 = vector.broadcast %598 : vector<1x1xf32> to vector<48x1xf32>
    %600 = arith.mulf %599, %45 : vector<48x1xf32>
    %601 = arith.addf %589, %600 : vector<48x1xf32>
    %602 = arith.mulf %588, %588 : vector<48x48xf32>
    %603 = vector.broadcast %52 : vector<48x1xf32> to vector<48x48xf32>
    %604 = arith.mulf %602, %603 : vector<48x48xf32>
    %cst_163 = arith.constant dense<0.000000e+00> : vector<48xf32>
    %605 = vector.multi_reduction <add>, %604, %cst_163 [0] : vector<48x48xf32> to vector<48xf32>
    %606 = vector.shape_cast %605 : vector<48xf32> to vector<1x48xf32>
    %cst_164 = arith.constant dense<0.000000e+00> : vector<1xf32>
    %607 = vector.multi_reduction <add>, %606, %cst_164 [1] : vector<1x48xf32> to vector<1xf32>
    %608 = vector.shape_cast %607 : vector<1xf32> to vector<1x1xf32>
    %cst_165 = arith.constant 0.00130208337 : f32
    %609 = vector.broadcast %cst_165 : f32 to vector<1x1xf32>
    %610 = arith.mulf %608, %609 : vector<1x1xf32>
    %611 = vector.broadcast %610 : vector<1x1xf32> to vector<48x1xf32>
    %612 = arith.mulf %611, %52 : vector<48x1xf32>
    %613 = arith.addf %601, %612 : vector<48x1xf32>
    %614 = arith.mulf %588, %588 : vector<48x48xf32>
    %615 = vector.broadcast %59 : vector<48x1xf32> to vector<48x48xf32>
    %616 = arith.mulf %614, %615 : vector<48x48xf32>
    %cst_166 = arith.constant dense<0.000000e+00> : vector<48xf32>
    %617 = vector.multi_reduction <add>, %616, %cst_166 [0] : vector<48x48xf32> to vector<48xf32>
    %618 = vector.shape_cast %617 : vector<48xf32> to vector<1x48xf32>
    %cst_167 = arith.constant dense<0.000000e+00> : vector<1xf32>
    %619 = vector.multi_reduction <add>, %618, %cst_167 [1] : vector<1x48xf32> to vector<1xf32>
    %620 = vector.shape_cast %619 : vector<1xf32> to vector<1x1xf32>
    %cst_168 = arith.constant 8.68055562E-4 : f32
    %621 = vector.broadcast %cst_168 : f32 to vector<1x1xf32>
    %622 = arith.mulf %620, %621 : vector<1x1xf32>
    %623 = vector.broadcast %622 : vector<1x1xf32> to vector<48x1xf32>
    %624 = arith.mulf %623, %59 : vector<48x1xf32>
    %625 = arith.addf %613, %624 : vector<48x1xf32>
    %cst_169 = arith.constant 9.99999974E-6 : f32
    %626 = vector.broadcast %cst_169 : f32 to vector<48x1xf32>
    %627 = arith.addf %625, %626 : vector<48x1xf32>
    %628 = math.rsqrt %627 : vector<48x1xf32>
    %629 = vector.broadcast %628 : vector<48x1xf32> to vector<48x48xf32>
    %630 = arith.mulf %588, %629 : vector<48x48xf32>
    %cst_170 = arith.constant dense<0xFF800000> : vector<48xf32>
    %631 = vector.multi_reduction <maximumf>, %630, %cst_170 [1] : vector<48x48xf32> to vector<48xf32>
    %632 = vector.shape_cast %631 : vector<48xf32> to vector<48x1xf32>
    %633 = vector.broadcast %632 : vector<48x1xf32> to vector<48x48xf32>
    %634 = arith.subf %630, %633 : vector<48x48xf32>
    %635 = math.exp %634 : vector<48x48xf32>
    %cst_171 = arith.constant dense<0.000000e+00> : vector<48xf32>
    %636 = vector.multi_reduction <add>, %635, %cst_171 [1] : vector<48x48xf32> to vector<48xf32>
    %637 = vector.shape_cast %636 : vector<48xf32> to vector<48x1xf32>
    %638 = tpu.reciprocal %637 : vector<48x1xf32> -> vector<48x1xf32>
    %639 = vector.broadcast %638 : vector<48x1xf32> to vector<48x48xf32>
    %640 = arith.mulf %635, %639 : vector<48x48xf32>
    %641 = arith.extui %0 : i1 to i32
    %c0_i32_172 = arith.constant 0 : i32
    %642 = arith.cmpi ne, %641, %c0_i32_172 : i32
    scf.if %642 {
      %c192 = arith.constant 192 : index
      %c0_299 = arith.constant 0 : index
      %1066 = vector.load %arg9[%c192, %c0_299] : memref<384x48xf32, #tpu.memory_space<vmem>>, vector<48x48xf32>
      tpu.vector_store %arg9[%c192, %c0_299], %640 {strides = array<i32>} : memref<384x48xf32, #tpu.memory_space<vmem>>, vector<48x48xf32>,
    } else {
    }
    %643 = vector.extract_strided_slice %158 {offsets = [48, 16], sizes = [48, 16], strides = [1, 1]} : vector<192x32xf32> to vector<48x16xf32>
    %644 = vector.extract_strided_slice %161 {offsets = [16, 48], sizes = [16, 48], strides = [1, 1]} : vector<32x384xf32> to vector<16x48xf32>
    %cst_173 = arith.constant dense<0.000000e+00> : vector<48x48xf32>
    %645 = tpu.matmul %643, %644, %cst_173 {dimension_numbers = #tpu.dot_dimension_numbers<[1], [0], [0], [1], [0, 0, 1, 1], [], []>} : vector<48x16xf32>, vector<16x48xf32>, vector<48x48xf32> -> vector<48x48xf32>
    %cst_174 = arith.constant 0.144337565 : f32
    %646 = vector.broadcast %cst_174 : f32 to vector<48x48xf32>
    %647 = arith.mulf %645, %646 : vector<48x48xf32>
    %cst_175 = arith.constant 0.000000e+00 : f32
    %648 = vector.broadcast %cst_175 : f32 to vector<48x1xf32>
    %649 = vector.broadcast %45 : vector<48x1xf32> to vector<48x48xf32>
    %650 = arith.mulf %647, %649 : vector<48x48xf32>
    %cst_176 = arith.constant dense<0.000000e+00> : vector<48xf32>
    %651 = vector.multi_reduction <add>, %650, %cst_176 [0] : vector<48x48xf32> to vector<48xf32>
    %652 = vector.shape_cast %651 : vector<48xf32> to vector<1x48xf32>
    %cst_177 = arith.constant dense<0.000000e+00> : vector<1xf32>
    %653 = vector.multi_reduction <add>, %652, %cst_177 [1] : vector<1x48xf32> to vector<1xf32>
    %654 = vector.shape_cast %653 : vector<1xf32> to vector<1x1xf32>
    %cst_178 = arith.constant 0.00260416674 : f32
    %655 = vector.broadcast %cst_178 : f32 to vector<1x1xf32>
    %656 = arith.mulf %654, %655 : vector<1x1xf32>
    %657 = vector.broadcast %656 : vector<1x1xf32> to vector<48x1xf32>
    %658 = arith.mulf %657, %45 : vector<48x1xf32>
    %659 = arith.addf %648, %658 : vector<48x1xf32>
    %660 = vector.broadcast %52 : vector<48x1xf32> to vector<48x48xf32>
    %661 = arith.mulf %647, %660 : vector<48x48xf32>
    %cst_179 = arith.constant dense<0.000000e+00> : vector<48xf32>
    %662 = vector.multi_reduction <add>, %661, %cst_179 [0] : vector<48x48xf32> to vector<48xf32>
    %663 = vector.shape_cast %662 : vector<48xf32> to vector<1x48xf32>
    %cst_180 = arith.constant dense<0.000000e+00> : vector<1xf32>
    %664 = vector.multi_reduction <add>, %663, %cst_180 [1] : vector<1x48xf32> to vector<1xf32>
    %665 = vector.shape_cast %664 : vector<1xf32> to vector<1x1xf32>
    %cst_181 = arith.constant 0.00130208337 : f32
    %666 = vector.broadcast %cst_181 : f32 to vector<1x1xf32>
    %667 = arith.mulf %665, %666 : vector<1x1xf32>
    %668 = vector.broadcast %667 : vector<1x1xf32> to vector<48x1xf32>
    %669 = arith.mulf %668, %52 : vector<48x1xf32>
    %670 = arith.addf %659, %669 : vector<48x1xf32>
    %671 = vector.broadcast %59 : vector<48x1xf32> to vector<48x48xf32>
    %672 = arith.mulf %647, %671 : vector<48x48xf32>
    %cst_182 = arith.constant dense<0.000000e+00> : vector<48xf32>
    %673 = vector.multi_reduction <add>, %672, %cst_182 [0] : vector<48x48xf32> to vector<48xf32>
    %674 = vector.shape_cast %673 : vector<48xf32> to vector<1x48xf32>
    %cst_183 = arith.constant dense<0.000000e+00> : vector<1xf32>
    %675 = vector.multi_reduction <add>, %674, %cst_183 [1] : vector<1x48xf32> to vector<1xf32>
    %676 = vector.shape_cast %675 : vector<1xf32> to vector<1x1xf32>
    %cst_184 = arith.constant 8.68055562E-4 : f32
    %677 = vector.broadcast %cst_184 : f32 to vector<1x1xf32>
    %678 = arith.mulf %676, %677 : vector<1x1xf32>
    %679 = vector.broadcast %678 : vector<1x1xf32> to vector<48x1xf32>
    %680 = arith.mulf %679, %59 : vector<48x1xf32>
    %681 = arith.addf %670, %680 : vector<48x1xf32>
    %682 = vector.broadcast %681 : vector<48x1xf32> to vector<48x48xf32>
    %683 = arith.subf %647, %682 : vector<48x48xf32>
    %cst_185 = arith.constant 0.000000e+00 : f32
    %684 = vector.broadcast %cst_185 : f32 to vector<48x1xf32>
    %685 = arith.mulf %683, %683 : vector<48x48xf32>
    %686 = vector.broadcast %45 : vector<48x1xf32> to vector<48x48xf32>
    %687 = arith.mulf %685, %686 : vector<48x48xf32>
    %cst_186 = arith.constant dense<0.000000e+00> : vector<48xf32>
    %688 = vector.multi_reduction <add>, %687, %cst_186 [0] : vector<48x48xf32> to vector<48xf32>
    %689 = vector.shape_cast %688 : vector<48xf32> to vector<1x48xf32>
    %cst_187 = arith.constant dense<0.000000e+00> : vector<1xf32>
    %690 = vector.multi_reduction <add>, %689, %cst_187 [1] : vector<1x48xf32> to vector<1xf32>
    %691 = vector.shape_cast %690 : vector<1xf32> to vector<1x1xf32>
    %cst_188 = arith.constant 0.00260416674 : f32
    %692 = vector.broadcast %cst_188 : f32 to vector<1x1xf32>
    %693 = arith.mulf %691, %692 : vector<1x1xf32>
    %694 = vector.broadcast %693 : vector<1x1xf32> to vector<48x1xf32>
    %695 = arith.mulf %694, %45 : vector<48x1xf32>
    %696 = arith.addf %684, %695 : vector<48x1xf32>
    %697 = arith.mulf %683, %683 : vector<48x48xf32>
    %698 = vector.broadcast %52 : vector<48x1xf32> to vector<48x48xf32>
    %699 = arith.mulf %697, %698 : vector<48x48xf32>
    %cst_189 = arith.constant dense<0.000000e+00> : vector<48xf32>
    %700 = vector.multi_reduction <add>, %699, %cst_189 [0] : vector<48x48xf32> to vector<48xf32>
    %701 = vector.shape_cast %700 : vector<48xf32> to vector<1x48xf32>
    %cst_190 = arith.constant dense<0.000000e+00> : vector<1xf32>
    %702 = vector.multi_reduction <add>, %701, %cst_190 [1] : vector<1x48xf32> to vector<1xf32>
    %703 = vector.shape_cast %702 : vector<1xf32> to vector<1x1xf32>
    %cst_191 = arith.constant 0.00130208337 : f32
    %704 = vector.broadcast %cst_191 : f32 to vector<1x1xf32>
    %705 = arith.mulf %703, %704 : vector<1x1xf32>
    %706 = vector.broadcast %705 : vector<1x1xf32> to vector<48x1xf32>
    %707 = arith.mulf %706, %52 : vector<48x1xf32>
    %708 = arith.addf %696, %707 : vector<48x1xf32>
    %709 = arith.mulf %683, %683 : vector<48x48xf32>
    %710 = vector.broadcast %59 : vector<48x1xf32> to vector<48x48xf32>
    %711 = arith.mulf %709, %710 : vector<48x48xf32>
    %cst_192 = arith.constant dense<0.000000e+00> : vector<48xf32>
    %712 = vector.multi_reduction <add>, %711, %cst_192 [0] : vector<48x48xf32> to vector<48xf32>
    %713 = vector.shape_cast %712 : vector<48xf32> to vector<1x48xf32>
    %cst_193 = arith.constant dense<0.000000e+00> : vector<1xf32>
    %714 = vector.multi_reduction <add>, %713, %cst_193 [1] : vector<1x48xf32> to vector<1xf32>
    %715 = vector.shape_cast %714 : vector<1xf32> to vector<1x1xf32>
    %cst_194 = arith.constant 8.68055562E-4 : f32
    %716 = vector.broadcast %cst_194 : f32 to vector<1x1xf32>
    %717 = arith.mulf %715, %716 : vector<1x1xf32>
    %718 = vector.broadcast %717 : vector<1x1xf32> to vector<48x1xf32>
    %719 = arith.mulf %718, %59 : vector<48x1xf32>
    %720 = arith.addf %708, %719 : vector<48x1xf32>
    %cst_195 = arith.constant 9.99999974E-6 : f32
    %721 = vector.broadcast %cst_195 : f32 to vector<48x1xf32>
    %722 = arith.addf %720, %721 : vector<48x1xf32>
    %723 = math.rsqrt %722 : vector<48x1xf32>
    %724 = vector.broadcast %723 : vector<48x1xf32> to vector<48x48xf32>
    %725 = arith.mulf %683, %724 : vector<48x48xf32>
    %cst_196 = arith.constant dense<0xFF800000> : vector<48xf32>
    %726 = vector.multi_reduction <maximumf>, %725, %cst_196 [1] : vector<48x48xf32> to vector<48xf32>
    %727 = vector.shape_cast %726 : vector<48xf32> to vector<48x1xf32>
    %728 = vector.broadcast %727 : vector<48x1xf32> to vector<48x48xf32>
    %729 = arith.subf %725, %728 : vector<48x48xf32>
    %730 = math.exp %729 : vector<48x48xf32>
    %cst_197 = arith.constant dense<0.000000e+00> : vector<48xf32>
    %731 = vector.multi_reduction <add>, %730, %cst_197 [1] : vector<48x48xf32> to vector<48xf32>
    %732 = vector.shape_cast %731 : vector<48xf32> to vector<48x1xf32>
    %733 = tpu.reciprocal %732 : vector<48x1xf32> -> vector<48x1xf32>
    %734 = vector.broadcast %733 : vector<48x1xf32> to vector<48x48xf32>
    %735 = arith.mulf %730, %734 : vector<48x48xf32>
    %736 = arith.extui %0 : i1 to i32
    %c0_i32_198 = arith.constant 0 : i32
    %737 = arith.cmpi ne, %736, %c0_i32_198 : i32
    scf.if %737 {
      %c240 = arith.constant 240 : index
      %c0_299 = arith.constant 0 : index
      %1066 = vector.load %arg9[%c240, %c0_299] : memref<384x48xf32, #tpu.memory_space<vmem>>, vector<48x48xf32>
      tpu.vector_store %arg9[%c240, %c0_299], %735 {strides = array<i32>} : memref<384x48xf32, #tpu.memory_space<vmem>>, vector<48x48xf32>,
    } else {
    }
    %738 = vector.extract_strided_slice %158 {offsets = [96, 16], sizes = [48, 16], strides = [1, 1]} : vector<192x32xf32> to vector<48x16xf32>
    %739 = vector.extract_strided_slice %161 {offsets = [16, 96], sizes = [16, 48], strides = [1, 1]} : vector<32x384xf32> to vector<16x48xf32>
    %cst_199 = arith.constant dense<0.000000e+00> : vector<48x48xf32>
    %740 = tpu.matmul %738, %739, %cst_199 {dimension_numbers = #tpu.dot_dimension_numbers<[1], [0], [0], [1], [0, 0, 1, 1], [], []>} : vector<48x16xf32>, vector<16x48xf32>, vector<48x48xf32> -> vector<48x48xf32>
    %cst_200 = arith.constant 0.144337565 : f32
    %741 = vector.broadcast %cst_200 : f32 to vector<48x48xf32>
    %742 = arith.mulf %740, %741 : vector<48x48xf32>
    %cst_201 = arith.constant 0.000000e+00 : f32
    %743 = vector.broadcast %cst_201 : f32 to vector<48x1xf32>
    %744 = vector.broadcast %45 : vector<48x1xf32> to vector<48x48xf32>
    %745 = arith.mulf %742, %744 : vector<48x48xf32>
    %cst_202 = arith.constant dense<0.000000e+00> : vector<48xf32>
    %746 = vector.multi_reduction <add>, %745, %cst_202 [0] : vector<48x48xf32> to vector<48xf32>
    %747 = vector.shape_cast %746 : vector<48xf32> to vector<1x48xf32>
    %cst_203 = arith.constant dense<0.000000e+00> : vector<1xf32>
    %748 = vector.multi_reduction <add>, %747, %cst_203 [1] : vector<1x48xf32> to vector<1xf32>
    %749 = vector.shape_cast %748 : vector<1xf32> to vector<1x1xf32>
    %cst_204 = arith.constant 0.00260416674 : f32
    %750 = vector.broadcast %cst_204 : f32 to vector<1x1xf32>
    %751 = arith.mulf %749, %750 : vector<1x1xf32>
    %752 = vector.broadcast %751 : vector<1x1xf32> to vector<48x1xf32>
    %753 = arith.mulf %752, %45 : vector<48x1xf32>
    %754 = arith.addf %743, %753 : vector<48x1xf32>
    %755 = vector.broadcast %52 : vector<48x1xf32> to vector<48x48xf32>
    %756 = arith.mulf %742, %755 : vector<48x48xf32>
    %cst_205 = arith.constant dense<0.000000e+00> : vector<48xf32>
    %757 = vector.multi_reduction <add>, %756, %cst_205 [0] : vector<48x48xf32> to vector<48xf32>
    %758 = vector.shape_cast %757 : vector<48xf32> to vector<1x48xf32>
    %cst_206 = arith.constant dense<0.000000e+00> : vector<1xf32>
    %759 = vector.multi_reduction <add>, %758, %cst_206 [1] : vector<1x48xf32> to vector<1xf32>
    %760 = vector.shape_cast %759 : vector<1xf32> to vector<1x1xf32>
    %cst_207 = arith.constant 0.00130208337 : f32
    %761 = vector.broadcast %cst_207 : f32 to vector<1x1xf32>
    %762 = arith.mulf %760, %761 : vector<1x1xf32>
    %763 = vector.broadcast %762 : vector<1x1xf32> to vector<48x1xf32>
    %764 = arith.mulf %763, %52 : vector<48x1xf32>
    %765 = arith.addf %754, %764 : vector<48x1xf32>
    %766 = vector.broadcast %59 : vector<48x1xf32> to vector<48x48xf32>
    %767 = arith.mulf %742, %766 : vector<48x48xf32>
    %cst_208 = arith.constant dense<0.000000e+00> : vector<48xf32>
    %768 = vector.multi_reduction <add>, %767, %cst_208 [0] : vector<48x48xf32> to vector<48xf32>
    %769 = vector.shape_cast %768 : vector<48xf32> to vector<1x48xf32>
    %cst_209 = arith.constant dense<0.000000e+00> : vector<1xf32>
    %770 = vector.multi_reduction <add>, %769, %cst_209 [1] : vector<1x48xf32> to vector<1xf32>
    %771 = vector.shape_cast %770 : vector<1xf32> to vector<1x1xf32>
    %cst_210 = arith.constant 8.68055562E-4 : f32
    %772 = vector.broadcast %cst_210 : f32 to vector<1x1xf32>
    %773 = arith.mulf %771, %772 : vector<1x1xf32>
    %774 = vector.broadcast %773 : vector<1x1xf32> to vector<48x1xf32>
    %775 = arith.mulf %774, %59 : vector<48x1xf32>
    %776 = arith.addf %765, %775 : vector<48x1xf32>
    %777 = vector.broadcast %776 : vector<48x1xf32> to vector<48x48xf32>
    %778 = arith.subf %742, %777 : vector<48x48xf32>
    %cst_211 = arith.constant 0.000000e+00 : f32
    %779 = vector.broadcast %cst_211 : f32 to vector<48x1xf32>
    %780 = arith.mulf %778, %778 : vector<48x48xf32>
    %781 = vector.broadcast %45 : vector<48x1xf32> to vector<48x48xf32>
    %782 = arith.mulf %780, %781 : vector<48x48xf32>
    %cst_212 = arith.constant dense<0.000000e+00> : vector<48xf32>
    %783 = vector.multi_reduction <add>, %782, %cst_212 [0] : vector<48x48xf32> to vector<48xf32>
    %784 = vector.shape_cast %783 : vector<48xf32> to vector<1x48xf32>
    %cst_213 = arith.constant dense<0.000000e+00> : vector<1xf32>
    %785 = vector.multi_reduction <add>, %784, %cst_213 [1] : vector<1x48xf32> to vector<1xf32>
    %786 = vector.shape_cast %785 : vector<1xf32> to vector<1x1xf32>
    %cst_214 = arith.constant 0.00260416674 : f32
    %787 = vector.broadcast %cst_214 : f32 to vector<1x1xf32>
    %788 = arith.mulf %786, %787 : vector<1x1xf32>
    %789 = vector.broadcast %788 : vector<1x1xf32> to vector<48x1xf32>
    %790 = arith.mulf %789, %45 : vector<48x1xf32>
    %791 = arith.addf %779, %790 : vector<48x1xf32>
    %792 = arith.mulf %778, %778 : vector<48x48xf32>
    %793 = vector.broadcast %52 : vector<48x1xf32> to vector<48x48xf32>
    %794 = arith.mulf %792, %793 : vector<48x48xf32>
    %cst_215 = arith.constant dense<0.000000e+00> : vector<48xf32>
    %795 = vector.multi_reduction <add>, %794, %cst_215 [0] : vector<48x48xf32> to vector<48xf32>
    %796 = vector.shape_cast %795 : vector<48xf32> to vector<1x48xf32>
    %cst_216 = arith.constant dense<0.000000e+00> : vector<1xf32>
    %797 = vector.multi_reduction <add>, %796, %cst_216 [1] : vector<1x48xf32> to vector<1xf32>
    %798 = vector.shape_cast %797 : vector<1xf32> to vector<1x1xf32>
    %cst_217 = arith.constant 0.00130208337 : f32
    %799 = vector.broadcast %cst_217 : f32 to vector<1x1xf32>
    %800 = arith.mulf %798, %799 : vector<1x1xf32>
    %801 = vector.broadcast %800 : vector<1x1xf32> to vector<48x1xf32>
    %802 = arith.mulf %801, %52 : vector<48x1xf32>
    %803 = arith.addf %791, %802 : vector<48x1xf32>
    %804 = arith.mulf %778, %778 : vector<48x48xf32>
    %805 = vector.broadcast %59 : vector<48x1xf32> to vector<48x48xf32>
    %806 = arith.mulf %804, %805 : vector<48x48xf32>
    %cst_218 = arith.constant dense<0.000000e+00> : vector<48xf32>
    %807 = vector.multi_reduction <add>, %806, %cst_218 [0] : vector<48x48xf32> to vector<48xf32>
    %808 = vector.shape_cast %807 : vector<48xf32> to vector<1x48xf32>
    %cst_219 = arith.constant dense<0.000000e+00> : vector<1xf32>
    %809 = vector.multi_reduction <add>, %808, %cst_219 [1] : vector<1x48xf32> to vector<1xf32>
    %810 = vector.shape_cast %809 : vector<1xf32> to vector<1x1xf32>
    %cst_220 = arith.constant 8.68055562E-4 : f32
    %811 = vector.broadcast %cst_220 : f32 to vector<1x1xf32>
    %812 = arith.mulf %810, %811 : vector<1x1xf32>
    %813 = vector.broadcast %812 : vector<1x1xf32> to vector<48x1xf32>
    %814 = arith.mulf %813, %59 : vector<48x1xf32>
    %815 = arith.addf %803, %814 : vector<48x1xf32>
    %cst_221 = arith.constant 9.99999974E-6 : f32
    %816 = vector.broadcast %cst_221 : f32 to vector<48x1xf32>
    %817 = arith.addf %815, %816 : vector<48x1xf32>
    %818 = math.rsqrt %817 : vector<48x1xf32>
    %819 = vector.broadcast %818 : vector<48x1xf32> to vector<48x48xf32>
    %820 = arith.mulf %778, %819 : vector<48x48xf32>
    %cst_222 = arith.constant dense<0xFF800000> : vector<48xf32>
    %821 = vector.multi_reduction <maximumf>, %820, %cst_222 [1] : vector<48x48xf32> to vector<48xf32>
    %822 = vector.shape_cast %821 : vector<48xf32> to vector<48x1xf32>
    %823 = vector.broadcast %822 : vector<48x1xf32> to vector<48x48xf32>
    %824 = arith.subf %820, %823 : vector<48x48xf32>
    %825 = math.exp %824 : vector<48x48xf32>
    %cst_223 = arith.constant dense<0.000000e+00> : vector<48xf32>
    %826 = vector.multi_reduction <add>, %825, %cst_223 [1] : vector<48x48xf32> to vector<48xf32>
    %827 = vector.shape_cast %826 : vector<48xf32> to vector<48x1xf32>
    %828 = tpu.reciprocal %827 : vector<48x1xf32> -> vector<48x1xf32>
    %829 = vector.broadcast %828 : vector<48x1xf32> to vector<48x48xf32>
    %830 = arith.mulf %825, %829 : vector<48x48xf32>
    %831 = arith.extui %0 : i1 to i32
    %c0_i32_224 = arith.constant 0 : i32
    %832 = arith.cmpi ne, %831, %c0_i32_224 : i32
    scf.if %832 {
      %c288 = arith.constant 288 : index
      %c0_299 = arith.constant 0 : index
      %1066 = vector.load %arg9[%c288, %c0_299] : memref<384x48xf32, #tpu.memory_space<vmem>>, vector<48x48xf32>
      tpu.vector_store %arg9[%c288, %c0_299], %830 {strides = array<i32>} : memref<384x48xf32, #tpu.memory_space<vmem>>, vector<48x48xf32>,
    } else {
    }
    %833 = vector.extract_strided_slice %158 {offsets = [144, 16], sizes = [48, 16], strides = [1, 1]} : vector<192x32xf32> to vector<48x16xf32>
    %834 = vector.extract_strided_slice %161 {offsets = [16, 144], sizes = [16, 48], strides = [1, 1]} : vector<32x384xf32> to vector<16x48xf32>
    %cst_225 = arith.constant dense<0.000000e+00> : vector<48x48xf32>
    %835 = tpu.matmul %833, %834, %cst_225 {dimension_numbers = #tpu.dot_dimension_numbers<[1], [0], [0], [1], [0, 0, 1, 1], [], []>} : vector<48x16xf32>, vector<16x48xf32>, vector<48x48xf32> -> vector<48x48xf32>
    %cst_226 = arith.constant 0.144337565 : f32
    %836 = vector.broadcast %cst_226 : f32 to vector<48x48xf32>
    %837 = arith.mulf %835, %836 : vector<48x48xf32>
    %cst_227 = arith.constant 0.000000e+00 : f32
    %838 = vector.broadcast %cst_227 : f32 to vector<48x1xf32>
    %839 = vector.broadcast %45 : vector<48x1xf32> to vector<48x48xf32>
    %840 = arith.mulf %837, %839 : vector<48x48xf32>
    %cst_228 = arith.constant dense<0.000000e+00> : vector<48xf32>
    %841 = vector.multi_reduction <add>, %840, %cst_228 [0] : vector<48x48xf32> to vector<48xf32>
    %842 = vector.shape_cast %841 : vector<48xf32> to vector<1x48xf32>
    %cst_229 = arith.constant dense<0.000000e+00> : vector<1xf32>
    %843 = vector.multi_reduction <add>, %842, %cst_229 [1] : vector<1x48xf32> to vector<1xf32>
    %844 = vector.shape_cast %843 : vector<1xf32> to vector<1x1xf32>
    %cst_230 = arith.constant 0.00260416674 : f32
    %845 = vector.broadcast %cst_230 : f32 to vector<1x1xf32>
    %846 = arith.mulf %844, %845 : vector<1x1xf32>
    %847 = vector.broadcast %846 : vector<1x1xf32> to vector<48x1xf32>
    %848 = arith.mulf %847, %45 : vector<48x1xf32>
    %849 = arith.addf %838, %848 : vector<48x1xf32>
    %850 = vector.broadcast %52 : vector<48x1xf32> to vector<48x48xf32>
    %851 = arith.mulf %837, %850 : vector<48x48xf32>
    %cst_231 = arith.constant dense<0.000000e+00> : vector<48xf32>
    %852 = vector.multi_reduction <add>, %851, %cst_231 [0] : vector<48x48xf32> to vector<48xf32>
    %853 = vector.shape_cast %852 : vector<48xf32> to vector<1x48xf32>
    %cst_232 = arith.constant dense<0.000000e+00> : vector<1xf32>
    %854 = vector.multi_reduction <add>, %853, %cst_232 [1] : vector<1x48xf32> to vector<1xf32>
    %855 = vector.shape_cast %854 : vector<1xf32> to vector<1x1xf32>
    %cst_233 = arith.constant 0.00130208337 : f32
    %856 = vector.broadcast %cst_233 : f32 to vector<1x1xf32>
    %857 = arith.mulf %855, %856 : vector<1x1xf32>
    %858 = vector.broadcast %857 : vector<1x1xf32> to vector<48x1xf32>
    %859 = arith.mulf %858, %52 : vector<48x1xf32>
    %860 = arith.addf %849, %859 : vector<48x1xf32>
    %861 = vector.broadcast %59 : vector<48x1xf32> to vector<48x48xf32>
    %862 = arith.mulf %837, %861 : vector<48x48xf32>
    %cst_234 = arith.constant dense<0.000000e+00> : vector<48xf32>
    %863 = vector.multi_reduction <add>, %862, %cst_234 [0] : vector<48x48xf32> to vector<48xf32>
    %864 = vector.shape_cast %863 : vector<48xf32> to vector<1x48xf32>
    %cst_235 = arith.constant dense<0.000000e+00> : vector<1xf32>
    %865 = vector.multi_reduction <add>, %864, %cst_235 [1] : vector<1x48xf32> to vector<1xf32>
    %866 = vector.shape_cast %865 : vector<1xf32> to vector<1x1xf32>
    %cst_236 = arith.constant 8.68055562E-4 : f32
    %867 = vector.broadcast %cst_236 : f32 to vector<1x1xf32>
    %868 = arith.mulf %866, %867 : vector<1x1xf32>
    %869 = vector.broadcast %868 : vector<1x1xf32> to vector<48x1xf32>
    %870 = arith.mulf %869, %59 : vector<48x1xf32>
    %871 = arith.addf %860, %870 : vector<48x1xf32>
    %872 = vector.broadcast %871 : vector<48x1xf32> to vector<48x48xf32>
    %873 = arith.subf %837, %872 : vector<48x48xf32>
    %cst_237 = arith.constant 0.000000e+00 : f32
    %874 = vector.broadcast %cst_237 : f32 to vector<48x1xf32>
    %875 = arith.mulf %873, %873 : vector<48x48xf32>
    %876 = vector.broadcast %45 : vector<48x1xf32> to vector<48x48xf32>
    %877 = arith.mulf %875, %876 : vector<48x48xf32>
    %cst_238 = arith.constant dense<0.000000e+00> : vector<48xf32>
    %878 = vector.multi_reduction <add>, %877, %cst_238 [0] : vector<48x48xf32> to vector<48xf32>
    %879 = vector.shape_cast %878 : vector<48xf32> to vector<1x48xf32>
    %cst_239 = arith.constant dense<0.000000e+00> : vector<1xf32>
    %880 = vector.multi_reduction <add>, %879, %cst_239 [1] : vector<1x48xf32> to vector<1xf32>
    %881 = vector.shape_cast %880 : vector<1xf32> to vector<1x1xf32>
    %cst_240 = arith.constant 0.00260416674 : f32
    %882 = vector.broadcast %cst_240 : f32 to vector<1x1xf32>
    %883 = arith.mulf %881, %882 : vector<1x1xf32>
    %884 = vector.broadcast %883 : vector<1x1xf32> to vector<48x1xf32>
    %885 = arith.mulf %884, %45 : vector<48x1xf32>
    %886 = arith.addf %874, %885 : vector<48x1xf32>
    %887 = arith.mulf %873, %873 : vector<48x48xf32>
    %888 = vector.broadcast %52 : vector<48x1xf32> to vector<48x48xf32>
    %889 = arith.mulf %887, %888 : vector<48x48xf32>
    %cst_241 = arith.constant dense<0.000000e+00> : vector<48xf32>
    %890 = vector.multi_reduction <add>, %889, %cst_241 [0] : vector<48x48xf32> to vector<48xf32>
    %891 = vector.shape_cast %890 : vector<48xf32> to vector<1x48xf32>
    %cst_242 = arith.constant dense<0.000000e+00> : vector<1xf32>
    %892 = vector.multi_reduction <add>, %891, %cst_242 [1] : vector<1x48xf32> to vector<1xf32>
    %893 = vector.shape_cast %892 : vector<1xf32> to vector<1x1xf32>
    %cst_243 = arith.constant 0.00130208337 : f32
    %894 = vector.broadcast %cst_243 : f32 to vector<1x1xf32>
    %895 = arith.mulf %893, %894 : vector<1x1xf32>
    %896 = vector.broadcast %895 : vector<1x1xf32> to vector<48x1xf32>
    %897 = arith.mulf %896, %52 : vector<48x1xf32>
    %898 = arith.addf %886, %897 : vector<48x1xf32>
    %899 = arith.mulf %873, %873 : vector<48x48xf32>
    %900 = vector.broadcast %59 : vector<48x1xf32> to vector<48x48xf32>
    %901 = arith.mulf %899, %900 : vector<48x48xf32>
    %cst_244 = arith.constant dense<0.000000e+00> : vector<48xf32>
    %902 = vector.multi_reduction <add>, %901, %cst_244 [0] : vector<48x48xf32> to vector<48xf32>
    %903 = vector.shape_cast %902 : vector<48xf32> to vector<1x48xf32>
    %cst_245 = arith.constant dense<0.000000e+00> : vector<1xf32>
    %904 = vector.multi_reduction <add>, %903, %cst_245 [1] : vector<1x48xf32> to vector<1xf32>
    %905 = vector.shape_cast %904 : vector<1xf32> to vector<1x1xf32>
    %cst_246 = arith.constant 8.68055562E-4 : f32
    %906 = vector.broadcast %cst_246 : f32 to vector<1x1xf32>
    %907 = arith.mulf %905, %906 : vector<1x1xf32>
    %908 = vector.broadcast %907 : vector<1x1xf32> to vector<48x1xf32>
    %909 = arith.mulf %908, %59 : vector<48x1xf32>
    %910 = arith.addf %898, %909 : vector<48x1xf32>
    %cst_247 = arith.constant 9.99999974E-6 : f32
    %911 = vector.broadcast %cst_247 : f32 to vector<48x1xf32>
    %912 = arith.addf %910, %911 : vector<48x1xf32>
    %913 = math.rsqrt %912 : vector<48x1xf32>
    %914 = vector.broadcast %913 : vector<48x1xf32> to vector<48x48xf32>
    %915 = arith.mulf %873, %914 : vector<48x48xf32>
    %cst_248 = arith.constant dense<0xFF800000> : vector<48xf32>
    %916 = vector.multi_reduction <maximumf>, %915, %cst_248 [1] : vector<48x48xf32> to vector<48xf32>
    %917 = vector.shape_cast %916 : vector<48xf32> to vector<48x1xf32>
    %918 = vector.broadcast %917 : vector<48x1xf32> to vector<48x48xf32>
    %919 = arith.subf %915, %918 : vector<48x48xf32>
    %920 = math.exp %919 : vector<48x48xf32>
    %cst_249 = arith.constant dense<0.000000e+00> : vector<48xf32>
    %921 = vector.multi_reduction <add>, %920, %cst_249 [1] : vector<48x48xf32> to vector<48xf32>
    %922 = vector.shape_cast %921 : vector<48xf32> to vector<48x1xf32>
    %923 = tpu.reciprocal %922 : vector<48x1xf32> -> vector<48x1xf32>
    %924 = vector.broadcast %923 : vector<48x1xf32> to vector<48x48xf32>
    %925 = arith.mulf %920, %924 : vector<48x48xf32>
    %926 = arith.extui %0 : i1 to i32
    %c0_i32_250 = arith.constant 0 : i32
    %927 = arith.cmpi ne, %926, %c0_i32_250 : i32
    scf.if %927 {
      %c336 = arith.constant 336 : index
      %c0_299 = arith.constant 0 : index
      %1066 = vector.load %arg9[%c336, %c0_299] : memref<384x48xf32, #tpu.memory_space<vmem>>, vector<48x48xf32>
      tpu.vector_store %arg9[%c336, %c0_299], %925 {strides = array<i32>} : memref<384x48xf32, #tpu.memory_space<vmem>>, vector<48x48xf32>,
    } else {
    }
    %928 = tpu.concatenate %640, %735, %830, %925 in 1 : vector<48x48xf32>, vector<48x48xf32>, vector<48x48xf32>, vector<48x48xf32> -> vector<48x192xf32>
    %cst_251 = arith.constant dense<0.000000e+00> : vector<16x48xf32>
    %929 = tpu.matmul %547, %928, %cst_251 {dimension_numbers = #tpu.dot_dimension_numbers<[1], [1], [0], [0], [0, 0, 1, 0], [], []>} : vector<16x192xf32>, vector<48x192xf32>, vector<16x48xf32> -> vector<16x48xf32>
    %cst_252 = arith.constant 2.500000e-01 : f32
    %930 = vector.broadcast %cst_252 : f32 to vector<16x48xf32>
    %931 = arith.mulf %929, %930 : vector<16x48xf32>
    %932 = tpu.concatenate %546, %931 in 0 : vector<16x48xf32>, vector<16x48xf32> -> vector<32x48xf32>
    %c0_253 = arith.constant 0 : index
    %c0_254 = arith.constant 0 : index
    %c0_255 = arith.constant 0 : index
    %933 = vector.load %arg5[%c0_253, %c0_254, %c0_255] : memref<1x48x48xf32, #tpu.memory_space<vmem>>, vector<1x48x48xf32>
    %934 = vector.shape_cast %933 : vector<1x48x48xf32> to vector<48x48xf32>
    %cst_256 = arith.constant dense<0.000000e+00> : vector<32x48xf32>
    %935 = tpu.matmul %932, %934, %cst_256 {dimension_numbers = #tpu.dot_dimension_numbers<[1], [0], [0], [1], [0, 0, 1, 1], [], []>} : vector<32x48xf32>, vector<48x48xf32>, vector<32x48xf32> -> vector<32x48xf32>
    %936 = arith.addf %5, %935 : vector<32x48xf32>
    %cst_257 = arith.constant 0.000000e+00 : f32
    %937 = vector.broadcast %cst_257 : f32 to vector<32x48xf32>
    %938 = vector.broadcast %24 : vector<1x48xf32> to vector<32x48xf32>
    %939 = arith.mulf %936, %938 : vector<32x48xf32>
    %cst_258 = arith.constant dense<0.000000e+00> : vector<32xf32>
    %940 = vector.multi_reduction <add>, %939, %cst_258 [1] : vector<32x48xf32> to vector<32xf32>
    %941 = vector.shape_cast %940 : vector<32xf32> to vector<32x1xf32>
    %cst_259 = arith.constant 1.250000e-01 : f32
    %942 = vector.broadcast %cst_259 : f32 to vector<32x1xf32>
    %943 = arith.mulf %941, %942 : vector<32x1xf32>
    %944 = vector.broadcast %943 : vector<32x1xf32> to vector<32x48xf32>
    %945 = vector.broadcast %24 : vector<1x48xf32> to vector<32x48xf32>
    %946 = arith.mulf %944, %945 : vector<32x48xf32>
    %947 = arith.addf %937, %946 : vector<32x48xf32>
    %948 = vector.broadcast %31 : vector<1x48xf32> to vector<32x48xf32>
    %949 = arith.mulf %936, %948 : vector<32x48xf32>
    %cst_260 = arith.constant dense<0.000000e+00> : vector<32xf32>
    %950 = vector.multi_reduction <add>, %949, %cst_260 [1] : vector<32x48xf32> to vector<32xf32>
    %951 = vector.shape_cast %950 : vector<32xf32> to vector<32x1xf32>
    %cst_261 = arith.constant 6.250000e-02 : f32
    %952 = vector.broadcast %cst_261 : f32 to vector<32x1xf32>
    %953 = arith.mulf %951, %952 : vector<32x1xf32>
    %954 = vector.broadcast %953 : vector<32x1xf32> to vector<32x48xf32>
    %955 = vector.broadcast %31 : vector<1x48xf32> to vector<32x48xf32>
    %956 = arith.mulf %954, %955 : vector<32x48xf32>
    %957 = arith.addf %947, %956 : vector<32x48xf32>
    %958 = vector.broadcast %38 : vector<1x48xf32> to vector<32x48xf32>
    %959 = arith.mulf %936, %958 : vector<32x48xf32>
    %cst_262 = arith.constant dense<0.000000e+00> : vector<32xf32>
    %960 = vector.multi_reduction <add>, %959, %cst_262 [1] : vector<32x48xf32> to vector<32xf32>
    %961 = vector.shape_cast %960 : vector<32xf32> to vector<32x1xf32>
    %cst_263 = arith.constant 0.0416666679 : f32
    %962 = vector.broadcast %cst_263 : f32 to vector<32x1xf32>
    %963 = arith.mulf %961, %962 : vector<32x1xf32>
    %964 = vector.broadcast %963 : vector<32x1xf32> to vector<32x48xf32>
    %965 = vector.broadcast %38 : vector<1x48xf32> to vector<32x48xf32>
    %966 = arith.mulf %964, %965 : vector<32x48xf32>
    %967 = arith.addf %957, %966 : vector<32x48xf32>
    %968 = arith.subf %936, %967 : vector<32x48xf32>
    %cst_264 = arith.constant 0.000000e+00 : f32
    %969 = vector.broadcast %cst_264 : f32 to vector<32x48xf32>
    %970 = arith.mulf %968, %968 : vector<32x48xf32>
    %971 = vector.broadcast %24 : vector<1x48xf32> to vector<32x48xf32>
    %972 = arith.mulf %970, %971 : vector<32x48xf32>
    %cst_265 = arith.constant dense<0.000000e+00> : vector<32xf32>
    %973 = vector.multi_reduction <add>, %972, %cst_265 [1] : vector<32x48xf32> to vector<32xf32>
    %974 = vector.shape_cast %973 : vector<32xf32> to vector<32x1xf32>
    %cst_266 = arith.constant 1.250000e-01 : f32
    %975 = vector.broadcast %cst_266 : f32 to vector<32x1xf32>
    %976 = arith.mulf %974, %975 : vector<32x1xf32>
    %977 = vector.broadcast %976 : vector<32x1xf32> to vector<32x48xf32>
    %978 = vector.broadcast %24 : vector<1x48xf32> to vector<32x48xf32>
    %979 = arith.mulf %977, %978 : vector<32x48xf32>
    %980 = arith.addf %969, %979 : vector<32x48xf32>
    %981 = arith.mulf %968, %968 : vector<32x48xf32>
    %982 = vector.broadcast %31 : vector<1x48xf32> to vector<32x48xf32>
    %983 = arith.mulf %981, %982 : vector<32x48xf32>
    %cst_267 = arith.constant dense<0.000000e+00> : vector<32xf32>
    %984 = vector.multi_reduction <add>, %983, %cst_267 [1] : vector<32x48xf32> to vector<32xf32>
    %985 = vector.shape_cast %984 : vector<32xf32> to vector<32x1xf32>
    %cst_268 = arith.constant 6.250000e-02 : f32
    %986 = vector.broadcast %cst_268 : f32 to vector<32x1xf32>
    %987 = arith.mulf %985, %986 : vector<32x1xf32>
    %988 = vector.broadcast %987 : vector<32x1xf32> to vector<32x48xf32>
    %989 = vector.broadcast %31 : vector<1x48xf32> to vector<32x48xf32>
    %990 = arith.mulf %988, %989 : vector<32x48xf32>
    %991 = arith.addf %980, %990 : vector<32x48xf32>
    %992 = arith.mulf %968, %968 : vector<32x48xf32>
    %993 = vector.broadcast %38 : vector<1x48xf32> to vector<32x48xf32>
    %994 = arith.mulf %992, %993 : vector<32x48xf32>
    %cst_269 = arith.constant dense<0.000000e+00> : vector<32xf32>
    %995 = vector.multi_reduction <add>, %994, %cst_269 [1] : vector<32x48xf32> to vector<32xf32>
    %996 = vector.shape_cast %995 : vector<32xf32> to vector<32x1xf32>
    %cst_270 = arith.constant 0.0416666679 : f32
    %997 = vector.broadcast %cst_270 : f32 to vector<32x1xf32>
    %998 = arith.mulf %996, %997 : vector<32x1xf32>
    %999 = vector.broadcast %998 : vector<32x1xf32> to vector<32x48xf32>
    %1000 = vector.broadcast %38 : vector<1x48xf32> to vector<32x48xf32>
    %1001 = arith.mulf %999, %1000 : vector<32x48xf32>
    %1002 = arith.addf %991, %1001 : vector<32x48xf32>
    %cst_271 = arith.constant 9.99999997E-7 : f32
    %1003 = vector.broadcast %cst_271 : f32 to vector<32x48xf32>
    %1004 = arith.addf %1002, %1003 : vector<32x48xf32>
    %1005 = math.rsqrt %1004 : vector<32x48xf32>
    %1006 = arith.mulf %968, %1005 : vector<32x48xf32>
    %1007 = vector.broadcast %12 : vector<1x48xf32> to vector<32x48xf32>
    %1008 = arith.mulf %1006, %1007 : vector<32x48xf32>
    %1009 = vector.broadcast %13 : vector<1x48xf32> to vector<32x48xf32>
    %1010 = arith.addf %1008, %1009 : vector<32x48xf32>
    %c0_272 = arith.constant 0 : index
    %c0_273 = arith.constant 0 : index
    %c0_274 = arith.constant 0 : index
    %1011 = vector.load %arg6[%c0_272, %c0_273, %c0_274] : memref<1x48x96xf32, #tpu.memory_space<vmem>>, vector<1x48x96xf32>
    %1012 = vector.shape_cast %1011 : vector<1x48x96xf32> to vector<48x96xf32>
    %cst_275 = arith.constant dense<0.000000e+00> : vector<32x96xf32>
    %1013 = tpu.matmul %1010, %1012, %cst_275 {dimension_numbers = #tpu.dot_dimension_numbers<[1], [0], [0], [1], [0, 0, 1, 1], [], []>} : vector<32x48xf32>, vector<48x96xf32>, vector<32x96xf32> -> vector<32x96xf32>
    %1014 = vector.broadcast %14 : vector<1x96xf32> to vector<32x96xf32>
    %1015 = arith.addf %1013, %1014 : vector<32x96xf32>
    %cst_276 = arith.constant 5.000000e-01 : f32
    %1016 = vector.broadcast %cst_276 : f32 to vector<32x96xf32>
    %1017 = arith.mulf %1016, %1015 : vector<32x96xf32>
    %cst_277 = arith.constant 0.707106769 : f32
    %1018 = vector.broadcast %cst_277 : f32 to vector<32x96xf32>
    %1019 = arith.mulf %1015, %1018 : vector<32x96xf32>
    %cst_278 = arith.constant 0.000000e+00 : f32
    %1020 = vector.broadcast %cst_278 : f32 to vector<32x96xf32>
    %1021 = arith.cmpf oge, %1019, %1020 : vector<32x96xf32>
    %cst_279 = arith.constant 1.000000e+00 : f32
    %cst_280 = arith.constant -1.000000e+00 : f32
    %1022 = vector.broadcast %cst_279 : f32 to vector<32x96xf32>
    %1023 = vector.broadcast %cst_280 : f32 to vector<32x96xf32>
    %1024 = arith.select %1021, %1022, %1023 : vector<32x96xi1>, vector<32x96xf32>
    %1025 = math.absf %1019 : vector<32x96xf32>
    %cst_281 = arith.constant 0.327591091 : f32
    %1026 = vector.broadcast %cst_281 : f32 to vector<32x96xf32>
    %1027 = arith.mulf %1026, %1025 : vector<32x96xf32>
    %cst_282 = arith.constant 1.000000e+00 : f32
    %1028 = vector.broadcast %cst_282 : f32 to vector<32x96xf32>
    %1029 = arith.addf %1028, %1027 : vector<32x96xf32>
    %cst_283 = arith.constant 1.000000e+00 : f32
    %1030 = vector.broadcast %cst_283 : f32 to vector<32x96xf32>
    %1031 = arith.divf %1030, %1029 : vector<32x96xf32>
    %cst_284 = arith.constant 1.06140542 : f32
    %1032 = vector.broadcast %cst_284 : f32 to vector<32x96xf32>
    %1033 = arith.mulf %1032, %1031 : vector<32x96xf32>
    %cst_285 = arith.constant -1.45315206 : f32
    %1034 = vector.broadcast %cst_285 : f32 to vector<32x96xf32>
    %1035 = arith.addf %1033, %1034 : vector<32x96xf32>
    %1036 = arith.mulf %1035, %1031 : vector<32x96xf32>
    %cst_286 = arith.constant 1.42141378 : f32
    %1037 = vector.broadcast %cst_286 : f32 to vector<32x96xf32>
    %1038 = arith.addf %1036, %1037 : vector<32x96xf32>
    %1039 = arith.mulf %1038, %1031 : vector<32x96xf32>
    %cst_287 = arith.constant -0.284496725 : f32
    %1040 = vector.broadcast %cst_287 : f32 to vector<32x96xf32>
    %1041 = arith.addf %1039, %1040 : vector<32x96xf32>
    %1042 = arith.mulf %1041, %1031 : vector<32x96xf32>
    %cst_288 = arith.constant 0.254829586 : f32
    %1043 = vector.broadcast %cst_288 : f32 to vector<32x96xf32>
    %1044 = arith.addf %1042, %1043 : vector<32x96xf32>
    %1045 = arith.mulf %1044, %1031 : vector<32x96xf32>
    %cst_289 = arith.constant 0.000000e+00 : f32
    %1046 = vector.broadcast %cst_289 : f32 to vector<32x96xf32>
    %1047 = arith.subf %1046, %1025 : vector<32x96xf32>
    %1048 = arith.mulf %1047, %1025 : vector<32x96xf32>
    %1049 = math.exp %1048 : vector<32x96xf32>
    %1050 = arith.mulf %1045, %1049 : vector<32x96xf32>
    %cst_290 = arith.constant 1.000000e+00 : f32
    %1051 = vector.broadcast %cst_290 : f32 to vector<32x96xf32>
    %1052 = arith.subf %1051, %1050 : vector<32x96xf32>
    %1053 = arith.mulf %1024, %1052 : vector<32x96xf32>
    %cst_291 = arith.constant 1.000000e+00 : f32
    %1054 = vector.broadcast %cst_291 : f32 to vector<32x96xf32>
    %1055 = arith.addf %1054, %1053 : vector<32x96xf32>
    %1056 = arith.mulf %1017, %1055 : vector<32x96xf32>
    %c0_292 = arith.constant 0 : index
    %c0_293 = arith.constant 0 : index
    %c0_294 = arith.constant 0 : index
    %1057 = vector.load %arg7[%c0_292, %c0_293, %c0_294] : memref<1x96x48xf32, #tpu.memory_space<vmem>>, vector<1x96x48xf32>
    %1058 = vector.shape_cast %1057 : vector<1x96x48xf32> to vector<96x48xf32>
    %cst_295 = arith.constant dense<0.000000e+00> : vector<32x48xf32>
    %1059 = tpu.matmul %1056, %1058, %cst_295 {dimension_numbers = #tpu.dot_dimension_numbers<[1], [0], [0], [1], [0, 0, 1, 1], [], []>} : vector<32x96xf32>, vector<96x48xf32>, vector<32x48xf32> -> vector<32x48xf32>
    %1060 = vector.broadcast %15 : vector<1x48xf32> to vector<32x48xf32>
    %1061 = arith.addf %1059, %1060 : vector<32x48xf32>
    %1062 = arith.addf %936, %1061 : vector<32x48xf32>
    %c0_296 = arith.constant 0 : index
    %c0_297 = arith.constant 0 : index
    %1063 = vector.load %arg10[%c0_296, %c0_297] : memref<32x48xf32, #tpu.memory_space<vmem>>, vector<32x48xf32>
    tpu.vector_store %arg10[%c0_296, %c0_297], %1062 {strides = array<i32>} : memref<32x48xf32, #tpu.memory_space<vmem>>, vector<32x48xf32>,
    %1064 = arith.extui %1 : i1 to i32
    %c0_i32_298 = arith.constant 0 : i32
    %1065 = arith.cmpi ne, %1064, %c0_i32_298 : i32
    scf.if %1065 {
      %1066 = vector.extract_strided_slice %7 {offsets = [8, 0], sizes = [1, 48], strides = [1, 1]} : vector<10x96xf32> to vector<1x48xf32>
      %1067 = vector.extract_strided_slice %7 {offsets = [9, 0], sizes = [1, 48], strides = [1, 1]} : vector<10x96xf32> to vector<1x48xf32>
      %cst_299 = arith.constant 0.000000e+00 : f32
      %1068 = vector.broadcast %cst_299 : f32 to vector<32x48xf32>
      %1069 = vector.broadcast %24 : vector<1x48xf32> to vector<32x48xf32>
      %1070 = arith.mulf %1062, %1069 : vector<32x48xf32>
      %cst_300 = arith.constant dense<0.000000e+00> : vector<32xf32>
      %1071 = vector.multi_reduction <add>, %1070, %cst_300 [1] : vector<32x48xf32> to vector<32xf32>
      %1072 = vector.shape_cast %1071 : vector<32xf32> to vector<32x1xf32>
      %cst_301 = arith.constant 1.250000e-01 : f32
      %1073 = vector.broadcast %cst_301 : f32 to vector<32x1xf32>
      %1074 = arith.mulf %1072, %1073 : vector<32x1xf32>
      %1075 = vector.broadcast %1074 : vector<32x1xf32> to vector<32x48xf32>
      %1076 = vector.broadcast %24 : vector<1x48xf32> to vector<32x48xf32>
      %1077 = arith.mulf %1075, %1076 : vector<32x48xf32>
      %1078 = arith.addf %1068, %1077 : vector<32x48xf32>
      %1079 = vector.broadcast %31 : vector<1x48xf32> to vector<32x48xf32>
      %1080 = arith.mulf %1062, %1079 : vector<32x48xf32>
      %cst_302 = arith.constant dense<0.000000e+00> : vector<32xf32>
      %1081 = vector.multi_reduction <add>, %1080, %cst_302 [1] : vector<32x48xf32> to vector<32xf32>
      %1082 = vector.shape_cast %1081 : vector<32xf32> to vector<32x1xf32>
      %cst_303 = arith.constant 6.250000e-02 : f32
      %1083 = vector.broadcast %cst_303 : f32 to vector<32x1xf32>
      %1084 = arith.mulf %1082, %1083 : vector<32x1xf32>
      %1085 = vector.broadcast %1084 : vector<32x1xf32> to vector<32x48xf32>
      %1086 = vector.broadcast %31 : vector<1x48xf32> to vector<32x48xf32>
      %1087 = arith.mulf %1085, %1086 : vector<32x48xf32>
      %1088 = arith.addf %1078, %1087 : vector<32x48xf32>
      %1089 = vector.broadcast %38 : vector<1x48xf32> to vector<32x48xf32>
      %1090 = arith.mulf %1062, %1089 : vector<32x48xf32>
      %cst_304 = arith.constant dense<0.000000e+00> : vector<32xf32>
      %1091 = vector.multi_reduction <add>, %1090, %cst_304 [1] : vector<32x48xf32> to vector<32xf32>
      %1092 = vector.shape_cast %1091 : vector<32xf32> to vector<32x1xf32>
      %cst_305 = arith.constant 0.0416666679 : f32
      %1093 = vector.broadcast %cst_305 : f32 to vector<32x1xf32>
      %1094 = arith.mulf %1092, %1093 : vector<32x1xf32>
      %1095 = vector.broadcast %1094 : vector<32x1xf32> to vector<32x48xf32>
      %1096 = vector.broadcast %38 : vector<1x48xf32> to vector<32x48xf32>
      %1097 = arith.mulf %1095, %1096 : vector<32x48xf32>
      %1098 = arith.addf %1088, %1097 : vector<32x48xf32>
      %1099 = arith.subf %1062, %1098 : vector<32x48xf32>
      %cst_306 = arith.constant 0.000000e+00 : f32
      %1100 = vector.broadcast %cst_306 : f32 to vector<32x48xf32>
      %1101 = arith.mulf %1099, %1099 : vector<32x48xf32>
      %1102 = vector.broadcast %24 : vector<1x48xf32> to vector<32x48xf32>
      %1103 = arith.mulf %1101, %1102 : vector<32x48xf32>
      %cst_307 = arith.constant dense<0.000000e+00> : vector<32xf32>
      %1104 = vector.multi_reduction <add>, %1103, %cst_307 [1] : vector<32x48xf32> to vector<32xf32>
      %1105 = vector.shape_cast %1104 : vector<32xf32> to vector<32x1xf32>
      %cst_308 = arith.constant 1.250000e-01 : f32
      %1106 = vector.broadcast %cst_308 : f32 to vector<32x1xf32>
      %1107 = arith.mulf %1105, %1106 : vector<32x1xf32>
      %1108 = vector.broadcast %1107 : vector<32x1xf32> to vector<32x48xf32>
      %1109 = vector.broadcast %24 : vector<1x48xf32> to vector<32x48xf32>
      %1110 = arith.mulf %1108, %1109 : vector<32x48xf32>
      %1111 = arith.addf %1100, %1110 : vector<32x48xf32>
      %1112 = arith.mulf %1099, %1099 : vector<32x48xf32>
      %1113 = vector.broadcast %31 : vector<1x48xf32> to vector<32x48xf32>
      %1114 = arith.mulf %1112, %1113 : vector<32x48xf32>
      %cst_309 = arith.constant dense<0.000000e+00> : vector<32xf32>
      %1115 = vector.multi_reduction <add>, %1114, %cst_309 [1] : vector<32x48xf32> to vector<32xf32>
      %1116 = vector.shape_cast %1115 : vector<32xf32> to vector<32x1xf32>
      %cst_310 = arith.constant 6.250000e-02 : f32
      %1117 = vector.broadcast %cst_310 : f32 to vector<32x1xf32>
      %1118 = arith.mulf %1116, %1117 : vector<32x1xf32>
      %1119 = vector.broadcast %1118 : vector<32x1xf32> to vector<32x48xf32>
      %1120 = vector.broadcast %31 : vector<1x48xf32> to vector<32x48xf32>
      %1121 = arith.mulf %1119, %1120 : vector<32x48xf32>
      %1122 = arith.addf %1111, %1121 : vector<32x48xf32>
      %1123 = arith.mulf %1099, %1099 : vector<32x48xf32>
      %1124 = vector.broadcast %38 : vector<1x48xf32> to vector<32x48xf32>
      %1125 = arith.mulf %1123, %1124 : vector<32x48xf32>
      %cst_311 = arith.constant dense<0.000000e+00> : vector<32xf32>
      %1126 = vector.multi_reduction <add>, %1125, %cst_311 [1] : vector<32x48xf32> to vector<32xf32>
      %1127 = vector.shape_cast %1126 : vector<32xf32> to vector<32x1xf32>
      %cst_312 = arith.constant 0.0416666679 : f32
      %1128 = vector.broadcast %cst_312 : f32 to vector<32x1xf32>
      %1129 = arith.mulf %1127, %1128 : vector<32x1xf32>
      %1130 = vector.broadcast %1129 : vector<32x1xf32> to vector<32x48xf32>
      %1131 = vector.broadcast %38 : vector<1x48xf32> to vector<32x48xf32>
      %1132 = arith.mulf %1130, %1131 : vector<32x48xf32>
      %1133 = arith.addf %1122, %1132 : vector<32x48xf32>
      %cst_313 = arith.constant 9.99999997E-7 : f32
      %1134 = vector.broadcast %cst_313 : f32 to vector<32x48xf32>
      %1135 = arith.addf %1133, %1134 : vector<32x48xf32>
      %1136 = math.rsqrt %1135 : vector<32x48xf32>
      %1137 = arith.mulf %1099, %1136 : vector<32x48xf32>
      %1138 = vector.broadcast %1066 : vector<1x48xf32> to vector<32x48xf32>
      %1139 = arith.mulf %1137, %1138 : vector<32x48xf32>
      %1140 = vector.broadcast %1067 : vector<1x48xf32> to vector<32x48xf32>
      %1141 = arith.addf %1139, %1140 : vector<32x48xf32>
      %c0_314 = arith.constant 0 : index
      %c0_315 = arith.constant 0 : index
      %1142 = vector.load %arg8[%c0_314, %c0_315] : memref<32x48xf32, #tpu.memory_space<vmem>>, vector<32x48xf32>
      tpu.vector_store %arg8[%c0_314, %c0_315], %1141 {strides = array<i32>} : memref<32x48xf32, #tpu.memory_space<vmem>>, vector<32x48xf32>,
    } else {
    }
    return
  }
  func.func @transform_0(%arg0: i32) -> (i32, i32) {
    %c0_i32 = arith.constant 0 : i32
    %c0_i32_0 = arith.constant 0 : i32
    %c0_i32_1 = arith.constant 0 : i32
    return %c0_i32, %c0_i32_0 : i32, i32
  }
  func.func @transform_1(%arg0: i32) -> (i32, i32, i32) {
    %c0_i32 = arith.constant 0 : i32
    %c0_i32_0 = arith.constant 0 : i32
    %c0_i32_1 = arith.constant 0 : i32
    return %arg0, %c0_i32, %c0_i32_0 : i32, i32, i32
  }
  func.func @transform_2(%arg0: i32) -> (i32, i32, i32) {
    %c0_i32 = arith.constant 0 : i32
    %c0_i32_0 = arith.constant 0 : i32
    %c0_i32_1 = arith.constant 0 : i32
    return %arg0, %c0_i32, %c0_i32_0 : i32, i32, i32
  }
  func.func @transform_3(%arg0: i32) -> (i32, i32, i32) {
    %c0_i32 = arith.constant 0 : i32
    %c0_i32_0 = arith.constant 0 : i32
    %c0_i32_1 = arith.constant 0 : i32
    return %arg0, %c0_i32, %c0_i32_0 : i32, i32, i32
  }
  func.func @transform_4(%arg0: i32) -> (i32, i32, i32) {
    %c0_i32 = arith.constant 0 : i32
    %c0_i32_0 = arith.constant 0 : i32
    %c0_i32_1 = arith.constant 0 : i32
    return %arg0, %c0_i32, %c0_i32_0 : i32, i32, i32
  }
  func.func @transform_5(%arg0: i32) -> (i32, i32, i32) {
    %c0_i32 = arith.constant 0 : i32
    %c0_i32_0 = arith.constant 0 : i32
    %c0_i32_1 = arith.constant 0 : i32
    return %arg0, %c0_i32, %c0_i32_0 : i32, i32, i32
  }
  func.func @transform_6(%arg0: i32) -> (i32, i32, i32) {
    %c0_i32 = arith.constant 0 : i32
    %c0_i32_0 = arith.constant 0 : i32
    %c0_i32_1 = arith.constant 0 : i32
    return %arg0, %c0_i32, %c0_i32_0 : i32, i32, i32
  }
  func.func @transform_7(%arg0: i32) -> (i32, i32) {
    %c0_i32 = arith.constant 0 : i32
    %c0_i32_0 = arith.constant 0 : i32
    %c0_i32_1 = arith.constant 0 : i32
    return %c0_i32, %c0_i32_0 : i32, i32
  }
  func.func @transform_8(%arg0: i32) -> (i32, i32) {
    %c0_i32 = arith.constant 0 : i32
    %c0_i32_0 = arith.constant 0 : i32
    %c0_i32_1 = arith.constant 0 : i32
    return %c0_i32, %c0_i32_0 : i32, i32
  }
}

</mosaic_0001>

<bundles_post_ra>
// kernel: encoder_pallas.1
= control target key start
LH: loop header
LB: loop body
LE: loop exit
PB: predicated region body
PF: predicated region fallthrough
CT: control target
= control target key end

     0   :  { %s7328_s27 = smov 0   ;;  %s9921_s0 = inlined_call_operand.vmem [shape: f32[32,48], index: 0, kind: input, shape index: {}]   ;;  %s9922_s1 = inlined_call_operand.vmem [shape: f32[4,10,96], index: 1, kind: input, shape index: {}]   ;;  %s9923_s2 = inlined_call_operand.vmem [shape: f32[4,192,48], index: 2, kind: input, shape index: {}]   ;;  %s9924_s3 = inlined_call_operand.vmem [shape: f32[4,48,384], index: 3, kind: input, shape index: {}]   ;;  %s9925_s4 = inlined_call_operand.vmem [shape: f32[4,48,48], index: 4, kind: input, shape index: {}]   ;;  %s9926_s5 = inlined_call_operand.vmem [shape: f32[4,48,96], index: 5, kind: input, shape index: {}]   ;;  %s9927_s6 = inlined_call_operand.vmem [shape: f32[4,96,48], index: 6, kind: input, shape index: {}]   ;;  %s9928_s7 = inlined_call_operand.vmem [shape: f32[32,48], index: 7, kind: output, shape index: {0}]   ;;  %s9929_s8 = inlined_call_operand.vmem [shape: f32[384,48], index: 8, kind: output, shape index: {1}]  }
   0x1 LB: > { %s7334_s28 = sadd.s32 4294967295, %s7271_s27   ;;  %p6743_p0 = scmp.ge.s32.totalorder %s7271_s27, 1  ;;  %s7271_s27 = sphi %s7328_s27, %s19_s27  }
   0x2   : > { %p305_p1 = scmp.lt.s32.totalorder %s7271_s27, 5 }
   0x4   : > { %p306_p2 = pnand %p6743_p0, %p305_p1 }
   0x6   : > { %309 = sbr.rel (%p306_p2) target bundleno = 8995 (0x2323), region = 48 }
   0xb   : > { %p359_p3 = scmp.lt.s32.totalorder %s7334_s28, 3  ;;  %p6751_p4 = scmp.ne.s32.totalorder %s7334_s28, 0 }
   0xd   : > { %s360_s29 = scalar_select %p359_p3, %s7334_s28, 3 }
   0xf   : > { %s6882_s30 = sshll.u32 %s360_s29, 4  ;;  %s6883_s9 = smul.u32 192, %s360_s29 }
  0x10   : > { %s7343_s12 = scalar_lea.vmem %s9922_s1, %s6882_s30  ;;  %s6884_s13 = smul.u32 144, %s360_s29 }
  0x11   : > { %s7348_s16 = scalar_lea.vmem %s9923_s2, %s6883_s9  ;;  %s6885_s17 = smul.u32 48, %s360_s29 }
  0x12   : > { %s7353_s20 = scalar_lea.vmem %s9924_s3, %s6884_s13  ;;  %s6886_s21 = smul.u32 96, %s360_s29 }
  0x13   : > { %s7358_s24 = scalar_lea.vmem %s9925_s4, %s6885_s17  ;;  %s7363_s30 = scalar_lea.vmem %s9926_s5, %s6885_s17 }
  0x14   : > { %s7368_s11 = scalar_lea.vmem %s9927_s6, %s6886_s21  ;;  %394 = sbr.rel (%p6751_p4) target bundleno = 30 (0x1e), region = 52 }
  0x19   : > { %v395_v0 = vld [vmem:[%s9921_s0] sm:$0xff]  ;;  %vm399_vm0 = vcmask 392192   ;;  %v396_v1 = vld [vmem:[%s9921_s0 + $0x8] sm:$0xff]  ;;  %v397_v2 = vld [vmem:[%s9921_s0 + $0x10] sm:$0xff] }
  0x1a   : > { %400 = vst.msk [vmem:[#allocation2] sm:$0xff] %vm399_vm0, %v395_v0  ;;  %v398_v3 = vld [vmem:[%s9921_s0 + $0x18] sm:$0xff] }
  0x1b   : > { %401 = vst.msk [vmem:[#allocation2 + $0x8] sm:$0xff] %vm399_vm0, %v396_v1 }
  0x1c   : > { %402 = vst.msk [vmem:[#allocation2 + $0x10] sm:$0xff] %vm399_vm0, %v397_v2 }
  0x1d   : > { %403 = vst.msk [vmem:[#allocation2 + $0x18] sm:$0xff] %vm399_vm0, %v398_v3 }
  0x1e PF: > { %v410_v4 = vlaneseq  ;;  %v7273_v8 = vmov 0.0   ;;  %vm528_vm5 = vcmask 392192   ;;  %v7274_v45 = vmov 48.0   ;;  %p6801_p5 = scmp.ne.s32.totalorder %s7334_s28, 1 }
  0x1f   : > { %6905 = vrcp.f32 %v7274_v45 }
  0x20   : > { %v411_v5 = vand.u32 127, %v410_v4 }
  0x21   : > { %v7422_v31 = vld [vmem:[#allocation2] sm:$0xff] }
  0x22   : > { %vm420_vm1 = vcmp.lt.s32.totalorder %v411_v5, 8  ;;  %vm424_vm2 = vcmp.ge.s32.totalorder %v411_v5, 8  ;;  %vm425_vm3 = vcmp.lt.s32.totalorder %v411_v5, 24  ;;  %vm429_vm4 = vcmp.ge.s32.totalorder %v411_v5, 24  ;;  %v7411_v24 = vld [vmem:[#allocation2 + $0x8] sm:$0xff]  ;;  %9968 = vst [vmem:[#allocation9_spill] sm:$0xff] %v7422_v31 }
  0x23   : > { %v7385_v7 = vld [vmem:[#allocation2 + $0x10] sm:$0xff]  ;;  %v7387_v9 = vsel %vm420_vm1, 1.0, %v7273_v8  ;;  %vm426_vm6 = vmand %vm424_vm2, %vm425_vm3  ;;  %vm430_vm7 = vcmp.lt.s32.totalorder %v411_v5, 48  ;;  %9967 = vst [vmem:[#allocation8_spill] sm:$0xff] %v7411_v24  ;;  %v759_v38 = vsel %vm528_vm5, %v7422_v31, 0.0  ;;  %v762_v39 = vsel %vm528_vm5, %v7411_v24, 0.0 }
  0x24   : > { %v7383_v6 = vld [vmem:[#allocation2 + $0x18] sm:$0xff]  ;;  %9963 = vst [vmem:[#allocation4_spill] sm:$0xff] %v7385_v7  ;;  %v7391_v11 = vsel %vm426_vm6, 1.0, %v7273_v8  ;;  %v526_v12 = vmul.f32 %v7387_v9, %v7385_v7  ;;  %vm431_vm8 = vmand %vm429_vm4, %vm430_vm7  ;;  %v525_v25 = vmul.f32 %v7387_v9, %v7411_v24  ;;  %v524_v32 = vmul.f32 %v7387_v9, %v7422_v31 }
  0x25   : > { %9962 = vst [vmem:[#allocation3_spill] sm:$0xff] %v7383_v6  ;;  %v527_v10 = vmul.f32 %v7387_v9, %v7383_v6  ;;  %v555_v13 = vmul.f32 %v7391_v11, %v7385_v7  ;;  %v7397_v14 = vsel %vm431_vm8, 1.0, %v7273_v8  ;;  %v556_v18 = vmul.f32 %v7391_v11, %v7383_v6  ;;  %v6906_v56 = vpop.eup %6905 }
  0x26   : > { %9964 = vst [vmem:[#allocation5_spill] sm:$0xff] %v7387_v9  ;;  %v535_v16 = vsel %vm528_vm5, %v526_v12, 0.0  ;;  %v584_v19 = vmul.f32 %v7397_v14, %v7383_v6  ;;  %v583_v20 = vmul.f32 %v7397_v14, %v7385_v7  ;;  %v554_v26 = vmul.f32 %v7391_v11, %v7411_v24 }
  0x27   : > { %9965 = vst [vmem:[#allocation6_spill] sm:$0xff] %v7391_v11  ;;  %v538_v15 = vsel %vm528_vm5, %v527_v10, 0.0  ;;  %v563_v17 = vsel %vm528_vm5, %v555_v13, 0.0  ;;  %536 = vadd.xlane.f32.xlu1 %v535_v16  ;;  %v566_v21 = vsel %vm528_vm5, %v556_v18, 0.0  ;;  %v582_v27 = vmul.f32 %v7397_v14, %v7411_v24 }
  0x28   : > { %9966 = vst [vmem:[#allocation7_spill] sm:$0xff] %v7397_v14  ;;  %539 = vadd.xlane.f32.xlu0 %v538_v15  ;;  %564 = vadd.xlane.f32.xlu2 %v563_v17  ;;  %v594_v22 = vsel %vm528_vm5, %v584_v19, 0.0  ;;  %v591_v23 = vsel %vm528_vm5, %v583_v20, 0.0  ;;  %v532_v28 = vsel %vm528_vm5, %v525_v25, 0.0  ;;  %v560_v29 = vsel %vm528_vm5, %v554_v26, 0.0 }
  0x29   : > { %v588_v30 = vsel %vm528_vm5, %v582_v27, 0.0  ;;  %v553_v33 = vmul.f32 %v7391_v11, %v7422_v31  ;;  %v581_v34 = vmul.f32 %v7397_v14, %v7422_v31  ;;  %v529_v35 = vsel %vm528_vm5, %v524_v32, 0.0 }
  0x2a   : > { %v772_v63 = vmul.f32 48.0, %v6906_v56  ;;  %vm776_vm9 = vweird.f32 %v6906_v56 }
  0x2b   : > { %v557_v36 = vsel %vm528_vm5, %v553_v33, 0.0  ;;  %v585_v37 = vsel %vm528_vm5, %v581_v34, 0.0 }
  0x2c   : > { %v773_v13 = vsub.f32 1.0, %v772_v63 }
  0x2f   : > { %595 = vadd.xlane.f32.xlu1 %v594_v22 }
  0x30   : > { %567 = vadd.xlane.f32.xlu0 %v566_v21  ;;  %592 = vadd.xlane.f32.xlu2 %v591_v23  ;;  %v774_v23 = vmul.f32 %v6906_v56, %v773_v13 }
  0x37   : > { %561 = vadd.xlane.f32.xlu1 %v560_v29 }
  0x38   : > { %533 = vadd.xlane.f32.xlu0 %v532_v28  ;;  %589 = vadd.xlane.f32.xlu2 %v588_v30 }
  0x3f   : > { %558 = vadd.xlane.f32.xlu1 %v557_v36 }
  0x40   : > { %530 = vadd.xlane.f32.xlu0 %v529_v35  ;;  %586 = vadd.xlane.f32.xlu2 %v585_v37  ;;  %v775_v37 = vadd.f32 %v6906_v56, %v774_v23  ;;  %v1076_v23 = vld [vmem:[%s7353_s20 + $0x78] sm:$0xff] }
  0x41   : > { %1101 = vmatpush.msra.mxu1 %v1076_v23 }
  0x42   : > { %v7470_v45 = vsel %vm776_vm9, %v6906_v56, %v775_v37  ;;  %v1068_v37 = vld [vmem:[%s7353_s20 + $0x38] sm:$0xff] }
  0x47   : > { %763 = vadd.xlane.f32.xlu1 %v762_v39 }
  0x48   : > { %760 = vadd.xlane.f32.xlu0 %v759_v38 }
  0x9a   : > { %v537_v41 = vpop.xlane.xlu1 %536 }
  0x9b   : > { %v540_v40 = vpop.xlane.xlu0 %539  ;;  %v565_v42 = vpop.xlane.xlu2 %564  ;;  %v543_v44 = vmul.f32 0.125, %v537_v41 }
  0x9c   : > { %v571_v43 = vmul.f32 0.0625, %v565_v42  ;;  %v544_v48 = vmul.f32 0.125, %v540_v40 }
  0x9d   : > { %v547_v47 = vmul.f32 %v7387_v9, %v543_v44 }
  0x9e   : > { %v575_v46 = vmul.f32 %v7391_v11, %v571_v43  ;;  %v548_v57 = vmul.f32 %v7387_v9, %v544_v48 }
  0xa0   : > { %v579_v54 = vadd.f32 %v575_v46, %v547_v47 }
  0xa2   : > { %v596_v50 = vpop.xlane.xlu1 %595 }
  0xa3   : > { %v568_v49 = vpop.xlane.xlu0 %567  ;;  %v593_v52 = vpop.xlane.xlu2 %592  ;;  %v600_v53 = vmul.f32 0.041666668, %v596_v50 }
  0xa4   : > { %v572_v51 = vmul.f32 0.0625, %v568_v49  ;;  %v599_v55 = vmul.f32 0.041666668, %v593_v52 }
  0xa5   : > { %v604_v59 = vmul.f32 %v7397_v14, %v600_v53 }
  0xa6   : > { %v576_v58 = vmul.f32 %v7391_v11, %v572_v51  ;;  %v603_v60 = vmul.f32 %v7397_v14, %v599_v55 }
  0xa8   : > { %v580_v61 = vadd.f32 %v576_v58, %v548_v57  ;;  %v607_v62 = vadd.f32 %v603_v60, %v579_v54 }
  0xaa   : > { %v608_v0 = vadd.f32 %v604_v59, %v580_v61  ;;  %v562_v2 = vpop.xlane.xlu1 %561  ;;  %v7444_v3 = vsub.f32 %v7385_v7, %v607_v62 }
  0xab   : > { %v534_v1 = vpop.xlane.xlu0 %533  ;;  %v570_v8 = vmul.f32 0.0625, %v562_v2  ;;  %v590_v10 = vpop.xlane.xlu2 %589 }
  0xac   : > { %v7447_v4 = vsub.f32 %v7383_v6, %v608_v0  ;;  %v542_v5 = vmul.f32 0.125, %v534_v1  ;;  %v598_v12 = vmul.f32 0.041666668, %v590_v10  ;;  %v615_v22 = vmul.f32 %v7444_v3, %v7444_v3 }
  0xad   : > { %v574_v16 = vmul.f32 %v7391_v11, %v570_v8 }
  0xae   : > { %v546_v15 = vmul.f32 %v7387_v9, %v542_v5  ;;  %v616_v17 = vmul.f32 %v7447_v4, %v7447_v4  ;;  %v602_v18 = vmul.f32 %v7397_v14, %v598_v12  ;;  %v675_v34 = vmul.f32 %v7397_v14, %v615_v22 }
  0xaf   : > { %v647_v35 = vmul.f32 %v7391_v11, %v615_v22  ;;  %v619_v10 = vmul.f32 %v7387_v9, %v615_v22  ;;  %v765_v12 = vsel %vm528_vm5, %v7385_v7, 0.0 }
  0xb0   : > { %v578_v19 = vadd.f32 %v574_v16, %v546_v15  ;;  %v676_v20 = vmul.f32 %v7397_v14, %v616_v17  ;;  %v648_v21 = vmul.f32 %v7391_v11, %v616_v17  ;;  %v683_v43 = vsel %vm528_vm5, %v675_v34, 0.0 }
  0xb1   : > { %v655_v44 = vsel %vm528_vm5, %v647_v35, 0.0  ;;  %v620_v63 = vmul.f32 %v7387_v9, %v616_v17  ;;  %v627_v15 = vsel %vm528_vm5, %v619_v10, 0.0 }
  0xb2   : > { %v606_v25 = vadd.f32 %v602_v18, %v578_v19  ;;  %v686_v26 = vsel %vm528_vm5, %v676_v20, 0.0  ;;  %v658_v27 = vsel %vm528_vm5, %v648_v21, 0.0  ;;  %v559_v29 = vpop.xlane.xlu1 %558  ;;  %v768_v20 = vsel %vm528_vm5, %v7383_v6, 0.0 }
  0xb3   : > { %687 = vadd.xlane.f32.xlu1 %v686_v26  ;;  %659 = vadd.xlane.f32.xlu0 %v658_v27  ;;  %v531_v28 = vpop.xlane.xlu0 %530  ;;  %v569_v32 = vmul.f32 0.0625, %v559_v29  ;;  %v587_v33 = vpop.xlane.xlu2 %586  ;;  %v630_v5 = vsel %vm528_vm5, %v620_v63, 0.0  ;;  %v1078_v26 = vld [vmem:[%s7353_s20 + $0x88] sm:$0xff]  ;;  %v1073_v27 = vld [vmem:[%s7353_s20 + $0x60] sm:$0xff]  ;;  %v1075_v29 = vld [vmem:[%s7353_s20 + $0x70] sm:$0xff] }
  0xb4   : > { %v541_v30 = vmul.f32 0.125, %v531_v28  ;;  %v597_v36 = vmul.f32 0.041666668, %v587_v33  ;;  %v7463_v38 = vsub.f32 %v7411_v24, %v606_v25  ;;  %v1077_v25 = vld [vmem:[%s7353_s20 + $0x80] sm:$0xff]  ;;  %1159 = vmatpush.msra.mxu3 %v1078_v26  ;;  %v1074_v28 = vld [vmem:[%s7353_s20 + $0x68] sm:$0xff]  ;;  %1102 = vmatpush.msra.mxu1 %v1073_v27  ;;  %v1072_v33 = vld [vmem:[%s7353_s20 + $0x58] sm:$0xff] }
  0xb5   : > { %v573_v40 = vmul.f32 %v7391_v11, %v569_v32  ;;  %1130 = vmatpush.msra.mxu2 %v1077_v25  ;;  %v1071_v32 = vld [vmem:[%s7353_s20 + $0x50] sm:$0xff]  ;;  %v7543_v26 = vld [vmem:[%s7343_s12] sm:$0xff] }
  0xb6   : > { %v545_v39 = vmul.f32 %v7387_v9, %v541_v30  ;;  %v601_v41 = vmul.f32 %v7397_v14, %v597_v36  ;;  %v614_v47 = vmul.f32 %v7463_v38, %v7463_v38  ;;  %1160 = vmatpush.msra.mxu3 %v1075_v29  ;;  %v1070_v30 = vld [vmem:[%s7353_s20 + $0x48] sm:$0xff]  ;;  %v1067_v36 = vld [vmem:[%s7353_s20 + $0x30] sm:$0xff]  ;;  %9969 = vst [vmem:[#allocation10_spill] sm:$0xff] %v7543_v26 }
  0xb7   : > { %1131 = vmatpush.msra.mxu2 %v1074_v28  ;;  %1103 = vmatpush.msra.mxu1 %v1070_v30 }
  0xb8   : > { %v577_v42 = vadd.f32 %v573_v40, %v545_v39  ;;  %v674_v52 = vmul.f32 %v7397_v14, %v614_v47  ;;  %v646_v53 = vmul.f32 %v7391_v11, %v614_v47  ;;  %v618_v16 = vmul.f32 %v7387_v9, %v614_v47  ;;  %1161 = vmatpush.msra.mxu3 %v1072_v33  ;;  %v1069_v39 = vld [vmem:[%s7353_s20 + $0x40] sm:$0xff]  ;;  %v1064_v40 = vld [vmem:[%s7353_s20 + $0x18] sm:$0xff] }
  0xb9   : > { %1132 = vmatpush.msra.mxu2 %v1071_v32  ;;  %1104 = vmatpush.msra.mxu1 %v1067_v36 }
  0xba   : > { %v605_v46 = vadd.f32 %v601_v41, %v577_v42  ;;  %v764_v55 = vpop.xlane.xlu1 %763  ;;  %v680_v56 = vsel %vm528_vm5, %v674_v52, 0.0  ;;  %v652_v57 = vsel %vm528_vm5, %v646_v53, 0.0  ;;  %v624_v17 = vsel %vm528_vm5, %v618_v16, 0.0  ;;  %1162 = vmatpush.msra.mxu3 %v1069_v39  ;;  %v1065_v41 = vld [vmem:[%s7353_s20 + $0x20] sm:$0xff]  ;;  %v1066_v42 = vld [vmem:[%s7353_s20 + $0x28] sm:$0xff] }
  0xbb   : > { %684 = vadd.xlane.f32.xlu1 %v683_v43  ;;  %656 = vadd.xlane.f32.xlu0 %v655_v44  ;;  %v761_v48 = vpop.xlane.xlu0 %760  ;;  %v779_v60 = vmul.f32 %v7470_v45, %v764_v55  ;;  %v1061_v43 = vld [vmem:[%s7353_s20] sm:$0xff]  ;;  %v1062_v44 = vld [vmem:[%s7353_s20 + $0x8] sm:$0xff] }
  0xbc   : > { %v778_v49 = vmul.f32 %v7470_v45, %v761_v48  ;;  %v7476_v50 = vsub.f32 %v7422_v31, %v605_v46  ;;  %1133 = vmatpush.msra.mxu2 %v1068_v37  ;;  %1105 = vmatpush.msra.mxu1 %v1064_v40  ;;  %v1063_v46 = vld [vmem:[%s7353_s20 + $0x10] sm:$0xff]  ;;  %v7556_v37 = vld [vmem:[%s7343_s12 + $0x8] sm:$0x3] }
  0xbd   : > { %v7495_v0 = vsub.f32 %v7411_v24, %v779_v60  ;;  %1163 = vmatpush.msra.mxu3 %v1066_v42  ;;  %9970 = vst [vmem:[#allocation11_spill] sm:$0xff] %v7556_v37 }
  0xbe   : > { %v7479_v51 = vsub.f32 %v7422_v31, %v778_v49  ;;  %v613_v59 = vmul.f32 %v7476_v50, %v7476_v50  ;;  %1134 = vmatpush.msra.mxu2 %v1065_v41  ;;  %1106 = vmatpush.msra.mxu1 %v1061_v43  ;;  %v7560_v43 = vperm.slane %v7543_v26, 3 }
  0xbf   : > { %v787_v8 = vmul.f32 %v7495_v0, %v7495_v0  ;;  %1164 = vmatpush.msra.mxu3 %v1063_v46 }
  0xc0   : > { %v786_v54 = vmul.f32 %v7479_v51, %v7479_v51  ;;  %v645_v61 = vmul.f32 %v7391_v11, %v613_v59  ;;  %v617_v62 = vmul.f32 %v7387_v9, %v613_v59  ;;  %v673_v18 = vmul.f32 %v7397_v14, %v613_v59  ;;  %1135 = vmatpush.msra.mxu2 %v1062_v44 }
  0xc1   : > { %v793_v13 = vsel %vm528_vm5, %v787_v8, 0.0 }
  0xc2   : > { %v790_v58 = vsel %vm528_vm5, %v786_v54, 0.0  ;;  %v649_v1 = vsel %vm528_vm5, %v645_v61, 0.0  ;;  %v621_v2 = vsel %vm528_vm5, %v617_v62, 0.0  ;;  %v677_v19 = vsel %vm528_vm5, %v673_v18, 0.0 }
  0xc3   : > { %681 = vadd.xlane.f32.xlu1 %v680_v56  ;;  %653 = vadd.xlane.f32.xlu0 %v652_v57 }
  0xc4   : > { %791 = vadd.xlane.f32.xlu2 %v790_v58 }
  0xcb   : > { %650 = vadd.xlane.f32.xlu1 %v649_v1  ;;  %622 = vadd.xlane.f32.xlu0 %v621_v2 }
  0xcc   : > { %631 = vadd.xlane.f32.xlu2 %v630_v5 }
  0xd3   : > { %766 = vadd.xlane.f32.xlu1 %v765_v12  ;;  %794 = vadd.xlane.f32.xlu0 %v793_v13 }
  0xd4   : > { %628 = vadd.xlane.f32.xlu2 %v627_v15 }
  0xdc   : > { %625 = vadd.xlane.f32.xlu2 %v624_v17 }
  0xe4   : > { %678 = vadd.xlane.f32.xlu2 %v677_v19 }
  0xec   : > { %769 = vadd.xlane.f32.xlu2 %v768_v20 }
 0x126   : > { %v688_v21 = vpop.xlane.xlu1 %687  ;;  %v660_v22 = vpop.xlane.xlu0 %659 }
 0x127   : > { %v664_v54 = vmul.f32 0.0625, %v660_v22  ;;  %v692_v58 = vmul.f32 0.041666668, %v688_v21 }
 0x129   : > { %v668_v61 = vmul.f32 %v7391_v11, %v664_v54  ;;  %v696_v1 = vmul.f32 %v7397_v14, %v692_v58 }
 0x12e   : > { %v685_v34 = vpop.xlane.xlu1 %684  ;;  %v657_v35 = vpop.xlane.xlu0 %656 }
 0x12f   : > { %v663_v8 = vmul.f32 0.0625, %v657_v35  ;;  %v691_v19 = vmul.f32 0.041666668, %v685_v34  ;;  %v7552_v34 = vperm.slane %v7543_v26, 2 }
 0x131   : > { %v667_v27 = vmul.f32 %v7391_v11, %v663_v8  ;;  %v695_v32 = vmul.f32 %v7397_v14, %v691_v19 }
 0x136   : > { %v682_v47 = vpop.xlane.xlu1 %681  ;;  %v654_v48 = vpop.xlane.xlu0 %653 }
 0x137   : > { %v792_v49 = vpop.xlane.xlu2 %791  ;;  %v662_v41 = vmul.f32 0.0625, %v654_v48  ;;  %v690_v54 = vmul.f32 0.041666668, %v682_v47 }
 0x138   : > { %v802_v52 = vmul.f32 %v792_v49, %v7470_v45 }
 0x139   : > { %v666_v48 = vmul.f32 %v7391_v11, %v662_v41 }
 0x13a   : > { %v806_v53 = vadd.f32 1e-06, %v802_v52 }
 0x13c   : > { %6907 = vrsqrt.f32 %v806_v53  ;;  %vm816_vm11 = vweird.f32 %v806_v53 }
 0x13e   : > { %v651_v55 = vpop.xlane.xlu1 %650  ;;  %v623_v56 = vpop.xlane.xlu0 %622 }
 0x13f   : > { %v632_v57 = vpop.xlane.xlu2 %631 }
 0x140   : > { %v636_v59 = vmul.f32 0.125, %v632_v57  ;;  %v661_v57 = vmul.f32 0.0625, %v651_v55 }
 0x142   : > { %v6908_v60 = vpop.eup %6907  ;;  %v640_v62 = vmul.f32 %v7387_v9, %v636_v59  ;;  %v633_v59 = vmul.f32 0.125, %v623_v56 }
 0x143   : > { %v811_v63 = vmul.f32 %v6908_v60, %v806_v53  ;;  %vm817_vm10 = vweird.f32 %v6908_v60 }
 0x144   : > { %v672_v2 = vadd.f32 %v668_v61, %v640_v62  ;;  %vm818_vm12 = vmor %vm816_vm11, %vm817_vm10  ;;  %v637_v56 = vmul.f32 %v7387_v9, %v633_v59 }
 0x145   : > { %v812_v5 = vmul.f32 %v6908_v60, %v811_v63 }
 0x146   : > { %v700_v10 = vadd.f32 %v696_v1, %v672_v2  ;;  %v767_v12 = vpop.xlane.xlu1 %766  ;;  %v795_v13 = vpop.xlane.xlu0 %794  ;;  %v694_v1 = vmul.f32 %v7397_v14, %v690_v54  ;;  %v665_v2 = vmul.f32 %v7391_v11, %v661_v57 }
 0x147   : > { %v813_v15 = vmul.f32 0.5, %v812_v5  ;;  %v780_v16 = vmul.f32 %v7470_v45, %v767_v12  ;;  %v629_v17 = vpop.xlane.xlu2 %628  ;;  %v803_v18 = vmul.f32 %v795_v13, %v7470_v45 }
 0x148   : > { %v7537_v20 = vadd.f32 1e-06, %v700_v10  ;;  %v635_v21 = vmul.f32 0.125, %v629_v17 }
 0x149   : > { %v814_v22 = vsub.f32 1.5, %v813_v15  ;;  %v7540_v23 = vsub.f32 %v7385_v7, %v780_v16  ;;  %v807_v25 = vadd.f32 1e-06, %v803_v18 }
 0x14a   : > { %6909 = vrsqrt.f32 %v7537_v20  ;;  %v639_v28 = vmul.f32 %v7387_v9, %v635_v21  ;;  %vm741_vm1 = vweird.f32 %v7537_v20 }
 0x14b   : > { %v815_v29 = vmul.f32 %v6908_v60, %v814_v22  ;;  %6911 = vrsqrt.f32 %v807_v25  ;;  %v788_v30 = vmul.f32 %v7540_v23, %v7540_v23  ;;  %vm826_vm13 = vweird.f32 %v807_v25 }
 0x14c   : > { %v671_v33 = vadd.f32 %v667_v27, %v639_v28  ;;  %v669_v22 = vadd.f32 %v665_v2, %v637_v56  ;;  %v749_v28 = vperm.slane %v7543_v26, 0 }
 0x14d   : > { %v819_v35 = vsel %vm818_vm12, %v6908_v60, %v815_v29  ;;  %v796_v36 = vsel %vm528_vm5, %v788_v30, 0.0 }
 0x14e   : > { %v699_v39 = vadd.f32 %v695_v32, %v671_v33  ;;  %797 = vadd.xlane.f32.xlu0 %v796_v36  ;;  %v850_v40 = vmul.f32 %v819_v35, %v7479_v51  ;;  %v754_v36 = vperm.slane %v7543_v26, 1 }
 0x14f   : > { %v626_v42 = vpop.xlane.xlu2 %625 }
 0x150   : > { %v6910_v44 = vpop.eup %6909  ;;  %v7562_v46 = vadd.f32 1e-06, %v699_v39  ;;  %v634_v49 = vmul.f32 0.125, %v626_v42  ;;  %v855_v52 = vmul.f32 %v7552_v34, %v850_v40 }
 0x151   : > { %v6912_v53 = vpop.eup %6911  ;;  %v736_v58 = vmul.f32 %v6910_v44, %v7537_v20  ;;  %vm742_vm15 = vweird.f32 %v6910_v44 }
 0x152   : > { %6913 = vrsqrt.f32 %v7562_v46  ;;  %v821_v51 = vmul.f32 %v6912_v53, %v807_v25  ;;  %v638_v61 = vmul.f32 %v7387_v9, %v634_v49  ;;  %v860_v62 = vadd.f32 %v7560_v43, %v855_v52  ;;  %vm743_vm2 = vmor %vm741_vm1, %vm742_vm15 }
 0x153   : > { %v737_v60 = vmul.f32 %v6910_v44, %v736_v58  ;;  %vm827_vm14 = vweird.f32 %v6912_v53  ;;  %vm731_vm4 = vweird.f32 %v7562_v46 }
 0x154   : > { %v822_v63 = vmul.f32 %v6912_v53, %v821_v51  ;;  %v670_v47 = vadd.f32 %v666_v48, %v638_v61  ;;  %6783 = vmatmul.msk.f32.vlgmr.msra.gmra.mxu1 %vm528_vm5, %v860_v62  ;;  %6787 = vmatmul.msk.f32.vlgmr.msra.gmra.mxu2 %vm528_vm5, %v860_v62  ;;  %vm7577_vm0 = vmor %vm826_vm13, %vm827_vm14 }
 0x155   : > { %v738_v55 = vmul.f32 0.5, %v737_v60  ;;  %6791 = vmatmul.msk.f32.vlgmr.msra.gmra.mxu3 %vm528_vm5, %v860_v62 }
 0x156   : > { %v823_v5 = vmul.f32 0.5, %v822_v63  ;;  %v698_v8 = vadd.f32 %v694_v1, %v670_v47 }
 0x157   : > { %v679_v10 = vpop.xlane.xlu2 %678  ;;  %v739_v12 = vsub.f32 1.5, %v738_v55 }
 0x158   : > { %v6914_v13 = vpop.eup %6913  ;;  %v824_v15 = vsub.f32 1.5, %v823_v5  ;;  %v689_v16 = vmul.f32 0.041666668, %v679_v10  ;;  %v702_v19 = vadd.f32 1e-06, %v698_v8 }
 0x159   : > { %v726_v17 = vmul.f32 %v6914_v13, %v7562_v46  ;;  %v740_v21 = vmul.f32 %v6910_v44, %v739_v12  ;;  %vm732_vm3 = vweird.f32 %v6914_v13 }
 0x15a   : > { %v825_v25 = vmul.f32 %v6912_v53, %v824_v15  ;;  %v693_v27 = vmul.f32 %v7397_v14, %v689_v16  ;;  %6915 = vrsqrt.f32 %v702_v19  ;;  %vm733_vm6 = vmor %vm731_vm4, %vm732_vm3  ;;  %vm721_vm8 = vweird.f32 %v702_v19 }
 0x15b   : > { %v727_v29 = vmul.f32 %v6914_v13, %v726_v17  ;;  %v744_v30 = vsel %vm743_vm2, %v6910_v44, %v740_v21  ;;  %v864_v21 = vld [vmem:[%s7348_s16] sm:$0xff]  ;;  %vm1178_vm3 = vcmask 130048  }
 0x15c   : > { %v829_v32 = vsel %vm7577_vm0, %v6912_v53, %v825_v25  ;;  %v697_v33 = vadd.f32 %v693_v27, %v669_v22  ;;  %v748_v35 = vmul.f32 %v744_v30, %v7447_v4  ;;  %v866_v22 = vld [vmem:[%s7348_s16 + $0x10] sm:$0xff]  ;;  %v867_v25 = vld [vmem:[%s7348_s16 + $0x18] sm:$0xff]  ;;  %v868_v27 = vld [vmem:[%s7348_s16 + $0x20] sm:$0xff] }
 0x15d   : > { %v728_v39 = vmul.f32 0.5, %v727_v29  ;;  %v851_v20 = vmul.f32 %v829_v32, %v7495_v0 }
 0x15e   : > { %v701_v40 = vadd.f32 1e-06, %v697_v33  ;;  %v753_v41 = vmul.f32 %v749_v28, %v748_v35 }
 0x15f   : > { %v729_v42 = vsub.f32 1.5, %v728_v39  ;;  %v770_v49 = vpop.xlane.xlu2 %769  ;;  %v856_v52 = vmul.f32 %v7552_v34, %v851_v20 }
 0x160   : > { %6917 = vrsqrt.f32 %v701_v40  ;;  %v781_v44 = vmul.f32 %v7470_v45, %v770_v49  ;;  %v758_v54 = vadd.f32 %v754_v36, %v753_v41  ;;  %v6916_v53 = vpop.eup %6915  ;;  %vm711_vm11 = vweird.f32 %v701_v40 }
 0x161   : > { %v861_v4 = vadd.f32 %v7560_v43, %v856_v52  ;;  %v730_v57 = vmul.f32 %v6914_v13, %v729_v42  ;;  %v716_v58 = vmul.f32 %v6916_v53, %v702_v19  ;;  %vm722_vm7 = vweird.f32 %v6916_v53 }
 0x162   : > { %v7594_v0 = vsub.f32 %v7383_v6, %v781_v44  ;;  %6755 = vmatpush.xpose.msk.msra.mxu0 %vm528_vm5, %v758_v54  ;;  %vm723_vm9 = vmor %vm721_vm8, %vm722_vm7 }
 0x163   : > { %6784 = vmatmul.msk.f32.gmra.mxu1 %vm528_vm5, %v861_v4  ;;  %6788 = vmatmul.msk.f32.gmra.mxu2 %vm528_vm5, %v861_v4  ;;  %v734_v59 = vsel %vm733_vm6, %v6914_v13, %v730_v57  ;;  %v717_v51 = vmul.f32 %v6916_v53, %v716_v58 }
 0x164   : > { %6792 = vmatmul.msk.f32.gmra.mxu3 %vm528_vm5, %v861_v4  ;;  %v789_v46 = vmul.f32 %v7594_v0, %v7594_v0  ;;  %v747_v48 = vmul.f32 %v734_v59, %v7444_v3 }
 0x165   : > { %v718_v61 = vmul.f32 0.5, %v717_v51 }
 0x166   : > { %v6918_v60 = vpop.eup %6917  ;;  %v799_v62 = vsel %vm528_vm5, %v789_v46, 0.0  ;;  %v752_v63 = vmul.f32 %v749_v28, %v747_v48 }
 0x167   : > { %v706_v1 = vmul.f32 %v6918_v60, %v701_v40  ;;  %800 = vadd.xlane.f32.xlu1 %v799_v62  ;;  %v719_v2 = vsub.f32 1.5, %v718_v61  ;;  %vm712_vm10 = vweird.f32 %v6918_v60 }
 0x168   : > { %v757_v47 = vadd.f32 %v754_v36, %v752_v63  ;;  %vm713_vm12 = vmor %vm711_vm11, %vm712_vm10 }
 0x169   : > { %v707_v55 = vmul.f32 %v6918_v60, %v706_v1  ;;  %v720_v56 = vmul.f32 %v6916_v53, %v719_v2 }
 0x16a   : > { %6756 = vmatpush.xpose.msk.msra.mxu0 %vm528_vm5, %v757_v47 }
 0x16b   : > { %v708_v5 = vmul.f32 0.5, %v707_v55  ;;  %v724_v8 = vsel %vm723_vm9, %v6916_v53, %v720_v56 }
 0x16c   : > { %v746_v10 = vmul.f32 %v724_v8, %v7463_v38  ;;  %v865_v38 = vld [vmem:[%s7348_s16 + $0x8] sm:$0xff] }
 0x16d   : > { %v709_v3 = vsub.f32 1.5, %v708_v5 }
 0x16e   : > { %v751_v12 = vmul.f32 %v749_v28, %v746_v10 }
 0x16f   : > { %v710_v13 = vmul.f32 %v6918_v60, %v709_v3 }
 0x170   : > { %v756_v15 = vadd.f32 %v754_v36, %v751_v12 }
 0x171   : > { %v714_v16 = vsel %vm713_vm12, %v6918_v60, %v710_v13 }
 0x172   : > { %v745_v17 = vmul.f32 %v714_v16, %v7476_v50  ;;  %6757 = vmatpush.xpose.msk.msra.mxu0 %vm528_vm5, %v756_v15  ;;  %v869_v50 = vld [vmem:[%s7348_s16 + $0x28] sm:$0xff] }
 0x174   : > { %v750_v18 = vmul.f32 %v749_v28, %v745_v17 }
 0x176   : > { %v755_v19 = vadd.f32 %v754_v36, %v750_v18 }
 0x178   : > { %6758 = vmatpush.xpose.msk.msra.mxu0 %vm528_vm5, %v755_v19 }
 0x17b   : > { %6759 = vmatmul.msk.f32.vlgmr.msra.gmra.mxu0 %vm528_vm5, %v864_v21 }
 0x183   : > { %6760 = vmatmul.msk.f32.gmra.mxu0 %vm528_vm5, %v865_v38 }
 0x18b   : > { %6761 = vmatmul.msk.f32.gmra.mxu0 %vm528_vm5, %v866_v22 }
 0x193   : > { %6762 = vmatmul.msk.f32.gmra.mxu0 %vm528_vm5, %v867_v25 }
 0x19b   : > { %6763 = vmatmul.msk.f32.gmra.mxu0 %vm528_vm5, %v868_v27 }
 0x1a3   : > { %6764 = vmatmul.msk.f32.gmra.mxu0 %vm528_vm5, %v869_v50 }
 0x1c1   : > { %v798_v28 = vpop.xlane.xlu0 %797 }
 0x1c2   : > { %v804_v29 = vmul.f32 %v798_v28, %v7470_v45 }
 0x1c4   : > { %v808_v30 = vadd.f32 1e-06, %v804_v29 }
 0x1c6   : > { %6919 = vrsqrt.f32 %v808_v30  ;;  %vm836_vm13 = vweird.f32 %v808_v30 }
 0x1cc   : > { %v6920_v32 = vpop.eup %6919 }
 0x1cd   : > { %v831_v33 = vmul.f32 %v6920_v32, %v808_v30  ;;  %vm837_vm14 = vweird.f32 %v6920_v32 }
 0x1ce   : > { %vm838_vm15 = vmor %vm836_vm13, %vm837_vm14 }
 0x1cf   : > { %v832_v35 = vmul.f32 %v6920_v32, %v831_v33 }
 0x1d1   : > { %v833_v36 = vmul.f32 0.5, %v832_v35  ;;  %v7622_v41 = vpop.f32.mrf.mxu1 }
 0x1d3   : > { %v834_v39 = vsub.f32 1.5, %v833_v36 }
 0x1d5   : > { %v835_v20 = vmul.f32 %v6920_v32, %v834_v39 }
 0x1d7   : > { %v839_v40 = vsel %vm838_vm15, %v6920_v32, %v835_v20  ;;  %v7624_v42 = vpop.f32.mrf.mxu2 }
 0x1d8   : > { %v852_v49 = vmul.f32 %v839_v40, %v7540_v23  ;;  %v7627_v52 = vpop.f32.mrf.mxu3 }
 0x1d9   : > { %9973 = vst [vmem:[#allocation12_spill] sm:$0xff] %v7627_v52 }
 0x1da   : > { %v801_v44 = vpop.xlane.xlu1 %800  ;;  %v857_v54 = vmul.f32 %v7552_v34, %v852_v49 }
 0x1db   : > { %v805_v53 = vmul.f32 %v801_v44, %v7470_v45 }
 0x1dc   : > { %v862_v4 = vadd.f32 %v7560_v43, %v857_v54 }
 0x1dd   : > { %v809_v57 = vadd.f32 1e-06, %v805_v53 }
 0x1de   : > { %6785 = vmatmul.msk.f32.gmra.mxu1 %vm528_vm5, %v862_v4  ;;  %6789 = vmatmul.msk.f32.gmra.mxu2 %vm528_vm5, %v862_v4 }
 0x1df   : > { %6921 = vrsqrt.f32 %v809_v57  ;;  %6793 = vmatmul.msk.f32.gmra.mxu3 %vm528_vm5, %v862_v4  ;;  %vm846_vm1 = vweird.f32 %v809_v57 }
 0x1e0   : > { %v7635_v58 = vpop.f32.mrf.mxu1 }
 0x1e1   : > { %1211 = vmatpush.msrb.mxu1 %v7635_v58 }
 0x1e3   : > { %1212 = vmatpush.msrb.mxu1 %v7622_v41 }
 0x1e5   : > { %v6922_v23 = vpop.eup %6921 }
 0x1e6   : > { %v841_v59 = vmul.f32 %v6922_v23, %v809_v57  ;;  %v7639_v51 = vpop.f32.mrf.mxu2  ;;  %vm847_vm0 = vweird.f32 %v6922_v23 }
 0x1e7   : > { %v7641_v45 = vpop.f32.mrf.mxu3  ;;  %vm848_vm2 = vmor %vm846_vm1, %vm847_vm0 }
 0x1e8   : > { %9974 = vst [vmem:[#allocation13_spill] sm:$0xff] %v7641_v45  ;;  %v842_v46 = vmul.f32 %v6922_v23, %v841_v59 }
 0x1ea   : > { %v843_v48 = vmul.f32 0.5, %v842_v46 }
 0x1ec   : > { %v844_v60 = vsub.f32 1.5, %v843_v48 }
 0x1ee   : > { %v845_v61 = vmul.f32 %v6922_v23, %v844_v60 }
 0x1f0   : > { %v849_v62 = vsel %vm848_vm2, %v6922_v23, %v845_v61 }
 0x1f1   : > { %v853_v63 = vmul.f32 %v849_v62, %v7594_v0 }
 0x1f3   : > { %v858_v1 = vmul.f32 %v7552_v34, %v853_v63 }
 0x1f5   : > { %v863_v2 = vadd.f32 %v7560_v43, %v858_v1 }
 0x1f7   : > { %6786 = vmatmul.msk.f32.gmra.mxu1 %vm528_vm5, %v863_v2  ;;  %6790 = vmatmul.msk.f32.gmra.mxu2 %vm528_vm5, %v863_v2 }
 0x1f8   : > { %6794 = vmatmul.msk.f32.gmra.mxu3 %vm528_vm5, %v863_v2  ;;  %v7649_v47 = vpop.f32.mrf.mxu0 }
 0x1ff   : > { %6795 = vmatmul.msk.f32.vlgmr.msrb.gmra.mxu1 %vm1178_vm3, %v7649_v47 }
 0x200   : > { %v7653_v55 = vpop.f32.mrf.mxu0 }
 0x207   : > { %6796 = vmatmul.msk.f32.gmra.mxu1 %vm1178_vm3, %v7653_v55 }
 0x208   : > { %v7657_v34 = vpop.f32.mrf.mxu0 }
 0x20f   : > { %6797 = vmatmul.msk.f32.gmra.mxu1 %vm1178_vm3, %v7657_v34 }
 0x210   : > { %v7661_v43 = vpop.f32.mrf.mxu0 }
 0x217   : > { %6798 = vmatmul.msk.f32.gmra.mxu1 %vm1178_vm3, %v7661_v43 }
 0x218   : > { %v7665_v0 = vpop.f32.mrf.mxu0 }
 0x21f   : > { %6799 = vmatmul.msk.f32.gmra.mxu1 %vm1178_vm3, %v7665_v0 }
 0x220   : > { %v7669_v56 = vpop.f32.mrf.mxu0 }
 0x221   : > { %9975 = vst [vmem:[#allocation14_spill] sm:$0xff] %v7669_v56 }
 0x227   : > { %6800 = vmatmul.msk.f32.gmra.mxu1 %vm1178_vm3, %v7669_v56 }
 0x25b   : > { %v7673_v5 = vpop.f32.mrf.mxu1 }
 0x261   : > { %v7675_v8 = vpop.f32.mrf.mxu2 }
 0x262   : > { %9976 = vst [vmem:[#allocation15_spill] sm:$0xff] %v7675_v8  ;;  %v7677_v3 = vpop.f32.mrf.mxu3 }
 0x263   : > { %9977 = vst [vmem:[#allocation16_spill] sm:$0xff] %v7677_v3 }
 0x274   : > { %v7679_v10 = vpop.f32.mrf.mxu1 }
 0x27a   : > { %v7681_v12 = vpop.f32.mrf.mxu2 }
 0x27b   : > { %9978 = vst [vmem:[#allocation17_spill] sm:$0xff] %v7681_v12  ;;  %v7683_v13 = vpop.f32.mrf.mxu3 }
 0x27c   : > { %9979 = vst [vmem:[#allocation18_spill] sm:$0xff] %v7683_v13  ;;  %v1214_v15 = vpop.f32.mrf.mxu1 }
 0x27d   : > { %v7687_v21 = vmul.f32 0.14433756, %v1214_v15 }
 0x27f   : > { %v1277_v25 = vmul.f32 0.0, %v7687_v21  ;;  %v1244_v20 = vsel %vm528_vm5, %v7687_v21, 0.0 }
 0x281   : > { %v1283_v32 = vsel %vm528_vm5, %v1277_v25, 0.0 }
 0x284   : > { %v1217_v16 = vpop.f32.mrf.mxu1 }
 0x285   : > { %v7685_v19 = vmul.f32 0.14433756, %v1217_v16 }
 0x287   : > { %v1239_v22 = vmul.f32 0.0, %v7685_v19  ;;  %v1284_v33 = vsel %vm528_vm5, %v7685_v19, 0.0 }
 0x288   : > { %v1285_v53 = vadd.f32 %v1284_v33, %v1283_v32 }
 0x289   : > { %v1245_v29 = vsel %vm528_vm5, %v1239_v22, 0.0 }
 0x28a   : > { %v1324_v39 = vadd.f32 %v1283_v32, %v1245_v29  ;;  %v1246_v54 = vadd.f32 %v1245_v29, %v1244_v20 }
 0x28c   : > { %v1220_v17 = vpop.f32.mrf.mxu1 }
 0x28d   : > { %v7689_v38 = vmul.f32 0.14433756, %v1220_v17 }
 0x28f   : > { %v1240_v27 = vmul.f32 0.0, %v7689_v38  ;;  %v1286_v40 = vsel %vm528_vm5, %v7689_v38, 0.0 }
 0x290   : > { %v1287_v46 = vadd.f32 %v1286_v40, %v1285_v53 }
 0x291   : > { %v1247_v35 = vsel %vm528_vm5, %v1240_v27, 0.0 }
 0x292   : > { %v1326_v4 = vadd.f32 %v1324_v39, %v1247_v35  ;;  %v1248_v59 = vadd.f32 %v1247_v35, %v1246_v54 }
 0x294   : > { %v1223_v18 = vpop.f32.mrf.mxu1 }
 0x295   : > { %v7694_v50 = vmul.f32 0.14433756, %v1223_v18 }
 0x297   : > { %v1241_v36 = vmul.f32 0.0, %v7694_v50  ;;  %v1327_v49 = vsel %vm528_vm5, %v7694_v50, 0.0 }
 0x298   : > { %v1328_v48 = vadd.f32 %v1327_v49, %v1326_v4 }
 0x299   : > { %v1249_v57 = vsel %vm528_vm5, %v1241_v36, 0.0 }
 0x29a   : > { %v1250_v63 = vadd.f32 %v1249_v57, %v1248_v59  ;;  %v1289_v1 = vadd.f32 %v1287_v46, %v1249_v57 }
 0x29c   : > { %v1226_v28 = vpop.f32.mrf.mxu1 }
 0x29d   : > { %v7697_v30 = vmul.f32 0.14433756, %v1226_v28 }
 0x29f   : > { %v1242_v44 = vmul.f32 0.0, %v7697_v30  ;;  %v1329_v23 = vsel %vm528_vm5, %v7697_v30, 0.0 }
 0x2a0   : > { %v1330_v2 = vadd.f32 %v1329_v23, %v1328_v48 }
 0x2a1   : > { %v1251_v61 = vsel %vm528_vm5, %v1242_v44, 0.0 }
 0x2a2   : > { %v1252_v17 = vadd.f32 %v1251_v61, %v1250_v63  ;;  %v1291_v18 = vadd.f32 %v1289_v1, %v1251_v61 }
 0x2a4   : > { %v1229_v60 = vpop.f32.mrf.mxu1 }
 0x2a5   : > { %v1237_v62 = vmul.f32 0.14433756, %v1229_v60 }
 0x2a7   : > { %v1243_v15 = vmul.f32 0.0, %v1237_v62  ;;  %v1331_v16 = vsel %vm528_vm5, %v1237_v62, 0.0 }
 0x2a8   : > { %v1332_v22 = vadd.f32 %v1331_v16, %v1330_v2 }
 0x2a9   : > { %v1253_v25 = vsel %vm528_vm5, %v1243_v15, 0.0 }
 0x2aa   : > { %v1254_v27 = vadd.f32 %v1253_v25, %v1252_v17  ;;  %v1293_v28 = vadd.f32 %v1291_v18, %v1253_v25  ;;  %v1333_v29 = vrot.slane %v1332_v22, 4 }
 0x2ac   : > { %v1334_v32 = vadd.f32 %v1333_v29, %v1332_v22  ;;  %v1294_v33 = vrot.slane %v1293_v28, 4  ;;  %v1255_v35 = vrot.slane %v1254_v27, 4 }
 0x2ae   : > { %v1335_v36 = vrot.slane %v1334_v32, 2  ;;  %v1295_v39 = vadd.f32 %v1294_v33, %v1293_v28  ;;  %v1256_v20 = vadd.f32 %v1255_v35, %v1254_v27 }
 0x2b0   : > { %v1336_v40 = vadd.f32 %v1335_v36, %v1334_v32  ;;  %v1296_v49 = vrot.slane %v1295_v39, 2  ;;  %v1257_v44 = vrot.slane %v1256_v20, 2 }
 0x2b2   : > { %v1337_v54 = vrot.slane %v1336_v40, 1  ;;  %v1297_v53 = vadd.f32 %v1296_v49, %v1295_v39  ;;  %v1258_v4 = vadd.f32 %v1257_v44, %v1256_v20 }
 0x2b4   : > { %v1338_v57 = vadd.f32 %v1337_v54, %v1336_v40  ;;  %v1298_v23 = vrot.slane %v1297_v53, 1  ;;  %v1259_v59 = vrot.slane %v1258_v4, 1 }
 0x2b6   : > { %v1339_v46 = vsel %vm528_vm5, %v1338_v57, 0.0  ;;  %v1299_v48 = vadd.f32 %v1298_v23, %v1297_v53  ;;  %v1260_v60 = vadd.f32 %v1259_v59, %v1258_v4 }
 0x2b7   : > { %1340 = vadd.xlane.f32.xlu1 %v1339_v46 }
 0x2b8   : > { %v1300_v61 = vsel %vm528_vm5, %v1299_v48, 0.0  ;;  %v1261_v63 = vsel %vm528_vm5, %v1260_v60, 0.0 }
 0x2b9   : > { %1301 = vadd.xlane.f32.xlu0 %v1300_v61  ;;  %1262 = vadd.xlane.f32.xlu2 %v1261_v63 }
 0x32a   : > { %v1341_v1 = vpop.xlane.xlu1 %1340 }
 0x32b   : > { %v1342_v16 = vmul.f32 0.00086805556, %v1341_v1 }
 0x32c   : > { %v1302_v2 = vpop.xlane.xlu0 %1301  ;;  %v1263_v15 = vpop.xlane.xlu2 %1262 }
 0x32d   : > { %v1303_v17 = vmul.f32 0.0013020834, %v1302_v2  ;;  %v1264_v18 = vmul.f32 0.0026041667, %v1263_v15  ;;  %v1343_v27 = vmul.f32 0.0, %v1342_v16 }
 0x32f   : > { %v1304_v22 = vmul.f32 0.0, %v1303_v17  ;;  %v1266_v25 = vmul.f32 0.0, %v1264_v18 }
 0x331   : > { %v1310_v28 = vadd.f32 %v1304_v22, %v1264_v18  ;;  %v1311_v29 = vadd.f32 %v1303_v17, %v1266_v25  ;;  %v1313_v32 = vadd.f32 %v1304_v22, %v1266_v25 }
 0x333   : > { %v1349_v33 = vadd.f32 %v1343_v27, %v1310_v28  ;;  %v1350_v35 = vadd.f32 %v1343_v27, %v1311_v29  ;;  %v1352_v36 = vadd.f32 %v1342_v16, %v1313_v32 }
 0x335   : > { %v7721_v39 = vsub.f32 %v7687_v21, %v1349_v33  ;;  %v7724_v20 = vsub.f32 %v7685_v19, %v1350_v35  ;;  %v7727_v40 = vsub.f32 %v7689_v38, %v1350_v35  ;;  %v7730_v49 = vsub.f32 %v7694_v50, %v1352_v36 }
 0x336   : > { %v7733_v44 = vsub.f32 %v7697_v30, %v1352_v36  ;;  %v7735_v54 = vsub.f32 %v1237_v62, %v1352_v36 }
 0x337   : > { %v1361_v53 = vmul.f32 %v7721_v39, %v7721_v39  ;;  %v1362_v21 = vmul.f32 %v7724_v20, %v7724_v20  ;;  %v1363_v19 = vmul.f32 %v7727_v40, %v7727_v40  ;;  %v1364_v38 = vmul.f32 %v7730_v49, %v7730_v49 }
 0x338   : > { %v1365_v50 = vmul.f32 %v7733_v44, %v7733_v44  ;;  %v1366_v62 = vmul.f32 %v7735_v54, %v7735_v54 }
 0x339   : > { %v1368_v4 = vmul.f32 0.0, %v1362_v21  ;;  %v1369_v30 = vmul.f32 0.0, %v1363_v19  ;;  %v1406_v57 = vmul.f32 0.0, %v1361_v53  ;;  %v1370_v23 = vmul.f32 0.0, %v1364_v38 }
 0x33a   : > { %v1373_v59 = vsel %vm528_vm5, %v1361_v53, 0.0  ;;  %v1413_v61 = vsel %vm528_vm5, %v1362_v21, 0.0  ;;  %v1371_v15 = vmul.f32 0.0, %v1365_v50  ;;  %v1415_v17 = vsel %vm528_vm5, %v1363_v19, 0.0 }
 0x33b   : > { %v1374_v46 = vsel %vm528_vm5, %v1368_v4, 0.0  ;;  %v1412_v60 = vsel %vm528_vm5, %v1406_v57, 0.0  ;;  %v1376_v63 = vsel %vm528_vm5, %v1369_v30, 0.0  ;;  %v1372_v22 = vmul.f32 0.0, %v1366_v62 }
 0x33c   : > { %v1375_v48 = vadd.f32 %v1374_v46, %v1373_v59  ;;  %v1414_v1 = vadd.f32 %v1413_v61, %v1412_v60  ;;  %v1453_v2 = vadd.f32 %v1412_v60, %v1374_v46  ;;  %v1378_v25 = vsel %vm528_vm5, %v1370_v23, 0.0 }
 0x33d   : > { %v1456_v28 = vsel %vm528_vm5, %v1364_v38, 0.0  ;;  %v1380_v32 = vsel %vm528_vm5, %v1371_v15, 0.0  ;;  %v1458_v36 = vsel %vm528_vm5, %v1365_v50, 0.0  ;;  %v1382_v21 = vsel %vm528_vm5, %v1372_v22, 0.0 }
 0x33e   : > { %v1377_v16 = vadd.f32 %v1376_v63, %v1375_v48  ;;  %v1416_v18 = vadd.f32 %v1415_v17, %v1414_v1  ;;  %v1455_v27 = vadd.f32 %v1453_v2, %v1376_v63  ;;  %v1460_v19 = vsel %vm528_vm5, %v1366_v62, 0.0 }
 0x340   : > { %v1379_v29 = vadd.f32 %v1378_v25, %v1377_v16  ;;  %v1418_v33 = vadd.f32 %v1416_v18, %v1378_v25  ;;  %v1457_v35 = vadd.f32 %v1456_v28, %v1455_v27 }
 0x342   : > { %v1381_v53 = vadd.f32 %v1380_v32, %v1379_v29  ;;  %v1420_v4 = vadd.f32 %v1418_v33, %v1380_v32  ;;  %v1459_v30 = vadd.f32 %v1458_v36, %v1457_v35 }
 0x344   : > { %v1383_v57 = vadd.f32 %v1382_v21, %v1381_v53  ;;  %v1422_v59 = vadd.f32 %v1420_v4, %v1382_v21  ;;  %v1461_v23 = vadd.f32 %v1460_v19, %v1459_v30 }
 0x346   : > { %v1384_v46 = vrot.slane %v1383_v57, 4  ;;  %v1423_v48 = vrot.slane %v1422_v59, 4  ;;  %v1462_v38 = vrot.slane %v1461_v23, 4 }
 0x348   : > { %v1385_v60 = vadd.f32 %v1384_v46, %v1383_v57  ;;  %v1424_v61 = vadd.f32 %v1423_v48, %v1422_v59  ;;  %v1463_v63 = vadd.f32 %v1462_v38, %v1461_v23 }
 0x34a   : > { %v1386_v1 = vrot.slane %v1385_v60, 2  ;;  %v1425_v2 = vrot.slane %v1424_v61, 2  ;;  %v1464_v15 = vrot.slane %v1463_v63, 2 }
 0x34c   : > { %v1387_v50 = vadd.f32 %v1386_v1, %v1385_v60  ;;  %v1426_v16 = vadd.f32 %v1425_v2, %v1424_v61  ;;  %v1465_v17 = vadd.f32 %v1464_v15, %v1463_v63  ;;  %v870_v1 = vld [vmem:[%s7348_s16 + $0x30] sm:$0xff] }
 0x34d   : > { %6765 = vmatmul.msk.f32.gmra.mxu0 %vm528_vm5, %v870_v1 }
 0x34e   : > { %v1388_v18 = vrot.slane %v1387_v50, 1  ;;  %v1427_v22 = vrot.slane %v1426_v16, 1  ;;  %v1466_v25 = vrot.slane %v1465_v17, 1 }
 0x350   : > { %v1389_v27 = vadd.f32 %v1388_v18, %v1387_v50  ;;  %v1428_v62 = vadd.f32 %v1427_v22, %v1426_v16  ;;  %v1467_v28 = vadd.f32 %v1466_v25, %v1465_v17  ;;  %v871_v50 = vld [vmem:[%s7348_s16 + $0x38] sm:$0xff] }
 0x352   : > { %v1390_v29 = vsel %vm528_vm5, %v1389_v27, 0.0  ;;  %v1429_v32 = vsel %vm528_vm5, %v1428_v62, 0.0  ;;  %v1468_v33 = vsel %vm528_vm5, %v1467_v28, 0.0 }
 0x353   : > { %1391 = vadd.xlane.f32.xlu2 %v1390_v29  ;;  %1430 = vadd.xlane.f32.xlu0 %v1429_v32 }
 0x354   : > { %1469 = vadd.xlane.f32.xlu1 %v1468_v33 }
 0x355   : > { %6766 = vmatmul.msk.f32.gmra.mxu0 %vm528_vm5, %v871_v50 }
 0x3c6   : > { %v1392_v35 = vpop.xlane.xlu2 %1391  ;;  %v1431_v36 = vpop.xlane.xlu0 %1430 }
 0x3c7   : > { %v1470_v53 = vpop.xlane.xlu1 %1469  ;;  %v1393_v21 = vmul.f32 0.0026041667, %v1392_v35  ;;  %v1432_v4 = vmul.f32 0.0013020834, %v1431_v36  ;;  %v872_v35 = vld [vmem:[%s7348_s16 + $0x40] sm:$0xff] }
 0x3c8   : > { %v1471_v30 = vmul.f32 0.00086805556, %v1470_v53  ;;  %6767 = vmatmul.msk.f32.gmra.mxu0 %vm528_vm5, %v872_v35  ;;  %v886_v35 = vld [vmem:[%s7348_s16 + $0xb0] sm:$0xff] }
 0x3c9   : > { %v1395_v19 = vmul.f32 0.0, %v1393_v21  ;;  %v1433_v57 = vmul.f32 0.0, %v1432_v4 }
 0x3ca   : > { %v1472_v59 = vmul.f32 0.0, %v1471_v30 }
 0x3cb   : > { %v1440_v23 = vadd.f32 %v1432_v4, %v1395_v19  ;;  %v1439_v46 = vadd.f32 %v1433_v57, %v1393_v21  ;;  %v1442_v48 = vadd.f32 %v1433_v57, %v1395_v19 }
 0x3cd   : > { %v1479_v38 = vadd.f32 %v1472_v59, %v1440_v23  ;;  %v1478_v60 = vadd.f32 %v1472_v59, %v1439_v46  ;;  %v1481_v61 = vadd.f32 %v1471_v30, %v1442_v48 }
 0x3cf   : > { %v1485_v63 = vadd.f32 1e-05, %v1479_v38  ;;  %v1484_v2 = vadd.f32 1e-05, %v1478_v60  ;;  %v1487_v15 = vadd.f32 1e-05, %v1481_v61 }
 0x3d1   : > { %6923 = vrsqrt.f32 %v1485_v63  ;;  %vm1506_vm7 = vweird.f32 %v1485_v63  ;;  %vm1496_vm8 = vweird.f32 %v1484_v2  ;;  %vm1526_vm12 = vweird.f32 %v1487_v15 }
 0x3d2   : > { %6925 = vrsqrt.f32 %v1484_v2 }
 0x3d3   : > { %6927 = vrsqrt.f32 %v1487_v15 }
 0x3d7   : > { %v6924_v16 = vpop.eup %6923 }
 0x3d8   : > { %v6926_v17 = vpop.eup %6925  ;;  %v1501_v18 = vmul.f32 %v6924_v16, %v1485_v63  ;;  %vm1507_vm4 = vweird.f32 %v6924_v16  ;;  %v873_v63 = vld [vmem:[%s7348_s16 + $0x48] sm:$0xff] }
 0x3d9   : > { %v6928_v22 = vpop.eup %6927  ;;  %v1491_v25 = vmul.f32 %v6926_v17, %v1484_v2  ;;  %vm1497_vm6 = vweird.f32 %v6926_v17  ;;  %vm1508_vm9 = vmor %vm1506_vm7, %vm1507_vm4  ;;  %6768 = vmatmul.msk.f32.gmra.mxu0 %vm528_vm5, %v873_v63 }
 0x3da   : > { %v1521_v27 = vmul.f32 %v6928_v22, %v1487_v15  ;;  %v1502_v62 = vmul.f32 %v6924_v16, %v1501_v18  ;;  %vm1498_vm10 = vmor %vm1496_vm8, %vm1497_vm6  ;;  %vm1527_vm11 = vweird.f32 %v6928_v22  ;;  %v878_v18 = vld [vmem:[%s7348_s16 + $0x70] sm:$0xff] }
 0x3db   : > { %v1492_v28 = vmul.f32 %v6926_v17, %v1491_v25  ;;  %vm1528_vm13 = vmor %vm1526_vm12, %vm1527_vm11  ;;  %v880_v25 = vld [vmem:[%s7348_s16 + $0x80] sm:$0xff] }
 0x3dc   : > { %v1503_v29 = vmul.f32 0.5, %v1502_v62  ;;  %v1522_v32 = vmul.f32 %v6928_v22, %v1521_v27  ;;  %v881_v27 = vld [vmem:[%s7348_s16 + $0x88] sm:$0xff]  ;;  %v882_v62 = vld [vmem:[%s7348_s16 + $0x90] sm:$0xff] }
 0x3dd   : > { %v1493_v33 = vmul.f32 0.5, %v1492_v28  ;;  %v883_v28 = vld [vmem:[%s7348_s16 + $0x98] sm:$0xff] }
 0x3de   : > { %v1504_v36 = vsub.f32 1.5, %v1503_v29  ;;  %v1523_v53 = vmul.f32 0.5, %v1522_v32  ;;  %v884_v29 = vld [vmem:[%s7348_s16 + $0xa0] sm:$0xff]  ;;  %v885_v32 = vld [vmem:[%s7348_s16 + $0xa8] sm:$0xff] }
 0x3df   : > { %v1494_v21 = vsub.f32 1.5, %v1493_v33  ;;  %v7808_v33 = vpop.f32.mrf.mxu0 }
 0x3e0   : > { %v1505_v4 = vmul.f32 %v6924_v16, %v1504_v36  ;;  %v1524_v30 = vsub.f32 1.5, %v1523_v53  ;;  %9980 = vst [vmem:[#allocation19_spill] sm:$0xff] %v7808_v33  ;;  %v887_v53 = vld [vmem:[%s7348_s16 + $0xb8] sm:$0xff] }
 0x3e1   : > { %v1495_v19 = vmul.f32 %v6926_v17, %v1494_v21 }
 0x3e2   : > { %v1509_v57 = vsel %vm1508_vm9, %v6924_v16, %v1505_v4  ;;  %v1525_v59 = vmul.f32 %v6928_v22, %v1524_v30  ;;  %v874_v16 = vld [vmem:[%s7348_s16 + $0x50] sm:$0xff] }
 0x3e3   : > { %v1499_v23 = vsel %vm1498_vm10, %v6926_v17, %v1495_v19  ;;  %v1552_v46 = vmul.f32 %v1509_v57, %v7727_v40  ;;  %v1551_v48 = vmul.f32 %v1509_v57, %v7724_v20  ;;  %6769 = vmatmul.msk.f32.gmra.mxu0 %vm528_vm5, %v874_v16 }
 0x3e4   : > { %v1550_v38 = vmul.f32 %v1499_v23, %v7721_v39  ;;  %v1529_v2 = vsel %vm1528_vm13, %v6928_v22, %v1525_v59  ;;  %v879_v22 = vld [vmem:[%s7348_s16 + $0x78] sm:$0xff] }
 0x3e5   : > { %v1562_v60 = vsel %vm528_vm5, %v1552_v46, -inf  ;;  %v1559_v61 = vsel %vm528_vm5, %v1551_v48, -inf  ;;  %v1555_v39 = vmul.f32 %v1529_v2, %v7735_v54  ;;  %v1554_v20 = vmul.f32 %v1529_v2, %v7733_v44  ;;  %v875_v44 = vld [vmem:[%s7348_s16 + $0x58] sm:$0xff]  ;;  %v877_v54 = vld [vmem:[%s7348_s16 + $0x68] sm:$0xff] }
 0x3e6   : > { %v1556_v1 = vsel %vm528_vm5, %v1550_v38, -inf  ;;  %1563 = vmax.xlane.f32.xlu1 %v1562_v60  ;;  %1560 = vmax.xlane.f32.xlu0 %v1559_v61  ;;  %v1553_v40 = vmul.f32 %v1529_v2, %v7730_v49  ;;  %v876_v49 = vld [vmem:[%s7348_s16 + $0x60] sm:$0xff] }
 0x3e7   : > { %1557 = vmax.xlane.f32.xlu2 %v1556_v1  ;;  %v1571_v15 = vsel %vm528_vm5, %v1555_v39, -inf  ;;  %v1568_v50 = vsel %vm528_vm5, %v1554_v20, -inf  ;;  %v7812_v36 = vpop.f32.mrf.mxu0 }
 0x3e8   : > { %v1565_v17 = vsel %vm528_vm5, %v1553_v40, -inf }
 0x3eb   : > { %6770 = vmatmul.msk.f32.gmra.mxu0 %vm528_vm5, %v875_v44 }
 0x3ee   : > { %1572 = vmax.xlane.f32.xlu1 %v1571_v15  ;;  %1569 = vmax.xlane.f32.xlu0 %v1568_v50 }
 0x3ef   : > { %1566 = vmax.xlane.f32.xlu2 %v1565_v17 }
 0x3f3   : > { %6771 = vmatmul.msk.f32.gmra.mxu0 %vm528_vm5, %v876_v49 }
 0x3fb   : > { %6772 = vmatmul.msk.f32.gmra.mxu0 %vm528_vm5, %v877_v54 }
 0x403   : > { %6773 = vmatmul.msk.f32.gmra.mxu0 %vm528_vm5, %v878_v18 }
 0x40b   : > { %6774 = vmatmul.msk.f32.gmra.mxu0 %vm528_vm5, %v879_v22 }
 0x413   : > { %6775 = vmatmul.msk.f32.gmra.mxu0 %vm528_vm5, %v880_v25 }
 0x41b   : > { %6776 = vmatmul.msk.f32.gmra.mxu0 %vm528_vm5, %v881_v27 }
 0x423   : > { %6777 = vmatmul.msk.f32.gmra.mxu0 %vm528_vm5, %v882_v62 }
 0x42b   : > { %6778 = vmatmul.msk.f32.gmra.mxu0 %vm528_vm5, %v883_v28 }
 0x433   : > { %6779 = vmatmul.msk.f32.gmra.mxu0 %vm528_vm5, %v884_v29 }
 0x43b   : > { %6780 = vmatmul.msk.f32.gmra.mxu0 %vm528_vm5, %v885_v32 }
 0x443   : > { %6781 = vmatmul.msk.f32.gmra.mxu0 %vm528_vm5, %v886_v35 }
 0x445   : > { %v7816_v63 = vpop.f32.mrf.mxu0 }
 0x44b   : > { %6782 = vmatmul.msk.f32.gmra.mxu0 %vm528_vm5, %v887_v53 }
 0x456   : > { %v7824_v18 = vpop.f32.mrf.mxu0 }
 0x459   : > { %v1564_v21 = vpop.xlane.xlu1 %1563  ;;  %v1561_v4 = vpop.xlane.xlu0 %1560 }
 0x45a   : > { %v1558_v30 = vpop.xlane.xlu2 %1557  ;;  %v1576_v19 = vsub.f32 %v1552_v46, %v1564_v21  ;;  %v1575_v57 = vsub.f32 %v1551_v48, %v1561_v4 }
 0x45b   : > { %v1574_v59 = vsub.f32 %v1550_v38, %v1558_v30 }
 0x45c   : > { %v1584_v23 = vmul.f32 1.442695, %v1576_v19  ;;  %v1582_v60 = vmul.f32 1.442695, %v1575_v57 }
 0x45d   : > { %v1580_v61 = vmul.f32 1.442695, %v1574_v59 }
 0x45e   : > { %6929 = vpow2.f32 %v1584_v23 }
 0x45f   : > { %6931 = vpow2.f32 %v1580_v61 }
 0x460   : > { %6933 = vpow2.f32 %v1582_v60  ;;  %v7838_v62 = vpop.f32.mrf.mxu0 }
 0x461   : > { %v1573_v1 = vpop.xlane.xlu1 %1572  ;;  %v1570_v2 = vpop.xlane.xlu0 %1569  ;;  %9981 = vst [vmem:[#allocation20_spill] sm:$0xff] %v7838_v62 }
 0x462   : > { %v1567_v15 = vpop.xlane.xlu2 %1566  ;;  %v1579_v50 = vsub.f32 %v1555_v39, %v1573_v1  ;;  %v1578_v16 = vsub.f32 %v1554_v20, %v1570_v2 }
 0x463   : > { %v1577_v17 = vsub.f32 %v1553_v40, %v1567_v15 }
 0x464   : > { %v7818_v44 = vpop.eup %6929  ;;  %v1590_v49 = vmul.f32 1.442695, %v1579_v50  ;;  %v1588_v46 = vmul.f32 1.442695, %v1578_v16 }
 0x465   : > { %v7820_v48 = vpop.eup %6931  ;;  %v1586_v38 = vmul.f32 1.442695, %v1577_v17  ;;  %v1598_v54 = vsel %vm528_vm5, %v7818_v44, 0.0 }
 0x466   : > { %v7826_v22 = vpop.eup %6933  ;;  %6935 = vpow2.f32 %v1590_v49  ;;  %v1592_v39 = vsel %vm528_vm5, %v7820_v48, 0.0  ;;  %1599 = vadd.xlane.f32.xlu1 %v1598_v54 }
 0x467   : > { %6937 = vpow2.f32 %v1586_v38  ;;  %1593 = vadd.xlane.f32.xlu2 %v1592_v39  ;;  %v1595_v20 = vsel %vm528_vm5, %v7826_v22, 0.0 }
 0x468   : > { %6939 = vpow2.f32 %v1588_v46  ;;  %1596 = vadd.xlane.f32.xlu0 %v1595_v20  ;;  %v7846_v35 = vpop.f32.mrf.mxu0 }
 0x469   : > { %9982 = vst [vmem:[#allocation21_spill] sm:$0xff] %v7846_v35 }
 0x46c   : > { %v7832_v40 = vpop.eup %6935 }
 0x46d   : > { %v7834_v25 = vpop.eup %6937  ;;  %v1607_v27 = vsel %vm528_vm5, %v7832_v40, 0.0 }
 0x46e   : > { %v7840_v28 = vpop.eup %6939  ;;  %v1601_v29 = vsel %vm528_vm5, %v7834_v25, 0.0  ;;  %1608 = vadd.xlane.f32.xlu1 %v1607_v27 }
 0x46f   : > { %1602 = vadd.xlane.f32.xlu2 %v1601_v29  ;;  %v1604_v32 = vsel %vm528_vm5, %v7840_v28, 0.0 }
 0x470   : > { %1605 = vadd.xlane.f32.xlu0 %v1604_v32  ;;  %v7848_v53 = vpop.f32.mrf.mxu0 }
 0x478   : > { %v7850_v21 = vpop.f32.mrf.mxu0 }
 0x479   : > { %9983 = vst [vmem:[#allocation22_spill] sm:$0xff] %v7850_v21 }
 0x480   : > { %v7852_v4 = vpop.f32.mrf.mxu0 }
 0x488   : > { %v7854_v30 = vpop.f32.mrf.mxu0 }
 0x489   : > { %9984 = vst [vmem:[#allocation23_spill] sm:$0xff] %v7854_v30 }
 0x490   : > { %v7856_v19 = vpop.f32.mrf.mxu0 }
 0x491   : > { %9985 = vst [vmem:[#allocation24_spill] sm:$0xff] %v7856_v19 }
 0x498   : > { %v7858_v57 = vpop.f32.mrf.mxu0 }
 0x499   : > { %9986 = vst [vmem:[#allocation25_spill] sm:$0xff] %v7858_v57 }
 0x4a0   : > { %v7860_v59 = vpop.f32.mrf.mxu0 }
 0x4a1   : > { %9987 = vst [vmem:[#allocation26_spill] sm:$0xff] %v7860_v59 }
 0x4a8   : > { %v7862_v23 = vpop.f32.mrf.mxu0 }
 0x4a9   : > { %9988 = vst [vmem:[#allocation27_spill] sm:$0xff] %v7862_v23 }
 0x4b0   : > { %v7864_v60 = vpop.f32.mrf.mxu0 }
 0x4b1   : > { %9989 = vst [vmem:[#allocation28_spill] sm:$0xff] %v7864_v60 }
 0x4b8   : > { %v7866_v61 = vpop.f32.mrf.mxu0 }
 0x4b9   : > { %9990 = vst [vmem:[#allocation29_spill] sm:$0xff] %v7866_v61 }
 0x4c0   : > { %v7868_v1 = vpop.f32.mrf.mxu0 }
 0x4c1   : > { %9991 = vst [vmem:[#allocation30_spill] sm:$0xff] %v7868_v1 }
 0x4c8   : > { %v7870_v16 = vpop.f32.mrf.mxu0 }
 0x4c9   : > { %9992 = vst [vmem:[#allocation31_spill] sm:$0xff] %v7870_v16 }
 0x4d9   : > { %v1600_v2 = vpop.xlane.xlu1 %1599 }
 0x4da   : > { %v1594_v15 = vpop.xlane.xlu2 %1593  ;;  %6941 = vrcp.f32 %v1600_v2  ;;  %v1647_v49 = vand.u32 2147483647, %v1600_v2  ;;  %vm1643_vm14 = vweird.f32 %v1600_v2  ;;  %v1649_v54 = vand.u32 2147483648, %v1600_v2 }
 0x4db   : > { %6943 = vrcp.f32 %v1594_v15  ;;  %v1597_v50 = vpop.xlane.xlu0 %1596  ;;  %vm1615_vm15 = vweird.f32 %v1594_v15  ;;  %v1619_v29 = vand.u32 2147483647, %v1594_v15  ;;  %v1621_v37 = vand.u32 2147483648, %v1594_v15 }
 0x4dc   : > { %6945 = vrcp.f32 %v1597_v50  ;;  %vm7880_vm0 = vcmp.eq.f32.partialorder %v1647_v49, 8.507059e+37  ;;  %v1633_v9 = vand.u32 2147483647, %v1597_v50  ;;  %v1635_v11 = vand.u32 2147483648, %v1597_v50 }
 0x4dd   : > { %v1650_v13 = vor.u32 1.1754944e-38, %v1649_v54  ;;  %vm1629_vm4 = vweird.f32 %v1597_v50  ;;  %vm7885_vm6 = vcmp.eq.f32.partialorder %v1619_v29, 8.507059e+37  ;;  %v1622_v52 = vor.u32 1.1754944e-38, %v1621_v37 }
 0x4de   : > { %vm7890_vm9 = vcmp.eq.f32.partialorder %v1633_v9, 8.507059e+37 }
 0x4e0   : > { %v6942_v17 = vpop.eup %6941 }
 0x4e1   : > { %v6944_v46 = vpop.eup %6943  ;;  %v1639_v38 = vmul.f32 %v6942_v17, %v1600_v2  ;;  %v7872_v39 = vpop.xlane.xlu1 %1608  ;;  %vm1644_vm1 = vweird.f32 %v6942_v17 }
 0x4e2   : > { %v6946_v20 = vpop.eup %6945  ;;  %v1611_v27 = vmul.f32 %v6944_v46, %v1594_v15  ;;  %v7874_v32 = vpop.xlane.xlu2 %1602  ;;  %6947 = vrcp.f32 %v7872_v39  ;;  %vm1616_vm2 = vweird.f32 %v6944_v46  ;;  %vm1645_vm8 = vmor %vm1643_vm14, %vm1644_vm1  ;;  %vm1685_vm14 = vweird.f32 %v7872_v39 }
 0x4e3   : > { %v1640_v26 = vsub.f32 1.0, %v1639_v38  ;;  %v1625_v6 = vmul.f32 %v6946_v20, %v1597_v50  ;;  %6949 = vrcp.f32 %v7874_v32  ;;  %v7878_v7 = vpop.xlane.xlu0 %1605  ;;  %vm1630_vm7 = vweird.f32 %v6946_v20  ;;  %vm1617_vm10 = vmor %vm1615_vm15, %vm1616_vm2 }
 0x4e4   : > { %v1612_v14 = vsub.f32 1.0, %v1611_v27  ;;  %6951 = vrcp.f32 %v7878_v7  ;;  %v1663_v56 = vand.u32 2147483648, %v7874_v32  ;;  %vm1631_vm11 = vmor %vm1629_vm4, %vm1630_vm7  ;;  %v1691_v50 = vand.u32 2147483648, %v7872_v39 }
 0x4e5   : > { %v1641_v31 = vmul.f32 %v6942_v17, %v1640_v26  ;;  %v1626_v3 = vsub.f32 1.0, %v1625_v6  ;;  %v1636_v6 = vor.u32 1.1754944e-38, %v1635_v11  ;;  %v1689_v11 = vand.u32 2147483647, %v7872_v39 }
 0x4e6   : > { %v1613_v8 = vmul.f32 %v6944_v46, %v1612_v14  ;;  %vm1657_vm15 = vweird.f32 %v7874_v32  ;;  %vm1671_vm7 = vweird.f32 %v7878_v7 }
 0x4e7   : > { %v1642_v27 = vadd.f32 %v6942_v17, %v1641_v31  ;;  %v1627_v49 = vmul.f32 %v6946_v20, %v1626_v3  ;;  %vm1690_vm1 = vcmp.eq.f32.partialorder %v1689_v11, 8.507059e+37 }
 0x4e8   : > { %v6948_v12 = vpop.eup %6947  ;;  %v1614_v45 = vadd.f32 %v6944_v46, %v1613_v8 }
 0x4e9   : > { %v6950_v14 = vpop.eup %6949  ;;  %v1646_v54 = vsel %vm1645_vm8, %v6942_v17, %v1642_v27  ;;  %v1628_v29 = vadd.f32 %v6946_v20, %v1627_v49  ;;  %v1681_v31 = vmul.f32 %v6948_v12, %v7872_v39  ;;  %vm1686_vm12 = vweird.f32 %v6948_v12 }
 0x4ea   : > { %v1618_v3 = vsel %vm1617_vm10, %v6944_v46, %v1614_v45  ;;  %v1651_v37 = vsel %vm7880_vm0, %v1650_v13, %v1646_v54  ;;  %v1653_v9 = vmul.f32 %v6950_v14, %v7874_v32  ;;  %v6952_v27 = vpop.eup %6951  ;;  %vm1658_vm13 = vweird.f32 %v6950_v14  ;;  %vm1687_vm0 = vmor %vm1685_vm14, %vm1686_vm12 }
 0x4eb   : > { %v1623_v8 = vsel %vm7885_vm6, %v1622_v52, %v1618_v3  ;;  %v7906_v2 = vmul.f32 %v7818_v44, %v1651_v37  ;;  %v1632_v15 = vsel %vm1631_vm11, %v6946_v20, %v1628_v29  ;;  %v1682_v17 = vsub.f32 1.0, %v1681_v31  ;;  %vm1659_vm2 = vmor %vm1657_vm15, %vm1658_vm13 }
 0x4ec   : > { %v7909_v45 = vmul.f32 %v7820_v48, %v1623_v8  ;;  %v1637_v24 = vsel %vm7890_vm9, %v1636_v6, %v1632_v15  ;;  %v1654_v13 = vsub.f32 1.0, %v1653_v9  ;;  %v1667_v52 = vmul.f32 %v6952_v27, %v7878_v7 }
 0x4ed   : > { %v7915_v46 = vmul.f32 %v7826_v22, %v1637_v24  ;;  %v1683_v38 = vmul.f32 %v6948_v12, %v1682_v17  ;;  %v1661_v20 = vand.u32 2147483647, %v7874_v32  ;;  %v1664_v48 = vor.u32 1.1754944e-38, %v1663_v56 }
 0x4ee   : > { %v1655_v44 = vmul.f32 %v6950_v14, %v1654_v13  ;;  %v1668_v26 = vsub.f32 1.0, %v1667_v52  ;;  %v1692_v22 = vor.u32 1.1754944e-38, %v1691_v50  ;;  %v1677_v54 = vand.u32 2147483648, %v7878_v7 }
 0x4ef   : > { %v1684_v49 = vadd.f32 %v6948_v12, %v1683_v38  ;;  %vm1672_vm4 = vweird.f32 %v6952_v27  ;;  %v1675_v3 = vand.u32 2147483647, %v7878_v7  ;;  %vm1662_vm6 = vcmp.eq.f32.partialorder %v1661_v20, 8.507059e+37 }
 0x4f0   : > { %v1656_v6 = vadd.f32 %v6950_v14, %v1655_v44  ;;  %v1669_v31 = vmul.f32 %v6952_v27, %v1668_v26  ;;  %vm1673_vm8 = vmor %vm1671_vm7, %vm1672_vm4  ;;  %v1678_v8 = vor.u32 1.1754944e-38, %v1677_v54 }
 0x4f1   : > { %v1688_v29 = vsel %vm1687_vm0, %v6948_v12, %v1684_v49  ;;  %vm1676_vm9 = vcmp.eq.f32.partialorder %v1675_v3, 8.507059e+37 }
 0x4f2   : > { %v1660_v37 = vsel %vm1659_vm2, %v6950_v14, %v1656_v6  ;;  %v1693_v39 = vsel %vm1690_vm1, %v1692_v22, %v1688_v29  ;;  %v1670_v32 = vadd.f32 %v6952_v27, %v1669_v31  ;;  %1702 = sbr.rel (%p6801_p5) target bundleno = 1277 (0x4fd), region = 56 }
 0x4f3   : > { %v1665_v9 = vsel %vm1662_vm6, %v1664_v48, %v1660_v37  ;;  %v7924_v56 = vmul.f32 %v7832_v40, %v1693_v39 }
 0x4f4   : > { %v7928_v11 = vmul.f32 %v7834_v25, %v1665_v9  ;;  %v1674_v12 = vsel %vm1673_vm8, %v6952_v27, %v1670_v32 }
 0x4f5   : > { %v1679_v15 = vsel %vm1676_vm9, %v1678_v8, %v1674_v12 }
 0x4f6   : > { %v7931_v17 = vmul.f32 %v7840_v28, %v1679_v15 }
 0x4f7   : > { %1703 = vst.msk [vmem:[%s9929_s8] sm:$0xff] %vm528_vm5, %v7909_v45 }
 0x4f8   : > { %1704 = vst.msk [vmem:[%s9929_s8 + $0x8] sm:$0xff] %vm528_vm5, %v7915_v46 }
 0x4f9   : > { %1705 = vst.msk [vmem:[%s9929_s8 + $0x10] sm:$0xff] %vm528_vm5, %v7906_v2 }
 0x4fa   : > { %1706 = vst.msk [vmem:[%s9929_s8 + $0x18] sm:$0xff] %vm528_vm5, %v7928_v11 }
 0x4fb   : > { %1707 = vst.msk [vmem:[%s9929_s8 + $0x20] sm:$0xff] %vm528_vm5, %v7931_v17 }
 0x4fc   : > { %1708 = vst.msk [vmem:[%s9929_s8 + $0x28] sm:$0xff] %vm528_vm5, %v7924_v56 }
 0x4fd PF: > { %v6953_v7 = vpack.i.bf16 %v7622_v41, %v7635_v58  ;;  %s7275_s15 = smov 80  }
 0x4ff   : > { %6954 = vrot.lane.b32.xlu0 %v6953_v7, %s7275_s15 }
 0x571   : > { %v6955_v40 = vpop.permute.xlu0 %6954 }
 0x572   : > { %v6956_v25 = vunpack.i.l.bf16 %v6955_v40  ;;  %v6957_v28 = vunpack.i.h.bf16 %v6955_v40 }
 0x574   : > { %1749 = vmatpush.msrb.mxu2 %v6956_v25 }
 0x576   : > { %1750 = vmatpush.msrb.mxu2 %v6957_v28 }
 0x577   : > { %6802 = vmatmul.msk.f32.vlgmr.msrb.gmra.mxu2 %vm1178_vm3, %v7808_v33 }
 0x57f   : > { %6803 = vmatmul.msk.f32.gmra.mxu2 %vm1178_vm3, %v7812_v36 }
 0x587   : > { %6804 = vmatmul.msk.f32.gmra.mxu2 %vm1178_vm3, %v7816_v63 }
 0x58f   : > { %6805 = vmatmul.msk.f32.gmra.mxu2 %vm1178_vm3, %v7824_v18 }
 0x597   : > { %6806 = vmatmul.msk.f32.gmra.mxu2 %vm1178_vm3, %v7838_v62 }
 0x59f   : > { %6807 = vmatmul.msk.f32.gmra.mxu2 %vm1178_vm3, %v7846_v35 }
 0x5fa   : > { %v1752_v14 = vpop.f32.mrf.mxu2 }
 0x5fb   : > { %v7983_v38 = vmul.f32 0.14433756, %v1752_v14 }
 0x5fd   : > { %v1815_v20 = vmul.f32 0.0, %v7983_v38  ;;  %v1782_v39 = vsel %vm528_vm5, %v7983_v38, 0.0 }
 0x5ff   : > { %v1821_v54 = vsel %vm528_vm5, %v1815_v20, 0.0 }
 0x602   : > { %v1755_v27 = vpop.f32.mrf.mxu2 }
 0x603   : > { %v7981_v50 = vmul.f32 0.14433756, %v1755_v27 }
 0x605   : > { %v1777_v44 = vmul.f32 0.0, %v7981_v50  ;;  %v1822_v29 = vsel %vm528_vm5, %v7981_v50, 0.0 }
 0x606   : > { %v1823_v15 = vadd.f32 %v1822_v29, %v1821_v54 }
 0x607   : > { %v1783_v6 = vsel %vm528_vm5, %v1777_v44, 0.0 }
 0x608   : > { %v1862_v37 = vadd.f32 %v1821_v54, %v1783_v6  ;;  %v1784_v12 = vadd.f32 %v1783_v6, %v1782_v39 }
 0x60a   : > { %v1758_v24 = vpop.f32.mrf.mxu2 }
 0x60b   : > { %v7985_v52 = vmul.f32 0.14433756, %v1758_v24 }
 0x60d   : > { %v1778_v48 = vmul.f32 0.0, %v7985_v52  ;;  %v1824_v9 = vsel %vm528_vm5, %v7985_v52, 0.0 }
 0x60e   : > { %v1825_v14 = vadd.f32 %v1824_v9, %v1823_v15 }
 0x60f   : > { %v1785_v31 = vsel %vm528_vm5, %v1778_v48, 0.0 }
 0x610   : > { %v1864_v7 = vadd.f32 %v1862_v37, %v1785_v31  ;;  %v1786_v28 = vadd.f32 %v1785_v31, %v1784_v12 }
 0x612   : > { %v1761_v13 = vpop.f32.mrf.mxu2 }
 0x613   : > { %v7990_v49 = vmul.f32 0.14433756, %v1761_v13 }
 0x615   : > { %v1779_v3 = vmul.f32 0.0, %v7990_v49  ;;  %v1865_v32 = vsel %vm528_vm5, %v7990_v49, 0.0 }
 0x616   : > { %v1866_v27 = vadd.f32 %v1865_v32, %v1864_v7 }
 0x617   : > { %v1787_v40 = vsel %vm528_vm5, %v1779_v3, 0.0 }
 0x618   : > { %v1788_v20 = vadd.f32 %v1787_v40, %v1786_v28  ;;  %v1827_v48 = vadd.f32 %v1825_v14, %v1787_v40 }
 0x61a   : > { %v1764_v26 = vpop.f32.mrf.mxu2 }
 0x61b   : > { %v7993_v22 = vmul.f32 0.14433756, %v1764_v26 }
 0x61d   : > { %v1780_v8 = vmul.f32 0.0, %v7993_v22  ;;  %v1867_v25 = vsel %vm528_vm5, %v7993_v22, 0.0 }
 0x61e   : > { %v1868_v26 = vadd.f32 %v1867_v25, %v1866_v27 }
 0x61f   : > { %v1789_v13 = vsel %vm528_vm5, %v1780_v8, 0.0 }
 0x620   : > { %v1790_v54 = vadd.f32 %v1789_v13, %v1788_v20  ;;  %v1829_v29 = vadd.f32 %v1827_v48, %v1789_v13 }
 0x622   : > { %v1767_v24 = vpop.f32.mrf.mxu2 }
 0x623   : > { %v1775_v44 = vmul.f32 0.14433756, %v1767_v24 }
 0x625   : > { %v1781_v35 = vmul.f32 0.0, %v1775_v44  ;;  %v1869_v6 = vsel %vm528_vm5, %v1775_v44, 0.0 }
 0x626   : > { %v1870_v37 = vadd.f32 %v1869_v6, %v1868_v26 }
 0x627   : > { %v1791_v3 = vsel %vm528_vm5, %v1781_v35, 0.0 }
 0x628   : > { %v1792_v39 = vadd.f32 %v1791_v3, %v1790_v54  ;;  %v1831_v33 = vadd.f32 %v1829_v29, %v1791_v3  ;;  %v1871_v31 = vrot.slane %v1870_v37, 4 }
 0x62a   : > { %v1832_v9 = vrot.slane %v1831_v33, 4  ;;  %v1793_v32 = vrot.slane %v1792_v39, 4  ;;  %v1872_v12 = vadd.f32 %v1871_v31, %v1870_v37 }
 0x62c   : > { %v1833_v15 = vadd.f32 %v1832_v9, %v1831_v33  ;;  %v1794_v8 = vadd.f32 %v1793_v32, %v1792_v39  ;;  %v1873_v40 = vrot.slane %v1872_v12, 2 }
 0x62e   : > { %v1834_v7 = vrot.slane %v1833_v15, 2  ;;  %v1795_v28 = vrot.slane %v1794_v8, 2  ;;  %v1874_v20 = vadd.f32 %v1873_v40, %v1872_v12 }
 0x630   : > { %v1835_v25 = vadd.f32 %v1834_v7, %v1833_v15  ;;  %v1796_v14 = vadd.f32 %v1795_v28, %v1794_v8  ;;  %v1875_v6 = vrot.slane %v1874_v20, 1 }
 0x632   : > { %v1836_v27 = vrot.slane %v1835_v25, 1  ;;  %v1797_v24 = vrot.slane %v1796_v14, 1  ;;  %v1876_v54 = vadd.f32 %v1875_v6, %v1874_v20 }
 0x634   : > { %v1837_v13 = vadd.f32 %v1836_v27, %v1835_v25  ;;  %v1798_v48 = vadd.f32 %v1797_v24, %v1796_v14  ;;  %v1877_v33 = vsel %vm528_vm5, %v1876_v54, 0.0 }
 0x636   : > { %v1838_v35 = vsel %vm528_vm5, %v1837_v13, 0.0  ;;  %v1799_v26 = vsel %vm528_vm5, %v1798_v48, 0.0 }
 0x637   : > { %1839 = vadd.xlane.f32.xlu1 %v1838_v35  ;;  %1800 = vadd.xlane.f32.xlu0 %v1799_v26 }
 0x63f   : > { %1878 = vadd.xlane.f32.xlu1 %v1877_v33 }
 0x6aa   : > { %v1840_v29 = vpop.xlane.xlu1 %1839  ;;  %v1801_v37 = vpop.xlane.xlu0 %1800 }
 0x6ab   : > { %v1841_v3 = vmul.f32 0.0013020834, %v1840_v29  ;;  %v1802_v39 = vmul.f32 0.0026041667, %v1801_v37 }
 0x6ad   : > { %v1842_v31 = vmul.f32 0.0, %v1841_v3  ;;  %v1804_v9 = vmul.f32 0.0, %v1802_v39 }
 0x6af   : > { %v1851_v12 = vadd.f32 %v1842_v31, %v1804_v9  ;;  %v1848_v8 = vadd.f32 %v1842_v31, %v1802_v39  ;;  %v1849_v7 = vadd.f32 %v1841_v3, %v1804_v9 }
 0x6b2   : > { %v1879_v32 = vpop.xlane.xlu1 %1878 }
 0x6b3   : > { %v1880_v15 = vmul.f32 0.00086805556, %v1879_v32 }
 0x6b5   : > { %v1881_v28 = vmul.f32 0.0, %v1880_v15  ;;  %v1890_v40 = vadd.f32 %v1880_v15, %v1851_v12 }
 0x6b7   : > { %v1887_v25 = vadd.f32 %v1881_v28, %v1848_v8  ;;  %v1888_v14 = vadd.f32 %v1881_v28, %v1849_v7  ;;  %v8017_v27 = vsub.f32 %v7990_v49, %v1890_v40  ;;  %v8029_v48 = vsub.f32 %v7993_v22, %v1890_v40 }
 0x6b8   : > { %v8031_v35 = vsub.f32 %v1775_v44, %v1890_v40 }
 0x6b9   : > { %v8020_v24 = vsub.f32 %v7983_v38, %v1887_v25  ;;  %v8023_v20 = vsub.f32 %v7981_v50, %v1888_v14  ;;  %v8026_v13 = vsub.f32 %v7985_v52, %v1888_v14  ;;  %v1902_v26 = vmul.f32 %v8017_v27, %v8017_v27 }
 0x6ba   : > { %v1903_v52 = vmul.f32 %v8029_v48, %v8029_v48  ;;  %v1904_v44 = vmul.f32 %v8031_v35, %v8031_v35 }
 0x6bb   : > { %v1899_v49 = vmul.f32 %v8020_v24, %v8020_v24  ;;  %v1900_v38 = vmul.f32 %v8023_v20, %v8023_v20  ;;  %v1901_v50 = vmul.f32 %v8026_v13, %v8026_v13  ;;  %v1908_v33 = vmul.f32 0.0, %v1902_v26 }
 0x6bc   : > { %v1909_v8 = vmul.f32 0.0, %v1903_v52  ;;  %v1994_v25 = vsel %vm528_vm5, %v1902_v26, 0.0  ;;  %v1910_v14 = vmul.f32 0.0, %v1904_v44 }
 0x6bd   : > { %v1906_v6 = vmul.f32 0.0, %v1900_v38  ;;  %v1907_v22 = vmul.f32 0.0, %v1901_v50  ;;  %v1944_v54 = vmul.f32 0.0, %v1899_v49  ;;  %v1911_v29 = vsel %vm528_vm5, %v1899_v49, 0.0 }
 0x6be   : > { %v1951_v39 = vsel %vm528_vm5, %v1900_v38, 0.0  ;;  %v1953_v15 = vsel %vm528_vm5, %v1901_v50, 0.0  ;;  %v1916_v49 = vsel %vm528_vm5, %v1908_v33, 0.0  ;;  %v1996_v38 = vsel %vm528_vm5, %v1903_v52, 0.0 }
 0x6bf   : > { %v1912_v37 = vsel %vm528_vm5, %v1906_v6, 0.0  ;;  %v1950_v3 = vsel %vm528_vm5, %v1944_v54, 0.0  ;;  %v1914_v12 = vsel %vm528_vm5, %v1907_v22, 0.0  ;;  %v1998_v50 = vsel %vm528_vm5, %v1904_v44, 0.0 }
 0x6c0   : > { %v1913_v31 = vadd.f32 %v1912_v37, %v1911_v29  ;;  %v1952_v9 = vadd.f32 %v1951_v39, %v1950_v3  ;;  %v1991_v32 = vadd.f32 %v1950_v3, %v1912_v37  ;;  %v1918_v29 = vsel %vm528_vm5, %v1909_v8, 0.0 }
 0x6c1   : > { %v1920_v39 = vsel %vm528_vm5, %v1910_v14, 0.0 }
 0x6c2   : > { %v1915_v7 = vadd.f32 %v1914_v12, %v1913_v31  ;;  %v1954_v28 = vadd.f32 %v1953_v15, %v1952_v9  ;;  %v1993_v40 = vadd.f32 %v1991_v32, %v1914_v12 }
 0x6c4   : > { %v1995_v6 = vadd.f32 %v1994_v25, %v1993_v40  ;;  %v1917_v54 = vadd.f32 %v1916_v49, %v1915_v7  ;;  %v1956_v62 = vadd.f32 %v1954_v28, %v1916_v49 }
 0x6c6   : > { %v1997_v37 = vadd.f32 %v1996_v38, %v1995_v6  ;;  %v1919_v22 = vadd.f32 %v1918_v29, %v1917_v54  ;;  %v1958_v3 = vadd.f32 %v1956_v62, %v1918_v29 }
 0x6c8   : > { %v1999_v31 = vadd.f32 %v1998_v50, %v1997_v37  ;;  %v1921_v9 = vadd.f32 %v1920_v39, %v1919_v22  ;;  %v1960_v26 = vadd.f32 %v1958_v3, %v1920_v39 }
 0x6ca   : > { %v2000_v32 = vrot.slane %v1999_v31, 4  ;;  %v1922_v12 = vrot.slane %v1921_v9, 4  ;;  %v1961_v33 = vrot.slane %v1960_v26, 4 }
 0x6cc   : > { %v2001_v15 = vadd.f32 %v2000_v32, %v1999_v31  ;;  %v1923_v7 = vadd.f32 %v1922_v12, %v1921_v9  ;;  %v1962_v28 = vadd.f32 %v1961_v33, %v1960_v26 }
 0x6ce   : > { %v2002_v40 = vrot.slane %v2001_v15, 2  ;;  %v1924_v52 = vrot.slane %v1923_v7, 2  ;;  %v1963_v25 = vrot.slane %v1962_v28, 2 }
 0x6d0   : > { %v2003_v8 = vadd.f32 %v2002_v40, %v2001_v15  ;;  %v1925_v49 = vadd.f32 %v1924_v52, %v1923_v7  ;;  %v1964_v54 = vadd.f32 %v1963_v25, %v1962_v28 }
 0x6d2   : > { %v2004_v6 = vrot.slane %v2003_v8, 1  ;;  %v1926_v62 = vrot.slane %v1925_v49, 1  ;;  %v1965_v37 = vrot.slane %v1964_v54, 1 }
 0x6d4   : > { %v2005_v44 = vadd.f32 %v2004_v6, %v2003_v8  ;;  %v1927_v38 = vadd.f32 %v1926_v62, %v1925_v49  ;;  %v1966_v22 = vadd.f32 %v1965_v37, %v1964_v54 }
 0x6d6   : > { %v2006_v14 = vsel %vm528_vm5, %v2005_v44, 0.0  ;;  %v1928_v29 = vsel %vm528_vm5, %v1927_v38, 0.0  ;;  %v1967_v3 = vsel %vm528_vm5, %v1966_v22, 0.0 }
 0x6d7   : > { %2007 = vadd.xlane.f32.xlu1 %v2006_v14  ;;  %1929 = vadd.xlane.f32.xlu2 %v1928_v29 }
 0x6df   : > { %1968 = vadd.xlane.f32.xlu2 %v1967_v3 }
 0x74a   : > { %v1930_v50 = vpop.xlane.xlu2 %1929  ;;  %v2008_v39 = vpop.xlane.xlu1 %2007 }
 0x74b   : > { %v1931_v31 = vmul.f32 0.0026041667, %v1930_v50  ;;  %v2009_v9 = vmul.f32 0.00086805556, %v2008_v39 }
 0x74d   : > { %v1933_v32 = vmul.f32 0.0, %v1931_v31  ;;  %v2010_v33 = vmul.f32 0.0, %v2009_v9 }
 0x752   : > { %v1969_v26 = vpop.xlane.xlu2 %1968 }
 0x753   : > { %v1970_v12 = vmul.f32 0.0013020834, %v1969_v26 }
 0x755   : > { %v1971_v15 = vmul.f32 0.0, %v1970_v12  ;;  %v1978_v7 = vadd.f32 %v1970_v12, %v1933_v32 }
 0x757   : > { %v1977_v28 = vadd.f32 %v1971_v15, %v1931_v31  ;;  %v1980_v40 = vadd.f32 %v1971_v15, %v1933_v32  ;;  %v2017_v52 = vadd.f32 %v2010_v33, %v1978_v7 }
 0x759   : > { %v2016_v25 = vadd.f32 %v2010_v33, %v1977_v28  ;;  %v2019_v8 = vadd.f32 %v2009_v9, %v1980_v40  ;;  %v2023_v49 = vadd.f32 1e-05, %v2017_v52 }
 0x75b   : > { %v2022_v6 = vadd.f32 1e-05, %v2016_v25  ;;  %v2025_v62 = vadd.f32 1e-05, %v2019_v8  ;;  %6958 = vrsqrt.f32 %v2023_v49  ;;  %vm2044_vm11 = vweird.f32 %v2023_v49 }
 0x75d   : > { %6960 = vrsqrt.f32 %v2022_v6  ;;  %vm2034_vm14 = vweird.f32 %v2022_v6  ;;  %vm2064_vm1 = vweird.f32 %v2025_v62 }
 0x75e   : > { %6962 = vrsqrt.f32 %v2025_v62 }
 0x761   : > { %v6959_v54 = vpop.eup %6958 }
 0x762   : > { %v2039_v44 = vmul.f32 %v6959_v54, %v2023_v49  ;;  %vm2045_vm10 = vweird.f32 %v6959_v54 }
 0x763   : > { %v6961_v38 = vpop.eup %6960  ;;  %vm2046_vm13 = vmor %vm2044_vm11, %vm2045_vm10 }
 0x764   : > { %v6963_v14 = vpop.eup %6962  ;;  %v2029_v29 = vmul.f32 %v6961_v38, %v2022_v6  ;;  %v2040_v37 = vmul.f32 %v6959_v54, %v2039_v44  ;;  %vm2035_vm12 = vweird.f32 %v6961_v38 }
 0x765   : > { %v2059_v22 = vmul.f32 %v6963_v14, %v2025_v62  ;;  %vm2065_vm15 = vweird.f32 %v6963_v14  ;;  %vm2036_vm0 = vmor %vm2034_vm14, %vm2035_vm12 }
 0x766   : > { %v2041_v3 = vmul.f32 0.5, %v2040_v37  ;;  %v2030_v50 = vmul.f32 %v6961_v38, %v2029_v29  ;;  %vm2066_vm2 = vmor %vm2064_vm1, %vm2065_vm15 }
 0x767   : > { %v2060_v39 = vmul.f32 %v6963_v14, %v2059_v22 }
 0x768   : > { %v2042_v31 = vsub.f32 1.5, %v2041_v3  ;;  %v2031_v26 = vmul.f32 0.5, %v2030_v50 }
 0x769   : > { %v2061_v9 = vmul.f32 0.5, %v2060_v39 }
 0x76a   : > { %v2043_v32 = vmul.f32 %v6959_v54, %v2042_v31  ;;  %v2032_v12 = vsub.f32 1.5, %v2031_v26 }
 0x76b   : > { %v2062_v33 = vsub.f32 1.5, %v2061_v9 }
 0x76c   : > { %v2047_v15 = vsel %vm2046_vm13, %v6959_v54, %v2043_v32  ;;  %v2033_v7 = vmul.f32 %v6961_v38, %v2032_v12 }
 0x76d   : > { %v2089_v28 = vmul.f32 %v2047_v15, %v8023_v20  ;;  %v2063_v40 = vmul.f32 %v6963_v14, %v2062_v33  ;;  %v2090_v6 = vmul.f32 %v2047_v15, %v8026_v13 }
 0x76e   : > { %v2037_v52 = vsel %vm2036_vm0, %v6961_v38, %v2033_v7 }
 0x76f   : > { %v2097_v25 = vsel %vm528_vm5, %v2089_v28, -inf  ;;  %v2088_v8 = vmul.f32 %v2037_v52, %v8020_v24  ;;  %v2067_v49 = vsel %vm2066_vm2, %v6963_v14, %v2063_v40  ;;  %v2100_v38 = vsel %vm528_vm5, %v2090_v6, -inf }
 0x770   : > { %2098 = vmax.xlane.f32.xlu1 %v2097_v25  ;;  %v2091_v54 = vmul.f32 %v2067_v49, %v8017_v27  ;;  %v2093_v62 = vmul.f32 %v2067_v49, %v8031_v35  ;;  %v2092_v24 = vmul.f32 %v2067_v49, %v8029_v48 }
 0x771   : > { %v2094_v44 = vsel %vm528_vm5, %v2088_v8, -inf }
 0x772   : > { %2095 = vmax.xlane.f32.xlu2 %v2094_v44  ;;  %v2103_v20 = vsel %vm528_vm5, %v2091_v54, -inf  ;;  %v2109_v29 = vsel %vm528_vm5, %v2093_v62, -inf  ;;  %v2106_v14 = vsel %vm528_vm5, %v2092_v24, -inf }
 0x778   : > { %2104 = vmax.xlane.f32.xlu1 %v2103_v20 }
 0x77a   : > { %2101 = vmax.xlane.f32.xlu2 %v2100_v38 }
 0x780   : > { %2110 = vmax.xlane.f32.xlu1 %v2109_v29 }
 0x782   : > { %2107 = vmax.xlane.f32.xlu2 %v2106_v14 }
 0x7e3   : > { %v2099_v37 = vpop.xlane.xlu1 %2098 }
 0x7e4   : > { %v2113_v27 = vsub.f32 %v2089_v28, %v2099_v37 }
 0x7e5   : > { %v2096_v22 = vpop.xlane.xlu2 %2095 }
 0x7e6   : > { %v2120_v13 = vmul.f32 1.442695, %v2113_v27  ;;  %v2112_v3 = vsub.f32 %v2088_v8, %v2096_v22 }
 0x7e8   : > { %6964 = vpow2.f32 %v2120_v13  ;;  %v2118_v50 = vmul.f32 1.442695, %v2112_v3 }
 0x7ea   : > { %6966 = vpow2.f32 %v2118_v50 }
 0x7eb   : > { %v2105_v39 = vpop.xlane.xlu1 %2104 }
 0x7ec   : > { %v2115_v31 = vsub.f32 %v2091_v54, %v2105_v39 }
 0x7ed   : > { %v2102_v26 = vpop.xlane.xlu2 %2101 }
 0x7ee   : > { %v8072_v35 = vpop.eup %6964  ;;  %v2124_v48 = vmul.f32 1.442695, %v2115_v31  ;;  %v2114_v9 = vsub.f32 %v2090_v6, %v2102_v26 }
 0x7ef   : > { %v2133_v32 = vsel %vm528_vm5, %v8072_v35, 0.0 }
 0x7f0   : > { %v8076_v12 = vpop.eup %6966  ;;  %6968 = vpow2.f32 %v2124_v48  ;;  %v2122_v33 = vmul.f32 1.442695, %v2114_v9  ;;  %2134 = vadd.xlane.f32.xlu1 %v2133_v32 }
 0x7f1   : > { %v2130_v15 = vsel %vm528_vm5, %v8076_v12, 0.0 }
 0x7f2   : > { %6970 = vpow2.f32 %v2122_v33  ;;  %2131 = vadd.xlane.f32.xlu2 %v2130_v15 }
 0x7f3   : > { %v2111_v7 = vpop.xlane.xlu1 %2110 }
 0x7f4   : > { %v2117_v28 = vsub.f32 %v2093_v62, %v2111_v7 }
 0x7f5   : > { %v2108_v40 = vpop.xlane.xlu2 %2107 }
 0x7f6   : > { %v8080_v52 = vpop.eup %6968  ;;  %v2128_v25 = vmul.f32 1.442695, %v2117_v28  ;;  %v2116_v8 = vsub.f32 %v2092_v24, %v2108_v40 }
 0x7f7   : > { %v2139_v49 = vsel %vm528_vm5, %v8080_v52, 0.0 }
 0x7f8   : > { %v8084_v44 = vpop.eup %6970  ;;  %6972 = vpow2.f32 %v2128_v25  ;;  %v2126_v54 = vmul.f32 1.442695, %v2116_v8  ;;  %2140 = vadd.xlane.f32.xlu0 %v2139_v49 }
 0x7f9   : > { %v2136_v6 = vsel %vm528_vm5, %v8084_v44, 0.0 }
 0x7fa   : > { %6974 = vpow2.f32 %v2126_v54  ;;  %2137 = vadd.xlane.f32.xlu2 %v2136_v6 }
 0x7fe   : > { %v8088_v20 = vpop.eup %6972 }
 0x7ff   : > { %v2145_v62 = vsel %vm528_vm5, %v8088_v20, 0.0 }
 0x800   : > { %v8090_v38 = vpop.eup %6974 }
 0x801   : > { %v2142_v24 = vsel %vm528_vm5, %v8090_v38, 0.0 }
 0x802   : > { %2146 = vadd.xlane.f32.xlu2 %v2145_v62  ;;  %2143 = vadd.xlane.f32.xlu1 %v2142_v24 }
 0x863   : > { %v2135_v29 = vpop.xlane.xlu1 %2134 }
 0x864   : > { %6976 = vrcp.f32 %v2135_v29  ;;  %v2171_v31 = vand.u32 2147483647, %v2135_v29  ;;  %v2173_v26 = vand.u32 2147483648, %v2135_v29  ;;  %vm2167_vm6 = vweird.f32 %v2135_v29 }
 0x865   : > { %v2132_v14 = vpop.xlane.xlu2 %2131 }
 0x866   : > { %6978 = vrcp.f32 %v2132_v14  ;;  %v2157_v32 = vand.u32 2147483647, %v2132_v14  ;;  %v2159_v33 = vand.u32 2147483648, %v2132_v14  ;;  %vm2172_vm9 = vcmp.eq.f32.partialorder %v2171_v31, 8.507059e+37 }
 0x867   : > { %v2174_v40 = vor.u32 1.1754944e-38, %v2173_v26  ;;  %vm2153_vm10 = vweird.f32 %v2132_v14 }
 0x868   : > { %vm2158_vm12 = vcmp.eq.f32.partialorder %v2157_v32, 8.507059e+37  ;;  %v2160_v62 = vor.u32 1.1754944e-38, %v2159_v33 }
 0x86a   : > { %v6977_v37 = vpop.eup %6976 }
 0x86b   : > { %v2163_v27 = vmul.f32 %v6977_v37, %v2135_v29  ;;  %v2141_v22 = vpop.xlane.xlu0 %2140  ;;  %vm2168_vm4 = vweird.f32 %v6977_v37 }
 0x86c   : > { %v6979_v13 = vpop.eup %6978  ;;  %6980 = vrcp.f32 %v2141_v22  ;;  %vm2169_vm8 = vmor %vm2167_vm6, %vm2168_vm4  ;;  %v2199_v31 = vand.u32 2147483647, %v2141_v22  ;;  %v2201_v26 = vand.u32 2147483648, %v2141_v22  ;;  %vm2195_vm14 = vweird.f32 %v2141_v22 }
 0x86d   : > { %v2164_v3 = vsub.f32 1.0, %v2163_v27  ;;  %v2149_v50 = vmul.f32 %v6979_v13, %v2132_v14  ;;  %v2138_v39 = vpop.xlane.xlu2 %2137  ;;  %vm2154_vm7 = vweird.f32 %v6979_v13 }
 0x86e   : > { %6982 = vrcp.f32 %v2138_v39  ;;  %vm2155_vm11 = vmor %vm2153_vm10, %vm2154_vm7  ;;  %v2187_v32 = vand.u32 2147483648, %v2138_v39  ;;  %vm2200_vm1 = vcmp.eq.f32.partialorder %v2199_v31, 8.507059e+37  ;;  %vm2181_vm2 = vweird.f32 %v2138_v39 }
 0x86f   : > { %v2165_v48 = vmul.f32 %v6977_v37, %v2164_v3  ;;  %v2150_v9 = vsub.f32 1.0, %v2149_v50 }
 0x871   : > { %v2166_v15 = vadd.f32 %v6977_v37, %v2165_v48  ;;  %v2151_v7 = vmul.f32 %v6979_v13, %v2150_v9 }
 0x872   : > { %v6981_v28 = vpop.eup %6980 }
 0x873   : > { %v2170_v25 = vsel %vm2169_vm8, %v6977_v37, %v2166_v15  ;;  %v2152_v8 = vadd.f32 %v6979_v13, %v2151_v7  ;;  %v2191_v49 = vmul.f32 %v6981_v28, %v2141_v22  ;;  %vm2196_vm13 = vweird.f32 %v6981_v28 }
 0x874   : > { %v6983_v54 = vpop.eup %6982  ;;  %v2175_v6 = vsel %vm2172_vm9, %v2174_v40, %v2170_v25  ;;  %vm2197_vm0 = vmor %vm2195_vm14, %vm2196_vm13  ;;  %v2202_v7 = vor.u32 1.1754944e-38, %v2201_v26 }
 0x875   : > { %v8097_v24 = vmul.f32 %v8072_v35, %v2175_v6  ;;  %v2156_v27 = vsel %vm2155_vm11, %v6979_v13, %v2152_v8  ;;  %v2192_v29 = vsub.f32 1.0, %v2191_v49  ;;  %v2177_v3 = vmul.f32 %v6983_v54, %v2138_v39  ;;  %v2144_v50 = vpop.xlane.xlu1 %2143  ;;  %v2147_v48 = vpop.xlane.xlu2 %2146 }
 0x876   : > { %v2161_v9 = vsel %vm2158_vm12, %v2160_v62, %v2156_v27  ;;  %6984 = vrcp.f32 %v2144_v50  ;;  %vm2182_vm15 = vweird.f32 %v6983_v54  ;;  %v2185_v13 = vand.u32 2147483647, %v2138_v39 }
 0x877   : > { %v8100_v14 = vmul.f32 %v8076_v12, %v2161_v9  ;;  %v2193_v37 = vmul.f32 %v6981_v28, %v2192_v29  ;;  %v2178_v15 = vsub.f32 1.0, %v2177_v3  ;;  %6986 = vrcp.f32 %v2147_v48  ;;  %vm2183_vm4 = vmor %vm2181_vm2, %vm2182_vm15 }
 0x878   : > { %v2188_v12 = vor.u32 1.1754944e-38, %v2187_v32  ;;  %vm2186_vm6 = vcmp.eq.f32.partialorder %v2185_v13, 8.507059e+37  ;;  %v2215_v31 = vand.u32 2147483648, %v2144_v50  ;;  %v2213_v39 = vand.u32 2147483647, %v2144_v50 }
 0x879   : > { %v2194_v35 = vadd.f32 %v6981_v28, %v2193_v37  ;;  %v2179_v33 = vmul.f32 %v6983_v54, %v2178_v15  ;;  %vm2209_vm8 = vweird.f32 %v2144_v50  ;;  %v2229_v15 = vand.u32 2147483648, %v2147_v48 }
 0x87a   : > { %vm2214_vm11 = vcmp.eq.f32.partialorder %v2213_v39, 8.507059e+37  ;;  %vm2223_vm12 = vweird.f32 %v2147_v48 }
 0x87b   : > { %v2198_v40 = vsel %vm2197_vm0, %v6981_v28, %v2194_v35  ;;  %v2180_v25 = vadd.f32 %v6983_v54, %v2179_v33  ;;  %v2216_v35 = vor.u32 1.1754944e-38, %v2215_v31 }
 0x87c   : > { %v6985_v8 = vpop.eup %6984  ;;  %v2203_v49 = vsel %vm2200_vm1, %v2202_v7, %v2198_v40  ;;  %v2230_v7 = vor.u32 1.1754944e-38, %v2229_v15 }
 0x87d   : > { %v8103_v6 = vmul.f32 %v8080_v52, %v2203_v49  ;;  %v2184_v22 = vsel %vm2183_vm4, %v6983_v54, %v2180_v25  ;;  %v2205_v62 = vmul.f32 %v6985_v8, %v2144_v50  ;;  %v6987_v27 = vpop.eup %6986  ;;  %vm2210_vm7 = vweird.f32 %v6985_v8 }
 0x87e   : > { %v2189_v29 = vsel %vm2186_vm6, %v2188_v12, %v2184_v22  ;;  %v2219_v28 = vmul.f32 %v6987_v27, %v2147_v48  ;;  %vm2224_vm9 = vweird.f32 %v6987_v27  ;;  %v2227_v54 = vand.u32 2147483647, %v2147_v48  ;;  %vm2211_vm10 = vmor %vm2209_vm8, %vm2210_vm7 }
 0x87f   : > { %v8106_v3 = vmul.f32 %v8084_v44, %v2189_v29  ;;  %v2206_v9 = vsub.f32 1.0, %v2205_v62  ;;  %vm2225_vm13 = vmor %vm2223_vm12, %vm2224_vm9 }
 0x880   : > { %v2220_v37 = vsub.f32 1.0, %v2219_v28  ;;  %vm2228_vm14 = vcmp.eq.f32.partialorder %v2227_v54, 8.507059e+37 }
 0x881   : > { %v2207_v26 = vmul.f32 %v6985_v8, %v2206_v9 }
 0x882   : > { %v2221_v52 = vmul.f32 %v6987_v27, %v2220_v37 }
 0x883   : > { %v2208_v32 = vadd.f32 %v6985_v8, %v2207_v26 }
 0x884   : > { %v2222_v13 = vadd.f32 %v6987_v27, %v2221_v52  ;;  %2240 = sbr.rel (%p6801_p5) target bundleno = 2191 (0x88f), region = 60 }
 0x885   : > { %v2212_v33 = vsel %vm2211_vm10, %v6985_v8, %v2208_v32 }
 0x886   : > { %v2217_v44 = vsel %vm2214_vm11, %v2216_v35, %v2212_v33  ;;  %v2226_v25 = vsel %vm2225_vm13, %v6987_v27, %v2222_v13 }
 0x887   : > { %v8109_v40 = vmul.f32 %v8090_v38, %v2217_v44  ;;  %v2231_v50 = vsel %vm2228_vm14, %v2230_v7, %v2226_v25 }
 0x888   : > { %v8112_v49 = vmul.f32 %v8088_v20, %v2231_v50 }
 0x889   : > { %2241 = vst.msk [vmem:[%s9929_s8 + $0x30] sm:$0xff] %vm528_vm5, %v8100_v14 }
 0x88a   : > { %2242 = vst.msk [vmem:[%s9929_s8 + $0x38] sm:$0xff] %vm528_vm5, %v8097_v24 }
 0x88b   : > { %2243 = vst.msk [vmem:[%s9929_s8 + $0x40] sm:$0xff] %vm528_vm5, %v8106_v3 }
 0x88c   : > { %2244 = vst.msk [vmem:[%s9929_s8 + $0x48] sm:$0xff] %vm528_vm5, %v8103_v6 }
 0x88d   : > { %2245 = vst.msk [vmem:[%s9929_s8 + $0x50] sm:$0xff] %vm528_vm5, %v8109_v40 }
 0x88e   : > { %2246 = vst.msk [vmem:[%s9929_s8 + $0x58] sm:$0xff] %vm528_vm5, %v8112_v49 }
 0x88f PF: > { %v6988_v20 = vpack.i.bf16 %v7639_v51, %v7635_v58  ;;  %s7276_s9 = smov 32   ;;  %v6993_v38 = vpack.i.bf16 %v7624_v42, %v7622_v41  ;;  %vm2257_vm15 = vcmask 261120  }
 0x891   : > { %6989 = vrot.lane.b32.xlu0 %v6988_v20, %s7276_s9 }
 0x899   : > { %6994 = vrot.lane.b32.xlu0 %v6993_v38, %s7276_s9 }
 0x903   : > { %v6990_v48 = vpop.permute.xlu0 %6989 }
 0x904   : > { %v6992_v8 = vunpack.i.h.bf16 %v6990_v48  ;;  %v6991_v12 = vunpack.i.l.bf16 %v6990_v48 }
 0x906   : > { %v2259_v22 = vsel %vm2257_vm15, %v6991_v12, %v6992_v8 }
 0x907   : > { %2294 = vmatpush.msrb.mxu3 %v2259_v22 }
 0x90b   : > { %v6995_v62 = vpop.permute.xlu0 %6994 }
 0x90c   : > { %v6997_v27 = vunpack.i.h.bf16 %v6995_v62  ;;  %v6996_v29 = vunpack.i.l.bf16 %v6995_v62 }
 0x90e   : > { %v2258_v58 = vsel %vm2257_vm15, %v6996_v29, %v6997_v27 }
 0x90f   : > { %2295 = vmatpush.msrb.mxu3 %v2258_v58 }
 0x910   : > { %6809 = vmatmul.msk.f32.vlgmr.msrb.gmra.mxu3 %vm1178_vm3, %v7848_v53 }
 0x918   : > { %6810 = vmatmul.msk.f32.gmra.mxu3 %vm1178_vm3, %v7850_v21 }
 0x920   : > { %6811 = vmatmul.msk.f32.gmra.mxu3 %vm1178_vm3, %v7852_v4 }
 0x928   : > { %6812 = vmatmul.msk.f32.gmra.mxu3 %vm1178_vm3, %v7854_v30 }
 0x930   : > { %6813 = vmatmul.msk.f32.gmra.mxu3 %vm1178_vm3, %v7856_v19 }
 0x938   : > { %6814 = vmatmul.msk.f32.gmra.mxu3 %vm1178_vm3, %v7858_v57 }
 0x993   : > { %v2297_v41 = vpop.f32.mrf.mxu3 }
 0x994   : > { %v8168_v39 = vmul.f32 0.14433756, %v2297_v41 }
 0x996   : > { %v2360_v32 = vmul.f32 0.0, %v8168_v39  ;;  %v2327_v38 = vsel %vm528_vm5, %v8168_v39, 0.0 }
 0x998   : > { %v2366_v44 = vsel %vm528_vm5, %v2360_v32, 0.0 }
 0x99b   : > { %v2300_v9 = vpop.f32.mrf.mxu3 }
 0x99c   : > { %v8166_v26 = vmul.f32 0.14433756, %v2300_v9 }
 0x99e   : > { %v2322_v15 = vmul.f32 0.0, %v8166_v26  ;;  %v2367_v7 = vsel %vm528_vm5, %v8166_v26, 0.0 }
 0x99f   : > { %v2368_v62 = vadd.f32 %v2367_v7, %v2366_v44 }
 0x9a0   : > { %v2328_v33 = vsel %vm528_vm5, %v2322_v15, 0.0 }
 0x9a1   : > { %v2407_v20 = vadd.f32 %v2366_v44, %v2328_v33  ;;  %v2329_v22 = vadd.f32 %v2328_v33, %v2327_v38 }
 0x9a3   : > { %v2303_v28 = vpop.f32.mrf.mxu3 }
 0x9a4   : > { %v8170_v37 = vmul.f32 0.14433756, %v2303_v28 }
 0x9a6   : > { %v2323_v52 = vmul.f32 0.0, %v8170_v37  ;;  %v2369_v48 = vsel %vm528_vm5, %v8170_v37, 0.0 }
 0x9a7   : > { %v2370_v9 = vadd.f32 %v2369_v48, %v2368_v62 }
 0x9a8   : > { %v2330_v25 = vsel %vm528_vm5, %v2323_v52, 0.0 }
 0x9a9   : > { %v2409_v27 = vadd.f32 %v2407_v20, %v2330_v25  ;;  %v2331_v41 = vadd.f32 %v2330_v25, %v2329_v22 }
 0x9ab   : > { %v2306_v31 = vpop.f32.mrf.mxu3 }
 0x9ac   : > { %v8175_v54 = vmul.f32 0.14433756, %v2306_v31 }
 0x9ae   : > { %v2324_v50 = vmul.f32 0.0, %v8175_v54  ;;  %v2410_v8 = vsel %vm528_vm5, %v8175_v54, 0.0 }
 0x9af   : > { %v2411_v28 = vadd.f32 %v2410_v8, %v2409_v27 }
 0x9b0   : > { %v2332_v29 = vsel %vm528_vm5, %v2324_v50, 0.0 }
 0x9b1   : > { %v2333_v52 = vadd.f32 %v2332_v29, %v2331_v41 }
 0x9b3   : > { %v2309_v35 = vpop.f32.mrf.mxu3 }
 0x9b4   : > { %v8178_v13 = vmul.f32 0.14433756, %v2309_v35  ;;  %v2372_v35 = vadd.f32 %v2370_v9, %v2332_v29 }
 0x9b6   : > { %v2325_v12 = vmul.f32 0.0, %v8178_v13  ;;  %v2412_v58 = vsel %vm528_vm5, %v8178_v13, 0.0 }
 0x9b7   : > { %v2413_v19 = vadd.f32 %v2412_v58, %v2411_v28 }
 0x9b8   : > { %v2334_v15 = vsel %vm528_vm5, %v2325_v12, 0.0 }
 0x9b9   : > { %v2335_v44 = vadd.f32 %v2334_v15, %v2333_v52  ;;  %v2374_v7 = vadd.f32 %v2372_v35, %v2334_v15 }
 0x9bb   : > { %v2312_v31 = vpop.f32.mrf.mxu3 }
 0x9bc   : > { %v2320_v32 = vmul.f32 0.14433756, %v2312_v31 }
 0x9be   : > { %v2326_v57 = vmul.f32 0.0, %v2320_v32  ;;  %v2414_v33 = vsel %vm528_vm5, %v2320_v32, 0.0 }
 0x9bf   : > { %v2415_v20 = vadd.f32 %v2414_v33, %v2413_v19 }
 0x9c0   : > { %v2336_v50 = vsel %vm528_vm5, %v2326_v57, 0.0 }
 0x9c1   : > { %v2337_v38 = vadd.f32 %v2336_v50, %v2335_v44  ;;  %v2376_v30 = vadd.f32 %v2374_v7, %v2336_v50  ;;  %v2416_v25 = vrot.slane %v2415_v20, 4 }
 0x9c3   : > { %v2417_v48 = vadd.f32 %v2416_v25, %v2415_v20  ;;  %v2338_v8 = vrot.slane %v2337_v38, 4  ;;  %v2377_v22 = vrot.slane %v2376_v30, 4 }
 0x9c5   : > { %v2418_v62 = vrot.slane %v2417_v48, 2  ;;  %v2339_v12 = vadd.f32 %v2338_v8, %v2337_v38  ;;  %v2378_v27 = vadd.f32 %v2377_v22, %v2376_v30 }
 0x9c7   : > { %v2419_v41 = vadd.f32 %v2418_v62, %v2417_v48  ;;  %v2340_v29 = vrot.slane %v2339_v12, 2  ;;  %v2379_v58 = vrot.slane %v2378_v27, 2 }
 0x9c9   : > { %v2420_v9 = vrot.slane %v2419_v41, 1  ;;  %v2341_v28 = vadd.f32 %v2340_v29, %v2339_v12  ;;  %v2380_v15 = vadd.f32 %v2379_v58, %v2378_v27 }
 0x9cb   : > { %v2421_v31 = vadd.f32 %v2420_v9, %v2419_v41  ;;  %v2342_v52 = vrot.slane %v2341_v28, 1  ;;  %v2381_v33 = vrot.slane %v2380_v15, 1 }
 0x9cd   : > { %v2422_v19 = vsel %vm528_vm5, %v2421_v31, 0.0  ;;  %v2343_v57 = vadd.f32 %v2342_v52, %v2341_v28  ;;  %v2382_v44 = vadd.f32 %v2381_v33, %v2380_v15 }
 0x9ce   : > { %2423 = vadd.xlane.f32.xlu2 %v2422_v19 }
 0x9cf   : > { %v2344_v35 = vsel %vm528_vm5, %v2343_v57, 0.0  ;;  %v2383_v7 = vsel %vm528_vm5, %v2382_v44, 0.0 }
 0x9d0   : > { %2345 = vadd.xlane.f32.xlu1 %v2344_v35 }
 0x9d8   : > { %2384 = vadd.xlane.f32.xlu1 %v2383_v7 }
 0xa41   : > { %v2424_v20 = vpop.xlane.xlu2 %2423 }
 0xa42   : > { %v2425_v38 = vmul.f32 0.00086805556, %v2424_v20 }
 0xa43   : > { %v2346_v30 = vpop.xlane.xlu1 %2345 }
 0xa44   : > { %v2347_v50 = vmul.f32 0.0026041667, %v2346_v30  ;;  %v2426_v22 = vmul.f32 0.0, %v2425_v38 }
 0xa46   : > { %v2349_v48 = vmul.f32 0.0, %v2347_v50 }
 0xa4b   : > { %v2385_v25 = vpop.xlane.xlu1 %2384 }
 0xa4c   : > { %v2386_v8 = vmul.f32 0.0013020834, %v2385_v25 }
 0xa4e   : > { %v2387_v62 = vmul.f32 0.0, %v2386_v8  ;;  %v2394_v12 = vadd.f32 %v2386_v8, %v2349_v48 }
 0xa50   : > { %v2393_v27 = vadd.f32 %v2387_v62, %v2347_v50  ;;  %v2396_v41 = vadd.f32 %v2387_v62, %v2349_v48  ;;  %v2433_v29 = vadd.f32 %v2426_v22, %v2394_v12 }
 0xa52   : > { %v2432_v58 = vadd.f32 %v2426_v22, %v2393_v27  ;;  %v2435_v9 = vadd.f32 %v2425_v38, %v2396_v41  ;;  %v8202_v28 = vsub.f32 %v8166_v26, %v2433_v29  ;;  %v8205_v31 = vsub.f32 %v8170_v37, %v2433_v29 }
 0xa54   : > { %v8208_v52 = vsub.f32 %v8168_v39, %v2432_v58  ;;  %v8211_v15 = vsub.f32 %v8175_v54, %v2435_v9  ;;  %v8214_v19 = vsub.f32 %v8178_v13, %v2435_v9  ;;  %v8216_v57 = vsub.f32 %v2320_v32, %v2435_v9 }
 0xa55   : > { %v2445_v35 = vmul.f32 %v8202_v28, %v8202_v28  ;;  %v2446_v26 = vmul.f32 %v8205_v31, %v8205_v31 }
 0xa56   : > { %v2444_v37 = vmul.f32 %v8208_v52, %v8208_v52  ;;  %v2447_v39 = vmul.f32 %v8211_v15, %v8211_v15  ;;  %v2448_v13 = vmul.f32 %v8214_v19, %v8214_v19  ;;  %v2449_v30 = vmul.f32 %v8216_v57, %v8216_v57 }
 0xa57   : > { %v2451_v33 = vmul.f32 0.0, %v2445_v35  ;;  %v2452_v54 = vmul.f32 0.0, %v2446_v26  ;;  %v2496_v25 = vsel %vm528_vm5, %v2445_v35, 0.0  ;;  %v2498_v27 = vsel %vm528_vm5, %v2446_v26, 0.0 }
 0xa58   : > { %v2456_v32 = vsel %vm528_vm5, %v2444_v37, 0.0  ;;  %v2489_v44 = vmul.f32 0.0, %v2444_v37  ;;  %v2453_v20 = vmul.f32 0.0, %v2447_v39  ;;  %v2454_v62 = vmul.f32 0.0, %v2448_v13 }
 0xa59   : > { %v2457_v7 = vsel %vm528_vm5, %v2451_v33, 0.0  ;;  %v2459_v48 = vsel %vm528_vm5, %v2452_v54, 0.0  ;;  %v2455_v58 = vmul.f32 0.0, %v2449_v30  ;;  %v2539_v33 = vsel %vm528_vm5, %v2447_v39, 0.0 }
 0xa5a   : > { %v2458_v50 = vadd.f32 %v2457_v7, %v2456_v32  ;;  %v2495_v38 = vsel %vm528_vm5, %v2489_v44, 0.0  ;;  %v2461_v9 = vsel %vm528_vm5, %v2453_v20, 0.0  ;;  %v2463_v32 = vsel %vm528_vm5, %v2454_v62, 0.0 }
 0xa5b   : > { %v2497_v8 = vadd.f32 %v2496_v25, %v2495_v38  ;;  %v2536_v22 = vadd.f32 %v2495_v38, %v2457_v7  ;;  %v2541_v54 = vsel %vm528_vm5, %v2448_v13, 0.0  ;;  %v2465_v7 = vsel %vm528_vm5, %v2455_v58, 0.0 }
 0xa5c   : > { %v2460_v12 = vadd.f32 %v2459_v48, %v2458_v50  ;;  %v2543_v25 = vsel %vm528_vm5, %v2449_v30, 0.0 }
 0xa5d   : > { %v2499_v41 = vadd.f32 %v2498_v27, %v2497_v8  ;;  %v2538_v29 = vadd.f32 %v2536_v22, %v2459_v48 }
 0xa5e   : > { %v2462_v37 = vadd.f32 %v2461_v9, %v2460_v12 }
 0xa5f   : > { %v2540_v44 = vadd.f32 %v2539_v33, %v2538_v29  ;;  %v2501_v35 = vadd.f32 %v2499_v41, %v2461_v9 }
 0xa60   : > { %v2464_v21 = vadd.f32 %v2463_v32, %v2462_v37 }
 0xa61   : > { %v2542_v50 = vadd.f32 %v2541_v54, %v2540_v44  ;;  %v2503_v38 = vadd.f32 %v2501_v35, %v2463_v32 }
 0xa62   : > { %v2466_v26 = vadd.f32 %v2465_v7, %v2464_v21 }
 0xa63   : > { %v2544_v48 = vadd.f32 %v2543_v25, %v2542_v50  ;;  %v2505_v8 = vadd.f32 %v2503_v38, %v2465_v7 }
 0xa64   : > { %v2467_v20 = vrot.slane %v2466_v26, 4 }
 0xa65   : > { %v2545_v22 = vrot.slane %v2544_v48, 4  ;;  %v2506_v12 = vrot.slane %v2505_v8, 4 }
 0xa66   : > { %v2468_v39 = vadd.f32 %v2467_v20, %v2466_v26 }
 0xa67   : > { %v2546_v27 = vadd.f32 %v2545_v22, %v2544_v48  ;;  %v2507_v62 = vadd.f32 %v2506_v12, %v2505_v8 }
 0xa68   : > { %v2469_v29 = vrot.slane %v2468_v39, 2 }
 0xa69   : > { %v2547_v41 = vrot.slane %v2546_v27, 2  ;;  %v2508_v9 = vrot.slane %v2507_v62, 2 }
 0xa6a   : > { %v2470_v37 = vadd.f32 %v2469_v29, %v2468_v39 }
 0xa6b   : > { %v2548_v13 = vadd.f32 %v2547_v41, %v2546_v27  ;;  %v2509_v33 = vadd.f32 %v2508_v9, %v2507_v62 }
 0xa6c   : > { %v2471_v58 = vrot.slane %v2470_v37, 1 }
 0xa6d   : > { %v2549_v44 = vrot.slane %v2548_v13, 1  ;;  %v2510_v32 = vrot.slane %v2509_v33, 1 }
 0xa6e   : > { %v2472_v21 = vadd.f32 %v2471_v58, %v2470_v37 }
 0xa6f   : > { %v2550_v35 = vadd.f32 %v2549_v44, %v2548_v13  ;;  %v2511_v30 = vadd.f32 %v2510_v32, %v2509_v33 }
 0xa70   : > { %v2473_v54 = vsel %vm528_vm5, %v2472_v21, 0.0 }
 0xa71   : > { %2474 = vadd.xlane.f32.xlu2 %v2473_v54  ;;  %v2551_v7 = vsel %vm528_vm5, %v2550_v35, 0.0  ;;  %v2512_v50 = vsel %vm528_vm5, %v2511_v30, 0.0 }
 0xa72   : > { %2552 = vadd.xlane.f32.xlu1 %v2551_v7  ;;  %2513 = vadd.xlane.f32.xlu0 %v2512_v50 }
 0xae4   : > { %v2475_v38 = vpop.xlane.xlu2 %2474 }
 0xae5   : > { %v2476_v26 = vmul.f32 0.0026041667, %v2475_v38  ;;  %v2553_v25 = vpop.xlane.xlu1 %2552  ;;  %v2514_v48 = vpop.xlane.xlu0 %2513 }
 0xae6   : > { %v2554_v8 = vmul.f32 0.00086805556, %v2553_v25  ;;  %v2515_v20 = vmul.f32 0.0013020834, %v2514_v48 }
 0xae7   : > { %v2478_v22 = vmul.f32 0.0, %v2476_v26 }
 0xae8   : > { %v2555_v12 = vmul.f32 0.0, %v2554_v8  ;;  %v2516_v39 = vmul.f32 0.0, %v2515_v20 }
 0xae9   : > { %v2523_v27 = vadd.f32 %v2515_v20, %v2478_v22 }
 0xaea   : > { %v2522_v62 = vadd.f32 %v2516_v39, %v2476_v26  ;;  %v2525_v29 = vadd.f32 %v2516_v39, %v2478_v22 }
 0xaeb   : > { %v2562_v41 = vadd.f32 %v2555_v12, %v2523_v27 }
 0xaec   : > { %v2561_v9 = vadd.f32 %v2555_v12, %v2522_v62  ;;  %v2564_v37 = vadd.f32 %v2554_v8, %v2525_v29 }
 0xaed   : > { %v2568_v13 = vadd.f32 1e-05, %v2562_v41 }
 0xaee   : > { %v2567_v33 = vadd.f32 1e-05, %v2561_v9  ;;  %v2570_v58 = vadd.f32 1e-05, %v2564_v37 }
 0xaef   : > { %6998 = vrsqrt.f32 %v2568_v13  ;;  %vm2589_vm2 = vweird.f32 %v2568_v13 }
 0xaf0   : > { %7000 = vrsqrt.f32 %v2567_v33  ;;  %vm2579_vm6 = vweird.f32 %v2567_v33  ;;  %vm2609_vm9 = vweird.f32 %v2570_v58 }
 0xaf1   : > { %7002 = vrsqrt.f32 %v2570_v58 }
 0xaf5   : > { %v6999_v44 = vpop.eup %6998 }
 0xaf6   : > { %v7001_v32 = vpop.eup %7000  ;;  %v2584_v21 = vmul.f32 %v6999_v44, %v2568_v13  ;;  %vm2590_vm0 = vweird.f32 %v6999_v44 }
 0xaf7   : > { %v7003_v35 = vpop.eup %7002  ;;  %v2574_v30 = vmul.f32 %v7001_v32, %v2567_v33  ;;  %vm2580_vm1 = vweird.f32 %v7001_v32  ;;  %vm2591_vm4 = vmor %vm2589_vm2, %vm2590_vm0 }
 0xaf8   : > { %v2604_v54 = vmul.f32 %v7003_v35, %v2570_v58  ;;  %v2585_v7 = vmul.f32 %v6999_v44, %v2584_v21  ;;  %vm2581_vm7 = vmor %vm2579_vm6, %vm2580_vm1  ;;  %vm2610_vm8 = vweird.f32 %v7003_v35 }
 0xaf9   : > { %v2575_v50 = vmul.f32 %v7001_v32, %v2574_v30  ;;  %vm2611_vm10 = vmor %vm2609_vm9, %vm2610_vm8 }
 0xafa   : > { %v2586_v38 = vmul.f32 0.5, %v2585_v7  ;;  %v2605_v26 = vmul.f32 %v7003_v35, %v2604_v54 }
 0xafb   : > { %v2576_v25 = vmul.f32 0.5, %v2575_v50 }
 0xafc   : > { %v2587_v48 = vsub.f32 1.5, %v2586_v38  ;;  %v2606_v8 = vmul.f32 0.5, %v2605_v26 }
 0xafd   : > { %v2577_v20 = vsub.f32 1.5, %v2576_v25 }
 0xafe   : > { %v2588_v22 = vmul.f32 %v6999_v44, %v2587_v48  ;;  %v2607_v12 = vsub.f32 1.5, %v2606_v8 }
 0xaff   : > { %v2578_v39 = vmul.f32 %v7001_v32, %v2577_v20 }
 0xb00   : > { %v2592_v27 = vsel %vm2591_vm4, %v6999_v44, %v2588_v22  ;;  %v2608_v62 = vmul.f32 %v7003_v35, %v2607_v12 }
 0xb01   : > { %v2634_v29 = vmul.f32 %v2592_v27, %v8202_v28  ;;  %v2582_v41 = vsel %vm2581_vm7, %v7001_v32, %v2578_v39  ;;  %v2635_v44 = vmul.f32 %v2592_v27, %v8205_v31 }
 0xb02   : > { %v2633_v9 = vmul.f32 %v2582_v41, %v8208_v52  ;;  %v2612_v21 = vsel %vm2611_vm10, %v7003_v35, %v2608_v62 }
 0xb03   : > { %v2642_v37 = vsel %vm528_vm5, %v2634_v29, -inf  ;;  %v2636_v33 = vmul.f32 %v2612_v21, %v8211_v15  ;;  %v2645_v28 = vsel %vm528_vm5, %v2635_v44, -inf  ;;  %v2638_v52 = vmul.f32 %v2612_v21, %v8216_v57 }
 0xb04   : > { %2643 = vmax.xlane.f32.xlu1 %v2642_v37  ;;  %v2639_v13 = vsel %vm528_vm5, %v2633_v9, -inf  ;;  %v2637_v58 = vmul.f32 %v2612_v21, %v8214_v19 }
 0xb05   : > { %2640 = vmax.xlane.f32.xlu2 %v2639_v13  ;;  %v2648_v30 = vsel %vm528_vm5, %v2636_v33, -inf  ;;  %v2654_v32 = vsel %vm528_vm5, %v2638_v52, -inf }
 0xb06   : > { %v2651_v35 = vsel %vm528_vm5, %v2637_v58, -inf }
 0xb0c   : > { %2649 = vmax.xlane.f32.xlu1 %v2648_v30 }
 0xb0d   : > { %2646 = vmax.xlane.f32.xlu2 %v2645_v28 }
 0xb14   : > { %2655 = vmax.xlane.f32.xlu1 %v2654_v32 }
 0xb15   : > { %2652 = vmax.xlane.f32.xlu2 %v2651_v35 }
 0xb77   : > { %v2644_v54 = vpop.xlane.xlu1 %2643 }
 0xb78   : > { %v2658_v15 = vsub.f32 %v2634_v29, %v2644_v54  ;;  %v2641_v7 = vpop.xlane.xlu2 %2640 }
 0xb79   : > { %v2657_v31 = vsub.f32 %v2633_v9, %v2641_v7 }
 0xb7a   : > { %v2665_v50 = vmul.f32 1.442695, %v2658_v15 }
 0xb7b   : > { %v2663_v38 = vmul.f32 1.442695, %v2657_v31 }
 0xb7c   : > { %7004 = vpow2.f32 %v2665_v50 }
 0xb7d   : > { %7006 = vpow2.f32 %v2663_v38 }
 0xb7f   : > { %v2650_v26 = vpop.xlane.xlu1 %2649 }
 0xb80   : > { %v2660_v25 = vsub.f32 %v2636_v33, %v2650_v26  ;;  %v2647_v48 = vpop.xlane.xlu2 %2646 }
 0xb81   : > { %v2659_v57 = vsub.f32 %v2635_v44, %v2647_v48 }
 0xb82   : > { %v8257_v8 = vpop.eup %7004  ;;  %v2669_v19 = vmul.f32 1.442695, %v2660_v25 }
 0xb83   : > { %v8259_v20 = vpop.eup %7006  ;;  %v2667_v22 = vmul.f32 1.442695, %v2659_v57  ;;  %v2678_v12 = vsel %vm528_vm5, %v8257_v8, 0.0 }
 0xb84   : > { %7008 = vpow2.f32 %v2669_v19  ;;  %2679 = vadd.xlane.f32.xlu1 %v2678_v12  ;;  %v2675_v39 = vsel %vm528_vm5, %v8259_v20, 0.0 }
 0xb85   : > { %7010 = vpow2.f32 %v2667_v22  ;;  %2676 = vadd.xlane.f32.xlu2 %v2675_v39 }
 0xb87   : > { %v2656_v27 = vpop.xlane.xlu1 %2655 }
 0xb88   : > { %v2662_v62 = vsub.f32 %v2638_v52, %v2656_v27  ;;  %v2653_v29 = vpop.xlane.xlu2 %2652 }
 0xb89   : > { %v2661_v41 = vsub.f32 %v2637_v58, %v2653_v29 }
 0xb8a   : > { %v8265_v9 = vpop.eup %7008  ;;  %v2673_v37 = vmul.f32 1.442695, %v2662_v62 }
 0xb8b   : > { %v8267_v13 = vpop.eup %7010  ;;  %v2671_v21 = vmul.f32 1.442695, %v2661_v41  ;;  %v2684_v33 = vsel %vm528_vm5, %v8265_v9, 0.0 }
 0xb8c   : > { %7012 = vpow2.f32 %v2673_v37  ;;  %2685 = vadd.xlane.f32.xlu1 %v2684_v33  ;;  %v2681_v44 = vsel %vm528_vm5, %v8267_v13, 0.0 }
 0xb8d   : > { %7014 = vpow2.f32 %v2671_v21  ;;  %2682 = vadd.xlane.f32.xlu2 %v2681_v44 }
 0xb92   : > { %v8273_v30 = vpop.eup %7012 }
 0xb93   : > { %v8275_v28 = vpop.eup %7014  ;;  %v2690_v52 = vsel %vm528_vm5, %v8273_v30, 0.0 }
 0xb94   : > { %2691 = vadd.xlane.f32.xlu0 %v2690_v52  ;;  %v2687_v58 = vsel %vm528_vm5, %v8275_v28, 0.0 }
 0xb95   : > { %2688 = vadd.xlane.f32.xlu2 %v2687_v58 }
 0xbf7   : > { %v2680_v32 = vpop.xlane.xlu1 %2679 }
 0xbf8   : > { %7016 = vrcp.f32 %v2680_v32  ;;  %v2677_v35 = vpop.xlane.xlu2 %2676  ;;  %v2718_v25 = vand.u32 2147483648, %v2680_v32  ;;  %v2716_v19 = vand.u32 2147483647, %v2680_v32  ;;  %vm2712_vm13 = vweird.f32 %v2680_v32 }
 0xbf9   : > { %7018 = vrcp.f32 %v2677_v35  ;;  %v2704_v22 = vand.u32 2147483648, %v2677_v35  ;;  %v2702_v39 = vand.u32 2147483647, %v2677_v35  ;;  %vm2698_vm0 = vweird.f32 %v2677_v35 }
 0xbfa   : > { %v2719_v29 = vor.u32 1.1754944e-38, %v2718_v25  ;;  %vm2717_vm1 = vcmp.eq.f32.partialorder %v2716_v19, 8.507059e+37 }
 0xbfb   : > { %v2705_v33 = vor.u32 1.1754944e-38, %v2704_v22  ;;  %vm2703_vm4 = vcmp.eq.f32.partialorder %v2702_v39, 8.507059e+37 }
 0xbfe   : > { %v7017_v54 = vpop.eup %7016 }
 0xbff   : > { %v7019_v15 = vpop.eup %7018  ;;  %v2708_v7 = vmul.f32 %v7017_v54, %v2680_v32  ;;  %v2686_v31 = vpop.xlane.xlu1 %2685  ;;  %vm2713_vm11 = vweird.f32 %v7017_v54 }
 0xc00   : > { %v2694_v50 = vmul.f32 %v7019_v15, %v2677_v35  ;;  %7020 = vrcp.f32 %v2686_v31  ;;  %v2683_v38 = vpop.xlane.xlu2 %2682  ;;  %vm2699_vm12 = vweird.f32 %v7019_v15  ;;  %vm2714_vm14 = vmor %vm2712_vm13, %vm2713_vm11  ;;  %v2746_v25 = vand.u32 2147483648, %v2686_v31 }
 0xc01   : > { %v2709_v26 = vsub.f32 1.0, %v2708_v7  ;;  %7022 = vrcp.f32 %v2683_v38  ;;  %vm2700_vm2 = vmor %vm2698_vm0, %vm2699_vm12  ;;  %v2730_v39 = vand.u32 2147483647, %v2683_v38  ;;  %vm2740_vm8 = vweird.f32 %v2686_v31 }
 0xc02   : > { %v2695_v48 = vsub.f32 1.0, %v2694_v50  ;;  %vm2726_vm10 = vweird.f32 %v2683_v38 }
 0xc03   : > { %v2710_v57 = vmul.f32 %v7017_v54, %v2709_v26  ;;  %vm2731_vm13 = vcmp.eq.f32.partialorder %v2730_v39, 8.507059e+37 }
 0xc04   : > { %v2696_v12 = vmul.f32 %v7019_v15, %v2695_v48 }
 0xc05   : > { %v2711_v27 = vadd.f32 %v7017_v54, %v2710_v57 }
 0xc06   : > { %v7021_v62 = vpop.eup %7020  ;;  %v2697_v41 = vadd.f32 %v7019_v15, %v2696_v12  ;;  %v2732_v12 = vand.u32 2147483648, %v2683_v38 }
 0xc07   : > { %v7023_v37 = vpop.eup %7022  ;;  %v2715_v21 = vsel %vm2714_vm14, %v7017_v54, %v2711_v27  ;;  %v2736_v44 = vmul.f32 %v7021_v62, %v2686_v31  ;;  %v2692_v52 = vpop.xlane.xlu0 %2691  ;;  %v2744_v54 = vand.u32 2147483647, %v2686_v31  ;;  %vm2741_vm6 = vweird.f32 %v7021_v62 }
 0xc08   : > { %v2720_v58 = vsel %vm2717_vm1, %v2719_v29, %v2715_v21  ;;  %v2701_v7 = vsel %vm2700_vm2, %v7019_v15, %v2697_v41  ;;  %v2722_v50 = vmul.f32 %v7023_v37, %v2683_v38  ;;  %v2689_v26 = vpop.xlane.xlu2 %2688  ;;  %7024 = vrcp.f32 %v2692_v52  ;;  %vm2742_vm9 = vmor %vm2740_vm8, %vm2741_vm6 }
 0xc09   : > { %v8282_v48 = vmul.f32 %v8257_v8, %v2720_v58  ;;  %v2706_v32 = vsel %vm2703_vm4, %v2705_v33, %v2701_v7  ;;  %v2737_v57 = vsub.f32 1.0, %v2736_v44  ;;  %7026 = vrcp.f32 %v2689_v26 }
 0xc0a   : > { %v8285_v35 = vmul.f32 %v8259_v20, %v2706_v32  ;;  %v2723_v19 = vsub.f32 1.0, %v2722_v50  ;;  %vm2727_vm7 = vweird.f32 %v7023_v37  ;;  %v2747_v8 = vor.u32 1.1754944e-38, %v2746_v25 }
 0xc0b   : > { %v2738_v22 = vmul.f32 %v7021_v62, %v2737_v57  ;;  %vm2745_vm11 = vcmp.eq.f32.partialorder %v2744_v54, 8.507059e+37  ;;  %vm2728_vm12 = vmor %vm2726_vm10, %vm2727_vm7  ;;  %v2733_v20 = vor.u32 1.1754944e-38, %v2732_v12  ;;  %v2774_v38 = vand.u32 2147483648, %v2692_v52 }
 0xc0c   : > { %v2724_v15 = vmul.f32 %v7023_v37, %v2723_v19  ;;  %vm2768_vm0 = vweird.f32 %v2692_v52  ;;  %vm2754_vm6 = vweird.f32 %v2689_v26 }
 0xc0d   : > { %v2739_v27 = vadd.f32 %v7021_v62, %v2738_v22  ;;  %v2760_v22 = vand.u32 2147483648, %v2689_v26 }
 0xc0e   : > { %v2725_v29 = vadd.f32 %v7023_v37, %v2724_v15  ;;  %v7025_v41 = vpop.eup %7024  ;;  %v2758_v15 = vand.u32 2147483647, %v2689_v26 }
 0xc0f   : > { %v2743_v21 = vsel %vm2742_vm9, %v7021_v62, %v2739_v27  ;;  %v2764_v58 = vmul.f32 %v7025_v41, %v2692_v52  ;;  %v7027_v7 = vpop.eup %7026  ;;  %vm2769_vm14 = vweird.f32 %v7025_v41  ;;  %v2772_v62 = vand.u32 2147483647, %v2692_v52 }
 0xc10   : > { %v2748_v33 = vsel %vm2745_vm11, %v2747_v8, %v2743_v21  ;;  %v2729_v44 = vsel %vm2728_vm12, %v7023_v37, %v2725_v29  ;;  %v2750_v25 = vmul.f32 %v7027_v7, %v2689_v26  ;;  %vm2755_vm1 = vweird.f32 %v7027_v7  ;;  %vm2770_vm2 = vmor %vm2768_vm0, %vm2769_vm14 }
 0xc11   : > { %v8288_v50 = vmul.f32 %v8265_v9, %v2748_v33  ;;  %v2734_v32 = vsel %vm2731_vm13, %v2733_v20, %v2729_v44  ;;  %v2765_v57 = vsub.f32 1.0, %v2764_v58  ;;  %v2775_v9 = vor.u32 1.1754944e-38, %v2774_v38  ;;  %vm2756_vm7 = vmor %vm2754_vm6, %vm2755_vm1 }
 0xc12   : > { %v8291_v31 = vmul.f32 %v8267_v13, %v2734_v32  ;;  %v2751_v54 = vsub.f32 1.0, %v2750_v25  ;;  %vm2773_vm4 = vcmp.eq.f32.partialorder %v2772_v62, 8.507059e+37  ;;  %v2761_v8 = vor.u32 1.1754944e-38, %v2760_v22 }
 0xc13   : > { %v2766_v19 = vmul.f32 %v7025_v41, %v2765_v57  ;;  %vm2759_vm8 = vcmp.eq.f32.partialorder %v2758_v15, 8.507059e+37 }
 0xc14   : > { %v2752_v12 = vmul.f32 %v7027_v7, %v2751_v54 }
 0xc15   : > { %v2767_v37 = vadd.f32 %v7025_v41, %v2766_v19 }
 0xc16   : > { %v2753_v27 = vadd.f32 %v7027_v7, %v2752_v12  ;;  %2785 = sbr.rel (%p6801_p5) target bundleno = 3105 (0xc21), region = 64 }
 0xc17   : > { %v2771_v39 = vsel %vm2770_vm2, %v7025_v41, %v2767_v37 }
 0xc18   : > { %v2776_v13 = vsel %vm2773_vm4, %v2775_v9, %v2771_v39  ;;  %v2757_v21 = vsel %vm2756_vm7, %v7027_v7, %v2753_v27 }
 0xc19   : > { %v8294_v29 = vmul.f32 %v8273_v30, %v2776_v13  ;;  %v2762_v52 = vsel %vm2759_vm8, %v2761_v8, %v2757_v21 }
 0xc1a   : > { %v8297_v20 = vmul.f32 %v8275_v28, %v2762_v52 }
 0xc1b   : > { %2786 = vst.msk [vmem:[%s9929_s8 + $0x60] sm:$0xff] %vm528_vm5, %v8285_v35 }
 0xc1c   : > { %2787 = vst.msk [vmem:[%s9929_s8 + $0x68] sm:$0xff] %vm528_vm5, %v8282_v48 }
 0xc1d   : > { %2788 = vst.msk [vmem:[%s9929_s8 + $0x70] sm:$0xff] %vm528_vm5, %v8291_v31 }
 0xc1e   : > { %2789 = vst.msk [vmem:[%s9929_s8 + $0x78] sm:$0xff] %vm528_vm5, %v8288_v50 }
 0xc1f   : > { %2790 = vst.msk [vmem:[%s9929_s8 + $0x80] sm:$0xff] %vm528_vm5, %v8297_v20 }
 0xc20   : > { %2791 = vst.msk [vmem:[%s9929_s8 + $0x88] sm:$0xff] %vm528_vm5, %v8294_v29 }
 0xc21 PF: > { %v7028_v30 = vpack.i.bf16 %v7624_v42, %v7639_v51  ;;  %s7277_s25 = smov 112  }
 0xc23   : > { %7029 = vrot.lane.b32.xlu0 %v7028_v30, %s7277_s25 }
 0xc95   : > { %v7030_v28 = vpop.permute.xlu0 %7029 }
 0xc96   : > { %v7031_v26 = vunpack.i.l.bf16 %v7030_v28  ;;  %v7032_v41 = vunpack.i.h.bf16 %v7030_v28 }
 0xc98   : > { %2830 = vmatpush.msra.mxu1 %v7031_v26 }
 0xc9a   : > { %2831 = vmatpush.msra.mxu1 %v7032_v41 }
 0xc9b   : > { %6816 = vmatmul.msk.f32.vlgmr.msra.gmra.mxu1 %vm1178_vm3, %v7860_v59 }
 0xca3   : > { %6817 = vmatmul.msk.f32.gmra.mxu1 %vm1178_vm3, %v7862_v23 }
 0xcab   : > { %6818 = vmatmul.msk.f32.gmra.mxu1 %vm1178_vm3, %v7864_v60 }
 0xcb3   : > { %6819 = vmatmul.msk.f32.gmra.mxu1 %vm1178_vm3, %v7866_v61 }
 0xcbb   : > { %6820 = vmatmul.msk.f32.gmra.mxu1 %vm1178_vm3, %v7868_v1 }
 0xcc3   : > { %6821 = vmatmul.msk.f32.gmra.mxu1 %vm1178_vm3, %v7870_v16 }
 0xd18   : > { %v2833_v33 = vpop.f32.mrf.mxu1 }
 0xd19   : > { %v8348_v57 = vmul.f32 0.14433756, %v2833_v33 }
 0xd1b   : > { %v2896_v19 = vmul.f32 0.0, %v8348_v57  ;;  %v2863_v8 = vsel %vm528_vm5, %v8348_v57, 0.0 }
 0xd1d   : > { %v2902_v15 = vsel %vm528_vm5, %v2896_v19, 0.0 }
 0xd20   : > { %v2836_v44 = vpop.f32.mrf.mxu1 }
 0xd21   : > { %v8346_v32 = vmul.f32 0.14433756, %v2836_v44 }
 0xd23   : > { %v2858_v38 = vmul.f32 0.0, %v8346_v32  ;;  %v2903_v9 = vsel %vm528_vm5, %v8346_v32, 0.0 }
 0xd24   : > { %v2904_v26 = vadd.f32 %v2903_v9, %v2902_v15 }
 0xd25   : > { %v2864_v37 = vsel %vm528_vm5, %v2858_v38, 0.0 }
 0xd26   : > { %v2943_v13 = vadd.f32 %v2902_v15, %v2864_v37  ;;  %v2865_v28 = vadd.f32 %v2864_v37, %v2863_v8 }
 0xd28   : > { %v2839_v58 = vpop.f32.mrf.mxu1 }
 0xd29   : > { %v8350_v25 = vmul.f32 0.14433756, %v2839_v58 }
 0xd2b   : > { %v2859_v62 = vmul.f32 0.0, %v8350_v25  ;;  %v2905_v21 = vsel %vm528_vm5, %v8350_v25, 0.0 }
 0xd2d   : > { %v2866_v39 = vsel %vm528_vm5, %v2859_v62, 0.0 }
 0xd2e   : > { %v2945_v41 = vadd.f32 %v2943_v13, %v2866_v39  ;;  %v2867_v58 = vadd.f32 %v2866_v39, %v2865_v28 }
 0xd30   : > { %v2842_v7 = vpop.f32.mrf.mxu1 }
 0xd31   : > { %v8355_v54 = vmul.f32 0.14433756, %v2842_v7  ;;  %v2906_v7 = vadd.f32 %v2905_v21, %v2904_v26 }
 0xd33   : > { %v2860_v27 = vmul.f32 0.0, %v8355_v54  ;;  %v2946_v52 = vsel %vm528_vm5, %v8355_v54, 0.0 }
 0xd34   : > { %v2947_v38 = vadd.f32 %v2946_v52, %v2945_v41 }
 0xd35   : > { %v2868_v33 = vsel %vm528_vm5, %v2860_v27, 0.0 }
 0xd36   : > { %v2869_v16 = vadd.f32 %v2868_v33, %v2867_v58  ;;  %v2908_v59 = vadd.f32 %v2906_v7, %v2868_v33 }
 0xd38   : > { %v2845_v22 = vpop.f32.mrf.mxu1 }
 0xd39   : > { %v8358_v12 = vmul.f32 0.14433756, %v2845_v22 }
 0xd3b   : > { %v2861_v30 = vmul.f32 0.0, %v8358_v12  ;;  %v2948_v44 = vsel %vm528_vm5, %v8358_v12, 0.0 }
 0xd3c   : > { %v2949_v1 = vadd.f32 %v2948_v44, %v2947_v38 }
 0xd3d   : > { %v2870_v62 = vsel %vm528_vm5, %v2861_v30, 0.0 }
 0xd3e   : > { %v2871_v15 = vadd.f32 %v2870_v62, %v2869_v16  ;;  %v2910_v9 = vadd.f32 %v2908_v59, %v2870_v62 }
 0xd40   : > { %v2848_v19 = vpop.f32.mrf.mxu1 }
 0xd41   : > { %v2856_v22 = vmul.f32 0.14433756, %v2848_v19 }
 0xd43   : > { %v2862_v60 = vmul.f32 0.0, %v2856_v22  ;;  %v2950_v37 = vsel %vm528_vm5, %v2856_v22, 0.0 }
 0xd44   : > { %v2951_v13 = vadd.f32 %v2950_v37, %v2949_v1 }
 0xd45   : > { %v2872_v27 = vsel %vm528_vm5, %v2862_v60, 0.0 }
 0xd46   : > { %v2873_v8 = vadd.f32 %v2872_v27, %v2871_v15  ;;  %v2912_v61 = vadd.f32 %v2910_v9, %v2872_v27  ;;  %v2952_v39 = vrot.slane %v2951_v13, 4 }
 0xd48   : > { %v2913_v21 = vrot.slane %v2912_v61, 4  ;;  %v2874_v52 = vrot.slane %v2873_v8, 4  ;;  %v2953_v28 = vadd.f32 %v2952_v39, %v2951_v13 }
 0xd4a   : > { %v2914_v26 = vadd.f32 %v2913_v21, %v2912_v61  ;;  %v2875_v30 = vadd.f32 %v2874_v52, %v2873_v8  ;;  %v2954_v33 = vrot.slane %v2953_v28, 2 }
 0xd4c   : > { %v2915_v41 = vrot.slane %v2914_v26, 2  ;;  %v2876_v58 = vrot.slane %v2875_v30, 2  ;;  %v2955_v16 = vadd.f32 %v2954_v33, %v2953_v28 }
 0xd4e   : > { %v2916_v44 = vadd.f32 %v2915_v41, %v2914_v26  ;;  %v2877_v7 = vadd.f32 %v2876_v58, %v2875_v30  ;;  %v2956_v37 = vrot.slane %v2955_v16, 1 }
 0xd50   : > { %v2917_v38 = vrot.slane %v2916_v44, 1  ;;  %v2878_v19 = vrot.slane %v2877_v7, 1  ;;  %v2957_v15 = vadd.f32 %v2956_v37, %v2955_v16 }
 0xd52   : > { %v2918_v59 = vadd.f32 %v2917_v38, %v2916_v44  ;;  %v2879_v1 = vadd.f32 %v2878_v19, %v2877_v7  ;;  %v2958_v61 = vsel %vm528_vm5, %v2957_v15, 0.0 }
 0xd54   : > { %v2919_v60 = vsel %vm528_vm5, %v2918_v59, 0.0  ;;  %v2880_v62 = vsel %vm528_vm5, %v2879_v1, 0.0 }
 0xd55   : > { %2920 = vadd.xlane.f32.xlu1 %v2919_v60  ;;  %2881 = vadd.xlane.f32.xlu0 %v2880_v62 }
 0xd5d   : > { %2959 = vadd.xlane.f32.xlu1 %v2958_v61 }
 0xdc8   : > { %v2921_v9 = vpop.xlane.xlu1 %2920  ;;  %v2882_v13 = vpop.xlane.xlu0 %2881 }
 0xdc9   : > { %v2922_v27 = vmul.f32 0.0013020834, %v2921_v9  ;;  %v2883_v8 = vmul.f32 0.0026041667, %v2882_v13 }
 0xdcb   : > { %v2923_v39 = vmul.f32 0.0, %v2922_v27  ;;  %v2885_v21 = vmul.f32 0.0, %v2883_v8 }
 0xdcd   : > { %v2932_v28 = vadd.f32 %v2923_v39, %v2885_v21  ;;  %v2929_v30 = vadd.f32 %v2923_v39, %v2883_v8  ;;  %v2930_v41 = vadd.f32 %v2922_v27, %v2885_v21 }
 0xdd0   : > { %v2960_v52 = vpop.xlane.xlu1 %2959 }
 0xdd1   : > { %v2961_v26 = vmul.f32 0.00086805556, %v2960_v52 }
 0xdd3   : > { %v2962_v58 = vmul.f32 0.0, %v2961_v26  ;;  %v2971_v33 = vadd.f32 %v2961_v26, %v2932_v28 }
 0xdd5   : > { %v2968_v44 = vadd.f32 %v2962_v58, %v2929_v30  ;;  %v2969_v7 = vadd.f32 %v2962_v58, %v2930_v41  ;;  %v8382_v38 = vsub.f32 %v8355_v54, %v2971_v33  ;;  %v8394_v1 = vsub.f32 %v8358_v12, %v2971_v33 }
 0xdd6   : > { %v8396_v60 = vsub.f32 %v2856_v22, %v2971_v33 }
 0xdd7   : > { %v8385_v19 = vsub.f32 %v8348_v57, %v2968_v44  ;;  %v8388_v16 = vsub.f32 %v8346_v32, %v2969_v7  ;;  %v8391_v59 = vsub.f32 %v8350_v25, %v2969_v7  ;;  %v2983_v62 = vmul.f32 %v8382_v38, %v8382_v38 }
 0xdd8   : > { %v2984_v25 = vmul.f32 %v8394_v1, %v8394_v1  ;;  %v2985_v22 = vmul.f32 %v8396_v60, %v8396_v60 }
 0xdd9   : > { %v2980_v54 = vmul.f32 %v8385_v19, %v8385_v19  ;;  %v2981_v57 = vmul.f32 %v8388_v16, %v8388_v16  ;;  %v2982_v32 = vmul.f32 %v8391_v59, %v8391_v59  ;;  %v2989_v61 = vmul.f32 0.0, %v2983_v62 }
 0xdda   : > { %v2990_v30 = vmul.f32 0.0, %v2984_v25  ;;  %v3075_v44 = vsel %vm528_vm5, %v2983_v62, 0.0  ;;  %v2991_v7 = vmul.f32 0.0, %v2985_v22 }
 0xddb   : > { %v2987_v37 = vmul.f32 0.0, %v2981_v57  ;;  %v2988_v12 = vmul.f32 0.0, %v2982_v32  ;;  %v3025_v15 = vmul.f32 0.0, %v2980_v54  ;;  %v2992_v9 = vsel %vm528_vm5, %v2980_v54, 0.0 }
 0xddc   : > { %v3032_v8 = vsel %vm528_vm5, %v2981_v57, 0.0  ;;  %v3034_v26 = vsel %vm528_vm5, %v2982_v32, 0.0  ;;  %v2997_v54 = vsel %vm528_vm5, %v2989_v61, 0.0  ;;  %v3077_v57 = vsel %vm528_vm5, %v2984_v25, 0.0 }
 0xddd   : > { %v2993_v13 = vsel %vm528_vm5, %v2987_v37, 0.0  ;;  %v3031_v27 = vsel %vm528_vm5, %v3025_v15, 0.0  ;;  %v2995_v28 = vsel %vm528_vm5, %v2988_v12, 0.0  ;;  %v3079_v32 = vsel %vm528_vm5, %v2985_v22, 0.0 }
 0xdde   : > { %v2994_v39 = vadd.f32 %v2993_v13, %v2992_v9  ;;  %v3033_v21 = vadd.f32 %v3032_v8, %v3031_v27  ;;  %v3072_v52 = vadd.f32 %v3031_v27, %v2993_v13  ;;  %v2999_v9 = vsel %vm528_vm5, %v2990_v30, 0.0 }
 0xddf   : > { %v3001_v8 = vsel %vm528_vm5, %v2991_v7, 0.0 }
 0xde0   : > { %v2996_v41 = vadd.f32 %v2995_v28, %v2994_v39  ;;  %v3035_v58 = vadd.f32 %v3034_v26, %v3033_v21  ;;  %v3074_v33 = vadd.f32 %v3072_v52, %v2995_v28 }
 0xde2   : > { %v3076_v37 = vadd.f32 %v3075_v44, %v3074_v33  ;;  %v2998_v15 = vadd.f32 %v2997_v54, %v2996_v41  ;;  %v3037_v23 = vadd.f32 %v3035_v58, %v2997_v54 }
 0xde4   : > { %v3078_v13 = vadd.f32 %v3077_v57, %v3076_v37  ;;  %v3000_v12 = vadd.f32 %v2999_v9, %v2998_v15  ;;  %v3039_v27 = vadd.f32 %v3037_v23, %v2999_v9 }
 0xde6   : > { %v3080_v39 = vadd.f32 %v3079_v32, %v3078_v13  ;;  %v3002_v21 = vadd.f32 %v3001_v8, %v3000_v12  ;;  %v3041_v62 = vadd.f32 %v3039_v27, %v3001_v8 }
 0xde8   : > { %v3081_v52 = vrot.slane %v3080_v39, 4  ;;  %v3003_v28 = vrot.slane %v3002_v21, 4  ;;  %v3042_v61 = vrot.slane %v3041_v62, 4 }
 0xdea   : > { %v3082_v26 = vadd.f32 %v3081_v52, %v3080_v39  ;;  %v3004_v41 = vadd.f32 %v3003_v28, %v3002_v21  ;;  %v3043_v58 = vadd.f32 %v3042_v61, %v3041_v62 }
 0xdec   : > { %v3083_v33 = vrot.slane %v3082_v26, 2  ;;  %v3005_v25 = vrot.slane %v3004_v41, 2  ;;  %v3044_v44 = vrot.slane %v3043_v58, 2 }
 0xdee   : > { %v3084_v30 = vadd.f32 %v3083_v33, %v3082_v26  ;;  %v3006_v54 = vadd.f32 %v3005_v25, %v3004_v41  ;;  %v3045_v15 = vadd.f32 %v3044_v44, %v3043_v58 }
 0xdf0   : > { %v3085_v37 = vrot.slane %v3084_v30, 1  ;;  %v3007_v23 = vrot.slane %v3006_v54, 1  ;;  %v3046_v13 = vrot.slane %v3045_v15, 1 }
 0xdf2   : > { %v3086_v22 = vadd.f32 %v3085_v37, %v3084_v30  ;;  %v3008_v57 = vadd.f32 %v3007_v23, %v3006_v54  ;;  %v3047_v12 = vadd.f32 %v3046_v13, %v3045_v15 }
 0xdf4   : > { %v3087_v7 = vsel %vm528_vm5, %v3086_v22, 0.0  ;;  %v3009_v9 = vsel %vm528_vm5, %v3008_v57, 0.0  ;;  %v3048_v27 = vsel %vm528_vm5, %v3047_v12, 0.0 }
 0xdf5   : > { %3088 = vadd.xlane.f32.xlu1 %v3087_v7  ;;  %3010 = vadd.xlane.f32.xlu2 %v3009_v9 }
 0xdfd   : > { %3049 = vadd.xlane.f32.xlu2 %v3048_v27 }
 0xe68   : > { %v3011_v32 = vpop.xlane.xlu2 %3010  ;;  %v3089_v8 = vpop.xlane.xlu1 %3088 }
 0xe69   : > { %v3012_v39 = vmul.f32 0.0026041667, %v3011_v32  ;;  %v3090_v21 = vmul.f32 0.00086805556, %v3089_v8 }
 0xe6b   : > { %v3014_v52 = vmul.f32 0.0, %v3012_v39  ;;  %v3091_v61 = vmul.f32 0.0, %v3090_v21 }
 0xe70   : > { %v3050_v62 = vpop.xlane.xlu2 %3049 }
 0xe71   : > { %v3051_v28 = vmul.f32 0.0013020834, %v3050_v62 }
 0xe73   : > { %v3052_v26 = vmul.f32 0.0, %v3051_v28  ;;  %v3059_v41 = vadd.f32 %v3051_v28, %v3014_v52 }
 0xe75   : > { %v3058_v58 = vadd.f32 %v3052_v26, %v3012_v39  ;;  %v3061_v33 = vadd.f32 %v3052_v26, %v3014_v52  ;;  %v3098_v25 = vadd.f32 %v3091_v61, %v3059_v41 }
 0xe77   : > { %v3097_v44 = vadd.f32 %v3091_v61, %v3058_v58  ;;  %v3100_v30 = vadd.f32 %v3090_v21, %v3061_v33  ;;  %v3104_v54 = vadd.f32 1e-05, %v3098_v25 }
 0xe79   : > { %v3103_v37 = vadd.f32 1e-05, %v3097_v44  ;;  %v3106_v23 = vadd.f32 1e-05, %v3100_v30  ;;  %7033 = vrsqrt.f32 %v3104_v54  ;;  %vm3125_vm10 = vweird.f32 %v3104_v54 }
 0xe7b   : > { %7035 = vrsqrt.f32 %v3103_v37  ;;  %vm3115_vm13 = vweird.f32 %v3103_v37  ;;  %vm3145_vm1 = vweird.f32 %v3106_v23 }
 0xe7c   : > { %7037 = vrsqrt.f32 %v3106_v23 }
 0xe7f   : > { %v7034_v15 = vpop.eup %7033 }
 0xe80   : > { %v3120_v22 = vmul.f32 %v7034_v15, %v3104_v54  ;;  %vm3126_vm9 = vweird.f32 %v7034_v15 }
 0xe81   : > { %v7036_v57 = vpop.eup %7035  ;;  %vm3127_vm12 = vmor %vm3125_vm10, %vm3126_vm9 }
 0xe82   : > { %v7038_v7 = vpop.eup %7037  ;;  %v3110_v9 = vmul.f32 %v7036_v57, %v3103_v37  ;;  %v3121_v13 = vmul.f32 %v7034_v15, %v3120_v22  ;;  %vm3116_vm11 = vweird.f32 %v7036_v57 }
 0xe83   : > { %v3140_v12 = vmul.f32 %v7038_v7, %v3106_v23  ;;  %vm3146_vm14 = vweird.f32 %v7038_v7  ;;  %vm3117_vm0 = vmor %vm3115_vm13, %vm3116_vm11 }
 0xe84   : > { %v3122_v27 = vmul.f32 0.5, %v3121_v13  ;;  %v3111_v32 = vmul.f32 %v7036_v57, %v3110_v9  ;;  %vm3147_vm2 = vmor %vm3145_vm1, %vm3146_vm14 }
 0xe85   : > { %v3141_v8 = vmul.f32 %v7038_v7, %v3140_v12 }
 0xe86   : > { %v3123_v39 = vsub.f32 1.5, %v3122_v27  ;;  %v3112_v62 = vmul.f32 0.5, %v3111_v32 }
 0xe87   : > { %v3142_v21 = vmul.f32 0.5, %v3141_v8 }
 0xe88   : > { %v3124_v52 = vmul.f32 %v7034_v15, %v3123_v39  ;;  %v3113_v28 = vsub.f32 1.5, %v3112_v62 }
 0xe89   : > { %v3143_v61 = vsub.f32 1.5, %v3142_v21 }
 0xe8a   : > { %v3128_v26 = vsel %vm3127_vm12, %v7034_v15, %v3124_v52  ;;  %v3114_v41 = vmul.f32 %v7036_v57, %v3113_v28 }
 0xe8b   : > { %v3170_v58 = vmul.f32 %v3128_v26, %v8388_v16  ;;  %v3144_v33 = vmul.f32 %v7038_v7, %v3143_v61  ;;  %v3171_v37 = vmul.f32 %v3128_v26, %v8391_v59 }
 0xe8c   : > { %v3118_v25 = vsel %vm3117_vm0, %v7036_v57, %v3114_v41 }
 0xe8d   : > { %v3178_v44 = vsel %vm528_vm5, %v3170_v58, -inf  ;;  %v3169_v30 = vmul.f32 %v3118_v25, %v8385_v19  ;;  %v3148_v54 = vsel %vm3147_vm2, %v7038_v7, %v3144_v33  ;;  %v3181_v57 = vsel %vm528_vm5, %v3171_v37, -inf }
 0xe8e   : > { %3179 = vmax.xlane.f32.xlu1 %v3178_v44  ;;  %v3172_v15 = vmul.f32 %v3148_v54, %v8382_v38  ;;  %v3174_v23 = vmul.f32 %v3148_v54, %v8396_v60  ;;  %v3173_v19 = vmul.f32 %v3148_v54, %v8394_v1 }
 0xe8f   : > { %v3175_v22 = vsel %vm528_vm5, %v3169_v30, -inf }
 0xe90   : > { %3176 = vmax.xlane.f32.xlu2 %v3175_v22  ;;  %v3184_v16 = vsel %vm528_vm5, %v3172_v15, -inf  ;;  %v3190_v9 = vsel %vm528_vm5, %v3174_v23, -inf  ;;  %v3187_v7 = vsel %vm528_vm5, %v3173_v19, -inf }
 0xe96   : > { %3185 = vmax.xlane.f32.xlu1 %v3184_v16 }
 0xe98   : > { %3182 = vmax.xlane.f32.xlu2 %v3181_v57 }
 0xe9e   : > { %3191 = vmax.xlane.f32.xlu1 %v3190_v9 }
 0xea0   : > { %3188 = vmax.xlane.f32.xlu2 %v3187_v7 }
 0xf01   : > { %v3180_v13 = vpop.xlane.xlu1 %3179 }
 0xf02   : > { %v3194_v38 = vsub.f32 %v3170_v58, %v3180_v13 }
 0xf03   : > { %v3177_v12 = vpop.xlane.xlu2 %3176 }
 0xf04   : > { %v3201_v59 = vmul.f32 1.442695, %v3194_v38  ;;  %v3193_v27 = vsub.f32 %v3169_v30, %v3177_v12 }
 0xf06   : > { %7039 = vpow2.f32 %v3201_v59  ;;  %v3199_v32 = vmul.f32 1.442695, %v3193_v27 }
 0xf08   : > { %7041 = vpow2.f32 %v3199_v32 }
 0xf09   : > { %v3186_v8 = vpop.xlane.xlu1 %3185 }
 0xf0a   : > { %v3196_v39 = vsub.f32 %v3172_v15, %v3186_v8 }
 0xf0b   : > { %v3183_v62 = vpop.xlane.xlu2 %3182 }
 0xf0c   : > { %v8437_v60 = vpop.eup %7039  ;;  %v3205_v1 = vmul.f32 1.442695, %v3196_v39  ;;  %v3195_v21 = vsub.f32 %v3171_v37, %v3183_v62 }
 0xf0d   : > { %v3214_v52 = vsel %vm528_vm5, %v8437_v60, 0.0 }
 0xf0e   : > { %v8441_v28 = vpop.eup %7041  ;;  %7043 = vpow2.f32 %v3205_v1  ;;  %v3203_v61 = vmul.f32 1.442695, %v3195_v21  ;;  %3215 = vadd.xlane.f32.xlu1 %v3214_v52 }
 0xf0f   : > { %v3211_v26 = vsel %vm528_vm5, %v8441_v28, 0.0 }
 0xf10   : > { %7045 = vpow2.f32 %v3203_v61  ;;  %3212 = vadd.xlane.f32.xlu2 %v3211_v26 }
 0xf11   : > { %v3192_v41 = vpop.xlane.xlu1 %3191 }
 0xf12   : > { %v3198_v58 = vsub.f32 %v3174_v23, %v3192_v41 }
 0xf13   : > { %v3189_v33 = vpop.xlane.xlu2 %3188 }
 0xf14   : > { %v8445_v25 = vpop.eup %7043  ;;  %v3209_v44 = vmul.f32 1.442695, %v3198_v58  ;;  %v3197_v30 = vsub.f32 %v3173_v19, %v3189_v33 }
 0xf15   : > { %v3220_v54 = vsel %vm528_vm5, %v8445_v25, 0.0 }
 0xf16   : > { %v8449_v22 = vpop.eup %7045  ;;  %7047 = vpow2.f32 %v3209_v44  ;;  %v3207_v15 = vmul.f32 1.442695, %v3197_v30  ;;  %3221 = vadd.xlane.f32.xlu0 %v3220_v54 }
 0xf17   : > { %v3217_v37 = vsel %vm528_vm5, %v8449_v22, 0.0 }
 0xf18   : > { %7049 = vpow2.f32 %v3207_v15  ;;  %3218 = vadd.xlane.f32.xlu2 %v3217_v37 }
 0xf1c   : > { %v8453_v16 = vpop.eup %7047 }
 0xf1d   : > { %v3226_v23 = vsel %vm528_vm5, %v8453_v16, 0.0 }
 0xf1e   : > { %v8455_v57 = vpop.eup %7049 }
 0xf1f   : > { %v3223_v19 = vsel %vm528_vm5, %v8455_v57, 0.0 }
 0xf20   : > { %3227 = vadd.xlane.f32.xlu2 %v3226_v23  ;;  %3224 = vadd.xlane.f32.xlu1 %v3223_v19 }
 0xf81   : > { %v3216_v9 = vpop.xlane.xlu1 %3215 }
 0xf82   : > { %7051 = vrcp.f32 %v3216_v9  ;;  %v3252_v39 = vand.u32 2147483647, %v3216_v9  ;;  %v3254_v62 = vand.u32 2147483648, %v3216_v9  ;;  %vm3248_vm6 = vweird.f32 %v3216_v9 }
 0xf83   : > { %v3213_v7 = vpop.xlane.xlu2 %3212 }
 0xf84   : > { %7053 = vrcp.f32 %v3213_v7  ;;  %v3238_v52 = vand.u32 2147483647, %v3213_v7  ;;  %v3240_v61 = vand.u32 2147483648, %v3213_v7  ;;  %vm3253_vm9 = vcmp.eq.f32.partialorder %v3252_v39, 8.507059e+37 }
 0xf85   : > { %v3255_v33 = vor.u32 1.1754944e-38, %v3254_v62  ;;  %vm3234_vm10 = vweird.f32 %v3213_v7 }
 0xf86   : > { %vm3239_vm12 = vcmp.eq.f32.partialorder %v3238_v52, 8.507059e+37  ;;  %v3241_v23 = vor.u32 1.1754944e-38, %v3240_v61 }
 0xf88   : > { %v7052_v13 = vpop.eup %7051 }
 0xf89   : > { %v3244_v38 = vmul.f32 %v7052_v13, %v3216_v9  ;;  %v3222_v12 = vpop.xlane.xlu0 %3221  ;;  %vm3249_vm4 = vweird.f32 %v7052_v13 }
 0xf8a   : > { %v7054_v59 = vpop.eup %7053  ;;  %7055 = vrcp.f32 %v3222_v12  ;;  %vm3250_vm8 = vmor %vm3248_vm6, %vm3249_vm4  ;;  %v3280_v39 = vand.u32 2147483647, %v3222_v12  ;;  %v3282_v62 = vand.u32 2147483648, %v3222_v12  ;;  %vm3276_vm14 = vweird.f32 %v3222_v12 }
 0xf8b   : > { %v3245_v27 = vsub.f32 1.0, %v3244_v38  ;;  %v3230_v32 = vmul.f32 %v7054_v59, %v3213_v7  ;;  %v3219_v8 = vpop.xlane.xlu2 %3218  ;;  %vm3235_vm7 = vweird.f32 %v7054_v59 }
 0xf8c   : > { %7057 = vrcp.f32 %v3219_v8  ;;  %vm3236_vm11 = vmor %vm3234_vm10, %vm3235_vm7  ;;  %v3268_v52 = vand.u32 2147483648, %v3219_v8  ;;  %vm3281_vm2 = vcmp.eq.f32.partialorder %v3280_v39, 8.507059e+37  ;;  %vm3262_vm4 = vweird.f32 %v3219_v8 }
 0xf8d   : > { %v3246_v1 = vmul.f32 %v7052_v13, %v3245_v27  ;;  %v3231_v21 = vsub.f32 1.0, %v3230_v32 }
 0xf8f   : > { %v3247_v26 = vadd.f32 %v7052_v13, %v3246_v1  ;;  %v3232_v41 = vmul.f32 %v7054_v59, %v3231_v21 }
 0xf90   : > { %v7056_v58 = vpop.eup %7055 }
 0xf91   : > { %v3251_v44 = vsel %vm3250_vm8, %v7052_v13, %v3247_v26  ;;  %v3233_v30 = vadd.f32 %v7054_v59, %v3232_v41  ;;  %v3272_v54 = vmul.f32 %v7056_v58, %v3222_v12  ;;  %vm3277_vm13 = vweird.f32 %v7056_v58 }
 0xf92   : > { %v7058_v15 = vpop.eup %7057  ;;  %v3256_v37 = vsel %vm3253_vm9, %v3255_v33, %v3251_v44  ;;  %vm3278_vm1 = vmor %vm3276_vm14, %vm3277_vm13  ;;  %v3283_v41 = vor.u32 1.1754944e-38, %v3282_v62 }
 0xf93   : > { %v8462_v19 = vmul.f32 %v8437_v60, %v3256_v37  ;;  %v3237_v38 = vsel %vm3236_vm11, %v7054_v59, %v3233_v30  ;;  %v3273_v9 = vsub.f32 1.0, %v3272_v54  ;;  %v3258_v27 = vmul.f32 %v7058_v15, %v3219_v8  ;;  %v3225_v32 = vpop.xlane.xlu1 %3224  ;;  %v3228_v1 = vpop.xlane.xlu2 %3227 }
 0xf94   : > { %v3242_v21 = vsel %vm3239_vm12, %v3241_v23, %v3237_v38  ;;  %7059 = vrcp.f32 %v3225_v32  ;;  %vm3263_vm0 = vweird.f32 %v7058_v15  ;;  %v3266_v59 = vand.u32 2147483647, %v3219_v8 }
 0xf95   : > { %v8465_v7 = vmul.f32 %v8441_v28, %v3242_v21  ;;  %v3274_v13 = vmul.f32 %v7056_v58, %v3273_v9  ;;  %v3259_v26 = vsub.f32 1.0, %v3258_v27  ;;  %7061 = vrcp.f32 %v3228_v1  ;;  %vm3264_vm6 = vmor %vm3262_vm4, %vm3263_vm0 }
 0xf96   : > { %v3269_v28 = vor.u32 1.1754944e-38, %v3268_v52  ;;  %vm3267_vm7 = vcmp.eq.f32.partialorder %v3266_v59, 8.507059e+37  ;;  %v3296_v62 = vand.u32 2147483648, %v3225_v32  ;;  %v3294_v39 = vand.u32 2147483647, %v3225_v32 }
 0xf97   : > { %v3275_v60 = vadd.f32 %v7056_v58, %v3274_v13  ;;  %v3260_v61 = vmul.f32 %v7058_v15, %v3259_v26  ;;  %vm3290_vm9 = vweird.f32 %v3225_v32  ;;  %v3310_v26 = vand.u32 2147483648, %v3228_v1 }
 0xf98   : > { %vm3295_vm12 = vcmp.eq.f32.partialorder %v3294_v39, 8.507059e+37  ;;  %vm3304_vm13 = vweird.f32 %v3228_v1 }
 0xf99   : > { %v3279_v33 = vsel %vm3278_vm1, %v7056_v58, %v3275_v60  ;;  %v3261_v44 = vadd.f32 %v7058_v15, %v3260_v61 }
 0xf9a   : > { %v7060_v30 = vpop.eup %7059  ;;  %v3284_v54 = vsel %vm3281_vm2, %v3283_v41, %v3279_v33  ;;  %v3311_v41 = vor.u32 1.1754944e-38, %v3310_v26 }
 0xf9b   : > { %v3316_v37 = vmul.f32 %v8445_v25, %v3284_v54  ;;  %v3265_v23 = vsel %vm3264_vm6, %v7058_v15, %v3261_v44  ;;  %v3286_v12 = vmul.f32 %v7060_v30, %v3225_v32  ;;  %v7062_v38 = vpop.eup %7061  ;;  %vm3291_vm8 = vweird.f32 %v7060_v30 }
 0xf9c   : > { %v3270_v9 = vsel %vm3267_vm7, %v3269_v28, %v3265_v23  ;;  %v3300_v13 = vmul.f32 %v7062_v38, %v3228_v1  ;;  %vm3305_vm10 = vweird.f32 %v7062_v38  ;;  %v3308_v25 = vand.u32 2147483647, %v3228_v1  ;;  %vm3292_vm11 = vmor %vm3290_vm9, %vm3291_vm8 }
 0xf9d   : > { %v3315_v27 = vmul.f32 %v8449_v22, %v3270_v9  ;;  %v3287_v21 = vsub.f32 1.0, %v3286_v12  ;;  %v3297_v15 = vor.u32 1.1754944e-38, %v3296_v62  ;;  %vm3306_vm14 = vmor %vm3304_vm13, %vm3305_vm10 }
 0xf9e   : > { %v3301_v8 = vsub.f32 1.0, %v3300_v13  ;;  %vm3309_vm0 = vcmp.eq.f32.partialorder %v3308_v25, 8.507059e+37 }
 0xf9f   : > { %v3288_v58 = vmul.f32 %v7060_v30, %v3287_v21 }
 0xfa0   : > { %v3302_v52 = vmul.f32 %v7062_v38, %v3301_v8 }
 0xfa1   : > { %v3289_v60 = vadd.f32 %v7060_v30, %v3288_v58 }
 0xfa2   : > { %v3303_v59 = vadd.f32 %v7062_v38, %v3302_v52  ;;  %3321 = sbr.rel (%p6801_p5) target bundleno = 4013 (0xfad), region = 68 }
 0xfa3   : > { %v3293_v61 = vsel %vm3292_vm11, %v7060_v30, %v3289_v60 }
 0xfa4   : > { %v3298_v22 = vsel %vm3295_vm12, %v3297_v15, %v3293_v61  ;;  %v3307_v44 = vsel %vm3306_vm14, %v7062_v38, %v3303_v59 }
 0xfa5   : > { %v3317_v33 = vmul.f32 %v8455_v57, %v3298_v22  ;;  %v3312_v54 = vsel %vm3309_vm0, %v3311_v41, %v3307_v44 }
 0xfa6   : > { %v3318_v32 = vmul.f32 %v8453_v16, %v3312_v54 }
 0xfa7   : > { %3322 = vst.msk [vmem:[%s9929_s8 + $0x90] sm:$0xff] %vm528_vm5, %v8465_v7 }
 0xfa8   : > { %3323 = vst.msk [vmem:[%s9929_s8 + $0x98] sm:$0xff] %vm528_vm5, %v8462_v19 }
 0xfa9   : > { %3324 = vst.msk [vmem:[%s9929_s8 + $0xa0] sm:$0xff] %vm528_vm5, %v3315_v27 }
 0xfaa   : > { %3325 = vst.msk [vmem:[%s9929_s8 + $0xa8] sm:$0xff] %vm528_vm5, %v3316_v37 }
 0xfab   : > { %3326 = vst.msk [vmem:[%s9929_s8 + $0xb0] sm:$0xff] %vm528_vm5, %v3317_v33 }
 0xfac   : > { %3327 = vst.msk [vmem:[%s9929_s8 + $0xb8] sm:$0xff] %vm528_vm5, %v3318_v32 }
 0xfad PF: > { %3504 = vrot.lane.b32.xlu0 %v7649_v47, %s7277_s25  ;;  %3508 = vrot.lane.b32.xlu1 %v7657_v34, %s7277_s25  ;;  %v9999_v16 = vld [vmem:[#allocation14_spill] sm:$0xff]  ;;  %s7278_s22 = smov 16   ;;  %s7279_s23 = smov 96   ;;  %v7068_v34 = vpack.i.bf16 %v8106_v3, %v8103_v6  ;;  %vm9961_vm1 = vcmask 785408   ;;  %vm9960_vm2 = vcmask 523264  }
 0xfae   : > { %3512 = vrot.lane.b32.xlu2 %v7665_v0, %s7277_s25  ;;  %3542 = vmatpush.msra.mxu2 %v7679_v10  ;;  %s7280_s26 = smov 48   ;;  %s7281_s10 = smov 64  }
 0xfb0   : > { %3543 = vmatpush.msra.mxu2 %v7673_v5 }
 0xfb5   : > { %3506 = vrot.lane.b32.xlu0 %v7653_v55, %s7277_s25  ;;  %3510 = vrot.lane.b32.xlu1 %v7661_v43, %s7277_s25  ;;  %v7063_v43 = vpack.i.bf16 %v8109_v40, %v8112_v49 }
 0xfb6   : > { %3514 = vrot.lane.b32.xlu2 %v9999_v16, %s7277_s25 }
 0xfbd   : > { %3392 = vrot.lane.b32.xlu0 %v3318_v32, %s7278_s22  ;;  %3366 = vrot.lane.b32.xlu1 %v8297_v20, %s7279_s23 }
 0xfbe   : > { %3368 = vrot.lane.b32.xlu2 %v8294_v29, %s7279_s23 }
 0xfc5   : > { %3390 = vrot.lane.b32.xlu0 %v3317_v33, %s7278_s22  ;;  %3364 = vrot.lane.b32.xlu1 %v8288_v50, %s7279_s23 }
 0xfc6   : > { %7064 = vrot.lane.b32.xlu2 %v7063_v43, %s7280_s26 }
 0xfcd   : > { %3388 = vrot.lane.b32.xlu0 %v3316_v37, %s7278_s22  ;;  %3386 = vrot.lane.b32.xlu1 %v3315_v27, %s7278_s22 }
 0xfce   : > { %3362 = vrot.lane.b32.xlu2 %v8291_v31, %s7279_s23 }
 0xfd5   : > { %3384 = vrot.lane.b32.xlu1 %v8462_v19, %s7278_s22  ;;  %7069 = vrot.lane.b32.xlu0 %v7068_v34, %s7280_s26 }
 0xfd6   : > { %3360 = vrot.lane.b32.xlu2 %v8282_v48, %s7279_s23 }
 0xfdd   : > { %3358 = vrot.lane.b32.xlu0 %v8285_v35, %s7279_s23 }
0x1008   : > { %v3513_v6 = vpop.permute.xlu2 %3512 }
0x1010   : > { %v3515_v3 = vpop.permute.xlu2 %3514 }
0x1018   : > { %v3369_v26 = vpop.permute.xlu2 %3368 }
0x101f   : > { %v3505_v47 = vpop.permute.xlu0 %3504  ;;  %v3509_v0 = vpop.permute.xlu1 %3508 }
0x1020   : > { %6831 = vmatmul.msk.f32.vlgmr.msra.gmra.mxu2 %vm1178_vm3, %v3505_v47 }
0x1027   : > { %v3507_v55 = vpop.permute.xlu0 %3506  ;;  %v3511_v50 = vpop.permute.xlu1 %3510 }
0x1028   : > { %6832 = vmatmul.msk.f32.gmra.mxu2 %vm1178_vm3, %v3507_v55 }
0x102f   : > { %v3393_v12 = vpop.permute.xlu0 %3392 }
0x1030   : > { %6833 = vmatmul.msk.f32.gmra.mxu2 %vm1178_vm3, %v3509_v0 }
0x1038   : > { %6834 = vmatmul.msk.f32.gmra.mxu2 %vm1178_vm3, %v3511_v50 }
0x1040   : > { %6835 = vmatmul.msk.f32.gmra.mxu2 %vm1178_vm3, %v3513_v6  ;;  %v3391_v6 = vpop.permute.xlu0 %3390 }
0x1048   : > { %6836 = vmatmul.msk.f32.gmra.mxu2 %vm1178_vm3, %v3515_v3 }
0x10a3   : > { %v3545_v40 = vpop.f32.mrf.mxu2 }
0x10a4   : > { %v8545_v57 = vmul.f32 0.14433756, %v3545_v40 }
0x10a6   : > { %v3608_v48 = vmul.f32 0.0, %v8545_v57  ;;  %v3575_v62 = vsel %vm528_vm5, %v8545_v57, 0.0 }
0x10a8   : > { %v3614_v38 = vsel %vm528_vm5, %v3608_v48, 0.0 }
0x10ab   : > { %v3548_v49 = vpop.f32.mrf.mxu2 }
0x10ac   : > { %v8543_v31 = vmul.f32 0.14433756, %v3548_v49 }
0x10ae   : > { %v3570_v19 = vmul.f32 0.0, %v8543_v31  ;;  %v3615_v9 = vsel %vm528_vm5, %v8543_v31, 0.0 }
0x10af   : > { %v3616_v52 = vadd.f32 %v3615_v9, %v3614_v38 }
0x10b0   : > { %v3576_v37 = vsel %vm528_vm5, %v3570_v19, 0.0 }
0x10b1   : > { %v3655_v13 = vadd.f32 %v3614_v38, %v3576_v37  ;;  %v3577_v60 = vadd.f32 %v3576_v37, %v3575_v62 }
0x10b3   : > { %v3551_v29 = vpop.f32.mrf.mxu2 }
0x10b4   : > { %v8547_v35 = vmul.f32 0.14433756, %v3551_v29 }
0x10b6   : > { %v3571_v1 = vmul.f32 0.0, %v8547_v35  ;;  %v3617_v58 = vsel %vm528_vm5, %v8547_v35, 0.0 }
0x10b7   : > { %v3618_v22 = vadd.f32 %v3617_v58, %v3616_v52  ;;  %v3389_v52 = vpop.permute.xlu0 %3388 }
0x10b8   : > { %v3578_v27 = vsel %vm528_vm5, %v3571_v1, 0.0 }
0x10b9   : > { %v3657_v25 = vadd.f32 %v3655_v13, %v3578_v27  ;;  %v3579_v59 = vadd.f32 %v3578_v27, %v3577_v60  ;;  %v3367_v60 = vpop.permute.xlu1 %3366 }
0x10bb   : > { %v3554_v20 = vpop.f32.mrf.mxu2 }
0x10bc   : > { %v8552_v30 = vmul.f32 0.14433756, %v3554_v20  ;;  %v7065_v20 = vpop.permute.xlu2 %7064 }
0x10bd   : > { %v7066_v9 = vunpack.i.l.bf16 %v7065_v20  ;;  %v7067_v27 = vunpack.i.h.bf16 %v7065_v20 }
0x10be   : > { %v3572_v21 = vmul.f32 0.0, %v8552_v30  ;;  %v3658_v39 = vsel %vm528_vm5, %v8552_v30, 0.0 }
0x10bf   : > { %v3659_v41 = vadd.f32 %v3658_v39, %v3657_v25  ;;  %v3405_v25 = vsel %vm528_vm5, %v7924_v56, %v7066_v9 }
0x10c0   : > { %v3580_v15 = vsel %vm528_vm5, %v3572_v21, 0.0 }
0x10c1   : > { %v3581_v32 = vadd.f32 %v3580_v15, %v3579_v59  ;;  %v3620_v16 = vadd.f32 %v3618_v22, %v3580_v15  ;;  %v3404_v15 = vsel %vm528_vm5, %v7931_v17, %v7067_v27 }
0x10c2   : > { %v3411_v17 = vsel %vm9961_vm1, %v3404_v15, %v3367_v60 }
0x10c3   : > { %v3557_v28 = vpop.f32.mrf.mxu2 }
0x10c4   : > { %v8555_v23 = vmul.f32 0.14433756, %v3557_v28 }
0x10c6   : > { %v3573_v8 = vmul.f32 0.0, %v8555_v23  ;;  %v3660_v61 = vsel %vm528_vm5, %v8555_v23, 0.0 }
0x10c7   : > { %v3661_v47 = vadd.f32 %v3660_v61, %v3659_v41  ;;  %v3418_v61 = vsel %vm1178_vm3, %v3369_v26, %v3393_v12 }
0x10c8   : > { %v3582_v44 = vsel %vm528_vm5, %v3573_v8, 0.0  ;;  %6823 = vmatpush.xpose.msk.msra.mxu3 %vm9960_vm2, %v3418_v61 }
0x10c9   : > { %v3583_v43 = vadd.f32 %v3582_v44, %v3581_v32  ;;  %v3622_v0 = vadd.f32 %v3620_v16, %v3582_v44  ;;  %v3417_v44 = vsel %vm1178_vm3, %v3367_v60, %v3391_v6 }
0x10cb   : > { %v3560_v33 = vpop.f32.mrf.mxu2 }
0x10cc   : > { %v8573_v54 = vmul.f32 0.14433756, %v3560_v33  ;;  %v3412_v33 = vsel %vm9961_vm1, %v3405_v25, %v3369_v26  ;;  %6824 = vmatpush.xpose.msk.msra.mxu3 %vm9960_vm2, %v3417_v44  ;;  %v3365_v26 = vpop.permute.xlu1 %3364 }
0x10cd   : > { %3466 = vmatpush.xpose.msrb.mxu0 %v3412_v33 }
0x10ce   : > { %v3574_v55 = vmul.f32 0.0, %v8573_v54  ;;  %v3662_v34 = vsel %vm528_vm5, %v8573_v54, 0.0 }
0x10cf   : > { %v3663_v50 = vadd.f32 %v3662_v34, %v3661_v47 }
0x10d0   : > { %v3584_v3 = vsel %vm528_vm5, %v3574_v55, 0.0  ;;  %v7070_v55 = vpop.permute.xlu0 %7069 }
0x10d1   : > { %v3585_v40 = vadd.f32 %v3584_v3, %v3583_v43  ;;  %v3624_v49 = vadd.f32 %v3622_v0, %v3584_v3  ;;  %v3664_v29 = vrot.slane %v3663_v50, 4  ;;  %3467 = vmatpush.xpose.msrb.mxu0 %v3411_v17  ;;  %v7072_v34 = vunpack.i.h.bf16 %v7070_v55  ;;  %v3363_v3 = vpop.permute.xlu2 %3362 }
0x10d2   : > { %v7071_v43 = vunpack.i.l.bf16 %v7070_v55  ;;  %v3416_v0 = vsel %vm1178_vm3, %v3365_v26, %v3389_v52 }
0x10d3   : > { %v3665_v19 = vadd.f32 %v3664_v29, %v3663_v50  ;;  %v3625_v48 = vrot.slane %v3624_v49, 4  ;;  %v3586_v1 = vrot.slane %v3585_v40, 4  ;;  %6825 = vmatpush.xpose.msk.msra.mxu3 %vm9960_vm2, %v3416_v0  ;;  %v3402_v50 = vsel %vm528_vm5, %v7906_v2, %v7072_v34 }
0x10d4   : > { %v3403_v6 = vsel %vm528_vm5, %v7928_v11, %v7071_v43  ;;  %v3387_v29 = vpop.permute.xlu1 %3386  ;;  %v10000_v11 = vld [vmem:[#allocation12_spill] sm:$0xff] }
0x10d5   : > { %v3666_v28 = vrot.slane %v3665_v19, 2  ;;  %v3626_v37 = vadd.f32 %v3625_v48, %v3624_v49  ;;  %v3587_v38 = vadd.f32 %v3586_v1, %v3585_v40  ;;  %v3410_v40 = vsel %vm9961_vm1, %v3403_v6, %v3365_v26 }
0x10d6   : > { %3468 = vmatpush.xpose.msrb.mxu0 %v3410_v40  ;;  %v3409_v49 = vsel %vm9961_vm1, %v3402_v50, %v3363_v3  ;;  %v3415_v20 = vsel %vm1178_vm3, %v3363_v3, %v3387_v29  ;;  %v7073_v1 = vpack.i.bf16 %v8100_v14, %v8097_v24 }
0x10d7   : > { %v3667_v21 = vadd.f32 %v3666_v28, %v3665_v19  ;;  %v3627_v13 = vrot.slane %v3626_v37, 2  ;;  %v3588_v62 = vrot.slane %v3587_v38, 2  ;;  %6826 = vmatpush.xpose.msk.msra.mxu3 %vm9960_vm2, %v3415_v20 }
0x10d8   : > { %v8614_v28 = vpop.permute.xlu0 %3358 }
0x10d9   : > { %v3668_v58 = vrot.slane %v3667_v21, 1  ;;  %v3628_v39 = vadd.f32 %v3627_v13, %v3626_v37  ;;  %v3589_v8 = vadd.f32 %v3588_v62, %v3587_v38  ;;  %v8602_v19 = vpop.permute.xlu2 %3360 }
0x10da   : > { %3469 = vmatpush.xpose.msrb.mxu0 %v3409_v49 }
0x10db   : > { %v3669_v59 = vadd.f32 %v3668_v58, %v3667_v21  ;;  %v3629_v22 = vrot.slane %v3628_v39, 1  ;;  %v3590_v41 = vrot.slane %v3589_v8, 1 }
0x10dc   : > { %v3385_v48 = vpop.permute.xlu1 %3384 }
0x10dd   : > { %v3670_v32 = vsel %vm528_vm5, %v3669_v59, 0.0  ;;  %v3630_v56 = vadd.f32 %v3629_v22, %v3628_v39  ;;  %v3591_v16 = vadd.f32 %v3590_v41, %v3589_v8  ;;  %v3414_v2 = vsel %vm1178_vm3, %v8602_v19, %v3385_v48 }
0x10de   : > { %3671 = vadd.xlane.f32.xlu2 %v3670_v32  ;;  %6827 = vmatpush.xpose.msk.msra.mxu3 %vm9960_vm2, %v3414_v2 }
0x10df   : > { %v3631_v12 = vsel %vm528_vm5, %v3630_v56, 0.0  ;;  %v3592_v47 = vsel %vm528_vm5, %v3591_v16, 0.0 }
0x10e0   : > { %3632 = vadd.xlane.f32.xlu1 %v3631_v12  ;;  %3593 = vadd.xlane.f32.xlu0 %v3592_v47 }
0x10f4   : > { %3423 = vrot.lane.b32.xlu0 %v10000_v11, %s7281_s10 }
0x10f6   : > { %3382 = vrot.lane.b32.xlu2 %v8465_v7, %s7278_s22 }
0x10f9   : > { %7074 = vrot.lane.b32.xlu1 %v7073_v1, %s7280_s26 }
0x1151   : > { %v3672_v37 = vpop.xlane.xlu2 %3671 }
0x1152   : > { %v3673_v27 = vmul.f32 0.00086805556, %v3672_v37 }
0x1153   : > { %v3633_v38 = vpop.xlane.xlu1 %3632  ;;  %v3594_v9 = vpop.xlane.xlu0 %3593 }
0x1154   : > { %v3634_v21 = vmul.f32 0.0013020834, %v3633_v38  ;;  %v3595_v13 = vmul.f32 0.0026041667, %v3594_v9  ;;  %v3674_v39 = vmul.f32 0.0, %v3673_v27 }
0x1156   : > { %v3635_v62 = vmul.f32 0.0, %v3634_v21  ;;  %v3597_v58 = vmul.f32 0.0, %v3595_v13 }
0x1158   : > { %v3641_v8 = vadd.f32 %v3635_v62, %v3595_v13  ;;  %v3642_v60 = vadd.f32 %v3634_v21, %v3597_v58  ;;  %v3644_v52 = vadd.f32 %v3635_v62, %v3597_v58 }
0x1159   : > { %v3383_v24 = vpop.permute.xlu2 %3382 }
0x115a   : > { %v3680_v14 = vadd.f32 %v3674_v39, %v3641_v8  ;;  %v3681_v25 = vadd.f32 %v3674_v39, %v3642_v60  ;;  %v3683_v7 = vadd.f32 %v3673_v27, %v3644_v52  ;;  %v3413_v15 = vsel %vm1178_vm3, %v8614_v28, %v3383_v24 }
0x115b   : > { %6828 = vmatpush.xpose.msk.msra.mxu3 %vm9960_vm2, %v3413_v15 }
0x115c   : > { %v8620_v61 = vsub.f32 %v8545_v57, %v3680_v14  ;;  %v8623_v59 = vsub.f32 %v8543_v31, %v3681_v25  ;;  %v8626_v22 = vsub.f32 %v8547_v35, %v3681_v25  ;;  %v8629_v41 = vsub.f32 %v8552_v30, %v3683_v7 }
0x115d   : > { %v8632_v33 = vsub.f32 %v8555_v23, %v3683_v7  ;;  %v8635_v44 = vsub.f32 %v8573_v54, %v3683_v7 }
0x115e   : > { %v3692_v32 = vmul.f32 %v8620_v61, %v8620_v61  ;;  %v3693_v57 = vmul.f32 %v8623_v59, %v8623_v59  ;;  %v3694_v31 = vmul.f32 %v8626_v22, %v8626_v22  ;;  %v3695_v35 = vmul.f32 %v8629_v41, %v8629_v41 }
0x115f   : > { %v3696_v23 = vmul.f32 %v8632_v33, %v8632_v33  ;;  %v3697_v54 = vmul.f32 %v8635_v44, %v8635_v44 }
0x1160   : > { %v3699_v30 = vmul.f32 0.0, %v3693_v57  ;;  %v3700_v56 = vmul.f32 0.0, %v3694_v31  ;;  %v3737_v16 = vmul.f32 0.0, %v3692_v32  ;;  %v3704_v17 = vsel %vm528_vm5, %v3692_v32, 0.0 }
0x1161   : > { %v3744_v26 = vsel %vm528_vm5, %v3693_v57, 0.0  ;;  %v3701_v0 = vmul.f32 0.0, %v3695_v35  ;;  %v3746_v6 = vsel %vm528_vm5, %v3694_v31, 0.0  ;;  %v3702_v3 = vmul.f32 0.0, %v3696_v23 }
0x1162   : > { %v3705_v12 = vsel %vm528_vm5, %v3699_v30, 0.0  ;;  %v3743_v47 = vsel %vm528_vm5, %v3737_v16, 0.0  ;;  %v3707_v50 = vsel %vm528_vm5, %v3700_v56, 0.0  ;;  %v3787_v20 = vsel %vm528_vm5, %v3695_v35, 0.0 }
0x1163   : > { %v3706_v55 = vadd.f32 %v3705_v12, %v3704_v17  ;;  %v3745_v34 = vadd.f32 %v3744_v26, %v3743_v47  ;;  %v3784_v43 = vadd.f32 %v3743_v47, %v3705_v12  ;;  %v3703_v48 = vmul.f32 0.0, %v3697_v54 }
0x1164   : > { %v3709_v2 = vsel %vm528_vm5, %v3701_v0, 0.0  ;;  %v3789_v38 = vsel %vm528_vm5, %v3696_v23, 0.0  ;;  %v3711_v9 = vsel %vm528_vm5, %v3702_v3, 0.0  ;;  %v3791_v62 = vsel %vm528_vm5, %v3697_v54, 0.0  ;;  %v10001_v3 = vld [vmem:[#allocation13_spill] sm:$0xff] }
0x1165   : > { %v3786_v40 = vadd.f32 %v3784_v43, %v3707_v50  ;;  %v3747_v49 = vadd.f32 %v3746_v6, %v3745_v34  ;;  %v3708_v29 = vadd.f32 %v3707_v50, %v3706_v55  ;;  %v3713_v58 = vsel %vm528_vm5, %v3703_v48, 0.0 }
0x1166   : > { %v3424_v26 = vpop.permute.xlu0 %3423 }
0x1167   : > { %v3788_v11 = vadd.f32 %v3787_v20, %v3786_v40  ;;  %v3749_v1 = vadd.f32 %v3747_v49, %v3709_v2  ;;  %v3710_v37 = vadd.f32 %v3709_v2, %v3708_v29  ;;  %6829 = vmatmul.msk.f32.vlgmr.msra.gmra.mxu3 %vm9960_vm2, %v3424_v26 }
0x1169   : > { %v3790_v27 = vadd.f32 %v3789_v38, %v3788_v11  ;;  %v3751_v21 = vadd.f32 %v3749_v1, %v3711_v9  ;;  %v3712_v13 = vadd.f32 %v3711_v9, %v3710_v37 }
0x116b   : > { %v7075_v39 = vpop.permute.xlu1 %7074  ;;  %v3792_v8 = vadd.f32 %v3791_v62, %v3790_v27  ;;  %v3753_v60 = vadd.f32 %v3751_v21, %v3713_v58  ;;  %v3714_v52 = vadd.f32 %v3713_v58, %v3712_v13 }
0x116c   : > { %v7077_v24 = vunpack.i.h.bf16 %v7075_v39  ;;  %v7076_v14 = vunpack.i.l.bf16 %v7075_v39 }
0x116d   : > { %v3793_v25 = vrot.slane %v3792_v8, 4  ;;  %v3754_v7 = vrot.slane %v3753_v60, 4  ;;  %v3715_v15 = vrot.slane %v3714_v52, 4 }
0x116e   : > { %v3401_v32 = vsel %vm528_vm5, %v7915_v46, %v7076_v14  ;;  %v3400_v30 = vsel %vm528_vm5, %v7909_v45, %v7077_v24 }
0x116f   : > { %v3408_v57 = vsel %vm9961_vm1, %v3401_v32, %v8602_v19  ;;  %v3794_v31 = vadd.f32 %v3793_v25, %v3792_v8  ;;  %v3755_v35 = vadd.f32 %v3754_v7, %v3753_v60  ;;  %v3716_v56 = vadd.f32 %v3715_v15, %v3714_v52 }
0x1170   : > { %3470 = vmatpush.xpose.msrb.mxu0 %v3408_v57  ;;  %v3407_v17 = vsel %vm9961_vm1, %v3400_v30, %v8614_v28 }
0x1171   : > { %v3795_v16 = vrot.slane %v3794_v31, 2  ;;  %v3756_v23 = vrot.slane %v3755_v35, 2  ;;  %v3717_v54 = vrot.slane %v3716_v56, 2 }
0x1173   : > { %v3796_v12 = vadd.f32 %v3795_v16, %v3794_v31  ;;  %v3757_v47 = vadd.f32 %v3756_v23, %v3755_v35  ;;  %v3718_v46 = vadd.f32 %v3717_v54, %v3716_v56 }
0x1174   : > { %3471 = vmatpush.xpose.msrb.mxu0 %v3407_v17 }
0x1175   : > { %v3797_v19 = vrot.slane %v3796_v12, 1  ;;  %v3758_v55 = vrot.slane %v3757_v47, 1  ;;  %v3719_v34 = vrot.slane %v3718_v46, 1 }
0x1177   : > { %v3798_v43 = vadd.f32 %v3797_v19, %v3796_v12  ;;  %v3759_v45 = vadd.f32 %v3758_v55, %v3757_v47  ;;  %v3720_v0 = vadd.f32 %v3719_v34, %v3718_v46 }
0x1179   : > { %v3799_v50 = vsel %vm528_vm5, %v3798_v43, 0.0  ;;  %v3760_v6 = vsel %vm528_vm5, %v3759_v45, 0.0  ;;  %v3721_v28 = vsel %vm528_vm5, %v3720_v0, 0.0 }
0x117a   : > { %3800 = vadd.xlane.f32.xlu0 %v3799_v50  ;;  %3761 = vadd.xlane.f32.xlu1 %v3760_v6 }
0x117b   : > { %3722 = vadd.xlane.f32.xlu2 %v3721_v28 }
0x118e   : > { %3425 = vrot.lane.b32.xlu0 %v7639_v51, %s7281_s10 }
0x1193   : > { %3421 = vrot.lane.b32.xlu2 %v7624_v42, %s7281_s10  ;;  %3427 = vrot.lane.b32.xlu1 %v10001_v3, %s7281_s10 }
0x11ed   : > { %v3801_v40 = vpop.xlane.xlu0 %3800  ;;  %v3762_v49 = vpop.xlane.xlu1 %3761 }
0x11ee   : > { %v3802_v29 = vmul.f32 0.00086805556, %v3801_v40  ;;  %v3763_v20 = vmul.f32 0.0013020834, %v3762_v49  ;;  %v3723_v48 = vpop.xlane.xlu2 %3722 }
0x11ef   : > { %v3724_v2 = vmul.f32 0.0026041667, %v3723_v48 }
0x11f0   : > { %v3764_v11 = vmul.f32 0.0, %v3763_v20  ;;  %v3803_v37 = vmul.f32 0.0, %v3802_v29 }
0x11f1   : > { %v3726_v1 = vmul.f32 0.0, %v3724_v2 }
0x11f2   : > { %v3770_v38 = vadd.f32 %v3764_v11, %v3724_v2 }
0x11f3   : > { %v3771_v9 = vadd.f32 %v3763_v20, %v3726_v1  ;;  %v3773_v27 = vadd.f32 %v3764_v11, %v3726_v1 }
0x11f4   : > { %v3809_v21 = vadd.f32 %v3803_v37, %v3770_v38 }
0x11f5   : > { %v3810_v51 = vadd.f32 %v3803_v37, %v3771_v9  ;;  %v3812_v13 = vadd.f32 %v3802_v29, %v3773_v27  ;;  %v3496_v29 = vpop.f32.mrf.mxu3 }
0x11f6   : > { %v3815_v62 = vadd.f32 1e-05, %v3809_v21  ;;  %v3422_v42 = vpop.permute.xlu2 %3421 }
0x11f7   : > { %v3816_v58 = vadd.f32 1e-05, %v3810_v51  ;;  %v3818_v39 = vadd.f32 1e-05, %v3812_v13  ;;  %v3430_v8 = vsel %vm9960_vm2, %v3422_v42, %v3424_v26 }
0x11f8   : > { %7078 = vrsqrt.f32 %v3815_v62  ;;  %3472 = vmatmul.f32.vlgmr.msrb.gmra.mxu0 %v3430_v8  ;;  %vm3827_vm7 = vweird.f32 %v3815_v62 }
0x11f9   : > { %7080 = vrsqrt.f32 %v3816_v58  ;;  %vm3837_vm9 = vweird.f32 %v3816_v58  ;;  %vm3857_vm12 = vweird.f32 %v3818_v39 }
0x11fa   : > { %7082 = vrsqrt.f32 %v3818_v39 }
0x11fe   : > { %v7079_v60 = vpop.eup %7078 }
0x11ff   : > { %v7081_v52 = vpop.eup %7080  ;;  %v3822_v24 = vmul.f32 %v7079_v60, %v3815_v62  ;;  %vm3828_vm4 = vweird.f32 %v7079_v60 }
0x1200   : > { %v7083_v14 = vpop.eup %7082  ;;  %v3832_v25 = vmul.f32 %v7081_v52, %v3816_v58  ;;  %v3426_v35 = vpop.permute.xlu0 %3425  ;;  %vm3838_vm6 = vweird.f32 %v7081_v52  ;;  %vm3829_vm8 = vmor %vm3827_vm7, %vm3828_vm4 }
0x1201   : > { %v3852_v7 = vmul.f32 %v7083_v14, %v3818_v39  ;;  %v3823_v15 = vmul.f32 %v7079_v60, %v3822_v24  ;;  %vm3839_vm10 = vmor %vm3837_vm9, %vm3838_vm6  ;;  %vm3858_vm11 = vweird.f32 %v7083_v14 }
0x1202   : > { %v3833_v32 = vmul.f32 %v7081_v52, %v3832_v25  ;;  %vm3859_vm13 = vmor %vm3857_vm12, %vm3858_vm11 }
0x1203   : > { %v3824_v57 = vmul.f32 0.5, %v3823_v15  ;;  %v3853_v31 = vmul.f32 %v7083_v14, %v3852_v7 }
0x1204   : > { %v3834_v30 = vmul.f32 0.5, %v3833_v32 }
0x1205   : > { %v3825_v56 = vsub.f32 1.5, %v3824_v57  ;;  %v3854_v16 = vmul.f32 0.5, %v3853_v31  ;;  %v3428_v23 = vpop.permute.xlu1 %3427 }
0x1206   : > { %v3835_v54 = vsub.f32 1.5, %v3834_v30  ;;  %6830 = vmatmul.msk.f32.gmra.mxu3 %vm9960_vm2, %v3428_v23  ;;  %v3431_v17 = vsel %vm9960_vm2, %v3426_v35, %v3428_v23 }
0x1207   : > { %v3826_v12 = vmul.f32 %v7079_v60, %v3825_v56  ;;  %v3855_v47 = vsub.f32 1.5, %v3854_v16  ;;  %3475 = vmatmul.f32.gmra.mxu0 %v3431_v17 }
0x1208   : > { %v3836_v26 = vmul.f32 %v7081_v52, %v3835_v54 }
0x1209   : > { %v3830_v46 = vsel %vm3829_vm8, %v7079_v60, %v3826_v12  ;;  %v3856_v19 = vmul.f32 %v7083_v14, %v3855_v47 }
0x120a   : > { %v3881_v55 = vmul.f32 %v3830_v46, %v8620_v61  ;;  %v3840_v34 = vsel %vm3839_vm10, %v7081_v52, %v3836_v26 }
0x120b   : > { %v3883_v43 = vmul.f32 %v3840_v34, %v8626_v22  ;;  %v3882_v45 = vmul.f32 %v3840_v34, %v8623_v59  ;;  %v3860_v28 = vsel %vm3859_vm13, %v7083_v14, %v3856_v19 }
0x120c   : > { %v3887_v0 = vsel %vm528_vm5, %v3881_v55, -inf  ;;  %v3884_v3 = vmul.f32 %v3860_v28, %v8629_v41  ;;  %v3886_v61 = vmul.f32 %v3860_v28, %v8635_v44  ;;  %v3885_v22 = vmul.f32 %v3860_v28, %v8632_v33 }
0x120d   : > { %3888 = vmax.xlane.f32.xlu2 %v3887_v0  ;;  %v3893_v50 = vsel %vm528_vm5, %v3883_v43, -inf  ;;  %v3890_v6 = vsel %vm528_vm5, %v3882_v45, -inf }
0x120e   : > { %3894 = vmax.xlane.f32.xlu1 %v3893_v50  ;;  %3891 = vmax.xlane.f32.xlu0 %v3890_v6  ;;  %v3896_v59 = vsel %vm528_vm5, %v3884_v3, -inf  ;;  %v3902_v40 = vsel %vm528_vm5, %v3886_v61, -inf  ;;  %v3899_v49 = vsel %vm528_vm5, %v3885_v22, -inf }
0x1215   : > { %3897 = vmax.xlane.f32.xlu2 %v3896_v59 }
0x1216   : > { %3903 = vmax.xlane.f32.xlu1 %v3902_v40  ;;  %3900 = vmax.xlane.f32.xlu0 %v3899_v49 }
0x1275   : > { %v3473_v20 = vpop.f32.mrf.mxu0 }
0x1276   : > { %v3497_v48 = vadd.f32 %v3496_v29, %v3473_v20 }
0x1278   : > { %v8694_v2 = vmul.f32 0.25, %v3497_v48 }
0x1280   : > { %v3889_v11 = vpop.xlane.xlu2 %3888 }
0x1281   : > { %v3895_v41 = vpop.xlane.xlu1 %3894  ;;  %v3892_v1 = vpop.xlane.xlu0 %3891  ;;  %v3905_v44 = vsub.f32 %v3881_v55, %v3889_v11 }
0x1282   : > { %v3907_v37 = vsub.f32 %v3883_v43, %v3895_v41  ;;  %v3906_v33 = vsub.f32 %v3882_v45, %v3892_v1 }
0x1283   : > { %v3911_v38 = vmul.f32 1.442695, %v3905_v44 }
0x1284   : > { %v3915_v9 = vmul.f32 1.442695, %v3907_v37  ;;  %v3913_v27 = vmul.f32 1.442695, %v3906_v33  ;;  %v3476_v51 = vpop.f32.mrf.mxu0 }
0x1285   : > { %7084 = vpow2.f32 %v3911_v38 }
0x1286   : > { %7086 = vpow2.f32 %v3915_v9 }
0x1287   : > { %7088 = vpow2.f32 %v3913_v27 }
0x1288   : > { %v3898_v21 = vpop.xlane.xlu2 %3897 }
0x1289   : > { %v3904_v13 = vpop.xlane.xlu1 %3903  ;;  %v3901_v62 = vpop.xlane.xlu0 %3900  ;;  %v3908_v42 = vsub.f32 %v3884_v3, %v3898_v21 }
0x128a   : > { %v3910_v58 = vsub.f32 %v3886_v61, %v3904_v13  ;;  %v3909_v39 = vsub.f32 %v3885_v22, %v3901_v62  ;;  %v3499_v8 = vpop.f32.mrf.mxu3 }
0x128b   : > { %v8696_v60 = vpop.eup %7084  ;;  %v3917_v52 = vmul.f32 1.442695, %v3908_v42  ;;  %v3500_v24 = vadd.f32 %v3499_v8, %v3476_v51 }
0x128c   : > { %v8698_v14 = vpop.eup %7086  ;;  %v3921_v25 = vmul.f32 1.442695, %v3910_v58  ;;  %v3919_v7 = vmul.f32 1.442695, %v3909_v39  ;;  %v3923_v15 = vsel %vm528_vm5, %v8696_v60, 0.0 }
0x128d   : > { %v8702_v32 = vpop.eup %7088  ;;  %7090 = vpow2.f32 %v3917_v52  ;;  %v3929_v57 = vsel %vm528_vm5, %v8698_v14, 0.0  ;;  %3924 = vadd.xlane.f32.xlu2 %v3923_v15  ;;  %v8706_v31 = vmul.f32 0.25, %v3500_v24 }
0x128e   : > { %7092 = vpow2.f32 %v3921_v25  ;;  %3930 = vadd.xlane.f32.xlu1 %v3929_v57  ;;  %v3926_v35 = vsel %vm528_vm5, %v8702_v32, 0.0 }
0x128f   : > { %7094 = vpow2.f32 %v3919_v7  ;;  %3927 = vadd.xlane.f32.xlu0 %v3926_v35 }
0x1293   : > { %v8710_v30 = vpop.eup %7090 }
0x1294   : > { %v8712_v56 = vpop.eup %7092  ;;  %v3932_v16 = vsel %vm528_vm5, %v8710_v30, 0.0 }
0x1295   : > { %v8716_v23 = vpop.eup %7094  ;;  %v3938_v54 = vsel %vm528_vm5, %v8712_v56, 0.0  ;;  %3933 = vadd.xlane.f32.xlu2 %v3932_v16 }
0x1296   : > { %3939 = vadd.xlane.f32.xlu1 %v3938_v54  ;;  %v3935_v17 = vsel %vm528_vm5, %v8716_v23, 0.0 }
0x1297   : > { %3936 = vadd.xlane.f32.xlu0 %v3935_v17 }
0x1300   : > { %v3925_v12 = vpop.xlane.xlu2 %3924 }
0x1301   : > { %v3931_v47 = vpop.xlane.xlu1 %3930  ;;  %7096 = vrcp.f32 %v3925_v12  ;;  %vm3946_vm14 = vweird.f32 %v3925_v12  ;;  %v3950_v43 = vand.u32 2147483647, %v3925_v12  ;;  %v3952_v45 = vand.u32 2147483648, %v3925_v12 }
0x1302   : > { %7098 = vrcp.f32 %v3931_v47  ;;  %v3928_v26 = vpop.xlane.xlu0 %3927  ;;  %v3978_v19 = vand.u32 2147483647, %v3931_v47  ;;  %vm3974_vm0 = vweird.f32 %v3931_v47  ;;  %v3980_v28 = vand.u32 2147483648, %v3931_v47 }
0x1303   : > { %7100 = vrcp.f32 %v3928_v26  ;;  %vm3960_vm4 = vweird.f32 %v3928_v26  ;;  %v3964_v29 = vand.u32 2147483647, %v3928_v26  ;;  %v3966_v20 = vand.u32 2147483648, %v3928_v26 }
0x1304   : > { %vm8730_vm6 = vcmp.eq.f32.partialorder %v3978_v19, 8.507059e+37  ;;  %v3981_v1 = vor.u32 1.1754944e-38, %v3980_v28  ;;  %vm8735_vm9 = vcmp.eq.f32.partialorder %v3950_v43, 8.507059e+37  ;;  %v3953_v38 = vor.u32 1.1754944e-38, %v3952_v45 }
0x1305   : > { %vm8739_vm11 = vcmp.eq.f32.partialorder %v3964_v29, 8.507059e+37  ;;  %v3967_v51 = vor.u32 1.1754944e-38, %v3966_v20 }
0x1307   : > { %v7097_v46 = vpop.eup %7096 }
0x1308   : > { %v7099_v55 = vpop.eup %7098  ;;  %v3942_v34 = vmul.f32 %v7097_v46, %v3925_v12  ;;  %v8722_v0 = vpop.xlane.xlu2 %3933  ;;  %vm3947_vm7 = vweird.f32 %v7097_v46 }
0x1309   : > { %v7101_v50 = vpop.eup %7100  ;;  %v3970_v6 = vmul.f32 %v7099_v55, %v3931_v47  ;;  %v8724_v3 = vpop.xlane.xlu1 %3939  ;;  %7102 = vrcp.f32 %v8722_v0  ;;  %vm3975_vm8 = vweird.f32 %v7099_v55  ;;  %vm3948_vm12 = vmor %vm3946_vm14, %vm3947_vm7  ;;  %vm3988_vm13 = vweird.f32 %v8722_v0 }
0x130a   : > { %v3956_v61 = vmul.f32 %v7101_v50, %v3928_v26  ;;  %v3943_v22 = vsub.f32 1.0, %v3942_v34  ;;  %7104 = vrcp.f32 %v8724_v3  ;;  %v8728_v59 = vpop.xlane.xlu0 %3936  ;;  %vm3961_vm10 = vweird.f32 %v7101_v50  ;;  %vm3976_vm2 = vmor %vm3974_vm0, %vm3975_vm8 }
0x130b   : > { %v3971_v40 = vsub.f32 1.0, %v3970_v6  ;;  %7106 = vrcp.f32 %v8728_v59  ;;  %v4022_v58 = vand.u32 2147483648, %v8724_v3  ;;  %vm3962_vm1 = vmor %vm3960_vm4, %vm3961_vm10  ;;  %v3994_v25 = vand.u32 2147483648, %v8722_v0 }
0x130c   : > { %v3957_v48 = vsub.f32 1.0, %v3956_v61  ;;  %v3944_v11 = vmul.f32 %v7097_v46, %v3943_v22  ;;  %v3992_v19 = vand.u32 2147483647, %v8722_v0  ;;  %vm4016_vm14 = vweird.f32 %v8724_v3 }
0x130d   : > { %v3972_v41 = vmul.f32 %v7099_v55, %v3971_v40  ;;  %v4008_v43 = vand.u32 2147483648, %v8728_v59  ;;  %v4023_v28 = vor.u32 1.1754944e-38, %v4022_v58  ;;  %vm4002_vm7 = vweird.f32 %v8728_v59 }
0x130e   : > { %v3958_v37 = vmul.f32 %v7101_v50, %v3957_v48  ;;  %v3945_v33 = vadd.f32 %v7097_v46, %v3944_v11  ;;  %vm3993_vm8 = vcmp.eq.f32.partialorder %v3992_v19, 8.507059e+37 }
0x130f   : > { %v7103_v9 = vpop.eup %7102  ;;  %v3973_v27 = vadd.f32 %v7099_v55, %v3972_v41  ;;  %v4009_v29 = vor.u32 1.1754944e-38, %v4008_v43 }
0x1310   : > { %v7105_v13 = vpop.eup %7104  ;;  %v3959_v62 = vadd.f32 %v7101_v50, %v3958_v37  ;;  %v3949_v42 = vsel %vm3948_vm12, %v7097_v46, %v3945_v33  ;;  %v3984_v39 = vmul.f32 %v7103_v9, %v8722_v0 }
0x1311   : > { %v3977_v8 = vsel %vm3976_vm2, %v7099_v55, %v3973_v27  ;;  %v3954_v52 = vsel %vm8735_vm9, %v3953_v38, %v3949_v42  ;;  %v4012_v24 = vmul.f32 %v7105_v13, %v8724_v3  ;;  %v7107_v7 = vpop.eup %7106  ;;  %vm3989_vm2 = vweird.f32 %v7103_v9 }
0x1312   : > { %v3982_v15 = vsel %vm8730_vm6, %v3981_v1, %v3977_v8  ;;  %v3963_v57 = vsel %vm3962_vm1, %v7101_v50, %v3959_v62  ;;  %v8757_v35 = vmul.f32 %v8696_v60, %v3954_v52  ;;  %v3985_v16 = vsub.f32 1.0, %v3984_v39  ;;  %vm3990_vm4 = vmor %vm3988_vm13, %vm3989_vm2 }
0x1313   : > { %v8760_v54 = vmul.f32 %v8698_v14, %v3982_v15  ;;  %v3968_v17 = vsel %vm8739_vm11, %v3967_v51, %v3963_v57  ;;  %v4013_v12 = vsub.f32 1.0, %v4012_v24  ;;  %v3998_v47 = vmul.f32 %v7107_v7, %v8728_v59 }
0x1314   : > { %v8766_v26 = vmul.f32 %v8702_v32, %v3968_v17  ;;  %v3986_v46 = vmul.f32 %v7103_v9, %v3985_v16  ;;  %vm4017_vm1 = vweird.f32 %v7105_v13  ;;  %v4020_v60 = vand.u32 2147483647, %v8724_v3 }
0x1315   : > { %v4014_v55 = vmul.f32 %v7105_v13, %v4013_v12  ;;  %v3999_v34 = vsub.f32 1.0, %v3998_v47  ;;  %v4006_v14 = vand.u32 2147483647, %v8728_v59  ;;  %vm4003_vm0 = vweird.f32 %v7107_v7  ;;  %vm4018_vm6 = vmor %vm4016_vm14, %vm4017_vm1 }
0x1316   : > { %v3987_v45 = vadd.f32 %v7103_v9, %v3986_v46  ;;  %v3995_v32 = vor.u32 1.1754944e-38, %v3994_v25  ;;  %vm4021_vm9 = vcmp.eq.f32.partialorder %v4020_v60, 8.507059e+37  ;;  %vm4004_vm10 = vmor %vm4002_vm7, %vm4003_vm0 }
0x1317   : > { %v4015_v50 = vadd.f32 %v7105_v13, %v4014_v55  ;;  %v4000_v6 = vmul.f32 %v7107_v7, %v3999_v34  ;;  %vm4007_vm11 = vcmp.eq.f32.partialorder %v4006_v14, 8.507059e+37 }
0x1318   : > { %v3991_v61 = vsel %vm3990_vm4, %v7103_v9, %v3987_v45 }
0x1319   : > { %v4019_v22 = vsel %vm4018_vm6, %v7105_v13, %v4015_v50  ;;  %v4001_v3 = vadd.f32 %v7107_v7, %v4000_v6  ;;  %v3996_v40 = vsel %vm3993_vm8, %v3995_v32, %v3991_v61  ;;  %4033 = sbr.rel (%p6801_p5) target bundleno = 4900 (0x1324), region = 72 }
0x131a   : > { %v4024_v49 = vsel %vm4021_vm9, %v4023_v28, %v4019_v22  ;;  %v8777_v20 = vmul.f32 %v8710_v30, %v3996_v40 }
0x131b   : > { %v8780_v0 = vmul.f32 %v8712_v56, %v4024_v49  ;;  %v4005_v48 = vsel %vm4004_vm10, %v7107_v7, %v4001_v3 }
0x131c   : > { %v4010_v11 = vsel %vm4007_vm11, %v4009_v29, %v4005_v48 }
0x131d   : > { %v8783_v59 = vmul.f32 %v8716_v23, %v4010_v11 }
0x131e   : > { %4034 = vst.msk [vmem:[%s9929_s8 + $0xc0] sm:$0xff] %vm528_vm5, %v8757_v35 }
0x131f   : > { %4035 = vst.msk [vmem:[%s9929_s8 + $0xc8] sm:$0xff] %vm528_vm5, %v8766_v26 }
0x1320   : > { %4036 = vst.msk [vmem:[%s9929_s8 + $0xd0] sm:$0xff] %vm528_vm5, %v8760_v54 }
0x1321   : > { %4037 = vst.msk [vmem:[%s9929_s8 + $0xd8] sm:$0xff] %vm528_vm5, %v8777_v20 }
0x1322   : > { %4038 = vst.msk [vmem:[%s9929_s8 + $0xe0] sm:$0xff] %vm528_vm5, %v8783_v59 }
0x1323   : > { %4039 = vst.msk [vmem:[%s9929_s8 + $0xe8] sm:$0xff] %vm528_vm5, %v8780_v0 }
0x1324 PF: > { %v7108_v30 = vpack.i.bf16 %v7673_v5, %v7679_v10  ;;  %4042 = vrot.lane.b32.xlu1 %v7812_v36, %s7277_s25  ;;  %4046 = vrot.lane.b32.xlu2 %v7824_v18, %s7277_s25  ;;  %v10008_v56 = vld [vmem:[#allocation20_spill] sm:$0xff]  ;;  %v10009_v23 = vld [vmem:[#allocation19_spill] sm:$0xff]  ;;  %v10010_v41 = vld [vmem:[#allocation21_spill] sm:$0xff] }
0x1326   : > { %7109 = vrot.lane.b32.xlu0 %v7108_v30, %s7275_s15 }
0x132c   : > { %4044 = vrot.lane.b32.xlu1 %v7816_v63, %s7277_s25  ;;  %4048 = vrot.lane.b32.xlu2 %v10008_v56, %s7277_s25 }
0x132e   : > { %4040 = vrot.lane.b32.xlu0 %v10009_v23, %s7277_s25 }
0x1336   : > { %4050 = vrot.lane.b32.xlu0 %v10010_v41, %s7277_s25 }
0x137e   : > { %v4047_v33 = vpop.permute.xlu2 %4046 }
0x1386   : > { %v4049_v38 = vpop.permute.xlu2 %4048 }
0x1396   : > { %v4043_v37 = vpop.permute.xlu1 %4042 }
0x1398   : > { %v7110_v1 = vpop.permute.xlu0 %7109 }
0x1399   : > { %v7111_v44 = vunpack.i.l.bf16 %v7110_v1  ;;  %v7112_v36 = vunpack.i.h.bf16 %v7110_v1 }
0x139b   : > { %4086 = vmatpush.msrb.mxu3 %v7111_v44 }
0x139d   : > { %4087 = vmatpush.msrb.mxu3 %v7112_v36 }
0x139e   : > { %v4045_v63 = vpop.permute.xlu1 %4044 }
0x13a0   : > { %v4041_v18 = vpop.permute.xlu0 %4040 }
0x13a1   : > { %6838 = vmatmul.msk.f32.vlgmr.msrb.gmra.mxu3 %vm1178_vm3, %v4041_v18 }
0x13a8   : > { %v4051_v9 = vpop.permute.xlu0 %4050 }
0x13a9   : > { %6839 = vmatmul.msk.f32.gmra.mxu3 %vm1178_vm3, %v4043_v37 }
0x13b1   : > { %6840 = vmatmul.msk.f32.gmra.mxu3 %vm1178_vm3, %v4045_v63 }
0x13b9   : > { %6841 = vmatmul.msk.f32.gmra.mxu3 %vm1178_vm3, %v4047_v33 }
0x13c1   : > { %6842 = vmatmul.msk.f32.gmra.mxu3 %vm1178_vm3, %v4049_v38 }
0x13c9   : > { %6843 = vmatmul.msk.f32.gmra.mxu3 %vm1178_vm3, %v4051_v9 }
0x1424   : > { %v4089_v27 = vpop.f32.mrf.mxu3 }
0x1425   : > { %v8840_v42 = vmul.f32 0.14433756, %v4089_v27 }
0x1427   : > { %v4152_v8 = vmul.f32 0.0, %v8840_v42  ;;  %v4119_v46 = vsel %vm528_vm5, %v8840_v42, 0.0 }
0x1429   : > { %v4158_v57 = vsel %vm528_vm5, %v4152_v8, 0.0 }
0x142c   : > { %v4092_v21 = vpop.f32.mrf.mxu3 }
0x142d   : > { %v8838_v62 = vmul.f32 0.14433756, %v4092_v21 }
0x142f   : > { %v4114_v39 = vmul.f32 0.0, %v8838_v62  ;;  %v4159_v16 = vsel %vm528_vm5, %v8838_v62, 0.0 }
0x1430   : > { %v4160_v14 = vadd.f32 %v4159_v16, %v4158_v57 }
0x1431   : > { %v4120_v7 = vsel %vm528_vm5, %v4114_v39, 0.0 }
0x1432   : > { %v4199_v47 = vadd.f32 %v4158_v57, %v4120_v7  ;;  %v4121_v34 = vadd.f32 %v4120_v7, %v4119_v46 }
0x1434   : > { %v4095_v51 = vpop.f32.mrf.mxu3 }
0x1435   : > { %v8842_v58 = vmul.f32 0.14433756, %v4095_v51 }
0x1437   : > { %v4115_v52 = vmul.f32 0.0, %v8842_v58  ;;  %v4161_v19 = vsel %vm528_vm5, %v8842_v58, 0.0 }
0x1438   : > { %v4162_v32 = vadd.f32 %v4161_v19, %v4160_v14 }
0x1439   : > { %v4122_v17 = vsel %vm528_vm5, %v4115_v52, 0.0 }
0x143a   : > { %v4201_v43 = vadd.f32 %v4199_v47, %v4122_v17  ;;  %v4123_v6 = vadd.f32 %v4122_v17, %v4121_v34 }
0x143c   : > { %v4098_v13 = vpop.f32.mrf.mxu3 }
0x143d   : > { %v8847_v24 = vmul.f32 0.14433756, %v4098_v13 }
0x143f   : > { %v4116_v12 = vmul.f32 0.0, %v8847_v24  ;;  %v4202_v55 = vsel %vm528_vm5, %v8847_v24, 0.0 }
0x1440   : > { %v4203_v28 = vadd.f32 %v4202_v55, %v4201_v43 }
0x1441   : > { %v4124_v45 = vsel %vm528_vm5, %v4116_v12, 0.0 }
0x1442   : > { %v4125_v40 = vadd.f32 %v4124_v45, %v4123_v6  ;;  %v4164_v49 = vadd.f32 %v4162_v32, %v4124_v45 }
0x1444   : > { %v4101_v25 = vpop.f32.mrf.mxu3 }
0x1445   : > { %v8850_v15 = vmul.f32 0.14433756, %v4101_v25 }
0x1447   : > { %v4117_v60 = vmul.f32 0.0, %v8850_v15  ;;  %v4204_v50 = vsel %vm528_vm5, %v8850_v15, 0.0 }
0x1448   : > { %v4205_v29 = vadd.f32 %v4204_v50, %v4203_v28 }
0x1449   : > { %v4126_v22 = vsel %vm528_vm5, %v4117_v60, 0.0 }
0x144a   : > { %v4127_v30 = vadd.f32 %v4126_v22, %v4125_v40  ;;  %v4166_v56 = vadd.f32 %v4164_v49, %v4126_v22 }
0x144c   : > { %v4104_v61 = vpop.f32.mrf.mxu3 }
0x144d   : > { %v4112_v3 = vmul.f32 0.14433756, %v4104_v61 }
0x144f   : > { %v4118_v48 = vmul.f32 0.0, %v4112_v3  ;;  %v4206_v11 = vsel %vm528_vm5, %v4112_v3, 0.0 }
0x1450   : > { %v4207_v23 = vadd.f32 %v4206_v11, %v4205_v29 }
0x1451   : > { %v4128_v41 = vsel %vm528_vm5, %v4118_v48, 0.0 }
0x1452   : > { %v4129_v1 = vadd.f32 %v4128_v41, %v4127_v30  ;;  %v4168_v44 = vadd.f32 %v4166_v56, %v4128_v41  ;;  %v4208_v36 = vrot.slane %v4207_v23, 4 }
0x1454   : > { %v4209_v18 = vadd.f32 %v4208_v36, %v4207_v23  ;;  %v4169_v37 = vrot.slane %v4168_v44, 4  ;;  %v4130_v63 = vrot.slane %v4129_v1, 4 }
0x1456   : > { %v4210_v33 = vrot.slane %v4209_v18, 2  ;;  %v4170_v38 = vadd.f32 %v4169_v37, %v4168_v44  ;;  %v4131_v9 = vadd.f32 %v4130_v63, %v4129_v1 }
0x1458   : > { %v4211_v27 = vadd.f32 %v4210_v33, %v4209_v18  ;;  %v4171_v21 = vrot.slane %v4170_v38, 2  ;;  %v4132_v51 = vrot.slane %v4131_v9, 2 }
0x145a   : > { %v4212_v13 = vrot.slane %v4211_v27, 1  ;;  %v4172_v39 = vadd.f32 %v4171_v21, %v4170_v38  ;;  %v4133_v8 = vadd.f32 %v4132_v51, %v4131_v9 }
0x145c   : > { %v4213_v52 = vadd.f32 %v4212_v13, %v4211_v27  ;;  %v4173_v25 = vrot.slane %v4172_v39, 1  ;;  %v4134_v7 = vrot.slane %v4133_v8, 1 }
0x145e   : > { %v4214_v57 = vsel %vm528_vm5, %v4213_v52, 0.0  ;;  %v4174_v16 = vadd.f32 %v4173_v25, %v4172_v39  ;;  %v4135_v17 = vadd.f32 %v4134_v7, %v4133_v8 }
0x145f   : > { %4215 = vadd.xlane.f32.xlu0 %v4214_v57 }
0x1460   : > { %v4175_v12 = vsel %vm528_vm5, %v4174_v16, 0.0  ;;  %v4136_v47 = vsel %vm528_vm5, %v4135_v17, 0.0 }
0x1461   : > { %4176 = vadd.xlane.f32.xlu2 %v4175_v12  ;;  %4137 = vadd.xlane.f32.xlu1 %v4136_v47 }
0x14d2   : > { %v4216_v46 = vpop.xlane.xlu0 %4215 }
0x14d3   : > { %v4217_v60 = vmul.f32 0.00086805556, %v4216_v46 }
0x14d4   : > { %v4177_v19 = vpop.xlane.xlu2 %4176  ;;  %v4138_v55 = vpop.xlane.xlu1 %4137 }
0x14d5   : > { %v4178_v34 = vmul.f32 0.0013020834, %v4177_v19  ;;  %v4139_v14 = vmul.f32 0.0026041667, %v4138_v55  ;;  %v4218_v50 = vmul.f32 0.0, %v4217_v60 }
0x14d7   : > { %v4179_v43 = vmul.f32 0.0, %v4178_v34  ;;  %v4141_v45 = vmul.f32 0.0, %v4139_v14 }
0x14d9   : > { %v4185_v6 = vadd.f32 %v4179_v43, %v4139_v14  ;;  %v4186_v32 = vadd.f32 %v4178_v34, %v4141_v45  ;;  %v4188_v28 = vadd.f32 %v4179_v43, %v4141_v45 }
0x14db   : > { %v4224_v61 = vadd.f32 %v4218_v50, %v4185_v6  ;;  %v4225_v22 = vadd.f32 %v4218_v50, %v4186_v32  ;;  %v4227_v40 = vadd.f32 %v4217_v60, %v4188_v28 }
0x14dd   : > { %v8874_v49 = vsub.f32 %v8840_v42, %v4224_v61  ;;  %v8877_v29 = vsub.f32 %v8838_v62, %v4225_v22  ;;  %v8880_v48 = vsub.f32 %v8842_v58, %v4225_v22  ;;  %v8883_v11 = vsub.f32 %v8847_v24, %v4227_v40 }
0x14de   : > { %v8886_v30 = vsub.f32 %v8850_v15, %v4227_v40  ;;  %v8888_v56 = vsub.f32 %v4112_v3, %v4227_v40 }
0x14df   : > { %v4236_v23 = vmul.f32 %v8874_v49, %v8874_v49  ;;  %v4237_v42 = vmul.f32 %v8877_v29, %v8877_v29  ;;  %v4238_v62 = vmul.f32 %v8880_v48, %v8880_v48  ;;  %v4239_v58 = vmul.f32 %v8883_v11, %v8883_v11 }
0x14e0   : > { %v4240_v15 = vmul.f32 %v8886_v30, %v8886_v30  ;;  %v4241_v44 = vmul.f32 %v8888_v56, %v8888_v56 }
0x14e1   : > { %v4243_v41 = vmul.f32 0.0, %v4237_v42  ;;  %v4244_v24 = vmul.f32 0.0, %v4238_v62  ;;  %v4281_v1 = vmul.f32 0.0, %v4236_v23  ;;  %v4248_v3 = vsel %vm528_vm5, %v4236_v23, 0.0 }
0x14e2   : > { %v4288_v37 = vsel %vm528_vm5, %v4237_v42, 0.0  ;;  %v4245_v63 = vmul.f32 0.0, %v4239_v58  ;;  %v4290_v21 = vsel %vm528_vm5, %v4238_v62, 0.0  ;;  %v4246_v51 = vmul.f32 0.0, %v4240_v15 }
0x14e3   : > { %v4249_v36 = vsel %vm528_vm5, %v4243_v41, 0.0  ;;  %v4287_v18 = vsel %vm528_vm5, %v4281_v1, 0.0  ;;  %v4251_v27 = vsel %vm528_vm5, %v4244_v24, 0.0  ;;  %v4247_v52 = vmul.f32 0.0, %v4241_v44 }
0x14e4   : > { %v4250_v33 = vadd.f32 %v4249_v36, %v4248_v3  ;;  %v4289_v38 = vadd.f32 %v4288_v37, %v4287_v18  ;;  %v4328_v9 = vadd.f32 %v4287_v18, %v4249_v36  ;;  %v4253_v25 = vsel %vm528_vm5, %v4245_v63, 0.0 }
0x14e5   : > { %v4331_v7 = vsel %vm528_vm5, %v4239_v58, 0.0  ;;  %v4255_v12 = vsel %vm528_vm5, %v4246_v51, 0.0  ;;  %v4333_v47 = vsel %vm528_vm5, %v4240_v15, 0.0  ;;  %v4257_v60 = vsel %vm528_vm5, %v4247_v52, 0.0 }
0x14e6   : > { %v4291_v13 = vadd.f32 %v4290_v21, %v4289_v38  ;;  %v4252_v39 = vadd.f32 %v4251_v27, %v4250_v33  ;;  %v4330_v8 = vadd.f32 %v4328_v9, %v4251_v27  ;;  %v4335_v34 = vsel %vm528_vm5, %v4241_v44, 0.0 }
0x14e8   : > { %v4293_v57 = vadd.f32 %v4291_v13, %v4253_v25  ;;  %v4254_v16 = vadd.f32 %v4253_v25, %v4252_v39  ;;  %v4332_v17 = vadd.f32 %v4331_v7, %v4330_v8 }
0x14ea   : > { %v4295_v46 = vadd.f32 %v4293_v57, %v4255_v12  ;;  %v4256_v19 = vadd.f32 %v4255_v12, %v4254_v16  ;;  %v4334_v55 = vadd.f32 %v4333_v47, %v4332_v17 }
0x14ec   : > { %v4297_v14 = vadd.f32 %v4295_v46, %v4257_v60  ;;  %v4258_v43 = vadd.f32 %v4257_v60, %v4256_v19  ;;  %v4336_v45 = vadd.f32 %v4335_v34, %v4334_v55 }
0x14ee   : > { %v4298_v50 = vrot.slane %v4297_v14, 4  ;;  %v4259_v6 = vrot.slane %v4258_v43, 4  ;;  %v4337_v32 = vrot.slane %v4336_v45, 4 }
0x14f0   : > { %v4299_v28 = vadd.f32 %v4298_v50, %v4297_v14  ;;  %v4260_v61 = vadd.f32 %v4259_v6, %v4258_v43  ;;  %v4338_v22 = vadd.f32 %v4337_v32, %v4336_v45 }
0x14f2   : > { %v4300_v40 = vrot.slane %v4299_v28, 2  ;;  %v4261_v23 = vrot.slane %v4260_v61, 2  ;;  %v4339_v42 = vrot.slane %v4338_v22, 2 }
0x14f4   : > { %v4301_v62 = vadd.f32 %v4300_v40, %v4299_v28  ;;  %v4262_v58 = vadd.f32 %v4261_v23, %v4260_v61  ;;  %v4340_v1 = vadd.f32 %v4339_v42, %v4338_v22 }
0x14f6   : > { %v4302_v41 = vrot.slane %v4301_v62, 1  ;;  %v4263_v24 = vrot.slane %v4262_v58, 1  ;;  %v4341_v18 = vrot.slane %v4340_v1, 1 }
0x14f8   : > { %v4303_v15 = vadd.f32 %v4302_v41, %v4301_v62  ;;  %v4264_v3 = vadd.f32 %v4263_v24, %v4262_v58  ;;  %v4342_v37 = vadd.f32 %v4341_v18, %v4340_v1 }
0x14fa   : > { %v4304_v44 = vsel %vm528_vm5, %v4303_v15, 0.0  ;;  %v4265_v36 = vsel %vm528_vm5, %v4264_v3, 0.0  ;;  %v4343_v63 = vsel %vm528_vm5, %v4342_v37, 0.0 }
0x14fb   : > { %4305 = vadd.xlane.f32.xlu1 %v4304_v44  ;;  %4266 = vadd.xlane.f32.xlu2 %v4265_v36 }
0x1503   : > { %4344 = vadd.xlane.f32.xlu2 %v4343_v63 }
0x156e   : > { %v4306_v33 = vpop.xlane.xlu1 %4305  ;;  %v4267_v38 = vpop.xlane.xlu2 %4266 }
0x156f   : > { %v4307_v9 = vmul.f32 0.0013020834, %v4306_v33  ;;  %v4268_v27 = vmul.f32 0.0026041667, %v4267_v38 }
0x1571   : > { %v4308_v21 = vmul.f32 0.0, %v4307_v9  ;;  %v4270_v51 = vmul.f32 0.0, %v4268_v27 }
0x1573   : > { %v4317_v39 = vadd.f32 %v4308_v21, %v4270_v51  ;;  %v4314_v52 = vadd.f32 %v4308_v21, %v4268_v27  ;;  %v4315_v25 = vadd.f32 %v4307_v9, %v4270_v51 }
0x1576   : > { %v4345_v13 = vpop.xlane.xlu2 %4344 }
0x1577   : > { %v4346_v8 = vmul.f32 0.00086805556, %v4345_v13 }
0x1579   : > { %v4347_v7 = vmul.f32 0.0, %v4346_v8  ;;  %v4356_v57 = vadd.f32 %v4346_v8, %v4317_v39 }
0x157b   : > { %v4353_v16 = vadd.f32 %v4347_v7, %v4314_v52  ;;  %v4354_v17 = vadd.f32 %v4347_v7, %v4315_v25  ;;  %v4362_v12 = vadd.f32 1e-05, %v4356_v57 }
0x157d   : > { %v4359_v47 = vadd.f32 1e-05, %v4353_v16  ;;  %v4360_v46 = vadd.f32 1e-05, %v4354_v17  ;;  %7113 = vrsqrt.f32 %v4362_v12  ;;  %vm4401_vm6 = vweird.f32 %v4362_v12 }
0x157f   : > { %7115 = vrsqrt.f32 %v4359_v47  ;;  %vm4371_vm2 = vweird.f32 %v4359_v47  ;;  %vm4381_vm1 = vweird.f32 %v4360_v46 }
0x1580   : > { %7117 = vrsqrt.f32 %v4360_v46 }
0x1583   : > { %v7114_v19 = vpop.eup %7113 }
0x1584   : > { %v4396_v55 = vmul.f32 %v7114_v19, %v4362_v12  ;;  %vm4402_vm4 = vweird.f32 %v7114_v19 }
0x1585   : > { %v7116_v60 = vpop.eup %7115  ;;  %vm4403_vm7 = vmor %vm4401_vm6, %vm4402_vm4 }
0x1586   : > { %v7118_v34 = vpop.eup %7117  ;;  %v4366_v14 = vmul.f32 %v7116_v60, %v4359_v47  ;;  %v4397_v43 = vmul.f32 %v7114_v19, %v4396_v55  ;;  %vm4372_vm12 = vweird.f32 %v7116_v60 }
0x1587   : > { %v4376_v45 = vmul.f32 %v7118_v34, %v4360_v46  ;;  %vm4382_vm13 = vweird.f32 %v7118_v34  ;;  %vm4373_vm14 = vmor %vm4371_vm2, %vm4372_vm12 }
0x1588   : > { %v4398_v50 = vmul.f32 0.5, %v4397_v43  ;;  %v4367_v6 = vmul.f32 %v7116_v60, %v4366_v14  ;;  %vm4383_vm0 = vmor %vm4381_vm1, %vm4382_vm13 }
0x1589   : > { %v4377_v32 = vmul.f32 %v7118_v34, %v4376_v45 }
0x158a   : > { %v4368_v28 = vmul.f32 0.5, %v4367_v6  ;;  %v4399_v22 = vsub.f32 1.5, %v4398_v50 }
0x158b   : > { %v4378_v61 = vmul.f32 0.5, %v4377_v32 }
0x158c   : > { %v4369_v40 = vsub.f32 1.5, %v4368_v28  ;;  %v4400_v41 = vmul.f32 %v7114_v19, %v4399_v22 }
0x158d   : > { %v4379_v23 = vsub.f32 1.5, %v4378_v61 }
0x158e   : > { %v4370_v42 = vmul.f32 %v7116_v60, %v4369_v40  ;;  %v4404_v37 = vsel %vm4403_vm7, %v7114_v19, %v4400_v41 }
0x158f   : > { %v4380_v62 = vmul.f32 %v7118_v34, %v4379_v23  ;;  %v4428_v63 = vmul.f32 %v4404_v37, %v8883_v11  ;;  %v4429_v33 = vmul.f32 %v4404_v37, %v8886_v30 }
0x1590   : > { %v4374_v58 = vsel %vm4373_vm14, %v7116_v60, %v4370_v42 }
0x1591   : > { %v4384_v24 = vsel %vm4383_vm0, %v7118_v34, %v4380_v62  ;;  %v4425_v1 = vmul.f32 %v4374_v58, %v8874_v49  ;;  %v4430_v49 = vmul.f32 %v4404_v37, %v8888_v56  ;;  %v4443_v38 = vsel %vm528_vm5, %v4429_v33, -inf }
0x1592   : > { %v4427_v15 = vmul.f32 %v4384_v24, %v8880_v48  ;;  %v4426_v3 = vmul.f32 %v4384_v24, %v8877_v29  ;;  %v4440_v48 = vsel %vm528_vm5, %v4428_v63, -inf }
0x1593   : > { %v4431_v44 = vsel %vm528_vm5, %v4425_v1, -inf  ;;  %v4446_v29 = vsel %vm528_vm5, %v4430_v49, -inf }
0x1594   : > { %v4437_v36 = vsel %vm528_vm5, %v4427_v15, -inf  ;;  %v4434_v18 = vsel %vm528_vm5, %v4426_v3, -inf  ;;  %4432 = vmax.xlane.f32.xlu0 %v4431_v44 }
0x1595   : > { %4438 = vmax.xlane.f32.xlu2 %v4437_v36  ;;  %4435 = vmax.xlane.f32.xlu1 %v4434_v18 }
0x159c   : > { %4441 = vmax.xlane.f32.xlu0 %v4440_v48 }
0x159d   : > { %4447 = vmax.xlane.f32.xlu2 %v4446_v29  ;;  %4444 = vmax.xlane.f32.xlu1 %v4443_v38 }
0x1607   : > { %v4433_v9 = vpop.xlane.xlu0 %4432 }
0x1608   : > { %v4439_v27 = vpop.xlane.xlu2 %4438  ;;  %v4436_v21 = vpop.xlane.xlu1 %4435  ;;  %v4449_v51 = vsub.f32 %v4425_v1, %v4433_v9 }
0x1609   : > { %v4451_v13 = vsub.f32 %v4427_v15, %v4439_v27  ;;  %v4450_v39 = vsub.f32 %v4426_v3, %v4436_v21 }
0x160a   : > { %v4455_v11 = vmul.f32 1.442695, %v4449_v51 }
0x160b   : > { %v4459_v8 = vmul.f32 1.442695, %v4451_v13  ;;  %v4457_v56 = vmul.f32 1.442695, %v4450_v39 }
0x160c   : > { %7119 = vpow2.f32 %v4455_v11 }
0x160d   : > { %7121 = vpow2.f32 %v4459_v8 }
0x160e   : > { %7123 = vpow2.f32 %v4457_v56 }
0x160f   : > { %v4442_v30 = vpop.xlane.xlu0 %4441 }
0x1610   : > { %v4448_v52 = vpop.xlane.xlu2 %4447  ;;  %v4445_v25 = vpop.xlane.xlu1 %4444  ;;  %v4452_v7 = vsub.f32 %v4428_v63, %v4442_v30 }
0x1611   : > { %v4454_v57 = vsub.f32 %v4430_v49, %v4448_v52  ;;  %v4453_v16 = vsub.f32 %v4429_v33, %v4445_v25 }
0x1612   : > { %v8929_v17 = vpop.eup %7119  ;;  %v4461_v12 = vmul.f32 1.442695, %v4452_v7 }
0x1613   : > { %v8931_v47 = vpop.eup %7121  ;;  %v4465_v46 = vmul.f32 1.442695, %v4454_v57  ;;  %v4463_v19 = vmul.f32 1.442695, %v4453_v16  ;;  %v4467_v55 = vsel %vm528_vm5, %v8929_v17, 0.0 }
0x1614   : > { %v8935_v60 = vpop.eup %7123  ;;  %7125 = vpow2.f32 %v4461_v12  ;;  %v4473_v34 = vsel %vm528_vm5, %v8931_v47, 0.0  ;;  %4468 = vadd.xlane.f32.xlu0 %v4467_v55 }
0x1615   : > { %7127 = vpow2.f32 %v4465_v46  ;;  %4474 = vadd.xlane.f32.xlu2 %v4473_v34  ;;  %v4470_v14 = vsel %vm528_vm5, %v8935_v60, 0.0 }
0x1616   : > { %7129 = vpow2.f32 %v4463_v19  ;;  %4471 = vadd.xlane.f32.xlu1 %v4470_v14 }
0x161a   : > { %v8941_v43 = vpop.eup %7125 }
0x161b   : > { %v8943_v45 = vpop.eup %7127  ;;  %v4476_v50 = vsel %vm528_vm5, %v8941_v43, 0.0 }
0x161c   : > { %v8947_v6 = vpop.eup %7129  ;;  %v4482_v32 = vsel %vm528_vm5, %v8943_v45, 0.0  ;;  %4477 = vadd.xlane.f32.xlu0 %v4476_v50 }
0x161d   : > { %4483 = vadd.xlane.f32.xlu2 %v4482_v32  ;;  %v4479_v28 = vsel %vm528_vm5, %v8947_v6, 0.0 }
0x161e   : > { %4480 = vadd.xlane.f32.xlu1 %v4479_v28 }
0x1687   : > { %v4469_v61 = vpop.xlane.xlu0 %4468 }
0x1688   : > { %v4475_v22 = vpop.xlane.xlu2 %4474  ;;  %7131 = vrcp.f32 %v4469_v61  ;;  %vm4490_vm8 = vweird.f32 %v4469_v61  ;;  %v4494_v41 = vand.u32 2147483647, %v4469_v61  ;;  %v4496_v24 = vand.u32 2147483648, %v4469_v61 }
0x1689   : > { %7133 = vrcp.f32 %v4475_v22  ;;  %v4472_v40 = vpop.xlane.xlu1 %4471  ;;  %v4522_v42 = vand.u32 2147483647, %v4475_v22  ;;  %vm4518_vm9 = vweird.f32 %v4475_v22  ;;  %v4524_v44 = vand.u32 2147483648, %v4475_v22 }
0x168a   : > { %7135 = vrcp.f32 %v4472_v40  ;;  %vm4504_vm10 = vweird.f32 %v4472_v40  ;;  %v4508_v48 = vand.u32 2147483647, %v4472_v40  ;;  %v4510_v29 = vand.u32 2147483648, %v4472_v40 }
0x168b   : > { %vm8961_vm11 = vcmp.eq.f32.partialorder %v4522_v42, 8.507059e+37  ;;  %v4525_v21 = vor.u32 1.1754944e-38, %v4524_v44  ;;  %vm8966_vm2 = vcmp.eq.f32.partialorder %v4494_v41, 8.507059e+37  ;;  %v4497_v11 = vor.u32 1.1754944e-38, %v4496_v24 }
0x168c   : > { %vm8970_vm14 = vcmp.eq.f32.partialorder %v4508_v48, 8.507059e+37  ;;  %v4511_v52 = vor.u32 1.1754944e-38, %v4510_v29 }
0x168e   : > { %v7132_v23 = vpop.eup %7131 }
0x168f   : > { %v7134_v62 = vpop.eup %7133  ;;  %v4486_v58 = vmul.f32 %v7132_v23, %v4469_v61  ;;  %v8953_v1 = vpop.xlane.xlu0 %4477  ;;  %vm4491_vm12 = vweird.f32 %v7132_v23 }
0x1690   : > { %v7136_v15 = vpop.eup %7135  ;;  %v4514_v3 = vmul.f32 %v7134_v62, %v4475_v22  ;;  %v8955_v36 = vpop.xlane.xlu2 %4483  ;;  %7137 = vrcp.f32 %v8953_v1  ;;  %vm4519_vm13 = vweird.f32 %v7134_v62  ;;  %vm4492_vm0 = vmor %vm4490_vm8, %vm4491_vm12  ;;  %vm4532_vm4 = vweird.f32 %v8953_v1 }
0x1691   : > { %v4500_v18 = vmul.f32 %v7136_v15, %v4472_v40  ;;  %v4487_v37 = vsub.f32 1.0, %v4486_v58  ;;  %7139 = vrcp.f32 %v8955_v36  ;;  %v8959_v63 = vpop.xlane.xlu1 %4480  ;;  %vm4505_vm1 = vweird.f32 %v7136_v15  ;;  %vm4520_vm6 = vmor %vm4518_vm9, %vm4519_vm13 }
0x1692   : > { %v4515_v49 = vsub.f32 1.0, %v4514_v3  ;;  %7141 = vrcp.f32 %v8959_v63  ;;  %v4566_v16 = vand.u32 2147483648, %v8955_v36  ;;  %vm4506_vm7 = vmor %vm4504_vm10, %vm4505_vm1  ;;  %v4538_v34 = vand.u32 2147483648, %v8953_v1 }
0x1693   : > { %v4501_v38 = vsub.f32 1.0, %v4500_v18  ;;  %v4488_v9 = vmul.f32 %v7132_v23, %v4487_v37  ;;  %v4536_v41 = vand.u32 2147483647, %v8953_v1  ;;  %vm4560_vm10 = vweird.f32 %v8955_v36 }
0x1694   : > { %v4516_v27 = vmul.f32 %v7134_v62, %v4515_v49  ;;  %v4552_v3 = vand.u32 2147483648, %v8959_v63  ;;  %v4567_v49 = vor.u32 1.1754944e-38, %v4566_v16 }
0x1695   : > { %v4502_v13 = vmul.f32 %v7136_v15, %v4501_v38  ;;  %v4489_v39 = vadd.f32 %v7132_v23, %v4488_v9  ;;  %vm4537_vm1 = vcmp.eq.f32.partialorder %v4536_v41, 8.507059e+37 }
0x1696   : > { %v7138_v8 = vpop.eup %7137  ;;  %v4517_v56 = vadd.f32 %v7134_v62, %v4516_v27  ;;  %v4553_v9 = vor.u32 1.1754944e-38, %v4552_v3 }
0x1697   : > { %v7140_v25 = vpop.eup %7139  ;;  %v4503_v7 = vadd.f32 %v7136_v15, %v4502_v13  ;;  %v4493_v57 = vsel %vm4492_vm0, %v7132_v23, %v4489_v39  ;;  %v4528_v12 = vmul.f32 %v7138_v8, %v8953_v1  ;;  %vm4533_vm8 = vweird.f32 %v7138_v8 }
0x1698   : > { %v4521_v46 = vsel %vm4520_vm6, %v7134_v62, %v4517_v56  ;;  %v4498_v19 = vsel %vm8966_vm2, %v4497_v11, %v4493_v57  ;;  %v4556_v55 = vmul.f32 %v7140_v25, %v8955_v36  ;;  %v7142_v14 = vpop.eup %7141  ;;  %vm4561_vm9 = vweird.f32 %v7140_v25  ;;  %vm4534_vm12 = vmor %vm4532_vm4, %vm4533_vm8 }
0x1699   : > { %v4526_v50 = vsel %vm8961_vm11, %v4525_v21, %v4521_v46  ;;  %v4507_v32 = vsel %vm4506_vm7, %v7136_v15, %v4503_v7  ;;  %v8988_v28 = vmul.f32 %v8929_v17, %v4498_v19  ;;  %v4529_v61 = vsub.f32 1.0, %v4528_v12  ;;  %vm4562_vm13 = vmor %vm4560_vm10, %vm4561_vm9 }
0x169a   : > { %v8991_v22 = vmul.f32 %v8931_v47, %v4526_v50  ;;  %v4512_v40 = vsel %vm8970_vm14, %v4511_v52, %v4507_v32  ;;  %v4557_v23 = vsub.f32 1.0, %v4556_v55  ;;  %v4542_v42 = vmul.f32 %v7142_v14, %v8959_v63 }
0x169b   : > { %v8997_v62 = vmul.f32 %v8935_v60, %v4512_v40  ;;  %v4530_v58 = vmul.f32 %v7138_v8, %v4529_v61  ;;  %v4564_v17 = vand.u32 2147483647, %v8955_v36  ;;  %v4550_v47 = vand.u32 2147483647, %v8959_v63 }
0x169c   : > { %v4558_v24 = vmul.f32 %v7140_v25, %v4557_v23  ;;  %v4543_v15 = vsub.f32 1.0, %v4542_v42  ;;  %vm4547_vm11 = vweird.f32 %v7142_v14  ;;  %v4539_v60 = vor.u32 1.1754944e-38, %v4538_v34 }
0x169d   : > { %v4531_v44 = vadd.f32 %v7138_v8, %v4530_v58  ;;  %vm4546_vm2 = vweird.f32 %v8959_v63  ;;  %vm4565_vm14 = vcmp.eq.f32.partialorder %v4564_v17, 8.507059e+37  ;;  %vm4551_vm4 = vcmp.eq.f32.partialorder %v4550_v47, 8.507059e+37 }
0x169e   : > { %v4559_v18 = vadd.f32 %v7140_v25, %v4558_v24  ;;  %v4544_v37 = vmul.f32 %v7142_v14, %v4543_v15  ;;  %vm4548_vm0 = vmor %vm4546_vm2, %vm4547_vm11 }
0x169f   : > { %v4535_v33 = vsel %vm4534_vm12, %v7138_v8, %v4531_v44 }
0x16a0   : > { %v4563_v48 = vsel %vm4562_vm13, %v7140_v25, %v4559_v18  ;;  %v4545_v36 = vadd.f32 %v7142_v14, %v4544_v37  ;;  %v4540_v29 = vsel %vm4537_vm1, %v4539_v60, %v4535_v33  ;;  %4577 = sbr.rel (%p6801_p5) target bundleno = 5803 (0x16ab), region = 76 }
0x16a1   : > { %v4568_v38 = vsel %vm4565_vm14, %v4567_v49, %v4563_v48  ;;  %v9008_v27 = vmul.f32 %v8941_v43, %v4540_v29 }
0x16a2   : > { %v9011_v1 = vmul.f32 %v8943_v45, %v4568_v38  ;;  %v4549_v21 = vsel %vm4548_vm0, %v7142_v14, %v4545_v36 }
0x16a3   : > { %v4554_v51 = vsel %vm4551_vm4, %v4553_v9, %v4549_v21 }
0x16a4   : > { %v9014_v63 = vmul.f32 %v8947_v6, %v4554_v51 }
0x16a5   : > { %4578 = vst.msk [vmem:[%s9929_s8 + $0xf0] sm:$0xff] %vm528_vm5, %v8988_v28 }
0x16a6   : > { %4579 = vst.msk [vmem:[%s9929_s8 + $0xf8] sm:$0xff] %vm528_vm5, %v8997_v62 }
0x16a7   : > { %4580 = vst.msk [vmem:[%s9929_s8 + $0x100] sm:$0xff] %vm528_vm5, %v8991_v22 }
0x16a8   : > { %4581 = vst.msk [vmem:[%s9929_s8 + $0x108] sm:$0xff] %vm528_vm5, %v9008_v27 }
0x16a9   : > { %4582 = vst.msk [vmem:[%s9929_s8 + $0x110] sm:$0xff] %vm528_vm5, %v9014_v63 }
0x16aa   : > { %4583 = vst.msk [vmem:[%s9929_s8 + $0x118] sm:$0xff] %vm528_vm5, %v9011_v1 }
0x16ab PF: > { %v10017_v43 = vld [vmem:[#allocation17_spill] sm:$0xff]  ;;  %4584 = vrot.lane.b32.xlu1 %v7848_v53, %s7277_s25  ;;  %4588 = vrot.lane.b32.xlu2 %v7852_v4, %s7277_s25  ;;  %v10018_v6 = vld [vmem:[#allocation15_spill] sm:$0xff]  ;;  %v10019_v39 = vld [vmem:[#allocation22_spill] sm:$0xff] }
0x16ac   : > { %v7143_v45 = vpack.i.bf16 %v10017_v43, %v7679_v10  ;;  %v7148_v13 = vpack.i.bf16 %v10018_v6, %v7673_v5  ;;  %v10020_v11 = vld [vmem:[#allocation23_spill] sm:$0xff]  ;;  %v10021_v10 = vld [vmem:[#allocation25_spill] sm:$0xff]  ;;  %v10022_v53 = vld [vmem:[#allocation24_spill] sm:$0xff] }
0x16ae   : > { %7144 = vrot.lane.b32.xlu0 %v7143_v45, %s7276_s9 }
0x16b3   : > { %4586 = vrot.lane.b32.xlu1 %v10019_v39, %s7277_s25  ;;  %4590 = vrot.lane.b32.xlu2 %v10020_v11, %s7277_s25 }
0x16b6   : > { %7149 = vrot.lane.b32.xlu0 %v7148_v13, %s7276_s9 }
0x16bb   : > { %4594 = vrot.lane.b32.xlu1 %v10021_v10, %s7277_s25 }
0x16be   : > { %4592 = vrot.lane.b32.xlu0 %v10022_v53, %s7277_s25 }
0x1705   : > { %v4589_v12 = vpop.permute.xlu2 %4588 }
0x170d   : > { %v4591_v46 = vpop.permute.xlu2 %4590 }
0x171d   : > { %v4585_v52 = vpop.permute.xlu1 %4584 }
0x1720   : > { %v7145_v4 = vpop.permute.xlu0 %7144 }
0x1721   : > { %v7147_v8 = vunpack.i.h.bf16 %v7145_v4  ;;  %v7146_v56 = vunpack.i.l.bf16 %v7145_v4 }
0x1723   : > { %v4607_v30 = vsel %vm2257_vm15, %v7146_v56, %v7147_v8 }
0x1724   : > { %4636 = vmatpush.msrb.mxu1 %v4607_v30 }
0x1725   : > { %v4587_v16 = vpop.permute.xlu1 %4586 }
0x1728   : > { %v7150_v5 = vpop.permute.xlu0 %7149 }
0x1729   : > { %v7152_v25 = vunpack.i.h.bf16 %v7150_v5  ;;  %v7151_v7 = vunpack.i.l.bf16 %v7150_v5 }
0x172b   : > { %v4606_v57 = vsel %vm2257_vm15, %v7151_v7, %v7152_v25 }
0x172c   : > { %4637 = vmatpush.msrb.mxu1 %v4606_v57 }
0x172d   : > { %6845 = vmatmul.msk.f32.vlgmr.msrb.gmra.mxu1 %vm1178_vm3, %v4585_v52  ;;  %v4595_v55 = vpop.permute.xlu1 %4594 }
0x1730   : > { %v4593_v19 = vpop.permute.xlu0 %4592 }
0x1735   : > { %6846 = vmatmul.msk.f32.gmra.mxu1 %vm1178_vm3, %v4587_v16 }
0x173d   : > { %6847 = vmatmul.msk.f32.gmra.mxu1 %vm1178_vm3, %v4589_v12 }
0x1745   : > { %6848 = vmatmul.msk.f32.gmra.mxu1 %vm1178_vm3, %v4591_v46 }
0x174d   : > { %6849 = vmatmul.msk.f32.gmra.mxu1 %vm1178_vm3, %v4593_v19 }
0x1755   : > { %6850 = vmatmul.msk.f32.gmra.mxu1 %vm1178_vm3, %v4595_v55 }
0x17aa   : > { %v4639_v34 = vpop.f32.mrf.mxu1 }
0x17ab   : > { %v9076_v40 = vmul.f32 0.14433756, %v4639_v34 }
0x17ad   : > { %v4702_v58 = vmul.f32 0.0, %v9076_v40  ;;  %v4669_v49 = vsel %vm528_vm5, %v9076_v40, 0.0 }
0x17af   : > { %v4708_v3 = vsel %vm528_vm5, %v4702_v58, 0.0 }
0x17b2   : > { %v4642_v14 = vpop.f32.mrf.mxu1 }
0x17b3   : > { %v9074_v61 = vmul.f32 0.14433756, %v4642_v14 }
0x17b5   : > { %v4664_v42 = vmul.f32 0.0, %v9074_v61  ;;  %v4709_v44 = vsel %vm528_vm5, %v9074_v61, 0.0 }
0x17b6   : > { %v4710_v38 = vadd.f32 %v4709_v44, %v4708_v3 }
0x17b7   : > { %v4670_v15 = vsel %vm528_vm5, %v4664_v42, 0.0 }
0x17b8   : > { %v4749_v60 = vadd.f32 %v4708_v3, %v4670_v15  ;;  %v4671_v29 = vadd.f32 %v4670_v15, %v4669_v49 }
0x17ba   : > { %v4645_v50 = vpop.f32.mrf.mxu1 }
0x17bb   : > { %v9078_v23 = vmul.f32 0.14433756, %v4645_v50 }
0x17bd   : > { %v4665_v41 = vmul.f32 0.0, %v9078_v23  ;;  %v4711_v33 = vsel %vm528_vm5, %v9078_v23, 0.0 }
0x17be   : > { %v4712_v45 = vadd.f32 %v4711_v33, %v4710_v38 }
0x17bf   : > { %v4672_v18 = vsel %vm528_vm5, %v4665_v41, 0.0 }
0x17c0   : > { %v4751_v9 = vadd.f32 %v4749_v60, %v4672_v18  ;;  %v4673_v43 = vadd.f32 %v4672_v18, %v4671_v29 }
0x17c2   : > { %v4648_v32 = vpop.f32.mrf.mxu1 }
0x17c3   : > { %v9083_v24 = vmul.f32 0.14433756, %v4648_v32 }
0x17c5   : > { %v4666_v37 = vmul.f32 0.0, %v9083_v24  ;;  %v4752_v48 = vsel %vm528_vm5, %v9083_v24, 0.0 }
0x17c6   : > { %v4753_v6 = vadd.f32 %v4752_v48, %v4751_v9 }
0x17c7   : > { %v4674_v21 = vsel %vm528_vm5, %v4666_v37, 0.0 }
0x17c8   : > { %v4675_v10 = vadd.f32 %v4674_v21, %v4673_v43  ;;  %v4714_v53 = vadd.f32 %v4712_v45, %v4674_v21 }
0x17ca   : > { %v4651_v17 = vpop.f32.mrf.mxu1 }
0x17cb   : > { %v9086_v47 = vmul.f32 0.14433756, %v4651_v17 }
0x17cd   : > { %v4667_v36 = vmul.f32 0.0, %v9086_v47  ;;  %v4754_v51 = vsel %vm528_vm5, %v9086_v47, 0.0 }
0x17ce   : > { %v4755_v4 = vadd.f32 %v4754_v51, %v4753_v6 }
0x17cf   : > { %v4676_v39 = vsel %vm528_vm5, %v4667_v36, 0.0 }
0x17d0   : > { %v4677_v30 = vadd.f32 %v4676_v39, %v4675_v10  ;;  %v4716_v5 = vadd.f32 %v4714_v53, %v4676_v39 }
0x17d2   : > { %v4654_v13 = vpop.f32.mrf.mxu1 }
0x17d3   : > { %v4662_v11 = vmul.f32 0.14433756, %v4654_v13 }
0x17d5   : > { %v4668_v8 = vmul.f32 0.0, %v4662_v11  ;;  %v4756_v56 = vsel %vm528_vm5, %v4662_v11, 0.0 }
0x17d6   : > { %v4757_v52 = vadd.f32 %v4756_v56, %v4755_v4 }
0x17d7   : > { %v4678_v25 = vsel %vm528_vm5, %v4668_v8, 0.0 }
0x17d8   : > { %v4679_v7 = vadd.f32 %v4678_v25, %v4677_v30  ;;  %v4718_v57 = vadd.f32 %v4716_v5, %v4678_v25  ;;  %v4758_v16 = vrot.slane %v4757_v52, 4 }
0x17da   : > { %v4759_v12 = vadd.f32 %v4758_v16, %v4757_v52  ;;  %v4719_v46 = vrot.slane %v4718_v57, 4  ;;  %v4680_v19 = vrot.slane %v4679_v7, 4 }
0x17dc   : > { %v4760_v55 = vrot.slane %v4759_v12, 2  ;;  %v4720_v34 = vadd.f32 %v4719_v46, %v4718_v57  ;;  %v4681_v14 = vadd.f32 %v4680_v19, %v4679_v7 }
0x17de   : > { %v4761_v50 = vadd.f32 %v4760_v55, %v4759_v12  ;;  %v4721_v32 = vrot.slane %v4720_v34, 2  ;;  %v4682_v42 = vrot.slane %v4681_v14, 2 }
0x17e0   : > { %v4762_v58 = vrot.slane %v4761_v50, 1  ;;  %v4722_v41 = vadd.f32 %v4721_v32, %v4720_v34  ;;  %v4683_v17 = vadd.f32 %v4682_v42, %v4681_v14 }
0x17e2   : > { %v4763_v15 = vadd.f32 %v4762_v58, %v4761_v50  ;;  %v4723_v3 = vrot.slane %v4722_v41, 1  ;;  %v4684_v44 = vrot.slane %v4683_v17, 1 }
0x17e4   : > { %v4764_v18 = vsel %vm528_vm5, %v4763_v15, 0.0  ;;  %v4724_v37 = vadd.f32 %v4723_v3, %v4722_v41  ;;  %v4685_v60 = vadd.f32 %v4684_v44, %v4683_v17 }
0x17e5   : > { %4765 = vadd.xlane.f32.xlu1 %v4764_v18 }
0x17e6   : > { %v4725_v49 = vsel %vm528_vm5, %v4724_v37, 0.0  ;;  %v4686_v33 = vsel %vm528_vm5, %v4685_v60, 0.0 }
0x17e7   : > { %4726 = vadd.xlane.f32.xlu0 %v4725_v49  ;;  %4687 = vadd.xlane.f32.xlu2 %v4686_v33 }
0x1858   : > { %v4766_v48 = vpop.xlane.xlu1 %4765 }
0x1859   : > { %v4767_v38 = vmul.f32 0.00086805556, %v4766_v48 }
0x185a   : > { %v4727_v36 = vpop.xlane.xlu0 %4726  ;;  %v4688_v29 = vpop.xlane.xlu2 %4687 }
0x185b   : > { %v4728_v9 = vmul.f32 0.0013020834, %v4727_v36  ;;  %v4689_v21 = vmul.f32 0.0026041667, %v4688_v29  ;;  %v4768_v45 = vmul.f32 0.0, %v4767_v38 }
0x185d   : > { %v4729_v51 = vmul.f32 0.0, %v4728_v9  ;;  %v4691_v43 = vmul.f32 0.0, %v4689_v21 }
0x185f   : > { %v4735_v6 = vadd.f32 %v4729_v51, %v4689_v21  ;;  %v4736_v13 = vadd.f32 %v4728_v9, %v4691_v43  ;;  %v4738_v39 = vadd.f32 %v4729_v51, %v4691_v43 }
0x1861   : > { %v4774_v10 = vadd.f32 %v4768_v45, %v4735_v6  ;;  %v4775_v53 = vadd.f32 %v4768_v45, %v4736_v13  ;;  %v4777_v4 = vadd.f32 %v4767_v38, %v4738_v39 }
0x1863   : > { %v9110_v8 = vsub.f32 %v9076_v40, %v4774_v10  ;;  %v9113_v56 = vsub.f32 %v9074_v61, %v4775_v53  ;;  %v9116_v30 = vsub.f32 %v9078_v23, %v4775_v53  ;;  %v9119_v5 = vsub.f32 %v9083_v24, %v4777_v4 }
0x1864   : > { %v9122_v52 = vsub.f32 %v9086_v47, %v4777_v4  ;;  %v9124_v25 = vsub.f32 %v4662_v11, %v4777_v4 }
0x1865   : > { %v4786_v7 = vmul.f32 %v9110_v8, %v9110_v8  ;;  %v4787_v40 = vmul.f32 %v9113_v56, %v9113_v56  ;;  %v4788_v61 = vmul.f32 %v9116_v30, %v9116_v30  ;;  %v4789_v23 = vmul.f32 %v9119_v5, %v9119_v5 }
0x1866   : > { %v4790_v47 = vmul.f32 %v9122_v52, %v9122_v52  ;;  %v4791_v11 = vmul.f32 %v9124_v25, %v9124_v25 }
0x1867   : > { %v4793_v57 = vmul.f32 0.0, %v4787_v40  ;;  %v4794_v24 = vmul.f32 0.0, %v4788_v61  ;;  %v4831_v16 = vmul.f32 0.0, %v4786_v7  ;;  %v4798_v12 = vsel %vm528_vm5, %v4786_v7, 0.0 }
0x1868   : > { %v4838_v55 = vsel %vm528_vm5, %v4787_v40, 0.0  ;;  %v4795_v32 = vmul.f32 0.0, %v4789_v23  ;;  %v4840_v58 = vsel %vm528_vm5, %v4788_v61, 0.0  ;;  %v4796_v41 = vmul.f32 0.0, %v4790_v47 }
0x1869   : > { %v4799_v46 = vsel %vm528_vm5, %v4793_v57, 0.0  ;;  %v4837_v19 = vsel %vm528_vm5, %v4831_v16, 0.0  ;;  %v4801_v42 = vsel %vm528_vm5, %v4794_v24, 0.0  ;;  %v4881_v44 = vsel %vm528_vm5, %v4789_v23, 0.0 }
0x186a   : > { %v4800_v34 = vadd.f32 %v4799_v46, %v4798_v12  ;;  %v4839_v14 = vadd.f32 %v4838_v55, %v4837_v19  ;;  %v4878_v50 = vadd.f32 %v4837_v19, %v4799_v46  ;;  %v4797_v18 = vmul.f32 0.0, %v4791_v11 }
0x186b   : > { %v4803_v37 = vsel %vm528_vm5, %v4795_v32, 0.0  ;;  %v4883_v48 = vsel %vm528_vm5, %v4790_v47, 0.0  ;;  %v4805_v36 = vsel %vm528_vm5, %v4796_v41, 0.0  ;;  %v4885_v21 = vsel %vm528_vm5, %v4791_v11, 0.0 }
0x186c   : > { %v4880_v17 = vadd.f32 %v4878_v50, %v4801_v42  ;;  %v4802_v15 = vadd.f32 %v4801_v42, %v4800_v34  ;;  %v4841_v3 = vadd.f32 %v4840_v58, %v4839_v14  ;;  %v4807_v51 = vsel %vm528_vm5, %v4797_v18, 0.0 }
0x186e   : > { %v4882_v60 = vadd.f32 %v4881_v44, %v4880_v17  ;;  %v4804_v49 = vadd.f32 %v4803_v37, %v4802_v15  ;;  %v4843_v33 = vadd.f32 %v4841_v3, %v4803_v37 }
0x1870   : > { %v4884_v29 = vadd.f32 %v4883_v48, %v4882_v60  ;;  %v4806_v38 = vadd.f32 %v4805_v36, %v4804_v49  ;;  %v4845_v9 = vadd.f32 %v4843_v33, %v4805_v36 }
0x1872   : > { %v4886_v43 = vadd.f32 %v4885_v21, %v4884_v29  ;;  %v4808_v45 = vadd.f32 %v4807_v51, %v4806_v38  ;;  %v4847_v6 = vadd.f32 %v4845_v9, %v4807_v51 }
0x1874   : > { %v4887_v13 = vrot.slane %v4886_v43, 4  ;;  %v4809_v39 = vrot.slane %v4808_v45, 4  ;;  %v4848_v10 = vrot.slane %v4847_v6, 4 }
0x1876   : > { %v4888_v53 = vadd.f32 %v4887_v13, %v4886_v43  ;;  %v4810_v4 = vadd.f32 %v4809_v39, %v4808_v45  ;;  %v4849_v7 = vadd.f32 %v4848_v10, %v4847_v6 }
0x1878   : > { %v4889_v40 = vrot.slane %v4888_v53, 2  ;;  %v4811_v61 = vrot.slane %v4810_v4, 2  ;;  %v4850_v23 = vrot.slane %v4849_v7, 2 }
0x187a   : > { %v4890_v57 = vadd.f32 %v4889_v40, %v4888_v53  ;;  %v4812_v24 = vadd.f32 %v4811_v61, %v4810_v4  ;;  %v4851_v12 = vadd.f32 %v4850_v23, %v4849_v7 }
0x187c   : > { %v4891_v16 = vrot.slane %v4890_v57, 1  ;;  %v4813_v47 = vrot.slane %v4812_v24, 1  ;;  %v4852_v34 = vrot.slane %v4851_v12, 1 }
0x187e   : > { %v4892_v11 = vadd.f32 %v4891_v16, %v4890_v57  ;;  %v4814_v46 = vadd.f32 %v4813_v47, %v4812_v24  ;;  %v4853_v14 = vadd.f32 %v4852_v34, %v4851_v12 }
0x1880   : > { %v4893_v19 = vsel %vm528_vm5, %v4892_v11, 0.0  ;;  %v4815_v55 = vsel %vm528_vm5, %v4814_v46, 0.0  ;;  %v4854_v50 = vsel %vm528_vm5, %v4853_v14, 0.0 }
0x1881   : > { %4894 = vadd.xlane.f32.xlu0 %v4893_v19  ;;  %4816 = vadd.xlane.f32.xlu2 %v4815_v55 }
0x1889   : > { %4855 = vadd.xlane.f32.xlu2 %v4854_v50 }
0x18f4   : > { %v4817_v32 = vpop.xlane.xlu2 %4816  ;;  %v4895_v42 = vpop.xlane.xlu0 %4894 }
0x18f5   : > { %v4818_v58 = vmul.f32 0.0026041667, %v4817_v32  ;;  %v4896_v41 = vmul.f32 0.00086805556, %v4895_v42 }
0x18f7   : > { %v4820_v15 = vmul.f32 0.0, %v4818_v58  ;;  %v4897_v44 = vmul.f32 0.0, %v4896_v41 }
0x18fc   : > { %v4856_v17 = vpop.xlane.xlu2 %4855 }
0x18fd   : > { %v4857_v3 = vmul.f32 0.0013020834, %v4856_v17 }
0x18ff   : > { %v4858_v18 = vmul.f32 0.0, %v4857_v3  ;;  %v4865_v37 = vadd.f32 %v4857_v3, %v4820_v15 }
0x1901   : > { %v4864_v60 = vadd.f32 %v4858_v18, %v4818_v58  ;;  %v4867_v49 = vadd.f32 %v4858_v18, %v4820_v15  ;;  %v4904_v33 = vadd.f32 %v4897_v44, %v4865_v37 }
0x1903   : > { %v4903_v48 = vadd.f32 %v4897_v44, %v4864_v60  ;;  %v4906_v36 = vadd.f32 %v4896_v41, %v4867_v49  ;;  %v4910_v29 = vadd.f32 1e-05, %v4904_v33 }
0x1905   : > { %v4909_v38 = vadd.f32 1e-05, %v4903_v48  ;;  %v4912_v9 = vadd.f32 1e-05, %v4906_v36  ;;  %7153 = vrsqrt.f32 %v4910_v29  ;;  %vm4931_vm6 = vweird.f32 %v4910_v29 }
0x1907   : > { %7155 = vrsqrt.f32 %v4909_v38  ;;  %vm4921_vm9 = vweird.f32 %v4909_v38  ;;  %vm4951_vm12 = vweird.f32 %v4912_v9 }
0x1908   : > { %7157 = vrsqrt.f32 %v4912_v9 }
0x190b   : > { %v7154_v21 = vpop.eup %7153 }
0x190c   : > { %v4926_v51 = vmul.f32 %v7154_v21, %v4910_v29  ;;  %vm4932_vm15 = vweird.f32 %v7154_v21 }
0x190d   : > { %v7156_v43 = vpop.eup %7155  ;;  %vm4933_vm8 = vmor %vm4931_vm6, %vm4932_vm15 }
0x190e   : > { %v7158_v45 = vpop.eup %7157  ;;  %v4916_v6 = vmul.f32 %v7156_v43, %v4909_v38  ;;  %v4927_v13 = vmul.f32 %v7154_v21, %v4926_v51  ;;  %vm4922_vm7 = vweird.f32 %v7156_v43 }
0x190f   : > { %v4946_v39 = vmul.f32 %v7158_v45, %v4912_v9  ;;  %vm4952_vm10 = vweird.f32 %v7158_v45  ;;  %vm4923_vm11 = vmor %vm4921_vm9, %vm4922_vm7 }
0x1910   : > { %v4928_v10 = vmul.f32 0.5, %v4927_v13  ;;  %v4917_v53 = vmul.f32 %v7156_v43, %v4916_v6  ;;  %vm4953_vm13 = vmor %vm4951_vm12, %vm4952_vm10 }
0x1911   : > { %v4947_v4 = vmul.f32 %v7158_v45, %v4946_v39 }
0x1912   : > { %v4929_v7 = vsub.f32 1.5, %v4928_v10  ;;  %v4918_v40 = vmul.f32 0.5, %v4917_v53 }
0x1913   : > { %v4948_v61 = vmul.f32 0.5, %v4947_v4 }
0x1914   : > { %v4930_v23 = vmul.f32 %v7154_v21, %v4929_v7  ;;  %v4919_v57 = vsub.f32 1.5, %v4918_v40 }
0x1915   : > { %v4949_v24 = vsub.f32 1.5, %v4948_v61 }
0x1916   : > { %v4934_v16 = vsel %vm4933_vm8, %v7154_v21, %v4930_v23  ;;  %v4920_v47 = vmul.f32 %v7156_v43, %v4919_v57 }
0x1917   : > { %v4977_v12 = vmul.f32 %v4934_v16, %v9116_v30  ;;  %v4976_v11 = vmul.f32 %v4934_v16, %v9113_v56  ;;  %v4950_v46 = vmul.f32 %v7158_v45, %v4949_v24 }
0x1918   : > { %v4924_v19 = vsel %vm4923_vm11, %v7156_v43, %v4920_v47 }
0x1919   : > { %v4987_v55 = vsel %vm528_vm5, %v4977_v12, -inf  ;;  %v4984_v34 = vsel %vm528_vm5, %v4976_v11, -inf  ;;  %v4975_v14 = vmul.f32 %v4924_v19, %v9110_v8  ;;  %v4954_v50 = vsel %vm4953_vm13, %v7158_v45, %v4950_v46 }
0x191a   : > { %4988 = vmax.xlane.f32.xlu0 %v4987_v55  ;;  %4985 = vmax.xlane.f32.xlu2 %v4984_v34  ;;  %v4980_v30 = vmul.f32 %v4954_v50, %v9124_v25  ;;  %v4979_v56 = vmul.f32 %v4954_v50, %v9122_v52  ;;  %v4978_v42 = vmul.f32 %v4954_v50, %v9119_v5 }
0x191b   : > { %v4981_v32 = vsel %vm528_vm5, %v4975_v14, -inf }
0x191c   : > { %4982 = vmax.xlane.f32.xlu1 %v4981_v32  ;;  %v4996_v58 = vsel %vm528_vm5, %v4980_v30, -inf  ;;  %v4993_v41 = vsel %vm528_vm5, %v4979_v56, -inf  ;;  %v4990_v8 = vsel %vm528_vm5, %v4978_v42, -inf }
0x1922   : > { %4997 = vmax.xlane.f32.xlu0 %v4996_v58  ;;  %4994 = vmax.xlane.f32.xlu2 %v4993_v41 }
0x1924   : > { %4991 = vmax.xlane.f32.xlu1 %v4990_v8 }
0x198d   : > { %v4989_v17 = vpop.xlane.xlu0 %4988  ;;  %v4986_v15 = vpop.xlane.xlu2 %4985 }
0x198e   : > { %v5001_v3 = vsub.f32 %v4977_v12, %v4989_v17  ;;  %v5000_v44 = vsub.f32 %v4976_v11, %v4986_v15 }
0x198f   : > { %v4983_v18 = vpop.xlane.xlu1 %4982 }
0x1990   : > { %v5009_v37 = vmul.f32 1.442695, %v5001_v3  ;;  %v5007_v25 = vmul.f32 1.442695, %v5000_v44  ;;  %v4999_v60 = vsub.f32 %v4975_v14, %v4983_v18 }
0x1992   : > { %7159 = vpow2.f32 %v5009_v37  ;;  %v5005_v52 = vmul.f32 1.442695, %v4999_v60 }
0x1993   : > { %7161 = vpow2.f32 %v5007_v25 }
0x1994   : > { %7163 = vpow2.f32 %v5005_v52 }
0x1995   : > { %v4998_v5 = vpop.xlane.xlu0 %4997  ;;  %v4995_v49 = vpop.xlane.xlu2 %4994 }
0x1996   : > { %v5004_v33 = vsub.f32 %v4980_v30, %v4998_v5  ;;  %v5003_v48 = vsub.f32 %v4979_v56, %v4995_v49 }
0x1997   : > { %v4992_v36 = vpop.xlane.xlu1 %4991 }
0x1998   : > { %v9165_v29 = vpop.eup %7159  ;;  %v5015_v38 = vmul.f32 1.442695, %v5004_v33  ;;  %v5013_v9 = vmul.f32 1.442695, %v5003_v48  ;;  %v5002_v21 = vsub.f32 %v4978_v42, %v4992_v36 }
0x1999   : > { %v9167_v51 = vpop.eup %7161  ;;  %v5023_v43 = vsel %vm528_vm5, %v9165_v29, 0.0 }
0x199a   : > { %v9171_v45 = vpop.eup %7163  ;;  %7165 = vpow2.f32 %v5015_v38  ;;  %v5011_v6 = vmul.f32 1.442695, %v5002_v21  ;;  %5024 = vadd.xlane.f32.xlu0 %v5023_v43  ;;  %v5020_v13 = vsel %vm528_vm5, %v9167_v51, 0.0 }
0x199b   : > { %7167 = vpow2.f32 %v5013_v9  ;;  %5021 = vadd.xlane.f32.xlu2 %v5020_v13  ;;  %v5017_v39 = vsel %vm528_vm5, %v9171_v45, 0.0 }
0x199c   : > { %7169 = vpow2.f32 %v5011_v6  ;;  %5018 = vadd.xlane.f32.xlu1 %v5017_v39 }
0x19a0   : > { %v9177_v10 = vpop.eup %7165 }
0x19a1   : > { %v9179_v53 = vpop.eup %7167  ;;  %v5032_v4 = vsel %vm528_vm5, %v9177_v10, 0.0 }
0x19a2   : > { %v9183_v7 = vpop.eup %7169  ;;  %5033 = vadd.xlane.f32.xlu0 %v5032_v4  ;;  %v5029_v40 = vsel %vm528_vm5, %v9179_v53, 0.0 }
0x19a3   : > { %5030 = vadd.xlane.f32.xlu2 %v5029_v40  ;;  %v5026_v61 = vsel %vm528_vm5, %v9183_v7, 0.0 }
0x19a4   : > { %5027 = vadd.xlane.f32.xlu1 %v5026_v61 }
0x1a0d   : > { %v5025_v23 = vpop.xlane.xlu0 %5024 }
0x1a0e   : > { %7171 = vrcp.f32 %v5025_v23  ;;  %v5022_v57 = vpop.xlane.xlu2 %5021  ;;  %v5072_v47 = vand.u32 2147483647, %v5025_v23  ;;  %vm5068_vm2 = vweird.f32 %v5025_v23  ;;  %v5074_v55 = vand.u32 2147483648, %v5025_v23 }
0x1a0f   : > { %7173 = vrcp.f32 %v5022_v57  ;;  %v5019_v24 = vpop.xlane.xlu1 %5018  ;;  %vm5054_vm1 = vweird.f32 %v5022_v57  ;;  %v5058_v32 = vand.u32 2147483647, %v5022_v57  ;;  %v5060_v41 = vand.u32 2147483648, %v5022_v57 }
0x1a10   : > { %7175 = vrcp.f32 %v5019_v24  ;;  %vm9196_vm14 = vcmp.eq.f32.partialorder %v5072_v47, 8.507059e+37  ;;  %v5044_v15 = vand.u32 2147483647, %v5019_v24  ;;  %v5046_v44 = vand.u32 2147483648, %v5019_v24 }
0x1a11   : > { %v5075_v37 = vor.u32 1.1754944e-38, %v5074_v55  ;;  %vm5059_vm7 = vcmp.eq.f32.partialorder %v5058_v32, 8.507059e+37  ;;  %v5061_v5 = vor.u32 1.1754944e-38, %v5060_v41  ;;  %vm5040_vm8 = vweird.f32 %v5019_v24 }
0x1a12   : > { %vm5045_vm10 = vcmp.eq.f32.partialorder %v5044_v15, 8.507059e+37  ;;  %v5047_v21 = vor.u32 1.1754944e-38, %v5046_v44 }
0x1a14   : > { %v7172_v16 = vpop.eup %7171 }
0x1a15   : > { %v7174_v12 = vpop.eup %7173  ;;  %v5064_v11 = vmul.f32 %v7172_v16, %v5025_v23  ;;  %v9189_v46 = vpop.xlane.xlu0 %5033  ;;  %vm5069_vm0 = vweird.f32 %v7172_v16 }
0x1a16   : > { %v7176_v19 = vpop.eup %7175  ;;  %v5050_v34 = vmul.f32 %v7174_v12, %v5022_v57  ;;  %7177 = vrcp.f32 %v9189_v46  ;;  %v9192_v14 = vpop.xlane.xlu2 %5030  ;;  %vm5055_vm4 = vweird.f32 %v7174_v12  ;;  %vm5070_vm6 = vmor %vm5068_vm2, %vm5069_vm0  ;;  %v5114_v43 = vand.u32 2147483647, %v9189_v46 }
0x1a17   : > { %v5065_v50 = vsub.f32 1.0, %v5064_v11  ;;  %v5036_v30 = vmul.f32 %v7176_v19, %v5019_v24  ;;  %v9194_v56 = vpop.xlane.xlu1 %5027  ;;  %7179 = vrcp.f32 %v9192_v14  ;;  %vm5041_vm15 = vweird.f32 %v7176_v19  ;;  %vm5056_vm9 = vmor %vm5054_vm1, %vm5055_vm4 }
0x1a18   : > { %v5051_v58 = vsub.f32 1.0, %v5050_v34  ;;  %7181 = vrcp.f32 %v9194_v56  ;;  %vm5042_vm11 = vmor %vm5040_vm8, %vm5041_vm15  ;;  %v5116_v57 = vand.u32 2147483648, %v9189_v46  ;;  %vm5110_vm13 = vweird.f32 %v9189_v46 }
0x1a19   : > { %v5066_v8 = vmul.f32 %v7172_v16, %v5065_v50  ;;  %v5037_v17 = vsub.f32 1.0, %v5036_v30  ;;  %vm5115_vm2 = vcmp.eq.f32.partialorder %v5114_v43, 8.507059e+37  ;;  %v5086_v42 = vand.u32 2147483647, %v9194_v56 }
0x1a1a   : > { %v5052_v3 = vmul.f32 %v7174_v12, %v5051_v58  ;;  %v5117_v34 = vor.u32 1.1754944e-38, %v5116_v57  ;;  %vm5096_vm4 = vweird.f32 %v9192_v14 }
0x1a1b   : > { %v5067_v18 = vadd.f32 %v7172_v16, %v5066_v8  ;;  %v5038_v25 = vmul.f32 %v7176_v19, %v5037_v17 }
0x1a1c   : > { %v7178_v60 = vpop.eup %7177  ;;  %v5053_v52 = vadd.f32 %v7174_v12, %v5052_v3 }
0x1a1d   : > { %v5071_v49 = vsel %vm5070_vm6, %v7172_v16, %v5067_v18  ;;  %v5039_v33 = vadd.f32 %v7176_v19, %v5038_v25  ;;  %v5106_v48 = vmul.f32 %v7178_v60, %v9189_v46  ;;  %v7180_v36 = vpop.eup %7179  ;;  %vm5111_vm12 = vweird.f32 %v7178_v60 }
0x1a1e   : > { %v5076_v38 = vsel %vm9196_vm14, %v5075_v37, %v5071_v49  ;;  %v5057_v9 = vsel %vm5056_vm9, %v7174_v12, %v5053_v52  ;;  %v7182_v40 = vpop.eup %7181  ;;  %v5092_v24 = vmul.f32 %v7180_v36, %v9192_v14  ;;  %vm5112_vm1 = vmor %vm5110_vm13, %vm5111_vm12  ;;  %vm5097_vm14 = vweird.f32 %v7180_v36 }
0x1a1f   : > { %v9210_v6 = vmul.f32 %v9165_v29, %v5076_v38  ;;  %v5062_v13 = vsel %vm5059_vm7, %v5061_v5, %v5057_v9  ;;  %v5043_v39 = vsel %vm5042_vm11, %v7176_v19, %v5039_v33  ;;  %v5107_v4 = vsub.f32 1.0, %v5106_v48  ;;  %vm5098_vm15 = vmor %vm5096_vm4, %vm5097_vm14 }
0x1a20   : > { %v9213_v61 = vmul.f32 %v9167_v51, %v5062_v13  ;;  %v5048_v23 = vsel %vm5045_vm10, %v5047_v21, %v5043_v39  ;;  %v5078_v29 = vmul.f32 %v7182_v40, %v9194_v56  ;;  %v5093_v12 = vsub.f32 1.0, %v5092_v24 }
0x1a21   : > { %v9218_v16 = vmul.f32 %v9171_v45, %v5048_v23  ;;  %v5108_v47 = vmul.f32 %v7178_v60, %v5107_v4  ;;  %v5100_v51 = vand.u32 2147483647, %v9192_v14  ;;  %v5102_v19 = vand.u32 2147483648, %v9192_v14 }
0x1a22   : > { %v5079_v55 = vsub.f32 1.0, %v5078_v29  ;;  %v5094_v50 = vmul.f32 %v7180_v36, %v5093_v12  ;;  %v5088_v45 = vand.u32 2147483648, %v9194_v56  ;;  %vm5083_vm0 = vweird.f32 %v7182_v40 }
0x1a23   : > { %v5109_v11 = vadd.f32 %v7178_v60, %v5108_v47  ;;  %v5103_v8 = vor.u32 1.1754944e-38, %v5102_v19  ;;  %vm5082_vm6 = vweird.f32 %v9194_v56  ;;  %vm5101_vm7 = vcmp.eq.f32.partialorder %v5100_v51, 8.507059e+37 }
0x1a24   : > { %v5080_v30 = vmul.f32 %v7182_v40, %v5079_v55  ;;  %v5095_v58 = vadd.f32 %v7180_v36, %v5094_v50  ;;  %vm5084_vm8 = vmor %vm5082_vm6, %vm5083_vm0  ;;  %v5089_v3 = vor.u32 1.1754944e-38, %v5088_v45  ;;  %vm5087_vm9 = vcmp.eq.f32.partialorder %v5086_v42, 8.507059e+37 }
0x1a25   : > { %v5113_v32 = vsel %vm5112_vm1, %v7178_v60, %v5109_v11 }
0x1a26   : > { %v5118_v46 = vsel %vm5115_vm2, %v5117_v34, %v5113_v32  ;;  %v5081_v17 = vadd.f32 %v7182_v40, %v5080_v30  ;;  %v5099_v15 = vsel %vm5098_vm15, %v7180_v36, %v5095_v58  ;;  %5127 = sbr.rel (%p6801_p5) target bundleno = 6705 (0x1a31), region = 80 }
0x1a27   : > { %v9228_v41 = vmul.f32 %v9177_v10, %v5118_v46  ;;  %v5104_v44 = vsel %vm5101_vm7, %v5103_v8, %v5099_v15 }
0x1a28   : > { %v5085_v18 = vsel %vm5084_vm8, %v7182_v40, %v5081_v17  ;;  %v9232_v37 = vmul.f32 %v9179_v53, %v5104_v44 }
0x1a29   : > { %v5090_v25 = vsel %vm5087_vm9, %v5089_v3, %v5085_v18 }
0x1a2a   : > { %v9235_v14 = vmul.f32 %v9183_v7, %v5090_v25 }
0x1a2b   : > { %5128 = vst.msk [vmem:[%s9929_s8 + $0x120] sm:$0xff] %vm528_vm5, %v9218_v16 }
0x1a2c   : > { %5129 = vst.msk [vmem:[%s9929_s8 + $0x128] sm:$0xff] %vm528_vm5, %v9213_v61 }
0x1a2d   : > { %5130 = vst.msk [vmem:[%s9929_s8 + $0x130] sm:$0xff] %vm528_vm5, %v9210_v6 }
0x1a2e   : > { %5131 = vst.msk [vmem:[%s9929_s8 + $0x138] sm:$0xff] %vm528_vm5, %v9235_v14 }
0x1a2f   : > { %5132 = vst.msk [vmem:[%s9929_s8 + $0x140] sm:$0xff] %vm528_vm5, %v9232_v37 }
0x1a30   : > { %5133 = vst.msk [vmem:[%s9929_s8 + $0x148] sm:$0xff] %vm528_vm5, %v9228_v41 }
0x1a31 PF: > { %v10025_v10 = vld [vmem:[#allocation17_spill] sm:$0xff]  ;;  %v10026_v53 = vld [vmem:[#allocation15_spill] sm:$0xff]  ;;  %v10029_v52 = vld [vmem:[#allocation28_spill] sm:$0xff] }
0x1a32   : > { %v7183_v7 = vpack.i.bf16 %v10026_v53, %v10025_v10  ;;  %v10027_v56 = vld [vmem:[#allocation27_spill] sm:$0xff]  ;;  %v10028_v60 = vld [vmem:[#allocation29_spill] sm:$0xff]  ;;  %v10030_v5 = vld [vmem:[#allocation30_spill] sm:$0xff] }
0x1a33   : > { %5136 = vrot.lane.b32.xlu1 %v10027_v56, %s7277_s25  ;;  %5140 = vrot.lane.b32.xlu2 %v10028_v60, %s7277_s25  ;;  %v10031_v49 = vld [vmem:[#allocation26_spill] sm:$0xff]  ;;  %v10032_v33 = vld [vmem:[#allocation31_spill] sm:$0xff] }
0x1a34   : > { %7184 = vrot.lane.b32.xlu0 %v7183_v7, %s7277_s25 }
0x1a3b   : > { %5138 = vrot.lane.b32.xlu1 %v10029_v52, %s7277_s25  ;;  %5142 = vrot.lane.b32.xlu2 %v10030_v5, %s7277_s25 }
0x1a3c   : > { %5134 = vrot.lane.b32.xlu0 %v10031_v49, %s7277_s25 }
0x1a44   : > { %5144 = vrot.lane.b32.xlu0 %v10032_v33, %s7277_s25 }
0x1a8d   : > { %v5141_v13 = vpop.permute.xlu2 %5140 }
0x1a95   : > { %v5143_v39 = vpop.permute.xlu2 %5142 }
0x1aa5   : > { %v5137_v21 = vpop.permute.xlu1 %5136 }
0x1aa6   : > { %v7185_v48 = vpop.permute.xlu0 %7184 }
0x1aa7   : > { %v7186_v36 = vunpack.i.l.bf16 %v7185_v48  ;;  %v7187_v38 = vunpack.i.h.bf16 %v7185_v48 }
0x1aa9   : > { %5178 = vmatpush.msrb.mxu2 %v7186_v36 }
0x1aab   : > { %5179 = vmatpush.msrb.mxu2 %v7187_v38 }
0x1aad   : > { %v5139_v43 = vpop.permute.xlu1 %5138 }
0x1aae   : > { %v5135_v9 = vpop.permute.xlu0 %5134 }
0x1aaf   : > { %6852 = vmatmul.msk.f32.vlgmr.msrb.gmra.mxu2 %vm1178_vm3, %v5135_v9 }
0x1ab6   : > { %v5145_v4 = vpop.permute.xlu0 %5144 }
0x1ab7   : > { %6853 = vmatmul.msk.f32.gmra.mxu2 %vm1178_vm3, %v5137_v21 }
0x1abf   : > { %6854 = vmatmul.msk.f32.gmra.mxu2 %vm1178_vm3, %v5139_v43 }
0x1ac7   : > { %6855 = vmatmul.msk.f32.gmra.mxu2 %vm1178_vm3, %v5141_v13 }
0x1acf   : > { %6856 = vmatmul.msk.f32.gmra.mxu2 %vm1178_vm3, %v5143_v39 }
0x1ad7   : > { %6857 = vmatmul.msk.f32.gmra.mxu2 %vm1178_vm3, %v5145_v4 }
0x1b32   : > { %v5181_v40 = vpop.f32.mrf.mxu2 }
0x1b33   : > { %v9292_v29 = vmul.f32 0.14433756, %v5181_v40 }
0x1b35   : > { %v5244_v51 = vmul.f32 0.0, %v9292_v29  ;;  %v5211_v8 = vsel %vm528_vm5, %v9292_v29, 0.0 }
0x1b37   : > { %v5250_v32 = vsel %vm528_vm5, %v5244_v51, 0.0 }
0x1b3a   : > { %v5184_v23 = vpop.f32.mrf.mxu2 }
0x1b3b   : > { %v9290_v47 = vmul.f32 0.14433756, %v5184_v23 }
0x1b3d   : > { %v5206_v11 = vmul.f32 0.0, %v9290_v47  ;;  %v5251_v30 = vsel %vm528_vm5, %v9290_v47, 0.0 }
0x1b3e   : > { %v5252_v18 = vadd.f32 %v5251_v30, %v5250_v32 }
0x1b3f   : > { %v5212_v50 = vsel %vm528_vm5, %v5206_v11, 0.0 }
0x1b40   : > { %v5291_v58 = vadd.f32 %v5250_v32, %v5212_v50  ;;  %v5213_v44 = vadd.f32 %v5212_v50, %v5211_v8 }
0x1b42   : > { %v5187_v57 = vpop.f32.mrf.mxu2 }
0x1b43   : > { %v9294_v12 = vmul.f32 0.14433756, %v5187_v57 }
0x1b45   : > { %v5207_v19 = vmul.f32 0.0, %v9294_v12  ;;  %v5253_v17 = vsel %vm528_vm5, %v9294_v12, 0.0 }
0x1b46   : > { %v5254_v56 = vadd.f32 %v5253_v17, %v5252_v18 }
0x1b47   : > { %v5214_v42 = vsel %vm528_vm5, %v5207_v19, 0.0 }
0x1b48   : > { %v5293_v25 = vadd.f32 %v5291_v58, %v5214_v42  ;;  %v5215_v7 = vadd.f32 %v5214_v42, %v5213_v44 }
0x1b4a   : > { %v5190_v24 = vpop.f32.mrf.mxu2 }
0x1b4b   : > { %v9299_v55 = vmul.f32 0.14433756, %v5190_v24 }
0x1b4d   : > { %v5208_v46 = vmul.f32 0.0, %v9299_v55  ;;  %v5294_v15 = vsel %vm528_vm5, %v9299_v55, 0.0 }
0x1b4e   : > { %v5295_v60 = vadd.f32 %v5294_v15, %v5293_v25 }
0x1b4f   : > { %v5216_v10 = vsel %vm528_vm5, %v5208_v46, 0.0 }
0x1b50   : > { %v5217_v33 = vadd.f32 %v5216_v10, %v5215_v7  ;;  %v5256_v48 = vadd.f32 %v5254_v56, %v5216_v10 }
0x1b52   : > { %v5193_v34 = vpop.f32.mrf.mxu2 }
0x1b53   : > { %v9302_v45 = vmul.f32 0.14433756, %v5193_v34 }
0x1b55   : > { %v5209_v3 = vmul.f32 0.0, %v9302_v45  ;;  %v5296_v53 = vsel %vm528_vm5, %v9302_v45, 0.0 }
0x1b56   : > { %v5297_v36 = vadd.f32 %v5296_v53, %v5295_v60 }
0x1b57   : > { %v5218_v5 = vsel %vm528_vm5, %v5209_v3, 0.0 }
0x1b58   : > { %v5219_v21 = vadd.f32 %v5218_v5, %v5217_v33  ;;  %v5258_v43 = vadd.f32 %v5256_v48, %v5218_v5 }
0x1b5a   : > { %v5196_v52 = vpop.f32.mrf.mxu2 }
0x1b5b   : > { %v5204_v49 = vmul.f32 0.14433756, %v5196_v52 }
0x1b5d   : > { %v5210_v38 = vmul.f32 0.0, %v5204_v49  ;;  %v5298_v9 = vsel %vm528_vm5, %v5204_v49, 0.0 }
0x1b5e   : > { %v5299_v13 = vadd.f32 %v5298_v9, %v5297_v36 }
0x1b5f   : > { %v5220_v39 = vsel %vm528_vm5, %v5210_v38, 0.0 }
0x1b60   : > { %v5221_v4 = vadd.f32 %v5220_v39, %v5219_v21  ;;  %v5260_v40 = vadd.f32 %v5258_v43, %v5220_v39  ;;  %v5300_v23 = vrot.slane %v5299_v13, 4 }
0x1b62   : > { %v5301_v57 = vadd.f32 %v5300_v23, %v5299_v13  ;;  %v5261_v24 = vrot.slane %v5260_v40, 4  ;;  %v5222_v11 = vrot.slane %v5221_v4, 4 }
0x1b64   : > { %v5302_v51 = vrot.slane %v5301_v57, 2  ;;  %v5262_v19 = vadd.f32 %v5261_v24, %v5260_v40  ;;  %v5223_v34 = vadd.f32 %v5222_v11, %v5221_v4 }
0x1b66   : > { %v5303_v50 = vadd.f32 %v5302_v51, %v5301_v57  ;;  %v5263_v32 = vrot.slane %v5262_v19, 2  ;;  %v5224_v30 = vrot.slane %v5223_v34, 2 }
0x1b68   : > { %v5304_v42 = vrot.slane %v5303_v50, 1  ;;  %v5264_v46 = vadd.f32 %v5263_v32, %v5262_v19  ;;  %v5225_v58 = vadd.f32 %v5224_v30, %v5223_v34 }
0x1b6a   : > { %v5305_v8 = vadd.f32 %v5304_v42, %v5303_v50  ;;  %v5265_v17 = vrot.slane %v5264_v46, 1  ;;  %v5226_v15 = vrot.slane %v5225_v58, 1 }
0x1b6c   : > { %v5306_v3 = vsel %vm528_vm5, %v5305_v8, 0.0  ;;  %v5266_v44 = vadd.f32 %v5265_v17, %v5264_v46  ;;  %v5227_v18 = vadd.f32 %v5226_v15, %v5225_v58 }
0x1b6d   : > { %5307 = vadd.xlane.f32.xlu0 %v5306_v3 }
0x1b6e   : > { %v5267_v25 = vsel %vm528_vm5, %v5266_v44, 0.0  ;;  %v5228_v10 = vsel %vm528_vm5, %v5227_v18, 0.0 }
0x1b6f   : > { %5268 = vadd.xlane.f32.xlu2 %v5267_v25  ;;  %5229 = vadd.xlane.f32.xlu1 %v5228_v10 }
0x1be0   : > { %v5308_v53 = vpop.xlane.xlu0 %5307 }
0x1be1   : > { %v5309_v60 = vmul.f32 0.00086805556, %v5308_v53 }
0x1be2   : > { %v5269_v7 = vpop.xlane.xlu2 %5268  ;;  %v5230_v56 = vpop.xlane.xlu1 %5229 }
0x1be3   : > { %v5270_v52 = vmul.f32 0.0013020834, %v5269_v7  ;;  %v5231_v5 = vmul.f32 0.0026041667, %v5230_v56  ;;  %v5310_v36 = vmul.f32 0.0, %v5309_v60 }
0x1be5   : > { %v5271_v33 = vmul.f32 0.0, %v5270_v52  ;;  %v5233_v48 = vmul.f32 0.0, %v5231_v5 }
0x1be7   : > { %v5277_v38 = vadd.f32 %v5271_v33, %v5231_v5  ;;  %v5278_v9 = vadd.f32 %v5270_v52, %v5233_v48  ;;  %v5280_v21 = vadd.f32 %v5271_v33, %v5233_v48 }
0x1be9   : > { %v5316_v43 = vadd.f32 %v5310_v36, %v5277_v38  ;;  %v5317_v13 = vadd.f32 %v5310_v36, %v5278_v9  ;;  %v5319_v39 = vadd.f32 %v5309_v60, %v5280_v21 }
0x1beb   : > { %v9326_v4 = vsub.f32 %v9292_v29, %v5316_v43  ;;  %v9329_v40 = vsub.f32 %v9290_v47, %v5317_v13  ;;  %v9332_v23 = vsub.f32 %v9294_v12, %v5317_v13  ;;  %v9335_v57 = vsub.f32 %v9299_v55, %v5319_v39 }
0x1bec   : > { %v9338_v24 = vsub.f32 %v9302_v45, %v5319_v39  ;;  %v9340_v11 = vsub.f32 %v5204_v49, %v5319_v39 }
0x1bed   : > { %v5328_v51 = vmul.f32 %v9326_v4, %v9326_v4  ;;  %v5329_v29 = vmul.f32 %v9329_v40, %v9329_v40  ;;  %v5330_v47 = vmul.f32 %v9332_v23, %v9332_v23  ;;  %v5331_v12 = vmul.f32 %v9335_v57, %v9335_v57 }
0x1bee   : > { %v5332_v45 = vmul.f32 %v9338_v24, %v9338_v24  ;;  %v5333_v50 = vmul.f32 %v9340_v11, %v9340_v11 }
0x1bef   : > { %v5335_v19 = vmul.f32 0.0, %v5329_v29  ;;  %v5336_v55 = vmul.f32 0.0, %v5330_v47  ;;  %v5373_v34 = vmul.f32 0.0, %v5328_v51  ;;  %v5340_v49 = vsel %vm528_vm5, %v5328_v51, 0.0 }
0x1bf0   : > { %v5380_v42 = vsel %vm528_vm5, %v5329_v29, 0.0  ;;  %v5337_v46 = vmul.f32 0.0, %v5331_v12  ;;  %v5382_v3 = vsel %vm528_vm5, %v5330_v47, 0.0  ;;  %v5338_v44 = vmul.f32 0.0, %v5332_v45 }
0x1bf1   : > { %v5341_v32 = vsel %vm528_vm5, %v5335_v19, 0.0  ;;  %v5379_v30 = vsel %vm528_vm5, %v5373_v34, 0.0  ;;  %v5343_v15 = vsel %vm528_vm5, %v5336_v55, 0.0  ;;  %v5339_v53 = vmul.f32 0.0, %v5333_v50 }
0x1bf2   : > { %v5342_v58 = vadd.f32 %v5341_v32, %v5340_v49  ;;  %v5381_v8 = vadd.f32 %v5380_v42, %v5379_v30  ;;  %v5420_v17 = vadd.f32 %v5379_v30, %v5341_v32  ;;  %v5345_v7 = vsel %vm528_vm5, %v5337_v46, 0.0 }
0x1bf3   : > { %v5423_v56 = vsel %vm528_vm5, %v5331_v12, 0.0  ;;  %v5347_v33 = vsel %vm528_vm5, %v5338_v44, 0.0  ;;  %v5425_v48 = vsel %vm528_vm5, %v5332_v45, 0.0  ;;  %v5349_v21 = vsel %vm528_vm5, %v5339_v53, 0.0 }
0x1bf4   : > { %v5383_v18 = vadd.f32 %v5382_v3, %v5381_v8  ;;  %v5344_v25 = vadd.f32 %v5343_v15, %v5342_v58  ;;  %v5422_v10 = vadd.f32 %v5420_v17, %v5343_v15  ;;  %v5427_v43 = vsel %vm528_vm5, %v5333_v50, 0.0 }
0x1bf6   : > { %v5385_v60 = vadd.f32 %v5383_v18, %v5345_v7  ;;  %v5346_v52 = vadd.f32 %v5345_v7, %v5344_v25  ;;  %v5424_v5 = vadd.f32 %v5423_v56, %v5422_v10 }
0x1bf8   : > { %v5387_v36 = vadd.f32 %v5385_v60, %v5347_v33  ;;  %v5348_v38 = vadd.f32 %v5347_v33, %v5346_v52  ;;  %v5426_v9 = vadd.f32 %v5425_v48, %v5424_v5 }
0x1bfa   : > { %v5389_v13 = vadd.f32 %v5387_v36, %v5349_v21  ;;  %v5350_v39 = vadd.f32 %v5349_v21, %v5348_v38  ;;  %v5428_v51 = vadd.f32 %v5427_v43, %v5426_v9 }
0x1bfc   : > { %v5390_v29 = vrot.slane %v5389_v13, 4  ;;  %v5351_v47 = vrot.slane %v5350_v39, 4  ;;  %v5429_v12 = vrot.slane %v5428_v51, 4 }
0x1bfe   : > { %v5391_v19 = vadd.f32 %v5390_v29, %v5389_v13  ;;  %v5352_v55 = vadd.f32 %v5351_v47, %v5350_v39  ;;  %v5430_v34 = vadd.f32 %v5429_v12, %v5428_v51 }
0x1c00   : > { %v5392_v49 = vrot.slane %v5391_v19, 2  ;;  %v5353_v32 = vrot.slane %v5352_v55, 2  ;;  %v5431_v30 = vrot.slane %v5430_v34, 2 }
0x1c02   : > { %v5393_v45 = vadd.f32 %v5392_v49, %v5391_v19  ;;  %v5354_v42 = vadd.f32 %v5353_v32, %v5352_v55  ;;  %v5432_v8 = vadd.f32 %v5431_v30, %v5430_v34 }
0x1c04   : > { %v5394_v46 = vrot.slane %v5393_v45, 1  ;;  %v5355_v58 = vrot.slane %v5354_v42, 1  ;;  %v5433_v44 = vrot.slane %v5432_v8, 1 }
0x1c06   : > { %v5395_v17 = vadd.f32 %v5394_v46, %v5393_v45  ;;  %v5356_v15 = vadd.f32 %v5355_v58, %v5354_v42  ;;  %v5434_v18 = vadd.f32 %v5433_v44, %v5432_v8 }
0x1c08   : > { %v5396_v50 = vsel %vm528_vm5, %v5395_v17, 0.0  ;;  %v5357_v3 = vsel %vm528_vm5, %v5356_v15, 0.0  ;;  %v5435_v25 = vsel %vm528_vm5, %v5434_v18, 0.0 }
0x1c09   : > { %5397 = vadd.xlane.f32.xlu1 %v5396_v50  ;;  %5358 = vadd.xlane.f32.xlu2 %v5357_v3 }
0x1c11   : > { %5436 = vadd.xlane.f32.xlu2 %v5435_v25 }
0x1c7c   : > { %v5398_v10 = vpop.xlane.xlu1 %5397  ;;  %v5359_v53 = vpop.xlane.xlu2 %5358 }
0x1c7d   : > { %v5399_v7 = vmul.f32 0.0013020834, %v5398_v10  ;;  %v5360_v56 = vmul.f32 0.0026041667, %v5359_v53 }
0x1c7f   : > { %v5400_v60 = vmul.f32 0.0, %v5399_v7  ;;  %v5362_v52 = vmul.f32 0.0, %v5360_v56 }
0x1c81   : > { %v5409_v33 = vadd.f32 %v5400_v60, %v5362_v52  ;;  %v5406_v36 = vadd.f32 %v5400_v60, %v5360_v56  ;;  %v5407_v38 = vadd.f32 %v5399_v7, %v5362_v52 }
0x1c84   : > { %v5437_v5 = vpop.xlane.xlu2 %5436 }
0x1c85   : > { %v5438_v48 = vmul.f32 0.00086805556, %v5437_v5 }
0x1c87   : > { %v5439_v9 = vmul.f32 0.0, %v5438_v48  ;;  %v5448_v21 = vadd.f32 %v5438_v48, %v5409_v33 }
0x1c89   : > { %v5445_v43 = vadd.f32 %v5439_v9, %v5406_v36  ;;  %v5446_v13 = vadd.f32 %v5439_v9, %v5407_v38  ;;  %v5454_v39 = vadd.f32 1e-05, %v5448_v21 }
0x1c8b   : > { %v5451_v51 = vadd.f32 1e-05, %v5445_v43  ;;  %v5452_v29 = vadd.f32 1e-05, %v5446_v13  ;;  %7188 = vrsqrt.f32 %v5454_v39  ;;  %vm5493_vm0 = vweird.f32 %v5454_v39 }
0x1c8d   : > { %7190 = vrsqrt.f32 %v5451_v51  ;;  %vm5463_vm12 = vweird.f32 %v5451_v51  ;;  %vm5473_vm13 = vweird.f32 %v5452_v29 }
0x1c8e   : > { %7192 = vrsqrt.f32 %v5452_v29 }
0x1c91   : > { %v7189_v47 = vpop.eup %7188 }
0x1c92   : > { %v5488_v12 = vmul.f32 %v7189_v47, %v5454_v39  ;;  %vm5494_vm14 = vweird.f32 %v7189_v47 }
0x1c93   : > { %v7191_v19 = vpop.eup %7190  ;;  %vm5495_vm4 = vmor %vm5493_vm0, %vm5494_vm14 }
0x1c94   : > { %v7193_v55 = vpop.eup %7192  ;;  %v5458_v34 = vmul.f32 %v7191_v19, %v5451_v51  ;;  %v5489_v49 = vmul.f32 %v7189_v47, %v5488_v12  ;;  %vm5464_vm10 = vweird.f32 %v7191_v19 }
0x1c95   : > { %v5468_v32 = vmul.f32 %v7193_v55, %v5452_v29  ;;  %vm5474_vm11 = vweird.f32 %v7193_v55  ;;  %vm5465_vm2 = vmor %vm5463_vm12, %vm5464_vm10 }
0x1c96   : > { %v5490_v30 = vmul.f32 0.5, %v5489_v49  ;;  %v5459_v45 = vmul.f32 %v7191_v19, %v5458_v34  ;;  %vm5475_vm1 = vmor %vm5473_vm13, %vm5474_vm11 }
0x1c97   : > { %v5469_v42 = vmul.f32 %v7193_v55, %v5468_v32 }
0x1c98   : > { %v5460_v46 = vmul.f32 0.5, %v5459_v45  ;;  %v5491_v8 = vsub.f32 1.5, %v5490_v30 }
0x1c99   : > { %v5470_v58 = vmul.f32 0.5, %v5469_v42 }
0x1c9a   : > { %v5461_v17 = vsub.f32 1.5, %v5460_v46  ;;  %v5492_v18 = vmul.f32 %v7189_v47, %v5491_v8 }
0x1c9b   : > { %v5471_v15 = vsub.f32 1.5, %v5470_v58 }
0x1c9c   : > { %v5462_v50 = vmul.f32 %v7191_v19, %v5461_v17  ;;  %v5496_v5 = vsel %vm5495_vm4, %v7189_v47, %v5492_v18 }
0x1c9d   : > { %v5472_v3 = vmul.f32 %v7193_v55, %v5471_v15  ;;  %v5520_v33 = vmul.f32 %v5496_v5, %v9335_v57  ;;  %v5521_v48 = vmul.f32 %v5496_v5, %v9338_v24 }
0x1c9e   : > { %v5466_v44 = vsel %vm5465_vm2, %v7191_v19, %v5462_v50 }
0x1c9f   : > { %v5476_v25 = vsel %vm5475_vm1, %v7193_v55, %v5472_v3  ;;  %v5517_v10 = vmul.f32 %v5466_v44, %v9326_v4  ;;  %v5522_v4 = vmul.f32 %v5496_v5, %v9340_v11  ;;  %v5535_v36 = vsel %vm528_vm5, %v5521_v48, -inf }
0x1ca0   : > { %v5519_v53 = vmul.f32 %v5476_v25, %v9332_v23  ;;  %v5518_v7 = vmul.f32 %v5476_v25, %v9329_v40  ;;  %v5532_v23 = vsel %vm528_vm5, %v5520_v33, -inf }
0x1ca1   : > { %v5523_v56 = vsel %vm528_vm5, %v5517_v10, -inf  ;;  %v5538_v40 = vsel %vm528_vm5, %v5522_v4, -inf }
0x1ca2   : > { %v5529_v60 = vsel %vm528_vm5, %v5519_v53, -inf  ;;  %v5526_v52 = vsel %vm528_vm5, %v5518_v7, -inf  ;;  %5524 = vmax.xlane.f32.xlu0 %v5523_v56 }
0x1ca3   : > { %5530 = vmax.xlane.f32.xlu2 %v5529_v60  ;;  %5527 = vmax.xlane.f32.xlu1 %v5526_v52 }
0x1caa   : > { %5533 = vmax.xlane.f32.xlu0 %v5532_v23 }
0x1cab   : > { %5539 = vmax.xlane.f32.xlu2 %v5538_v40  ;;  %5536 = vmax.xlane.f32.xlu1 %v5535_v36 }
0x1d15   : > { %v5525_v38 = vpop.xlane.xlu0 %5524 }
0x1d16   : > { %v5531_v9 = vpop.xlane.xlu2 %5530  ;;  %v5528_v21 = vpop.xlane.xlu1 %5527  ;;  %v5541_v43 = vsub.f32 %v5517_v10, %v5525_v38 }
0x1d17   : > { %v5543_v13 = vsub.f32 %v5519_v53, %v5531_v9  ;;  %v5542_v39 = vsub.f32 %v5518_v7, %v5528_v21 }
0x1d18   : > { %v5547_v57 = vmul.f32 1.442695, %v5541_v43 }
0x1d19   : > { %v5551_v51 = vmul.f32 1.442695, %v5543_v13  ;;  %v5549_v11 = vmul.f32 1.442695, %v5542_v39 }
0x1d1a   : > { %7194 = vpow2.f32 %v5547_v57 }
0x1d1b   : > { %7196 = vpow2.f32 %v5551_v51 }
0x1d1c   : > { %7198 = vpow2.f32 %v5549_v11 }
0x1d1d   : > { %v5534_v24 = vpop.xlane.xlu0 %5533 }
0x1d1e   : > { %v5540_v29 = vpop.xlane.xlu2 %5539  ;;  %v5537_v47 = vpop.xlane.xlu1 %5536  ;;  %v5544_v12 = vsub.f32 %v5520_v33, %v5534_v24 }
0x1d1f   : > { %v5546_v19 = vsub.f32 %v5522_v4, %v5540_v29  ;;  %v5545_v55 = vsub.f32 %v5521_v48, %v5537_v47 }
0x1d20   : > { %v9381_v34 = vpop.eup %7194  ;;  %v5553_v49 = vmul.f32 1.442695, %v5544_v12 }
0x1d21   : > { %v9383_v32 = vpop.eup %7196  ;;  %v5557_v30 = vmul.f32 1.442695, %v5546_v19  ;;  %v5555_v45 = vmul.f32 1.442695, %v5545_v55  ;;  %v5559_v42 = vsel %vm528_vm5, %v9381_v34, 0.0 }
0x1d22   : > { %v9387_v46 = vpop.eup %7198  ;;  %7200 = vpow2.f32 %v5553_v49  ;;  %v5565_v58 = vsel %vm528_vm5, %v9383_v32, 0.0  ;;  %5560 = vadd.xlane.f32.xlu0 %v5559_v42 }
0x1d23   : > { %7202 = vpow2.f32 %v5557_v30  ;;  %5566 = vadd.xlane.f32.xlu2 %v5565_v58  ;;  %v5562_v8 = vsel %vm528_vm5, %v9387_v46, 0.0 }
0x1d24   : > { %7204 = vpow2.f32 %v5555_v45  ;;  %5563 = vadd.xlane.f32.xlu1 %v5562_v8 }
0x1d28   : > { %v9393_v17 = vpop.eup %7200 }
0x1d29   : > { %v9395_v15 = vpop.eup %7202  ;;  %v5568_v50 = vsel %vm528_vm5, %v9393_v17, 0.0 }
0x1d2a   : > { %v9399_v3 = vpop.eup %7204  ;;  %v5574_v44 = vsel %vm528_vm5, %v9395_v15, 0.0  ;;  %5569 = vadd.xlane.f32.xlu0 %v5568_v50 }
0x1d2b   : > { %5575 = vadd.xlane.f32.xlu2 %v5574_v44  ;;  %v5571_v18 = vsel %vm528_vm5, %v9399_v3, 0.0 }
0x1d2c   : > { %5572 = vadd.xlane.f32.xlu1 %v5571_v18 }
0x1d95   : > { %v5561_v25 = vpop.xlane.xlu0 %5560 }
0x1d96   : > { %v5567_v10 = vpop.xlane.xlu2 %5566  ;;  %7206 = vrcp.f32 %v5561_v25  ;;  %vm5582_vm15 = vweird.f32 %v5561_v25  ;;  %v5586_v5 = vand.u32 2147483647, %v5561_v25  ;;  %v5588_v33 = vand.u32 2147483648, %v5561_v25 }
0x1d97   : > { %7208 = vrcp.f32 %v5567_v10  ;;  %v5564_v53 = vpop.xlane.xlu1 %5563  ;;  %v5614_v56 = vand.u32 2147483647, %v5567_v10  ;;  %vm5610_vm6 = vweird.f32 %v5567_v10  ;;  %v5616_v40 = vand.u32 2147483648, %v5567_v10 }
0x1d98   : > { %7210 = vrcp.f32 %v5564_v53  ;;  %vm5596_vm7 = vweird.f32 %v5564_v53  ;;  %v5600_v39 = vand.u32 2147483647, %v5564_v53  ;;  %v5602_v57 = vand.u32 2147483648, %v5564_v53 }
0x1d99   : > { %vm9413_vm8 = vcmp.eq.f32.partialorder %v5614_v56, 8.507059e+37  ;;  %v5617_v29 = vor.u32 1.1754944e-38, %v5616_v40  ;;  %vm9418_vm11 = vcmp.eq.f32.partialorder %v5586_v5, 8.507059e+37  ;;  %v5589_v55 = vor.u32 1.1754944e-38, %v5588_v33 }
0x1d9a   : > { %vm9422_vm13 = vcmp.eq.f32.partialorder %v5600_v39, 8.507059e+37  ;;  %v5603_v42 = vor.u32 1.1754944e-38, %v5602_v57 }
0x1d9c   : > { %v7207_v7 = vpop.eup %7206 }
0x1d9d   : > { %v7209_v60 = vpop.eup %7208  ;;  %v5578_v52 = vmul.f32 %v7207_v7, %v5561_v25  ;;  %v9405_v4 = vpop.xlane.xlu0 %5569  ;;  %vm5583_vm9 = vweird.f32 %v7207_v7 }
0x1d9e   : > { %v7211_v48 = vpop.eup %7210  ;;  %v5606_v23 = vmul.f32 %v7209_v60, %v5567_v10  ;;  %v9407_v36 = vpop.xlane.xlu2 %5575  ;;  %7212 = vrcp.f32 %v9405_v4  ;;  %vm5611_vm10 = vweird.f32 %v7209_v60  ;;  %vm5584_vm2 = vmor %vm5582_vm15, %vm5583_vm9  ;;  %vm5624_vm1 = vweird.f32 %v9405_v4 }
0x1d9f   : > { %v5592_v38 = vmul.f32 %v7211_v48, %v5564_v53  ;;  %v5579_v9 = vsub.f32 1.0, %v5578_v52  ;;  %7214 = vrcp.f32 %v9407_v36  ;;  %v9411_v21 = vpop.xlane.xlu1 %5572  ;;  %vm5597_vm12 = vweird.f32 %v7211_v48  ;;  %vm5612_vm14 = vmor %vm5610_vm6, %vm5611_vm10 }
0x1da0   : > { %v5607_v43 = vsub.f32 1.0, %v5606_v23  ;;  %7216 = vrcp.f32 %v9411_v21  ;;  %v5658_v44 = vand.u32 2147483648, %v9407_v36  ;;  %vm5598_vm0 = vmor %vm5596_vm7, %vm5597_vm12  ;;  %v5630_v5 = vand.u32 2147483648, %v9405_v4 }
0x1da1   : > { %v5593_v51 = vsub.f32 1.0, %v5592_v38  ;;  %v5580_v11 = vmul.f32 %v7207_v7, %v5579_v9  ;;  %v5628_v13 = vand.u32 2147483647, %v9405_v4  ;;  %vm5652_vm6 = vweird.f32 %v9407_v36 }
0x1da2   : > { %v5608_v24 = vmul.f32 %v7209_v60, %v5607_v43  ;;  %v5659_v47 = vor.u32 1.1754944e-38, %v5658_v44  ;;  %vm5638_vm10 = vweird.f32 %v9411_v21 }
0x1da3   : > { %v5594_v12 = vmul.f32 %v7211_v48, %v5593_v51  ;;  %v5581_v19 = vadd.f32 %v7207_v7, %v5580_v11  ;;  %v5644_v51 = vand.u32 2147483648, %v9411_v21 }
0x1da4   : > { %v7213_v49 = vpop.eup %7212  ;;  %v5609_v30 = vadd.f32 %v7209_v60, %v5608_v24 }
0x1da5   : > { %v7215_v58 = vpop.eup %7214  ;;  %v5595_v8 = vadd.f32 %v7211_v48, %v5594_v12  ;;  %v5585_v50 = vsel %vm5584_vm2, %v7207_v7, %v5581_v19  ;;  %v5620_v18 = vmul.f32 %v7213_v49, %v9405_v4  ;;  %vm5625_vm4 = vweird.f32 %v7213_v49 }
0x1da6   : > { %v5613_v56 = vsel %vm5612_vm14, %v7209_v60, %v5609_v30  ;;  %v5590_v52 = vsel %vm9418_vm11, %v5589_v55, %v5585_v50  ;;  %v5648_v25 = vmul.f32 %v7215_v58, %v9407_v36  ;;  %v7217_v33 = vpop.eup %7216  ;;  %vm5653_vm15 = vweird.f32 %v7215_v58 }
0x1da7   : > { %v5618_v10 = vsel %vm9413_vm8, %v5617_v29, %v5613_v56  ;;  %v5599_v7 = vsel %vm5598_vm0, %v7211_v48, %v5595_v8  ;;  %v9440_v23 = vmul.f32 %v9381_v34, %v5590_v52  ;;  %v5621_v40 = vsub.f32 1.0, %v5620_v18  ;;  %vm5626_vm8 = vmor %vm5624_vm1, %vm5625_vm4 }
0x1da8   : > { %v5663_v60 = vmul.f32 %v9383_v32, %v5618_v10  ;;  %v5604_v53 = vsel %vm9422_vm13, %v5603_v42, %v5599_v7  ;;  %v5649_v38 = vsub.f32 1.0, %v5648_v25  ;;  %v5634_v9 = vmul.f32 %v7217_v33, %v9411_v21  ;;  %vm5654_vm9 = vmor %vm5652_vm6, %vm5653_vm15 }
0x1da9   : > { %v5662_v43 = vmul.f32 %v9387_v46, %v5604_v53  ;;  %v5622_v39 = vmul.f32 %v7213_v49, %v5621_v40  ;;  %v5656_v34 = vand.u32 2147483647, %v9407_v36  ;;  %v5642_v32 = vand.u32 2147483647, %v9411_v21 }
0x1daa   : > { %v5650_v57 = vmul.f32 %v7215_v58, %v5649_v38  ;;  %v5635_v48 = vsub.f32 1.0, %v5634_v9  ;;  %vm5639_vm7 = vweird.f32 %v7217_v33  ;;  %v5631_v46 = vor.u32 1.1754944e-38, %v5630_v5 }
0x1dab   : > { %v5623_v11 = vadd.f32 %v7213_v49, %v5622_v39  ;;  %vm5629_vm11 = vcmp.eq.f32.partialorder %v5628_v13, 8.507059e+37  ;;  %vm5657_vm12 = vcmp.eq.f32.partialorder %v5656_v34, 8.507059e+37  ;;  %vm5640_vm13 = vmor %vm5638_vm10, %vm5639_vm7  ;;  %v5645_v45 = vor.u32 1.1754944e-38, %v5644_v51 }
0x1dac   : > { %v5651_v24 = vadd.f32 %v7215_v58, %v5650_v57  ;;  %v5636_v29 = vmul.f32 %v7217_v33, %v5635_v48  ;;  %vm5643_vm2 = vcmp.eq.f32.partialorder %v5642_v32, 8.507059e+37 }
0x1dad   : > { %v5627_v12 = vsel %vm5626_vm8, %v7213_v49, %v5623_v11 }
0x1dae   : > { %v5655_v19 = vsel %vm5654_vm9, %v7215_v58, %v5651_v24  ;;  %v5637_v36 = vadd.f32 %v7217_v33, %v5636_v29  ;;  %v5632_v55 = vsel %vm5629_vm11, %v5631_v46, %v5627_v12  ;;  %5669 = sbr.rel (%p6801_p5) target bundleno = 7609 (0x1db9), region = 84 }
0x1daf   : > { %v5660_v30 = vsel %vm5657_vm12, %v5659_v47, %v5655_v19  ;;  %v5664_v42 = vmul.f32 %v9393_v17, %v5632_v55 }
0x1db0   : > { %v5666_v8 = vmul.f32 %v9395_v15, %v5660_v30  ;;  %v5641_v4 = vsel %vm5640_vm13, %v7217_v33, %v5637_v36 }
0x1db1   : > { %v5646_v50 = vsel %vm5643_vm2, %v5645_v45, %v5641_v4 }
0x1db2   : > { %v5665_v44 = vmul.f32 %v9399_v3, %v5646_v50 }
0x1db3   : > { %5670 = vst.msk [vmem:[%s9929_s8 + $0x150] sm:$0xff] %vm528_vm5, %v9440_v23 }
0x1db4   : > { %5671 = vst.msk [vmem:[%s9929_s8 + $0x158] sm:$0xff] %vm528_vm5, %v5662_v43 }
0x1db5   : > { %5672 = vst.msk [vmem:[%s9929_s8 + $0x160] sm:$0xff] %vm528_vm5, %v5663_v60 }
0x1db6   : > { %5673 = vst.msk [vmem:[%s9929_s8 + $0x168] sm:$0xff] %vm528_vm5, %v5664_v42 }
0x1db7   : > { %5674 = vst.msk [vmem:[%s9929_s8 + $0x170] sm:$0xff] %vm528_vm5, %v5665_v44 }
0x1db8   : > { %5675 = vst.msk [vmem:[%s9929_s8 + $0x178] sm:$0xff] %vm528_vm5, %v5666_v8 }
0x1db9 PF: > { %5714 = vrot.lane.b32.xlu1 %v9232_v37, %s7279_s23  ;;  %v7218_v17 = vpack.i.bf16 %v9014_v63, %v9011_v1  ;;  %5712 = vrot.lane.b32.xlu2 %v9235_v14, %s7279_s23  ;;  %v7223_v15 = vpack.i.bf16 %v8991_v22, %v9008_v27  ;;  %v7228_v1 = vpack.i.bf16 %v8988_v28, %v8997_v62  ;;  %v10039_v22 = vld [vmem:[#allocation15_spill] sm:$0xff]  ;;  %v10040_v28 = vld [vmem:[#allocation16_spill] sm:$0xff]  ;;  %v10041_v62 = vld [vmem:[#allocation18_spill] sm:$0xff]  ;;  %vm10043_vm1 = vcmask 785408   ;;  %p6879_p6 = scmp.ne.s32.totalorder %s7334_s28, 3 }
0x1dba   : > { %v10042_v27 = vld [vmem:[#allocation17_spill] sm:$0xff]  ;;  %v5855_v63 = vld [vmem:[%s7358_s24 + $0x28] sm:$0xff]  ;;  %v5850_v21 = vld [vmem:[%s7358_s24] sm:$0xff]  ;;  %vm10049_vm7 = vcmask 523264  }
0x1dbb   : > { %7219 = vrot.lane.b32.xlu0 %v7218_v17, %s7280_s26  ;;  %5878 = vmatpush.msra.mxu1 %v5855_v63  ;;  %v5851_v14 = vld [vmem:[%s7358_s24 + $0x8] sm:$0xff]  ;;  %vm10044_vm14 = vmmov %vm10043_vm1  ;;  %v10060_v4 = vld [vmem:[#allocation6_spill] sm:$0xff] }
0x1dbc   : > { %vm10045_vm0 = vmmov %vm10043_vm1  ;;  %v10061_v17 = vld [vmem:[#allocation5_spill] sm:$0xff] }
0x1dbd   : > { %vm10046_vm4 = vmmov %vm10045_vm0 }
0x1dbe   : > { %vm10047_vm15 = vmmov %vm10045_vm0 }
0x1dbf   : > { %vm10048_vm6 = vmmov %vm10045_vm0 }
0x1dc0   : > { %vm10050_vm8 = vmmov %vm10049_vm7 }
0x1dc1   : > { %7224 = vrot.lane.b32.xlu1 %v7223_v15, %s7280_s26  ;;  %5710 = vrot.lane.b32.xlu2 %v9210_v6, %s7279_s23  ;;  %vm10051_vm9 = vmmov %vm10049_vm7 }
0x1dc2   : > { %vm10052_vm10 = vmmov %vm10049_vm7 }
0x1dc3   : > { %5716 = vrot.lane.b32.xlu0 %v9228_v41, %s7279_s23  ;;  %v5852_v41 = vld [vmem:[%s7358_s24 + $0x10] sm:$0xff]  ;;  %vm10053_vm11 = vmmov %vm10049_vm7 }
0x1dc4   : > { %vm10054_vm12 = vmmov %vm10049_vm7 }
0x1dc5   : > { %vm10055_vm13 = vmmov %vm10049_vm7 }
0x1dc6   : > { %vm10056_vm2 = vmmov %vm10049_vm7 }
0x1dc9   : > { %5708 = vrot.lane.b32.xlu1 %v9213_v61, %s7279_s23  ;;  %5740 = vrot.lane.b32.xlu2 %v5666_v8, %s7278_s22  ;;  %v5854_v61 = vld [vmem:[%s7358_s24 + $0x20] sm:$0xff] }
0x1dca   : > { %5879 = vmatpush.msra.mxu1 %v5854_v61 }
0x1dcb   : > { %7229 = vrot.lane.b32.xlu0 %v7228_v1, %s7280_s26 }
0x1dd1   : > { %5738 = vrot.lane.b32.xlu1 %v5665_v44, %s7278_s22  ;;  %5768 = vrot.lane.b32.xlu2 %v10039_v22, %s7281_s10 }
0x1dd3   : > { %5706 = vrot.lane.b32.xlu0 %v9218_v16, %s7279_s23  ;;  %v5853_v16 = vld [vmem:[%s7358_s24 + $0x18] sm:$0xff] }
0x1dd4   : > { %5880 = vmatpush.msra.mxu1 %v5853_v16 }
0x1dd6   : > { %5881 = vmatpush.msra.mxu1 %v5852_v41 }
0x1dd8   : > { %5882 = vmatpush.msra.mxu1 %v5851_v14 }
0x1dd9   : > { %5736 = vrot.lane.b32.xlu1 %v5664_v42, %s7278_s22  ;;  %5734 = vrot.lane.b32.xlu2 %v5663_v60, %s7278_s22  ;;  %v10059_v42 = vld [vmem:[#allocation9_spill] sm:$0xff] }
0x1dda   : > { %5883 = vmatpush.msra.mxu1 %v5850_v21 }
0x1ddb   : > { %5770 = vrot.lane.b32.xlu0 %v10040_v28, %s7281_s10  ;;  %6867 = vmatmul.msk.f32.vlgmr.msra.gmra.mxu1 %vm528_vm5, %v8694_v2  ;;  %v10062_v28 = vld [vmem:[#allocation8_spill] sm:$0xff] }
0x1de1   : > { %5774 = vrot.lane.b32.xlu1 %v10041_v62, %s7281_s10  ;;  %5732 = vrot.lane.b32.xlu2 %v5662_v43, %s7278_s22 }
0x1de3   : > { %5772 = vrot.lane.b32.xlu0 %v10042_v27, %s7281_s10  ;;  %6868 = vmatmul.msk.f32.gmra.mxu1 %vm528_vm5, %v8706_v31  ;;  %v10063_v27 = vld [vmem:[#allocation7_spill] sm:$0xff] }
0x1deb   : > { %5730 = vrot.lane.b32.xlu0 %v9440_v23, %s7278_s22 }
0x1e13   : > { %v5713_v6 = vpop.permute.xlu2 %5712 }
0x1e1b   : > { %v5711_v49 = vpop.permute.xlu2 %5710 }
0x1e23   : > { %v5741_v7 = vpop.permute.xlu2 %5740 }
0x1e2b   : > { %v5715_v37 = vpop.permute.xlu1 %5714  ;;  %v5769_v39 = vpop.permute.xlu2 %5768 }
0x1e2d   : > { %v7220_v3 = vpop.permute.xlu0 %7219 }
0x1e2e   : > { %v7221_v58 = vunpack.i.l.bf16 %v7220_v3  ;;  %v7222_v18 = vunpack.i.h.bf16 %v7220_v3 }
0x1e30   : > { %v5753_v25 = vsel %vm528_vm5, %v8780_v0, %v7221_v58  ;;  %v5752_v10 = vsel %vm528_vm5, %v8783_v59, %v7222_v18 }
0x1e31   : > { %v5758_v2 = vsel %vm10044_vm14, %v5752_v10, %v5715_v37 }
0x1e33   : > { %v7225_v56 = vpop.permute.xlu1 %7224  ;;  %v5735_v11 = vpop.permute.xlu2 %5734 }
0x1e34   : > { %v7226_v33 = vunpack.i.l.bf16 %v7225_v56  ;;  %v7227_v23 = vunpack.i.h.bf16 %v7225_v56  ;;  %v5762_v12 = vsel %vm1178_vm3, %v5711_v49, %v5735_v11 }
0x1e35   : > { %v5717_v52 = vpop.permute.xlu0 %5716 }
0x1e36   : > { %v5759_v5 = vsel %vm10043_vm1, %v5753_v25, %v5717_v52  ;;  %v5751_v60 = vsel %vm528_vm5, %v8777_v20, %v7226_v33  ;;  %v5750_v59 = vsel %vm528_vm5, %v8760_v54, %v7227_v23  ;;  %v5765_v54 = vsel %vm1178_vm3, %v5717_v52, %v5741_v7  ;;  %vm10057_vm1 = vmmov %vm10056_vm2 }
0x1e37   : > { %5812 = vmatpush.xpose.msra.mxu3 %v5759_v5  ;;  %v5757_v53 = vsel %vm10045_vm0, %v5751_v60, %v5713_v6  ;;  %v5756_v9 = vsel %vm10046_vm4, %v5750_v59, %v5711_v49  ;;  %vm10058_vm14 = vmmov %vm10057_vm1 }
0x1e3b   : > { %v5709_v40 = vpop.permute.xlu1 %5708  ;;  %5813 = vmatpush.xpose.msra.mxu3 %v5758_v2  ;;  %v5733_v19 = vpop.permute.xlu2 %5732 }
0x1e3c   : > { %v5761_v36 = vsel %vm1178_vm3, %v5709_v40, %v5733_v19 }
0x1e3d   : > { %v7230_v0 = vpop.permute.xlu0 %7229 }
0x1e3e   : > { %v7231_v38 = vunpack.i.l.bf16 %v7230_v0  ;;  %v7232_v13 = vunpack.i.h.bf16 %v7230_v0 }
0x1e3f   : > { %5814 = vmatpush.xpose.msra.mxu3 %v5757_v53 }
0x1e40   : > { %v5749_v43 = vsel %vm528_vm5, %v8766_v26, %v7231_v38  ;;  %v5748_v34 = vsel %vm528_vm5, %v8757_v35, %v7232_v13  ;;  %v10064_v13 = vld [vmem:[#allocation4_spill] sm:$0xff] }
0x1e41   : > { %v5755_v20 = vsel %vm10047_vm15, %v5749_v43, %v5709_v40 }
0x1e43   : > { %v5739_v31 = vpop.permute.xlu1 %5738  ;;  %5815 = vmatpush.xpose.msra.mxu3 %v5756_v9 }
0x1e44   : > { %v5764_v24 = vsel %vm1178_vm3, %v5715_v37, %v5739_v31 }
0x1e45   : > { %v5707_v57 = vpop.permute.xlu0 %5706 }
0x1e46   : > { %v5754_v48 = vsel %vm10048_vm6, %v5748_v34, %v5707_v57 }
0x1e47   : > { %5816 = vmatpush.xpose.msra.mxu3 %v5755_v20 }
0x1e4b   : > { %v5737_v32 = vpop.permute.xlu1 %5736  ;;  %5817 = vmatpush.xpose.msra.mxu3 %v5754_v48 }
0x1e4c   : > { %v5763_v29 = vsel %vm1178_vm3, %v5713_v6, %v5737_v32 }
0x1e4d   : > { %v5771_v51 = vpop.permute.xlu0 %5770 }
0x1e4e   : > { %v5776_v26 = vsel %vm10050_vm8, %v5769_v39, %v5771_v51 }
0x1e4f   : > { %6859 = vmatpush.xpose.msk.msrb.mxu3 %vm10049_vm7, %v5765_v54 }
0x1e50   : > { %5818 = vmatmul.f32.vlgmr.msra.gmra.mxu3 %v5776_v26 }
0x1e53   : > { %6860 = vmatpush.xpose.msk.msrb.mxu3 %vm10051_vm9, %v5764_v24  ;;  %v5775_v35 = vpop.permute.xlu1 %5774 }
0x1e55   : > { %v5773_v46 = vpop.permute.xlu0 %5772 }
0x1e56   : > { %v5777_v47 = vsel %vm10053_vm11, %v5773_v46, %v5775_v35 }
0x1e57   : > { %6861 = vmatpush.xpose.msk.msrb.mxu3 %vm10052_vm10, %v5763_v29 }
0x1e58   : > { %5821 = vmatmul.f32.gmra.mxu3 %v5777_v47  ;;  %v5885_v45 = vpop.f32.mrf.mxu1 }
0x1e59   : > { %v9566_v8 = vadd.f32 %v5885_v45, %v10059_v42 }
0x1e5b   : > { %6862 = vmatpush.xpose.msk.msrb.mxu3 %vm10054_vm12, %v5762_v12  ;;  %v5929_v50 = vmul.f32 %v10060_v4, %v9566_v8  ;;  %v5901_v15 = vmul.f32 %v10061_v17, %v9566_v8  ;;  %v5957_v63 = vmul.f32 %v10063_v27, %v9566_v8 }
0x1e5d   : > { %v5731_v55 = vpop.permute.xlu0 %5730  ;;  %v5933_v44 = vsel %vm528_vm5, %v5929_v50, 0.0  ;;  %v5905_v1 = vsel %vm528_vm5, %v5901_v15, 0.0  ;;  %v5961_v61 = vsel %vm528_vm5, %v5957_v63, 0.0 }
0x1e5e   : > { %v5760_v30 = vsel %vm1178_vm3, %v5707_v57, %v5731_v55  ;;  %5934 = vadd.xlane.f32.xlu2 %v5933_v44  ;;  %5906 = vadd.xlane.f32.xlu1 %v5905_v1 }
0x1e5f   : > { %6863 = vmatpush.xpose.msk.msrb.mxu3 %vm10055_vm13, %v5761_v36  ;;  %5962 = vadd.xlane.f32.xlu0 %v5961_v61  ;;  %v10065_v36 = vld [vmem:[#allocation3_spill] sm:$0xff] }
0x1e60   : > { %v5888_v22 = vpop.f32.mrf.mxu1 }
0x1e61   : > { %v9575_v62 = vadd.f32 %v5888_v22, %v10062_v28 }
0x1e63   : > { %6864 = vmatpush.xpose.msk.msrb.mxu3 %vm10056_vm2, %v5760_v30  ;;  %v5902_v6 = vmul.f32 %v10061_v17, %v9575_v62  ;;  %v5930_v41 = vmul.f32 %v10060_v4, %v9575_v62  ;;  %v5958_v14 = vmul.f32 %v10063_v27, %v9575_v62 }
0x1e65   : > { %v5908_v16 = vsel %vm528_vm5, %v5902_v6, 0.0  ;;  %v5936_v37 = vsel %vm528_vm5, %v5930_v41, 0.0  ;;  %v5964_v3 = vsel %vm528_vm5, %v5958_v14, 0.0 }
0x1e66   : > { %6865 = vmatmul.msk.f32.vlgmr.msrb.gmra.mxu3 %vm10057_vm1, %v5771_v51  ;;  %5909 = vadd.xlane.f32.xlu2 %v5908_v16 }
0x1e67   : > { %5937 = vadd.xlane.f32.xlu1 %v5936_v37 }
0x1e6e   : > { %6866 = vmatmul.msk.f32.gmra.mxu3 %vm10058_vm14, %v5775_v35  ;;  %5965 = vadd.xlane.f32.xlu2 %v5964_v3 }
0x1ed1   : > { %v5935_v33 = vpop.xlane.xlu2 %5934  ;;  %v5907_v10 = vpop.xlane.xlu1 %5906 }
0x1ed2   : > { %v5945_v7 = vmul.f32 0.0625, %v5935_v33  ;;  %v5917_v2 = vmul.f32 0.125, %v5907_v10  ;;  %v5963_v40 = vpop.xlane.xlu0 %5962 }
0x1ed3   : > { %v5819_v21 = vpop.f32.mrf.mxu3  ;;  %v5973_v53 = vmul.f32 0.041666668, %v5963_v40 }
0x1ed4   : > { %v5949_v60 = vmul.f32 %v10060_v4, %v5945_v7  ;;  %v5921_v0 = vmul.f32 %v10061_v17, %v5917_v2 }
0x1ed5   : > { %v5977_v9 = vmul.f32 %v10063_v27, %v5973_v53 }
0x1ed6   : > { %v5953_v59 = vadd.f32 %v5949_v60, %v5921_v0 }
0x1ed8   : > { %v5981_v54 = vadd.f32 %v5977_v9, %v5953_v59 }
0x1ed9   : > { %v5910_v23 = vpop.xlane.xlu2 %5909 }
0x1eda   : > { %v5938_v38 = vpop.xlane.xlu1 %5937  ;;  %v5918_v31 = vmul.f32 0.125, %v5910_v23  ;;  %v9609_v46 = vsub.f32 %v9566_v8, %v5981_v54 }
0x1edb   : > { %v5822_v49 = vpop.f32.mrf.mxu3  ;;  %v5946_v43 = vmul.f32 0.0625, %v5938_v38 }
0x1edc   : > { %v5922_v51 = vmul.f32 %v10061_v17, %v5918_v31  ;;  %v5989_v50 = vmul.f32 %v9609_v46, %v9609_v46 }
0x1edd   : > { %v5950_v11 = vmul.f32 %v10060_v4, %v5946_v43  ;;  %v6140_v43 = vld [vmem:[%s7363_s30 + $0x28] sm:$0xff] }
0x1ede   : > { %v6049_v63 = vmul.f32 %v10063_v27, %v5989_v50  ;;  %v6021_v6 = vmul.f32 %v10060_v4, %v5989_v50  ;;  %v5993_v61 = vmul.f32 %v10061_v17, %v5989_v50  ;;  %6164 = vmatpush.msra.mxu3 %v6140_v43 }
0x1edf   : > { %v5954_v12 = vadd.f32 %v5950_v11, %v5922_v51  ;;  %v6138_v51 = vld [vmem:[%s7363_s30 + $0x18] sm:$0xff] }
0x1ee0   : > { %v6053_v16 = vsel %vm528_vm5, %v6049_v63, 0.0  ;;  %v6025_v41 = vsel %vm528_vm5, %v6021_v6, 0.0  ;;  %v5997_v14 = vsel %vm528_vm5, %v5993_v61, 0.0 }
0x1ee1   : > { %v5966_v20 = vpop.xlane.xlu2 %5965 }
0x1ee2   : > { %v5974_v26 = vmul.f32 0.041666668, %v5966_v20 }
0x1ee4   : > { %v5978_v19 = vmul.f32 %v10063_v27, %v5974_v26 }
0x1ee6   : > { %v5982_v44 = vadd.f32 %v5978_v19, %v5954_v12 }
0x1ee8   : > { %v9627_v28 = vsub.f32 %v9575_v62, %v5982_v44 }
0x1ee9   : > { %v5842_v58 = vpop.f32.mrf.mxu3 }
0x1eea   : > { %v5843_v18 = vadd.f32 %v5842_v58, %v5819_v21  ;;  %v5990_v37 = vmul.f32 %v9627_v28, %v9627_v28 }
0x1eec   : > { %v5848_v56 = vmul.f32 0.25, %v5843_v18  ;;  %v6050_v3 = vmul.f32 %v10063_v27, %v5990_v37  ;;  %v6022_v21 = vmul.f32 %v10060_v4, %v5990_v37 }
0x1eee   : > { %6869 = vmatmul.msk.f32.gmra.mxu1 %vm528_vm5, %v5848_v56  ;;  %v6056_v58 = vsel %vm528_vm5, %v6050_v3, 0.0  ;;  %v6028_v18 = vsel %vm528_vm5, %v6022_v21, 0.0 }
0x1ef1   : > { %v5845_v52 = vpop.f32.mrf.mxu3 }
0x1ef2   : > { %v5846_v25 = vadd.f32 %v5845_v52, %v5822_v49  ;;  %v5994_v49 = vmul.f32 %v10061_v17, %v5990_v37 }
0x1ef4   : > { %v5849_v5 = vmul.f32 0.25, %v5846_v25  ;;  %v6000_v56 = vsel %vm528_vm5, %v5994_v49, 0.0 }
0x1ef6   : > { %6870 = vmatmul.msk.f32.gmra.mxu1 %vm528_vm5, %v5849_v5 }
0x1f6b   : > { %v5891_v39 = vpop.f32.mrf.mxu1 }
0x1f6c   : > { %v9595_v57 = vadd.f32 %v5891_v39, %v10064_v13 }
0x1f6e   : > { %v5959_v34 = vmul.f32 %v10063_v27, %v9595_v57  ;;  %v5931_v48 = vmul.f32 %v10060_v4, %v9595_v57  ;;  %v5903_v32 = vmul.f32 %v10061_v17, %v9595_v57 }
0x1f70   : > { %v5967_v24 = vsel %vm528_vm5, %v5959_v34, 0.0  ;;  %v5939_v29 = vsel %vm528_vm5, %v5931_v48, 0.0  ;;  %v5911_v35 = vsel %vm528_vm5, %v5903_v32, 0.0  ;;  %v6139_v34 = vld [vmem:[%s7363_s30 + $0x20] sm:$0xff] }
0x1f71   : > { %5968 = vadd.xlane.f32.xlu2 %v5967_v24  ;;  %5940 = vadd.xlane.f32.xlu1 %v5939_v29 }
0x1f72   : > { %5912 = vadd.xlane.f32.xlu0 %v5911_v35  ;;  %6165 = vmatpush.msra.mxu3 %v6139_v34  ;;  %v6137_v35 = vld [vmem:[%s7363_s30 + $0x10] sm:$0xff] }
0x1f73   : > { %v5894_v47 = vpop.f32.mrf.mxu1 }
0x1f74   : > { %v9613_v55 = vadd.f32 %v5894_v47, %v10065_v36  ;;  %6166 = vmatpush.msra.mxu3 %v6138_v51  ;;  %v6136_v47 = vld [vmem:[%s7363_s30 + $0x8] sm:$0xff] }
0x1f76   : > { %v5960_v30 = vmul.f32 %v10063_v27, %v9613_v55  ;;  %v5932_v45 = vmul.f32 %v10060_v4, %v9613_v55  ;;  %v5904_v42 = vmul.f32 %v10061_v17, %v9613_v55  ;;  %6167 = vmatpush.msra.mxu3 %v6137_v35 }
0x1f78   : > { %v5970_v15 = vsel %vm528_vm5, %v5960_v30, 0.0  ;;  %v5942_v1 = vsel %vm528_vm5, %v5932_v45, 0.0  ;;  %v5914_v22 = vsel %vm528_vm5, %v5904_v42, 0.0  ;;  %6168 = vmatpush.msra.mxu3 %v6136_v47 }
0x1f79   : > { %5971 = vadd.xlane.f32.xlu2 %v5970_v15  ;;  %5943 = vadd.xlane.f32.xlu1 %v5942_v1  ;;  %v6135_v1 = vld [vmem:[%s7363_s30] sm:$0xff] }
0x1f7a   : > { %5915 = vadd.xlane.f32.xlu0 %v5914_v22  ;;  %6169 = vmatpush.msra.mxu3 %v6135_v1 }
0x1f81   : > { %6054 = vadd.xlane.f32.xlu2 %v6053_v16  ;;  %6026 = vadd.xlane.f32.xlu1 %v6025_v41 }
0x1f82   : > { %5998 = vadd.xlane.f32.xlu0 %v5997_v14 }
0x1f89   : > { %6057 = vadd.xlane.f32.xlu2 %v6056_v58  ;;  %6029 = vadd.xlane.f32.xlu1 %v6028_v18 }
0x1f8a   : > { %6001 = vadd.xlane.f32.xlu0 %v6000_v56 }
0x1fe4   : > { %v5969_v52 = vpop.xlane.xlu2 %5968  ;;  %v5941_v25 = vpop.xlane.xlu1 %5940 }
0x1fe5   : > { %v5947_v5 = vmul.f32 0.0625, %v5941_v25  ;;  %v5913_v33 = vpop.xlane.xlu0 %5912  ;;  %v5975_v10 = vmul.f32 0.041666668, %v5969_v52 }
0x1fe6   : > { %v5919_v7 = vmul.f32 0.125, %v5913_v33 }
0x1fe7   : > { %v5951_v2 = vmul.f32 %v10060_v4, %v5947_v5  ;;  %v5979_v40 = vmul.f32 %v10063_v27, %v5975_v10 }
0x1fe8   : > { %v5923_v23 = vmul.f32 %v10061_v17, %v5919_v7 }
0x1fea   : > { %v5955_v60 = vadd.f32 %v5951_v2, %v5923_v23 }
0x1fec   : > { %v5983_v0 = vadd.f32 %v5979_v40, %v5955_v60  ;;  %v5972_v53 = vpop.xlane.xlu2 %5971  ;;  %v5944_v38 = vpop.xlane.xlu1 %5943 }
0x1fed   : > { %v5976_v59 = vmul.f32 0.041666668, %v5972_v53  ;;  %v5948_v9 = vmul.f32 0.0625, %v5944_v38  ;;  %v5916_v31 = vpop.xlane.xlu0 %5915 }
0x1fee   : > { %v9648_v39 = vsub.f32 %v9595_v57, %v5983_v0  ;;  %v5920_v13 = vmul.f32 0.125, %v5916_v31 }
0x1fef   : > { %v5952_v20 = vmul.f32 %v10060_v4, %v5948_v9  ;;  %v5980_v54 = vmul.f32 %v10063_v27, %v5976_v59 }
0x1ff0   : > { %v5924_v48 = vmul.f32 %v10061_v17, %v5920_v13  ;;  %v5991_v32 = vmul.f32 %v9648_v39, %v9648_v39 }
0x1ff2   : > { %v5956_v11 = vadd.f32 %v5952_v20, %v5924_v48  ;;  %v6051_v26 = vmul.f32 %v10063_v27, %v5991_v32  ;;  %v6023_v24 = vmul.f32 %v10060_v4, %v5991_v32  ;;  %v5995_v29 = vmul.f32 %v10061_v17, %v5991_v32  ;;  %v10066_v32 = vld [vmem:[#allocation10_spill] sm:$0xff] }
0x1ff4   : > { %v5984_v12 = vadd.f32 %v5980_v54, %v5956_v11  ;;  %v6059_v19 = vsel %vm528_vm5, %v6051_v26, 0.0  ;;  %v6055_v36 = vpop.xlane.xlu2 %6054  ;;  %v6031_v30 = vsel %vm528_vm5, %v6023_v24, 0.0  ;;  %v6027_v45 = vpop.xlane.xlu1 %6026  ;;  %v6003_v42 = vsel %vm528_vm5, %v5995_v29, 0.0 }
0x1ff5   : > { %6060 = vadd.xlane.f32.xlu2 %v6059_v19  ;;  %v6065_v50 = vmul.f32 0.041666668, %v6055_v36  ;;  %6032 = vadd.xlane.f32.xlu1 %v6031_v30  ;;  %v6037_v44 = vmul.f32 0.0625, %v6027_v45  ;;  %v5999_v15 = vpop.xlane.xlu0 %5998  ;;  %v9684_v54 = vperm.slane %v10066_v32, 4  ;;  %v9688_v24 = vperm.slane %v10066_v32, 5 }
0x1ff6   : > { %v9667_v22 = vsub.f32 %v9613_v55, %v5984_v12  ;;  %6004 = vadd.xlane.f32.xlu0 %v6003_v42  ;;  %v6009_v63 = vmul.f32 0.125, %v5999_v15 }
0x1ff7   : > { %v6041_v6 = vmul.f32 %v10060_v4, %v6037_v44  ;;  %v6069_v41 = vmul.f32 %v10063_v27, %v6065_v50 }
0x1ff8   : > { %v6013_v61 = vmul.f32 %v10061_v17, %v6009_v63  ;;  %v5992_v16 = vmul.f32 %v9667_v22, %v9667_v22 }
0x1ffa   : > { %v6045_v37 = vadd.f32 %v6041_v6, %v6013_v61  ;;  %v6052_v14 = vmul.f32 %v10063_v27, %v5992_v16  ;;  %v6024_v3 = vmul.f32 %v10060_v4, %v5992_v16  ;;  %v5996_v21 = vmul.f32 %v10061_v17, %v5992_v16 }
0x1ffc   : > { %v6073_v49 = vadd.f32 %v6069_v41, %v6045_v37  ;;  %v6058_v58 = vpop.xlane.xlu2 %6057  ;;  %v6030_v18 = vpop.xlane.xlu1 %6029  ;;  %v6062_v56 = vsel %vm528_vm5, %v6052_v14, 0.0  ;;  %v6034_v52 = vsel %vm528_vm5, %v6024_v3, 0.0  ;;  %v6006_v25 = vsel %vm528_vm5, %v5996_v21, 0.0 }
0x1ffd   : > { %v6038_v5 = vmul.f32 0.0625, %v6030_v18  ;;  %6063 = vadd.xlane.f32.xlu2 %v6062_v56  ;;  %6035 = vadd.xlane.f32.xlu1 %v6034_v52  ;;  %v6002_v33 = vpop.xlane.xlu0 %6001  ;;  %v6066_v7 = vmul.f32 0.041666668, %v6058_v58 }
0x1ffe   : > { %v6077_v10 = vadd.f32 1e-06, %v6073_v49  ;;  %6007 = vadd.xlane.f32.xlu0 %v6006_v25  ;;  %v6010_v2 = vmul.f32 0.125, %v6002_v33 }
0x1fff   : > { %v6042_v23 = vmul.f32 %v10060_v4, %v6038_v5  ;;  %v6070_v60 = vmul.f32 %v10063_v27, %v6066_v7 }
0x2000   : > { %7233 = vrsqrt.f32 %v6077_v10  ;;  %v6014_v40 = vmul.f32 %v10061_v17, %v6010_v2  ;;  %vm6087_vm0 = vweird.f32 %v6077_v10 }
0x2002   : > { %v6046_v0 = vadd.f32 %v6042_v23, %v6014_v40 }
0x2004   : > { %v6074_v53 = vadd.f32 %v6070_v60, %v6046_v0 }
0x2006   : > { %v7234_v38 = vpop.eup %7233  ;;  %v6078_v59 = vadd.f32 1e-06, %v6074_v53 }
0x2007   : > { %v6082_v9 = vmul.f32 %v7234_v38, %v6077_v10  ;;  %vm6088_vm3 = vweird.f32 %v7234_v38 }
0x2008   : > { %7235 = vrsqrt.f32 %v6078_v59  ;;  %vm6089_vm4 = vmor %vm6087_vm0, %vm6088_vm3  ;;  %vm6097_vm6 = vweird.f32 %v6078_v59 }
0x2009   : > { %v6083_v31 = vmul.f32 %v7234_v38, %v6082_v9 }
0x200b   : > { %v6084_v43 = vmul.f32 0.5, %v6083_v31 }
0x200d   : > { %v6085_v13 = vsub.f32 1.5, %v6084_v43 }
0x200e   : > { %v7236_v20 = vpop.eup %7235 }
0x200f   : > { %v6086_v34 = vmul.f32 %v7234_v38, %v6085_v13  ;;  %v6092_v48 = vmul.f32 %v7236_v20, %v6078_v59  ;;  %vm6098_vm15 = vweird.f32 %v7236_v20 }
0x2010   : > { %vm6099_vm7 = vmor %vm6097_vm6, %vm6098_vm15 }
0x2011   : > { %v6093_v51 = vmul.f32 %v7236_v20, %v6092_v48  ;;  %v6090_v11 = vsel %vm6089_vm4, %v7234_v38, %v6086_v34 }
0x2012   : > { %v6121_v26 = vmul.f32 %v6090_v11, %v9609_v46  ;;  %v6353_v11 = vld [vmem:[%s7368_s11 + $0x50] sm:$0xff] }
0x2013   : > { %v6094_v29 = vmul.f32 0.5, %v6093_v51  ;;  %v6354_v51 = vld [vmem:[%s7368_s11 + $0x58] sm:$0xff] }
0x2014   : > { %v6126_v35 = vmul.f32 %v9684_v54, %v6121_v26  ;;  %v9714_v26 = vperm.slane %v10066_v32, 6  ;;  %6372 = vmatpush.msra.mxu2 %v6354_v51 }
0x2015   : > { %v6095_v47 = vsub.f32 1.5, %v6094_v29  ;;  %v6352_v29 = vld [vmem:[%s7368_s11 + $0x48] sm:$0xff] }
0x2016   : > { %v6131_v12 = vadd.f32 %v9688_v24, %v6126_v35  ;;  %6373 = vmatpush.msra.mxu2 %v6353_v11 }
0x2017   : > { %v6096_v19 = vmul.f32 %v7236_v20, %v6095_v47  ;;  %v6351_v47 = vld [vmem:[%s7368_s11 + $0x40] sm:$0xff] }
0x2018   : > { %6871 = vmatmul.msk.f32.vlgmr.msra.gmra.mxu3 %vm528_vm5, %v6131_v12  ;;  %6374 = vmatpush.msra.mxu2 %v6352_v29  ;;  %v6349_v12 = vld [vmem:[%s7368_s11 + $0x30] sm:$0xff] }
0x2019   : > { %v6100_v36 = vsel %vm6099_vm7, %v7236_v20, %v6096_v19 }
0x201a   : > { %v6122_v30 = vmul.f32 %v6100_v36, %v9627_v28  ;;  %6375 = vmatpush.msra.mxu2 %v6351_v47  ;;  %v6348_v36 = vld [vmem:[%s7368_s11 + $0x28] sm:$0xff] }
0x201c   : > { %v6127_v46 = vmul.f32 %v9684_v54, %v6122_v30 }
0x201e   : > { %v6132_v45 = vadd.f32 %v9688_v24, %v6127_v46 }
0x2020   : > { %6872 = vmatmul.msk.f32.gmra.mxu3 %vm528_vm5, %v6132_v45  ;;  %v6347_v45 = vld [vmem:[%s7368_s11 + $0x20] sm:$0xff] }
0x2068   : > { %v6061_v42 = vpop.xlane.xlu2 %6060  ;;  %v6033_v50 = vpop.xlane.xlu1 %6032 }
0x2069   : > { %v6039_v44 = vmul.f32 0.0625, %v6033_v50  ;;  %v6005_v15 = vpop.xlane.xlu0 %6004  ;;  %v6067_v1 = vmul.f32 0.041666668, %v6061_v42 }
0x206a   : > { %v6011_v63 = vmul.f32 0.125, %v6005_v15 }
0x206b   : > { %v6043_v6 = vmul.f32 %v10060_v4, %v6039_v44  ;;  %v6071_v16 = vmul.f32 %v10063_v27, %v6067_v1  ;;  %v6346_v44 = vld [vmem:[%s7368_s11 + $0x18] sm:$0xff]  ;;  %v6345_v1 = vld [vmem:[%s7368_s11 + $0x10] sm:$0xff] }
0x206c   : > { %v6015_v61 = vmul.f32 %v10061_v17, %v6011_v63 }
0x206e   : > { %v6047_v41 = vadd.f32 %v6043_v6, %v6015_v61  ;;  %v6344_v6 = vld [vmem:[%s7368_s11 + $0x8] sm:$0xff] }
0x2070   : > { %v6075_v28 = vadd.f32 %v6071_v16, %v6047_v41  ;;  %v6064_v37 = vpop.xlane.xlu2 %6063  ;;  %v6036_v14 = vpop.xlane.xlu1 %6035  ;;  %v6343_v16 = vld [vmem:[%s7368_s11] sm:$0xff] }
0x2071   : > { %v6040_v3 = vmul.f32 0.0625, %v6036_v14  ;;  %v6008_v21 = vpop.xlane.xlu0 %6007  ;;  %v6068_v58 = vmul.f32 0.041666668, %v6064_v37 }
0x2072   : > { %v6079_v49 = vadd.f32 1e-06, %v6075_v28  ;;  %v6012_v18 = vmul.f32 0.125, %v6008_v21 }
0x2073   : > { %v6044_v56 = vmul.f32 %v10060_v4, %v6040_v3  ;;  %v6072_v25 = vmul.f32 %v10063_v27, %v6068_v58 }
0x2074   : > { %7237 = vrsqrt.f32 %v6079_v49  ;;  %v6016_v52 = vmul.f32 %v10061_v17, %v6012_v18  ;;  %vm6107_vm9 = vweird.f32 %v6079_v49 }
0x2076   : > { %v6048_v5 = vadd.f32 %v6044_v56, %v6016_v52 }
0x2078   : > { %v6076_v33 = vadd.f32 %v6072_v25, %v6048_v5 }
0x207a   : > { %v7238_v10 = vpop.eup %7237  ;;  %v6080_v7 = vadd.f32 1e-06, %v6076_v33 }
0x207b   : > { %v6102_v2 = vmul.f32 %v7238_v10, %v6079_v49  ;;  %vm6108_vm8 = vweird.f32 %v7238_v10 }
0x207c   : > { %7239 = vrsqrt.f32 %v6080_v7  ;;  %vm6109_vm10 = vmor %vm6107_vm9, %vm6108_vm8  ;;  %vm6117_vm12 = vweird.f32 %v6080_v7  ;;  %vm10067_vm9 = vcmask 785408  }
0x207d   : > { %v6103_v23 = vmul.f32 %v7238_v10, %v6102_v2 }
0x207f   : > { %v6104_v40 = vmul.f32 0.5, %v6103_v23 }
0x2081   : > { %v6105_v60 = vsub.f32 1.5, %v6104_v40 }
0x2082   : > { %v7240_v0 = vpop.eup %7239 }
0x2083   : > { %v6112_v53 = vmul.f32 %v7240_v0, %v6080_v7  ;;  %v6106_v38 = vmul.f32 %v7238_v10, %v6105_v60  ;;  %vm6118_vm11 = vweird.f32 %v7240_v0 }
0x2084   : > { %vm6119_vm13 = vmor %vm6117_vm12, %vm6118_vm11 }
0x2085   : > { %v6113_v4 = vmul.f32 %v7240_v0, %v6112_v53  ;;  %v6110_v59 = vsel %vm6109_vm10, %v7238_v10, %v6106_v38  ;;  %vm10068_vm10 = vmmov %vm10067_vm9 }
0x2086   : > { %v6123_v17 = vmul.f32 %v6110_v59, %v9648_v39 }
0x2087   : > { %v6114_v27 = vmul.f32 0.5, %v6113_v4 }
0x2088   : > { %v6128_v9 = vmul.f32 %v9684_v54, %v6123_v17 }
0x2089   : > { %v6115_v31 = vsub.f32 1.5, %v6114_v27 }
0x208a   : > { %v6133_v43 = vadd.f32 %v9688_v24, %v6128_v9 }
0x208b   : > { %v6116_v13 = vmul.f32 %v7240_v0, %v6115_v31 }
0x208c   : > { %6873 = vmatmul.msk.f32.gmra.mxu3 %vm528_vm5, %v6133_v43 }
0x208d   : > { %v6120_v20 = vsel %vm6119_vm13, %v7240_v0, %v6116_v13 }
0x208e   : > { %v6124_v34 = vmul.f32 %v6120_v20, %v9667_v22 }
0x2090   : > { %v6129_v39 = vmul.f32 %v9684_v54, %v6124_v34  ;;  %v6350_v54 = vld [vmem:[%s7368_s11 + $0x38] sm:$0xff] }
0x2091   : > { %6376 = vmatpush.msra.mxu2 %v6350_v54 }
0x2092   : > { %v6134_v48 = vadd.f32 %v9688_v24, %v6129_v39 }
0x2093   : > { %6377 = vmatpush.msra.mxu2 %v6349_v12 }
0x2094   : > { %6874 = vmatmul.msk.f32.gmra.mxu3 %vm528_vm5, %v6134_v48 }
0x2095   : > { %6378 = vmatpush.msra.mxu2 %v6348_v36 }
0x2097   : > { %6379 = vmatpush.msra.mxu2 %v6347_v45  ;;  %v7282_v45 = vmov -1.0  }
0x2099   : > { %6380 = vmatpush.msra.mxu2 %v6346_v44 }
0x209b   : > { %v6171_v35 = vpop.f32.mrf.mxu3  ;;  %6381 = vmatpush.msra.mxu2 %v6345_v1 }
0x209c   : > { %v9719_v22 = vadd.f32 %v6171_v35, %v9714_v26 }
0x209d   : > { %6382 = vmatpush.msra.mxu2 %v6344_v6 }
0x209e   : > { %v9723_v24 = vmul.f32 0.70710677, %v9719_v22 }
0x209f   : > { %6383 = vmatpush.msra.mxu2 %v6343_v16 }
0x20a0   : > { %v6199_v19 = vand.u32 2147483647, %v9723_v24  ;;  %vm6191_vm7 = vcmp.ge.f32.partialorder %v9723_v24, 0.0 }
0x20a2   : > { %v6203_v30 = vmul.f32 0.3275911, %v6199_v19  ;;  %v6307_v5 = vsub.f32 0.0, %v6199_v19 }
0x20a3   : > { %v6174_v46 = vpop.f32.mrf.mxu3 }
0x20a4   : > { %v6207_v42 = vadd.f32 1.0, %v6203_v30  ;;  %v9730_v50 = vadd.f32 %v6174_v46, %v9714_v26  ;;  %v6311_v0 = vmul.f32 %v6307_v5, %v6199_v19 }
0x20a6   : > { %7241 = vrcp.f32 %v6207_v42  ;;  %v9734_v15 = vmul.f32 0.70710677, %v9730_v50  ;;  %v6222_v3 = vand.u32 2147483648, %v6207_v42  ;;  %v6220_v49 = vand.u32 2147483647, %v6207_v42 }
0x20a7   : > { %vm6216_vm1 = vweird.f32 %v6207_v42  ;;  %v6315_v27 = vmul.f32 1.442695, %v6311_v0 }
0x20a8   : > { %v6200_v63 = vand.u32 2147483647, %v9734_v15  ;;  %v6223_v56 = vor.u32 1.1754944e-38, %v6222_v3  ;;  %vm6221_vm3 = vcmp.eq.f32.partialorder %v6220_v49, 8.507059e+37  ;;  %vm6192_vm8 = vcmp.ge.f32.partialorder %v9734_v15, 0.0 }
0x20a9   : > { %v6184_v3 = vmul.f32 0.5, %v9730_v50 }
0x20aa   : > { %v6204_v61 = vmul.f32 0.3275911, %v6200_v63  ;;  %v6308_v9 = vsub.f32 0.0, %v6200_v63 }
0x20ac   : > { %v7242_v41 = vpop.eup %7241  ;;  %v6208_v28 = vadd.f32 1.0, %v6204_v61  ;;  %v6312_v39 = vmul.f32 %v6308_v9, %v6200_v63  ;;  %v6183_v63 = vmul.f32 0.5, %v9719_v22 }
0x20ad   : > { %v6212_v37 = vmul.f32 %v7242_v41, %v6207_v42  ;;  %vm6217_vm2 = vweird.f32 %v7242_v41  ;;  %v6195_v42 = vsel %vm6191_vm7, 1.0, %v7282_v45 }
0x20ae   : > { %7243 = vrcp.f32 %v6208_v28  ;;  %vm6218_vm14 = vmor %vm6216_vm1, %vm6217_vm2  ;;  %v6237_v2 = vand.u32 2147483648, %v6208_v28  ;;  %v6235_v60 = vand.u32 2147483647, %v6208_v28  ;;  %vm6231_vm4 = vweird.f32 %v6208_v28 }
0x20af   : > { %v6213_v14 = vsub.f32 1.0, %v6212_v37  ;;  %7245 = vpow2.f32 %v6315_v27  ;;  %v6317_v35 = vmul.f32 1.442695, %v6312_v39  ;;  %v6196_v37 = vsel %vm6192_vm8, 1.0, %v7282_v45 }
0x20b0   : > { %v6238_v4 = vor.u32 1.1754944e-38, %v6237_v2  ;;  %vm6236_vm6 = vcmp.eq.f32.partialorder %v6235_v60, 8.507059e+37 }
0x20b1   : > { %v6214_v21 = vmul.f32 %v7242_v41, %v6213_v14  ;;  %7247 = vpow2.f32 %v6317_v35 }
0x20b3   : > { %v6215_v58 = vadd.f32 %v7242_v41, %v6214_v21 }
0x20b4   : > { %v7244_v18 = vpop.eup %7243 }
0x20b5   : > { %v6227_v52 = vmul.f32 %v7244_v18, %v6208_v28  ;;  %v6219_v25 = vsel %vm6218_vm14, %v7242_v41, %v6215_v58  ;;  %vm6232_vm0 = vweird.f32 %v7244_v18  ;;  %v7246_v12 = vpop.eup %7245 }
0x20b6   : > { %v6224_v33 = vsel %vm6221_vm3, %v6223_v56, %v6219_v25  ;;  %vm6233_vm15 = vmor %vm6231_vm4, %vm6232_vm0 }
0x20b7   : > { %v6228_v10 = vsub.f32 1.0, %v6227_v52  ;;  %v6271_v7 = vmul.f32 1.0614054, %v6224_v33  ;;  %v7248_v16 = vpop.eup %7247 }
0x20b9   : > { %v6275_v23 = vadd.f32 -1.4531521, %v6271_v7  ;;  %v6229_v40 = vmul.f32 %v7244_v18, %v6228_v10 }
0x20bb   : > { %v6279_v53 = vmul.f32 %v6275_v23, %v6224_v33  ;;  %v6230_v38 = vadd.f32 %v7244_v18, %v6229_v40 }
0x20bd   : > { %v6283_v59 = vadd.f32 1.4214138, %v6279_v53  ;;  %v6234_v17 = vsel %vm6233_vm15, %v7244_v18, %v6230_v38 }
0x20be   : > { %v6239_v31 = vsel %vm6236_vm6, %v6238_v4, %v6234_v17  ;;  %vm10069_vm6 = vmmov %vm10067_vm9 }
0x20bf   : > { %v6287_v43 = vmul.f32 %v6283_v59, %v6224_v33  ;;  %v6272_v13 = vmul.f32 1.0614054, %v6239_v31  ;;  %vm10070_vm7 = vmmov %vm10069_vm6 }
0x20c1   : > { %v6291_v20 = vadd.f32 -0.28449672, %v6287_v43  ;;  %v6276_v34 = vadd.f32 -1.4531521, %v6272_v13 }
0x20c3   : > { %v6295_v48 = vmul.f32 %v6291_v20, %v6224_v33  ;;  %v6280_v51 = vmul.f32 %v6276_v34, %v6239_v31 }
0x20c5   : > { %v6299_v11 = vadd.f32 0.2548296, %v6295_v48  ;;  %v6284_v29 = vadd.f32 1.4214138, %v6280_v51 }
0x20c7   : > { %v6303_v47 = vmul.f32 %v6299_v11, %v6224_v33  ;;  %v6288_v54 = vmul.f32 %v6284_v29, %v6239_v31 }
0x20c9   : > { %v6323_v19 = vmul.f32 %v7246_v12, %v6303_v47  ;;  %v6292_v36 = vadd.f32 -0.28449672, %v6288_v54 }
0x20cb   : > { %v6327_v30 = vsub.f32 1.0, %v6323_v19  ;;  %v6296_v46 = vmul.f32 %v6292_v36, %v6239_v31 }
0x20cd   : > { %v6331_v44 = vmul.f32 %v6327_v30, %v6195_v42  ;;  %v6300_v1 = vadd.f32 0.2548296, %v6296_v46 }
0x20cf   : > { %v6335_v6 = vadd.f32 1.0, %v6331_v44  ;;  %v6304_v61 = vmul.f32 %v6300_v1, %v6239_v31 }
0x20d1   : > { %v6339_v41 = vmul.f32 %v6335_v6, %v6183_v63  ;;  %v6324_v28 = vmul.f32 %v7248_v16, %v6304_v61 }
0x20d3   : > { %6875 = vmatmul.msk.f32.vlgmr.msra.gmra.mxu2 %vm10067_vm9, %v6339_v41  ;;  %v6328_v24 = vsub.f32 1.0, %v6324_v28 }
0x20d5   : > { %v6332_v14 = vmul.f32 %v6328_v24, %v6196_v37 }
0x20d7   : > { %v6336_v21 = vadd.f32 1.0, %v6332_v14 }
0x20d9   : > { %v6340_v49 = vmul.f32 %v6336_v21, %v6184_v3 }
0x20db   : > { %6876 = vmatmul.msk.f32.gmra.mxu2 %vm10068_vm10, %v6340_v49 }
0x210f   : > { %v6177_v22 = vpop.f32.mrf.mxu3 }
0x2110   : > { %v9749_v58 = vadd.f32 %v6177_v22, %v9714_v26 }
0x2112   : > { %v9752_v15 = vmul.f32 0.70710677, %v9749_v58 }
0x2114   : > { %v6201_v18 = vand.u32 2147483647, %v9752_v15  ;;  %vm6193_vm4 = vcmp.ge.f32.partialorder %v9752_v15, 0.0 }
0x2115   : > { %v6197_v49 = vsel %vm6193_vm4, 1.0, %v7282_v45 }
0x2116   : > { %v6205_v56 = vmul.f32 0.3275911, %v6201_v18  ;;  %v6309_v27 = vsub.f32 0.0, %v6201_v18 }
0x2117   : > { %v6180_v52 = vpop.f32.mrf.mxu3 }
0x2118   : > { %v6209_v25 = vadd.f32 1.0, %v6205_v56  ;;  %v9756_v5 = vadd.f32 %v6180_v52, %v9714_v26  ;;  %v6313_v48 = vmul.f32 %v6309_v27, %v6201_v18  ;;  %v6185_v56 = vmul.f32 0.5, %v9749_v58 }
0x2119   : > { %v6355_v58 = vperm.slane %v10066_v32, 7 }
0x211a   : > { %7249 = vrcp.f32 %v6209_v25  ;;  %v9759_v50 = vmul.f32 0.70710677, %v9756_v5  ;;  %v6252_v60 = vand.u32 2147483648, %v6209_v25  ;;  %v6250_v53 = vand.u32 2147483647, %v6209_v25 }
0x211b   : > { %vm6246_vm12 = vweird.f32 %v6209_v25  ;;  %v6319_v54 = vmul.f32 1.442695, %v6313_v48 }
0x211c   : > { %v6202_v33 = vand.u32 2147483647, %v9759_v50  ;;  %v6253_v4 = vor.u32 1.1754944e-38, %v6252_v60  ;;  %vm6251_vm2 = vcmp.eq.f32.partialorder %v6250_v53, 8.507059e+37  ;;  %vm6194_vm15 = vcmp.ge.f32.partialorder %v9759_v50, 0.0 }
0x211e   : > { %v6206_v10 = vmul.f32 0.3275911, %v6202_v33  ;;  %v6310_v12 = vsub.f32 0.0, %v6202_v33 }
0x2120   : > { %v7250_v7 = vpop.eup %7249  ;;  %v6210_v2 = vadd.f32 1.0, %v6206_v10  ;;  %v6314_v44 = vmul.f32 %v6310_v12, %v6202_v33 }
0x2121   : > { %v6242_v23 = vmul.f32 %v7250_v7, %v6209_v25  ;;  %vm6247_vm11 = vweird.f32 %v7250_v7 }
0x2122   : > { %7251 = vrcp.f32 %v6210_v2  ;;  %vm6248_vm13 = vmor %vm6246_vm12, %vm6247_vm11  ;;  %v6267_v13 = vand.u32 2147483648, %v6210_v2  ;;  %v6265_v39 = vand.u32 2147483647, %v6210_v2  ;;  %vm6261_vm14 = vweird.f32 %v6210_v2 }
0x2123   : > { %v6243_v40 = vsub.f32 1.0, %v6242_v23  ;;  %7253 = vpow2.f32 %v6319_v54  ;;  %v6321_v16 = vmul.f32 1.442695, %v6314_v44 }
0x2124   : > { %v6268_v29 = vor.u32 1.1754944e-38, %v6267_v13  ;;  %vm6266_vm0 = vcmp.eq.f32.partialorder %v6265_v39, 8.507059e+37 }
0x2125   : > { %v6244_v0 = vmul.f32 %v7250_v7, %v6243_v40  ;;  %7255 = vpow2.f32 %v6321_v16  ;;  %v6186_v40 = vmul.f32 0.5, %v9756_v5 }
0x2127   : > { %v6245_v38 = vadd.f32 %v7250_v7, %v6244_v0 }
0x2128   : > { %v7252_v26 = vpop.eup %7251 }
0x2129   : > { %v6257_v59 = vmul.f32 %v7252_v26, %v6210_v2  ;;  %v6249_v17 = vsel %vm6248_vm13, %v7250_v7, %v6245_v38  ;;  %vm6262_vm1 = vweird.f32 %v7252_v26  ;;  %v7254_v24 = vpop.eup %7253  ;;  %v6198_v2 = vsel %vm6194_vm15, 1.0, %v7282_v45 }
0x212a   : > { %v6254_v9 = vsel %vm6251_vm2, %v6253_v4, %v6249_v17  ;;  %vm6263_vm3 = vmor %vm6261_vm14, %vm6262_vm1 }
0x212b   : > { %v6258_v31 = vsub.f32 1.0, %v6257_v59  ;;  %v6273_v43 = vmul.f32 1.0614054, %v6254_v9  ;;  %v7256_v33 = vpop.eup %7255 }
0x212d   : > { %v6277_v20 = vadd.f32 -1.4531521, %v6273_v43  ;;  %v6259_v34 = vmul.f32 %v7252_v26, %v6258_v31 }
0x212f   : > { %v6281_v51 = vmul.f32 %v6277_v20, %v6254_v9  ;;  %v6260_v11 = vadd.f32 %v7252_v26, %v6259_v34 }
0x2131   : > { %v6285_v35 = vadd.f32 1.4214138, %v6281_v51  ;;  %v6264_v47 = vsel %vm6263_vm3, %v7252_v26, %v6260_v11 }
0x2132   : > { %v6269_v19 = vsel %vm6266_vm0, %v6268_v29, %v6264_v47 }
0x2133   : > { %v6289_v36 = vmul.f32 %v6285_v35, %v6254_v9  ;;  %v6274_v30 = vmul.f32 1.0614054, %v6269_v19 }
0x2135   : > { %v6293_v46 = vadd.f32 -0.28449672, %v6289_v36  ;;  %v6278_v42 = vadd.f32 -1.4531521, %v6274_v30 }
0x2137   : > { %v6297_v1 = vmul.f32 %v6293_v46, %v6254_v9  ;;  %v6282_v63 = vmul.f32 %v6278_v42, %v6269_v19 }
0x2139   : > { %v6301_v6 = vadd.f32 0.2548296, %v6297_v1  ;;  %v6286_v61 = vadd.f32 1.4214138, %v6282_v63 }
0x213b   : > { %v6305_v41 = vmul.f32 %v6301_v6, %v6254_v9  ;;  %v6290_v28 = vmul.f32 %v6286_v61, %v6269_v19 }
0x213d   : > { %v6325_v37 = vmul.f32 %v7254_v24, %v6305_v41  ;;  %v6294_v14 = vadd.f32 -0.28449672, %v6290_v28 }
0x213f   : > { %v6329_v3 = vsub.f32 1.0, %v6325_v37  ;;  %v6298_v21 = vmul.f32 %v6294_v14, %v6269_v19 }
0x2141   : > { %v6333_v22 = vmul.f32 %v6329_v3, %v6197_v49  ;;  %v6302_v18 = vadd.f32 0.2548296, %v6298_v21 }
0x2143   : > { %v6337_v52 = vadd.f32 1.0, %v6333_v22  ;;  %v6306_v25 = vmul.f32 %v6302_v18, %v6269_v19 }
0x2145   : > { %v6341_v10 = vmul.f32 %v6337_v52, %v6185_v56  ;;  %v6326_v7 = vmul.f32 %v7256_v33, %v6306_v25 }
0x2147   : > { %6877 = vmatmul.msk.f32.gmra.mxu2 %vm10069_vm6, %v6341_v10  ;;  %v6330_v15 = vsub.f32 1.0, %v6326_v7 }
0x2149   : > { %v6334_v23 = vmul.f32 %v6330_v15, %v6198_v2 }
0x214b   : > { %v6338_v60 = vadd.f32 1.0, %v6334_v23 }
0x214d   : > { %v6342_v0 = vmul.f32 %v6338_v60, %v6186_v40 }
0x214f   : > { %6878 = vmatmul.msk.f32.gmra.mxu2 %vm10070_vm7, %v6342_v0 }
0x2156   : > { %v6385_v53 = vpop.f32.mrf.mxu2 }
0x2157   : > { %v6386_v38 = vadd.f32 %v6385_v53, %v6355_v58 }
0x2159   : > { %v9772_v50 = vadd.f32 %v6386_v38, %v9566_v8 }
0x215b   : > { %6401 = vst.msk [vmem:[#allocation2] sm:$0xff] %vm528_vm5, %v9772_v50 }
0x215e   : > { %v6388_v26 = vpop.f32.mrf.mxu2 }
0x215f   : > { %v6389_v4 = vadd.f32 %v6388_v26, %v6355_v58 }
0x2161   : > { %v9777_v45 = vadd.f32 %v6389_v4, %v9575_v62 }
0x2163   : > { %6402 = vst.msk [vmem:[#allocation2 + $0x8] sm:$0xff] %vm528_vm5, %v9777_v45 }
0x21ca   : > { %v6391_v5 = vpop.f32.mrf.mxu2 }
0x21cb   : > { %v6392_v59 = vadd.f32 %v6391_v5, %v6355_v58 }
0x21cd   : > { %v9782_v32 = vadd.f32 %v6392_v59, %v9595_v57 }
0x21cf   : > { %6403 = vst.msk [vmem:[#allocation2 + $0x10] sm:$0xff] %vm528_vm5, %v9782_v32 }
0x21d2   : > { %v6394_v8 = vpop.f32.mrf.mxu2 }
0x21d3   : > { %v6395_v17 = vadd.f32 %v6394_v8, %v6355_v58  ;;  %6407 = sbr.rel (%p6879_p6) target bundleno = 8995 (0x2323), region = 88 }
0x21d5   : > { %v9787_v27 = vadd.f32 %v6395_v17, %v9613_v55 }
0x21d7   : > { %6404 = vst.msk [vmem:[#allocation2 + $0x18] sm:$0xff] %vm528_vm5, %v9787_v27 }
0x21d8   : > { %v10071_v62 = vld [vmem:[#allocation6_spill] sm:$0xff]  ;;  %v10072_v57 = vld [vmem:[#allocation5_spill] sm:$0xff]  ;;  %v10073_v35 = vld [vmem:[#allocation7_spill] sm:$0xff] }
0x21d9   : > { %v6436_v9 = vmul.f32 %v10071_v62, %v9772_v50  ;;  %v6410_v31 = vmul.f32 %v10072_v57, %v9782_v32  ;;  %v6408_v43 = vmul.f32 %v10072_v57, %v9772_v50  ;;  %v6437_v34 = vmul.f32 %v10071_v62, %v9777_v45 }
0x21da   : > { %v6411_v39 = vmul.f32 %v10072_v57, %v9787_v27  ;;  %v6409_v48 = vmul.f32 %v10072_v57, %v9777_v45  ;;  %v6464_v47 = vmul.f32 %v10073_v35, %v9772_v50  ;;  %v6439_v54 = vmul.f32 %v10071_v62, %v9787_v27 }
0x21db   : > { %v6440_v13 = vsel %vm528_vm5, %v6436_v9, 0.0  ;;  %v6418_v55 = vsel %vm528_vm5, %v6410_v31, 0.0  ;;  %v6412_v20 = vsel %vm528_vm5, %v6408_v43, 0.0  ;;  %v6443_v51 = vsel %vm528_vm5, %v6437_v34, 0.0 }
0x21dc   : > { %6441 = vadd.xlane.f32.xlu2 %v6440_v13  ;;  %6419 = vadd.xlane.f32.xlu1 %v6418_v55  ;;  %v6421_v11 = vsel %vm528_vm5, %v6411_v39, 0.0  ;;  %v6415_v29 = vsel %vm528_vm5, %v6409_v48, 0.0  ;;  %v6438_v12 = vmul.f32 %v10071_v62, %v9782_v32  ;;  %v6468_v19 = vsel %vm528_vm5, %v6464_v47, 0.0 }
0x21dd   : > { %6413 = vadd.xlane.f32.xlu0 %v6412_v20  ;;  %v6449_v36 = vsel %vm528_vm5, %v6439_v54, 0.0  ;;  %v6467_v46 = vmul.f32 %v10073_v35, %v9787_v27  ;;  %v6466_v42 = vmul.f32 %v10073_v35, %v9782_v32  ;;  %v6465_v44 = vmul.f32 %v10073_v35, %v9777_v45 }
0x21de   : > { %v6446_v30 = vsel %vm528_vm5, %v6438_v12, 0.0 }
0x21df   : > { %v6477_v1 = vsel %vm528_vm5, %v6467_v46, 0.0  ;;  %v6474_v63 = vsel %vm528_vm5, %v6466_v42, 0.0  ;;  %v6471_v6 = vsel %vm528_vm5, %v6465_v44, 0.0 }
0x21e4   : > { %6444 = vadd.xlane.f32.xlu2 %v6443_v51  ;;  %6422 = vadd.xlane.f32.xlu1 %v6421_v11 }
0x21e5   : > { %6416 = vadd.xlane.f32.xlu0 %v6415_v29 }
0x21ec   : > { %6469 = vadd.xlane.f32.xlu2 %v6468_v19  ;;  %6450 = vadd.xlane.f32.xlu1 %v6449_v36 }
0x21ed   : > { %6447 = vadd.xlane.f32.xlu0 %v6446_v30 }
0x21f4   : > { %6478 = vadd.xlane.f32.xlu2 %v6477_v1  ;;  %6475 = vadd.xlane.f32.xlu1 %v6474_v63 }
0x21f5   : > { %6472 = vadd.xlane.f32.xlu0 %v6471_v6 }
0x224f   : > { %v6442_v61 = vpop.xlane.xlu2 %6441  ;;  %v6420_v16 = vpop.xlane.xlu1 %6419 }
0x2250   : > { %v6414_v41 = vpop.xlane.xlu0 %6413  ;;  %v6452_v14 = vmul.f32 0.0625, %v6442_v61  ;;  %v6426_v40 = vmul.f32 0.125, %v6420_v16 }
0x2251   : > { %v6424_v3 = vmul.f32 0.125, %v6414_v41 }
0x2252   : > { %v6456_v21 = vmul.f32 %v10071_v62, %v6452_v14  ;;  %v6430_v8 = vmul.f32 %v10072_v57, %v6426_v40 }
0x2253   : > { %v6428_v49 = vmul.f32 %v10072_v57, %v6424_v3 }
0x2255   : > { %v6460_v33 = vadd.f32 %v6456_v21, %v6428_v49 }
0x2257   : > { %v6445_v28 = vpop.xlane.xlu2 %6444  ;;  %v6423_v24 = vpop.xlane.xlu1 %6422 }
0x2258   : > { %v6417_v37 = vpop.xlane.xlu0 %6416  ;;  %v6453_v15 = vmul.f32 0.0625, %v6445_v28  ;;  %v6427_v2 = vmul.f32 0.125, %v6423_v24 }
0x2259   : > { %v6425_v23 = vmul.f32 0.125, %v6417_v37 }
0x225a   : > { %v6457_v38 = vmul.f32 %v10071_v62, %v6453_v15  ;;  %v6431_v26 = vmul.f32 %v10072_v57, %v6427_v2 }
0x225b   : > { %v6429_v4 = vmul.f32 %v10072_v57, %v6425_v23 }
0x225d   : > { %v6461_v48 = vadd.f32 %v6457_v38, %v6429_v4 }
0x225f   : > { %v6470_v22 = vpop.xlane.xlu2 %6469  ;;  %v6451_v18 = vpop.xlane.xlu1 %6450 }
0x2260   : > { %v6480_v56 = vmul.f32 0.041666668, %v6470_v22  ;;  %v6448_v52 = vpop.xlane.xlu0 %6447  ;;  %v6455_v25 = vmul.f32 0.0625, %v6451_v18 }
0x2261   : > { %v6454_v7 = vmul.f32 0.0625, %v6448_v52 }
0x2262   : > { %v6484_v10 = vmul.f32 %v10073_v35, %v6480_v56  ;;  %v6459_v0 = vmul.f32 %v10071_v62, %v6455_v25 }
0x2263   : > { %v6458_v53 = vmul.f32 %v10071_v62, %v6454_v7 }
0x2264   : > { %v6488_v60 = vadd.f32 %v6484_v10, %v6460_v33 }
0x2265   : > { %v6462_v55 = vadd.f32 %v6458_v53, %v6430_v8 }
0x2266   : > { %v9833_v58 = vsub.f32 %v9772_v50, %v6488_v60  ;;  %v6463_v50 = vadd.f32 %v6459_v0, %v6431_v26 }
0x2267   : > { %v6479_v5 = vpop.xlane.xlu2 %6478  ;;  %v6476_v59 = vpop.xlane.xlu1 %6475 }
0x2268   : > { %v6483_v17 = vmul.f32 0.041666668, %v6479_v5  ;;  %v6482_v9 = vmul.f32 0.041666668, %v6476_v59  ;;  %v6473_v31 = vpop.xlane.xlu0 %6472  ;;  %v6496_v43 = vmul.f32 %v9833_v58, %v9833_v58 }
0x2269   : > { %v6481_v13 = vmul.f32 0.041666668, %v6473_v31 }
0x226a   : > { %v6487_v20 = vmul.f32 %v10073_v35, %v6483_v17  ;;  %v6486_v34 = vmul.f32 %v10073_v35, %v6482_v9  ;;  %v6500_v39 = vmul.f32 %v10072_v57, %v6496_v43  ;;  %v6528_v16 = vmul.f32 %v10071_v62, %v6496_v43 }
0x226b   : > { %v6485_v51 = vmul.f32 %v10073_v35, %v6481_v13  ;;  %v6556_v14 = vmul.f32 %v10073_v35, %v6496_v43 }
0x226c   : > { %v6491_v11 = vadd.f32 %v6487_v20, %v6463_v50  ;;  %v6490_v29 = vadd.f32 %v6486_v34, %v6462_v55  ;;  %v6504_v47 = vsel %vm528_vm5, %v6500_v39, 0.0  ;;  %v6532_v24 = vsel %vm528_vm5, %v6528_v16, 0.0 }
0x226d   : > { %v6489_v54 = vadd.f32 %v6485_v51, %v6461_v48  ;;  %6505 = vadd.xlane.f32.xlu0 %v6504_v47  ;;  %v6560_v49 = vsel %vm528_vm5, %v6556_v14, 0.0 }
0x226e   : > { %v9848_v12 = vsub.f32 %v9787_v27, %v6491_v11  ;;  %v9851_v19 = vsub.f32 %v9782_v32, %v6490_v29 }
0x226f   : > { %v9854_v36 = vsub.f32 %v9777_v45, %v6489_v54 }
0x2270   : > { %v6499_v30 = vmul.f32 %v9848_v12, %v9848_v12  ;;  %v6498_v46 = vmul.f32 %v9851_v19, %v9851_v19 }
0x2271   : > { %v6497_v42 = vmul.f32 %v9854_v36, %v9854_v36 }
0x2272   : > { %v6503_v44 = vmul.f32 %v10072_v57, %v6499_v30  ;;  %v6502_v27 = vmul.f32 %v10072_v57, %v6498_v46  ;;  %v6530_v6 = vmul.f32 %v10071_v62, %v6498_v46  ;;  %v6531_v3 = vmul.f32 %v10071_v62, %v6499_v30 }
0x2273   : > { %v6501_v1 = vmul.f32 %v10072_v57, %v6497_v42  ;;  %v6529_v61 = vmul.f32 %v10071_v62, %v6497_v42  ;;  %v6557_v37 = vmul.f32 %v10073_v35, %v6497_v42  ;;  %v6559_v18 = vmul.f32 %v10073_v35, %v6499_v30 }
0x2274   : > { %v6513_v32 = vsel %vm528_vm5, %v6503_v44, 0.0  ;;  %v6510_v45 = vsel %vm528_vm5, %v6502_v27, 0.0  ;;  %v6538_v41 = vsel %vm528_vm5, %v6530_v6, 0.0  ;;  %v6541_v22 = vsel %vm528_vm5, %v6531_v3, 0.0 }
0x2275   : > { %6514 = vadd.xlane.f32.xlu0 %v6513_v32  ;;  %6511 = vadd.xlane.f32.xlu2 %v6510_v45  ;;  %v6507_v63 = vsel %vm528_vm5, %v6501_v1, 0.0  ;;  %v6535_v28 = vsel %vm528_vm5, %v6529_v61, 0.0  ;;  %v6563_v21 = vsel %vm528_vm5, %v6557_v37, 0.0  ;;  %v6558_v56 = vmul.f32 %v10073_v35, %v6498_v46 }
0x2276   : > { %6508 = vadd.xlane.f32.xlu1 %v6507_v63  ;;  %v6569_v52 = vsel %vm528_vm5, %v6559_v18, 0.0 }
0x2277   : > { %v6566_v25 = vsel %vm528_vm5, %v6558_v56, 0.0 }
0x227d   : > { %6539 = vadd.xlane.f32.xlu0 %v6538_v41  ;;  %6536 = vadd.xlane.f32.xlu2 %v6535_v28 }
0x227e   : > { %6533 = vadd.xlane.f32.xlu1 %v6532_v24 }
0x2285   : > { %6564 = vadd.xlane.f32.xlu0 %v6563_v21  ;;  %6561 = vadd.xlane.f32.xlu2 %v6560_v49 }
0x2286   : > { %6542 = vadd.xlane.f32.xlu1 %v6541_v22 }
0x228d   : > { %6570 = vadd.xlane.f32.xlu2 %v6569_v52 }
0x228e   : > { %6567 = vadd.xlane.f32.xlu1 %v6566_v25 }
0x22e0   : > { %v6506_v33 = vpop.xlane.xlu0 %6505 }
0x22e1   : > { %v6516_v38 = vmul.f32 0.125, %v6506_v33 }
0x22e3   : > { %v6520_v17 = vmul.f32 %v10072_v57, %v6516_v38 }
0x22e8   : > { %v6512_v10 = vpop.xlane.xlu2 %6511  ;;  %v6515_v7 = vpop.xlane.xlu0 %6514 }
0x22e9   : > { %v6509_v15 = vpop.xlane.xlu1 %6508  ;;  %v6519_v48 = vmul.f32 0.125, %v6515_v7  ;;  %v6518_v29 = vmul.f32 0.125, %v6512_v10  ;;  %v10074_v7 = vld [vmem:[#allocation11_spill] sm:$0xff] }
0x22ea   : > { %v6517_v53 = vmul.f32 0.125, %v6509_v15  ;;  %v6632_v15 = vperm.slane %v10074_v7, 0 }
0x22eb   : > { %v6523_v44 = vmul.f32 %v10072_v57, %v6519_v48  ;;  %v6522_v32 = vmul.f32 %v10072_v57, %v6518_v29 }
0x22ec   : > { %v6521_v5 = vmul.f32 %v10072_v57, %v6517_v53 }
0x22f0   : > { %v6537_v2 = vpop.xlane.xlu2 %6536  ;;  %v6540_v23 = vpop.xlane.xlu0 %6539 }
0x22f1   : > { %v6534_v40 = vpop.xlane.xlu1 %6533  ;;  %v6545_v60 = vmul.f32 0.0625, %v6537_v2  ;;  %v6546_v39 = vmul.f32 0.0625, %v6540_v23 }
0x22f2   : > { %v6544_v0 = vmul.f32 0.0625, %v6534_v40 }
0x22f3   : > { %v6549_v26 = vmul.f32 %v10071_v62, %v6545_v60  ;;  %v6550_v46 = vmul.f32 %v10071_v62, %v6546_v39 }
0x22f4   : > { %v6548_v4 = vmul.f32 %v10071_v62, %v6544_v0  ;;  %v6637_v0 = vperm.slane %v10074_v7, 1 }
0x22f5   : > { %v6553_v50 = vadd.f32 %v6549_v26, %v6521_v5  ;;  %v6554_v61 = vadd.f32 %v6550_v46, %v6522_v32 }
0x22f6   : > { %v6552_v13 = vadd.f32 %v6548_v4, %v6520_v17 }
0x22f8   : > { %v6562_v59 = vpop.xlane.xlu2 %6561  ;;  %v6565_v8 = vpop.xlane.xlu0 %6564 }
0x22f9   : > { %v6572_v9 = vmul.f32 0.041666668, %v6562_v59  ;;  %v6543_v31 = vpop.xlane.xlu1 %6542  ;;  %v6573_v43 = vmul.f32 0.041666668, %v6565_v8 }
0x22fa   : > { %v6547_v20 = vmul.f32 0.0625, %v6543_v31 }
0x22fb   : > { %v6576_v55 = vmul.f32 %v10073_v35, %v6572_v9  ;;  %v6577_v34 = vmul.f32 %v10073_v35, %v6573_v43 }
0x22fc   : > { %v6551_v54 = vmul.f32 %v10071_v62, %v6547_v20 }
0x22fd   : > { %v6580_v51 = vadd.f32 %v6576_v55, %v6552_v13  ;;  %v6581_v11 = vadd.f32 %v6577_v34, %v6553_v50 }
0x22fe   : > { %v6555_v63 = vadd.f32 %v6551_v54, %v6523_v44 }
0x22ff   : > { %v6584_v47 = vadd.f32 1e-06, %v6580_v51  ;;  %v6585_v30 = vadd.f32 1e-06, %v6581_v11 }
0x2300   : > { %v6571_v42 = vpop.xlane.xlu2 %6570 }
0x2301   : > { %7257 = vrsqrt.f32 %v6584_v47  ;;  %v6575_v27 = vmul.f32 0.041666668, %v6571_v42  ;;  %v6568_v1 = vpop.xlane.xlu1 %6567  ;;  %vm6594_vm10 = vweird.f32 %v6584_v47  ;;  %vm6604_vm12 = vweird.f32 %v6585_v30 }
0x2302   : > { %7259 = vrsqrt.f32 %v6585_v30  ;;  %v6574_v45 = vmul.f32 0.041666668, %v6568_v1 }
0x2303   : > { %v6579_v6 = vmul.f32 %v10073_v35, %v6575_v27 }
0x2304   : > { %v6578_v16 = vmul.f32 %v10073_v35, %v6574_v45 }
0x2305   : > { %v6583_v41 = vadd.f32 %v6579_v6, %v6555_v63 }
0x2306   : > { %v6582_v28 = vadd.f32 %v6578_v16, %v6554_v61 }
0x2307   : > { %v7258_v24 = vpop.eup %7257  ;;  %v6587_v62 = vadd.f32 1e-06, %v6583_v41 }
0x2308   : > { %v7260_v37 = vpop.eup %7259  ;;  %v6589_v14 = vmul.f32 %v7258_v24, %v6584_v47  ;;  %v6586_v3 = vadd.f32 1e-06, %v6582_v28  ;;  %vm6595_vm8 = vweird.f32 %v7258_v24 }
0x2309   : > { %v6599_v21 = vmul.f32 %v7260_v37, %v6585_v30  ;;  %7261 = vrsqrt.f32 %v6587_v62  ;;  %vm6605_vm9 = vweird.f32 %v7260_v37  ;;  %vm6596_vm11 = vmor %vm6594_vm10, %vm6595_vm8  ;;  %vm6624_vm14 = vweird.f32 %v6587_v62 }
0x230a   : > { %v6590_v49 = vmul.f32 %v7258_v24, %v6589_v14  ;;  %7263 = vrsqrt.f32 %v6586_v3  ;;  %vm6606_vm13 = vmor %vm6604_vm12, %vm6605_vm9  ;;  %vm6614_vm0 = vweird.f32 %v6586_v3 }
0x230b   : > { %v6600_v57 = vmul.f32 %v7260_v37, %v6599_v21 }
0x230c   : > { %v6591_v22 = vmul.f32 0.5, %v6590_v49 }
0x230d   : > { %v6601_v18 = vmul.f32 0.5, %v6600_v57 }
0x230e   : > { %v6592_v56 = vsub.f32 1.5, %v6591_v22 }
0x230f   : > { %v7262_v52 = vpop.eup %7261  ;;  %v6602_v25 = vsub.f32 1.5, %v6601_v18 }
0x2310   : > { %v7264_v35 = vpop.eup %7263  ;;  %v6593_v33 = vmul.f32 %v7258_v24, %v6592_v56  ;;  %v6619_v10 = vmul.f32 %v7262_v52, %v6587_v62  ;;  %vm6625_vm2 = vweird.f32 %v7262_v52 }
0x2311   : > { %v6603_v2 = vmul.f32 %v7260_v37, %v6602_v25  ;;  %v6609_v23 = vmul.f32 %v7264_v35, %v6586_v3  ;;  %vm6615_vm1 = vweird.f32 %v7264_v35  ;;  %vm6626_vm3 = vmor %vm6624_vm14, %vm6625_vm2 }
0x2312   : > { %v6597_v40 = vsel %vm6596_vm11, %v7258_v24, %v6593_v33  ;;  %v6620_v60 = vmul.f32 %v7262_v52, %v6619_v10  ;;  %vm6616_vm4 = vmor %vm6614_vm0, %vm6615_vm1 }
0x2313   : > { %v6628_v53 = vmul.f32 %v6597_v40, %v9833_v58  ;;  %v6607_v38 = vsel %vm6606_vm13, %v7260_v37, %v6603_v2  ;;  %v6610_v26 = vmul.f32 %v7264_v35, %v6609_v23 }
0x2314   : > { %v6629_v4 = vmul.f32 %v6607_v38, %v9854_v36  ;;  %v6621_v5 = vmul.f32 0.5, %v6620_v60 }
0x2315   : > { %v6633_v59 = vmul.f32 %v6632_v15, %v6628_v53  ;;  %v6611_v8 = vmul.f32 0.5, %v6610_v26 }
0x2316   : > { %v6634_v17 = vmul.f32 %v6632_v15, %v6629_v4  ;;  %v6622_v9 = vsub.f32 1.5, %v6621_v5 }
0x2317   : > { %v6638_v31 = vadd.f32 %v6637_v0, %v6633_v59  ;;  %v6612_v43 = vsub.f32 1.5, %v6611_v8 }
0x2318   : > { %v6639_v50 = vadd.f32 %v6637_v0, %v6634_v17  ;;  %v6623_v13 = vmul.f32 %v7262_v52, %v6622_v9 }
0x2319   : > { %6642 = vst.msk [vmem:[%s9928_s7] sm:$0xff] %vm528_vm5, %v6638_v31  ;;  %v6613_v58 = vmul.f32 %v7264_v35, %v6612_v43 }
0x231a   : > { %6643 = vst.msk [vmem:[%s9928_s7 + $0x8] sm:$0xff] %vm528_vm5, %v6639_v50  ;;  %v6627_v36 = vsel %vm6626_vm3, %v7262_v52, %v6623_v13 }
0x231b   : > { %v6631_v55 = vmul.f32 %v6627_v36, %v9848_v12  ;;  %v6617_v20 = vsel %vm6616_vm4, %v7264_v35, %v6613_v58 }
0x231c   : > { %v6630_v34 = vmul.f32 %v6617_v20, %v9851_v19 }
0x231d   : > { %v6636_v39 = vmul.f32 %v6632_v15, %v6631_v55 }
0x231e   : > { %v6635_v48 = vmul.f32 %v6632_v15, %v6630_v34 }
0x231f   : > { %v6641_v51 = vadd.f32 %v6637_v0, %v6636_v39 }
0x2320   : > { %v6640_v11 = vadd.f32 %v6637_v0, %v6635_v48 }
0x2321   : > { %6645 = vst.msk [vmem:[%s9928_s7 + $0x18] sm:$0xff] %vm528_vm5, %v6641_v51 }
0x2322   : > { %6644 = vst.msk [vmem:[%s9928_s7 + $0x10] sm:$0xff] %vm528_vm5, %v6640_v11 }
0x2323 PF: > { %s19_s27 = sadd.s32 1, %s7271_s27  }
0x2324   : > { %p16_p7 = scmp.ge.s32.totalorder %s19_s27, 6  }
0x2326   :  { %18 = sbr.rel (!%p16_p7) target bundleno = 1 (0x1), region = 137 }

</bundles_post_ra>
